<compile_context>
chip_gen: v7x
topology: tpu7x:2x2x1
jax: 0.10.0
libtpu: 0.0.40
codegen_flags: <defaults>
</compile_context>

<pallas_src>
import jax
import jax.numpy as jnp
from jax.experimental import pallas as pl
from jax.experimental.pallas import tpu as pltpu
import numpy as np

R_MAX = 32
C_Z = 128
NBINS = 2 * (R_MAX + 1)          # 66   (one-hot width for d_residue / d_token)
F_DIM = 2 * NBINS                # 132  (= 4 * r_max + 4, torch linear in_features)
K_PAD = 128                      # zero-padded K per weight half -> dense MXU K-pass


def relpos_kernel(row_ref, col_ref, w_res_ref, w_tok_ref, out_ref):
    """One (tile_m, tile_n) block of the NxN pair grid.

    row_ref   : (tile_m, 3) int32   -- row ("i") features: [residue, chain, token]
    col_ref   : (3, tile_n) int32   -- column ("j") features, same order
    w_res_ref : (K_PAD, C_Z) bf16   -- weight rows [0, 66) zero-padded to 128
    w_tok_ref : (K_PAD, C_Z) bf16   -- weight rows [66, 132) zero-padded to 128
    out_ref   : (tile_m, tile_n, C_Z) bf16 (or f32)
    """
    tm = row_ref.shape[0]
    tn = col_ref.shape[1]
    pairs = tm * tn

    row = row_ref[...]                       # (tm, 3)
    col = col_ref[...]                       # (3, tn)
    res_i, chn_i, tok_i = row[:, 0:1], row[:, 1:2], row[:, 2:3]   # (tm, 1)
    res_j, chn_j, tok_j = col[0:1, :], col[1:2, :], col[2:3, :]   # (1, tn)

    same_chain = chn_i == chn_j                                   # (tm, tn)
    same_res = res_i == res_j                                     # (tm, tn)

    d_res = jnp.clip(res_i - res_j + R_MAX, 0, 2 * R_MAX)
    d_res = jnp.where(same_chain, d_res, 2 * R_MAX + 1)           # (tm, tn), <= 65

    d_tok = jnp.clip(tok_i - tok_j + R_MAX, 0, 2 * R_MAX)
    d_tok = jnp.where(same_chain & same_res, d_tok, 2 * R_MAX + 1)

    # Two 66-wide one-hots built directly in bf16 (0/1 exact) against a
    # 128-lane iota; the padded weight rows [66, 128) are zero and the d
    # values never exceed 65, so each dot gathers exactly one weight row.
    iota = jax.lax.broadcasted_iota(jnp.int32, (1, 1, K_PAD), 2)

    feat_res = (iota == d_res[:, :, None]).astype(jnp.bfloat16)   # (tm, tn, 128)
    acc = jnp.dot(feat_res.reshape(pairs, K_PAD), w_res_ref[...],
                  preferred_element_type=jnp.float32)             # (pairs, C_Z) f32

    feat_tok = (iota == d_tok[:, :, None]).astype(jnp.bfloat16)
    acc = acc + jnp.dot(feat_tok.reshape(pairs, K_PAD), w_tok_ref[...],
                        preferred_element_type=jnp.float32)

    # Cast immediately at the store so the f32 intermediate doesn't stay live.
    out_ref[...] = acc.reshape(tm, tn, C_Z).astype(out_ref.dtype)


def _auto_tiles(n):
    """VMEM-capacity-aware tile defaults, shrunk to divide small N."""
    try:
        vmem = pltpu.get_tpu_info().vmem_capacity_bytes
    except Exception:
        vmem = 64 << 20
    if vmem >= (128 << 20):
        tm, tn = 64, 512          # v5e / v6e (128 MiB VMEM)
    else:
        tm, tn = 32, 512          # v7x (64 MiB VMEM per TC)
    while tm > 8 and n % tm:
        tm //= 2
    if n % tm or tm > n:
        tm = n
    while tn > 128 and n % tn:
        tn //= 2
    if n % tn or tn > n:
        tn = n
    return tm, tn


def relative_position_encoding(residue_index, token_index, chain_index, weight,
                               *, tile_m=None, tile_n=None,
                               out_dtype=jnp.bfloat16):
    """weight: (F_DIM, C_Z) float32 (W.T of the torch LinearNoBias)."""
    n = residue_index.shape[-1]

    if tile_m is None or tile_n is None:
        auto_m, auto_n = _auto_tiles(n)
        tile_m = auto_m if tile_m is None else tile_m
        tile_n = auto_n if tile_n is None else tile_n

    # (8,128) tiling rules: last-two dims of every block must be divisible by
    # (8, 128) or equal the full array dims.
    assert n % tile_m == 0 and n % tile_n == 0
    assert tile_m == n or tile_m % 8 == 0
    assert tile_n == n or tile_n % 128 == 0

    res = residue_index.astype(jnp.int32)
    tok = token_index.astype(jnp.int32)
    chn = chain_index.astype(jnp.int32)

    # Pack the three features into one row array and one column array so each
    # grid step issues 2 tiny DMAs instead of 6.
    row_feats = jnp.stack([res, chn, tok], axis=-1)   # (N, 3)
    col_feats = jnp.stack([res, chn, tok], axis=0)    # (3, N)

    # Split + zero-pad the bf16 weight into two dense-K halves.
    w_bf16 = weight.astype(jnp.bfloat16)                                   # (132, 128)
    w_res = jnp.zeros((K_PAD, C_Z), jnp.bfloat16).at[:NBINS].set(w_bf16[:NBINS])
    w_tok = jnp.zeros((K_PAD, C_Z), jnp.bfloat16).at[:NBINS].set(w_bf16[NBINS:])

    row_spec = pl.BlockSpec((tile_m, 3), lambda i, j: (i, 0))
    col_spec = pl.BlockSpec((3, tile_n), lambda i, j: (0, j))
    w_spec = pl.BlockSpec((K_PAD, C_Z), lambda i, j: (0, 0))
    out_spec = pl.BlockSpec((tile_m, tile_n, C_Z), lambda i, j: (i, j, 0))

    # Per-grid-step footprint: out block (double-buffered) + one live bf16
    # one-hot + the f32 MXU accumulator + small int/weight blocks + headroom.
    pair_block = tile_m * tile_n
    out_bytes = pair_block * C_Z * jnp.dtype(out_dtype).itemsize
    feat_bytes = pair_block * K_PAD * 2
    acc_bytes = pair_block * C_Z * 4
    vmem_limit = 2 * out_bytes + feat_bytes + acc_bytes + (8 << 20)
    vmem_limit = int(min(max(vmem_limit, 16 << 20), 100 << 20))

    return pl.pallas_call(
        relpos_kernel,
        out_shape=jax.ShapeDtypeStruct((n, n, C_Z), out_dtype),
        grid_spec=pltpu.PrefetchScalarGridSpec(
            num_scalar_prefetch=0,
            grid=(n // tile_m, n // tile_n),
            in_specs=[row_spec, col_spec, w_spec, w_spec],
            out_specs=out_spec,
        ),
        compiler_params=pltpu.CompilerParams(
            dimension_semantics=("parallel", "parallel"),
            vmem_limit_bytes=vmem_limit,
        ),
    )(row_feats, col_feats, w_res, w_tok)


def reference(res, tok, chn, weight_f32):
    """Pure-JAX mirror of the PyTorch forward (one-hot matmul == row gather)."""
    same_chain = chn[:, None] == chn[None, :]
    same_res = res[:, None] == res[None, :]
    d_res = jnp.clip(res[:, None] - res[None, :] + R_MAX, 0, 2 * R_MAX)
    d_res = jnp.where(same_chain, d_res, 2 * R_MAX + 1)
    d_tok = jnp.clip(tok[:, None] - tok[None, :] + R_MAX, 0, 2 * R_MAX)
    d_tok = jnp.where(same_chain & same_res, d_tok, 2 * R_MAX + 1)
    return weight_f32[d_res] + weight_f32[d_tok + NBINS]


if __name__ == "__main__":
    N = 256          # number of tokens (small test size, exercises 2-D grid)

    key = jax.random.PRNGKey(0)
    k_w, k_perm = jax.random.split(key)

    # Deterministic LinearNoBias weight: torch stores (c_z, 4*r_max+4); we use
    # the transposed layout (F_DIM, C_Z) so the kernel does feat @ W.T directly.
    weight = (jax.random.normal(k_w, (F_DIM, C_Z), dtype=jnp.float32)
              * (1.0 / np.sqrt(F_DIM)))

    # Four chains of 64 tokens; residue index restarts per chain and repeats
    # (ligand-style multi-token residues); token index is global + shuffled
    # to exercise the clipping paths.
    n_chains = 4
    per_chain = N // n_chains
    chain_index = jnp.repeat(jnp.arange(n_chains, dtype=jnp.int32), per_chain)
    residue_index = jnp.tile(jnp.arange(per_chain, dtype=jnp.int32) // 2,
                             n_chains)
    token_index = jax.random.permutation(
        k_perm, jnp.arange(N, dtype=jnp.int32) * 3)

    # Reference uses the bf16-cast weight (the kernel's MXU operand) in f32.
    w_ref = weight.astype(jnp.bfloat16).astype(jnp.float32)
    ref = reference(residue_index, token_index, chain_index, w_ref)

    # 1) Explicit small tiles -> multi-tile 2-D grid (8, 2).
    out = relative_position_encoding(residue_index, token_index, chain_index,
                                     weight, tile_m=32, tile_n=128)
    out = jax.block_until_ready(out)
    assert out.shape == (N, N, C_Z) and out.dtype == jnp.bfloat16
    np.testing.assert_allclose(np.asarray(out, dtype=np.float32),
                               np.asarray(ref), rtol=2e-2, atol=2e-3)

    # 2) Auto (VMEM-capacity-aware) tiles, the production default path.
    out2 = relative_position_encoding(residue_index, token_index, chain_index,
                                      weight)
    out2 = jax.block_until_ready(out2)
    assert out2.shape == (N, N, C_Z)
    np.testing.assert_allclose(np.asarray(out2, dtype=np.float32),
                               np.asarray(ref), rtol=2e-2, atol=2e-3)

    print("KERNEL_OK")
</pallas_src>

<mosaic_0001>
module attributes {stable_mosaic.version = 11 : i64} {
  func.func @relpos_kernel(%arg0: i32, %arg1: i32, %arg2: memref<32x3xi32, #tpu.memory_space<vmem>>, %arg3: memref<3x128xi32, #tpu.memory_space<vmem>>, %arg4: memref<128x128xbf16, #tpu.memory_space<vmem>>, %arg5: memref<128x128xbf16, #tpu.memory_space<vmem>>, %arg6: memref<32x128x128xbf16, #tpu.memory_space<vmem>>) attributes {dimension_semantics = [#tpu.dimension_semantics<parallel>, #tpu.dimension_semantics<parallel>], iteration_bounds = array<i64: 8, 2>, scalar_prefetch = 0 : i64, scratch_operands = 0 : i64, tpu.core_type = #tpu.core_type<tc>, window_params = [{transform_indices = @transform_0, window_bounds = array<i64: 32, 3>}, {transform_indices = @transform_1, window_bounds = array<i64: 3, 128>}, {pipeline_mode = #tpu.pipeline_mode<synchronous>, transform_indices = @transform_2, window_bounds = array<i64: 128, 128>}, {pipeline_mode = #tpu.pipeline_mode<synchronous>, transform_indices = @transform_3, window_bounds = array<i64: 128, 128>}, {transform_indices = @transform_4, window_bounds = array<i64: 32, 128, 128>}]} {
    %c0 = arith.constant 0 : index
    %c0_0 = arith.constant 0 : index
    %0 = vector.load %arg2[%c0, %c0_0] : memref<32x3xi32, #tpu.memory_space<vmem>>, vector<32x3xi32>
    %c0_1 = arith.constant 0 : index
    %c0_2 = arith.constant 0 : index
    %1 = vector.load %arg3[%c0_1, %c0_2] : memref<3x128xi32, #tpu.memory_space<vmem>>, vector<3x128xi32>
    %2 = vector.extract_strided_slice %0 {offsets = [0, 0], sizes = [32, 1], strides = [1, 1]} : vector<32x3xi32> to vector<32x1xi32>
    %3 = vector.extract_strided_slice %0 {offsets = [0, 1], sizes = [32, 1], strides = [1, 1]} : vector<32x3xi32> to vector<32x1xi32>
    %4 = vector.extract_strided_slice %0 {offsets = [0, 2], sizes = [32, 1], strides = [1, 1]} : vector<32x3xi32> to vector<32x1xi32>
    %5 = vector.extract_strided_slice %1 {offsets = [0, 0], sizes = [1, 128], strides = [1, 1]} : vector<3x128xi32> to vector<1x128xi32>
    %6 = vector.extract_strided_slice %1 {offsets = [1, 0], sizes = [1, 128], strides = [1, 1]} : vector<3x128xi32> to vector<1x128xi32>
    %7 = vector.extract_strided_slice %1 {offsets = [2, 0], sizes = [1, 128], strides = [1, 1]} : vector<3x128xi32> to vector<1x128xi32>
    %8 = vector.broadcast %3 : vector<32x1xi32> to vector<32x128xi32>
    %9 = vector.broadcast %6 : vector<1x128xi32> to vector<32x128xi32>
    %10 = arith.cmpi eq, %8, %9 : vector<32x128xi32>
    %11 = vector.broadcast %2 : vector<32x1xi32> to vector<32x128xi32>
    %12 = vector.broadcast %5 : vector<1x128xi32> to vector<32x128xi32>
    %13 = arith.cmpi eq, %11, %12 : vector<32x128xi32>
    %14 = vector.broadcast %2 : vector<32x1xi32> to vector<32x128xi32>
    %15 = vector.broadcast %5 : vector<1x128xi32> to vector<32x128xi32>
    %16 = arith.subi %14, %15 : vector<32x128xi32>
    %c32_i32 = arith.constant 32 : i32
    %17 = vector.broadcast %c32_i32 : i32 to vector<32x128xi32>
    %18 = arith.addi %16, %17 : vector<32x128xi32>
    %c0_i32 = arith.constant 0 : i32
    %c64_i32 = arith.constant 64 : i32
    %19 = vector.broadcast %c0_i32 : i32 to vector<32x128xi32>
    %20 = arith.maxsi %19, %18 : vector<32x128xi32>
    %21 = vector.broadcast %c64_i32 : i32 to vector<32x128xi32>
    %22 = arith.minsi %21, %20 : vector<32x128xi32>
    %c65_i32 = arith.constant 65 : i32
    %23 = vector.broadcast %c65_i32 : i32 to vector<32x128xi32>
    %24 = arith.select %10, %22, %23 : vector<32x128xi1>, vector<32x128xi32>
    %25 = vector.broadcast %4 : vector<32x1xi32> to vector<32x128xi32>
    %26 = vector.broadcast %7 : vector<1x128xi32> to vector<32x128xi32>
    %27 = arith.subi %25, %26 : vector<32x128xi32>
    %c32_i32_3 = arith.constant 32 : i32
    %28 = vector.broadcast %c32_i32_3 : i32 to vector<32x128xi32>
    %29 = arith.addi %27, %28 : vector<32x128xi32>
    %c0_i32_4 = arith.constant 0 : i32
    %c64_i32_5 = arith.constant 64 : i32
    %30 = vector.broadcast %c0_i32_4 : i32 to vector<32x128xi32>
    %31 = arith.maxsi %30, %29 : vector<32x128xi32>
    %32 = vector.broadcast %c64_i32_5 : i32 to vector<32x128xi32>
    %33 = arith.minsi %32, %31 : vector<32x128xi32>
    %34 = arith.andi %10, %13 : vector<32x128xi1>
    %c65_i32_6 = arith.constant 65 : i32
    %35 = vector.broadcast %c65_i32_6 : i32 to vector<32x128xi32>
    %36 = arith.select %34, %33, %35 : vector<32x128xi1>, vector<32x128xi32>
    %37 = tpu.iota {dimensions = array<i32: 2>} : vector<1x1x128xi32>
    %38 = vector.shape_cast %24 : vector<32x128xi32> to vector<32x128x1xi32>
    %39 = vector.broadcast %37 : vector<1x1x128xi32> to vector<32x128x128xi32>
    %40 = vector.broadcast %38 : vector<32x128x1xi32> to vector<32x128x128xi32>
    %41 = arith.cmpi eq, %39, %40 : vector<32x128x128xi32>
    %42 = arith.extui %41 : vector<32x128x128xi1> to vector<32x128x128xi32>
    %43 = arith.sitofp %42 : vector<32x128x128xi32> to vector<32x128x128xf32>
    %44 = arith.truncf %43 : vector<32x128x128xf32> to vector<32x128x128xbf16>
    %45 = vector.shape_cast %44 : vector<32x128x128xbf16> to vector<4096x128xbf16>
    %c0_7 = arith.constant 0 : index
    %c0_8 = arith.constant 0 : index
    %46 = vector.load %arg4[%c0_7, %c0_8] : memref<128x128xbf16, #tpu.memory_space<vmem>>, vector<128x128xbf16>
    %cst = arith.constant dense<0.000000e+00> : vector<4096x128xf32>
    %47 = tpu.matmul %45, %46, %cst {dimension_numbers = #tpu.dot_dimension_numbers<[1], [0], [0], [1], [0, 0, 1, 1], [], []>} : vector<4096x128xbf16>, vector<128x128xbf16>, vector<4096x128xf32> -> vector<4096x128xf32>
    %48 = vector.shape_cast %36 : vector<32x128xi32> to vector<32x128x1xi32>
    %49 = vector.broadcast %37 : vector<1x1x128xi32> to vector<32x128x128xi32>
    %50 = vector.broadcast %48 : vector<32x128x1xi32> to vector<32x128x128xi32>
    %51 = arith.cmpi eq, %49, %50 : vector<32x128x128xi32>
    %52 = arith.extui %51 : vector<32x128x128xi1> to vector<32x128x128xi32>
    %53 = arith.sitofp %52 : vector<32x128x128xi32> to vector<32x128x128xf32>
    %54 = arith.truncf %53 : vector<32x128x128xf32> to vector<32x128x128xbf16>
    %55 = vector.shape_cast %54 : vector<32x128x128xbf16> to vector<4096x128xbf16>
    %c0_9 = arith.constant 0 : index
    %c0_10 = arith.constant 0 : index
    %56 = vector.load %arg5[%c0_9, %c0_10] : memref<128x128xbf16, #tpu.memory_space<vmem>>, vector<128x128xbf16>
    %cst_11 = arith.constant dense<0.000000e+00> : vector<4096x128xf32>
    %57 = tpu.matmul %55, %56, %cst_11 {dimension_numbers = #tpu.dot_dimension_numbers<[1], [0], [0], [1], [0, 0, 1, 1], [], []>} : vector<4096x128xbf16>, vector<128x128xbf16>, vector<4096x128xf32> -> vector<4096x128xf32>
    %58 = arith.addf %47, %57 : vector<4096x128xf32>
    %59 = vector.shape_cast %58 : vector<4096x128xf32> to vector<32x128x128xf32>
    %60 = arith.truncf %59 : vector<32x128x128xf32> to vector<32x128x128xbf16>
    %c0_12 = arith.constant 0 : index
    %c0_13 = arith.constant 0 : index
    %c0_14 = arith.constant 0 : index
    %61 = vector.load %arg6[%c0_12, %c0_13, %c0_14] : memref<32x128x128xbf16, #tpu.memory_space<vmem>>, vector<32x128x128xbf16>
    tpu.vector_store %arg6[%c0_12, %c0_13, %c0_14], %60 {strides = array<i32>} : memref<32x128x128xbf16, #tpu.memory_space<vmem>>, vector<32x128x128xbf16>,
    return
  }
  func.func @transform_0(%arg0: i32, %arg1: i32) -> (i32, i32) {
    %c0_i32 = arith.constant 0 : i32
    %c0_i32_0 = arith.constant 0 : i32
    return %arg0, %c0_i32 : i32, i32
  }
  func.func @transform_1(%arg0: i32, %arg1: i32) -> (i32, i32) {
    %c0_i32 = arith.constant 0 : i32
    %c0_i32_0 = arith.constant 0 : i32
    return %c0_i32, %arg1 : i32, i32
  }
  func.func @transform_2(%arg0: i32, %arg1: i32) -> (i32, i32) {
    %c0_i32 = arith.constant 0 : i32
    %c0_i32_0 = arith.constant 0 : i32
    %c0_i32_1 = arith.constant 0 : i32
    return %c0_i32, %c0_i32_0 : i32, i32
  }
  func.func @transform_3(%arg0: i32, %arg1: i32) -> (i32, i32) {
    %c0_i32 = arith.constant 0 : i32
    %c0_i32_0 = arith.constant 0 : i32
    %c0_i32_1 = arith.constant 0 : i32
    return %c0_i32, %c0_i32_0 : i32, i32
  }
  func.func @transform_4(%arg0: i32, %arg1: i32) -> (i32, i32, i32) {
    %c0_i32 = arith.constant 0 : i32
    %c0_i32_0 = arith.constant 0 : i32
    return %arg0, %arg1, %c0_i32 : i32, i32, i32
  }
}

</mosaic_0001>

<bundles_post_ra>
// kernel: tpu_custom_call.1
= control target key start
LH: loop header
LB: loop body
LE: loop exit
PB: predicated region body
PF: predicated region fallthrough
CT: control target
= control target key end

     0   :  { %s26980_s0 = inlined_call_operand.vmem [shape: s32[256,3], index: 0, kind: input, shape index: {}]   ;;  %s26981_s1 = inlined_call_operand.hbm [shape: s32[3,256], index: 1, kind: input, shape index: {}]   ;;  %s26982_s2 = inlined_call_operand.hbm [shape: bf16[128,128], index: 2, kind: input, shape index: {}]   ;;  %s26983_s3 = inlined_call_operand.hbm [shape: bf16[128,128], index: 3, kind: input, shape index: {}]   ;;  %s26984_s4 = inlined_call_operand.hbm [shape: bf16[256,256,128], index: 4, kind: output, shape index: {}]  }
   0x1   :  { %27019 = sst [smem:[#allocation368_spill]] %s26982_s2 }
   0x2   :  { %27020 = sst [smem:[#allocation369_spill]] %s26983_s3 }
   0x3   :  { %27021 = sst [smem:[#allocation370_spill]] %s26984_s4 }
   0x4   :  { %9 = vsyncpa [#allocation3], 0 }
   0x5   :  { %11 = vsyncpa [#allocation3 + $0x1], 0 }
   0x6   :  { %12 = vsyncpa [#allocation6], 0 }
   0x7   :  { %13 = vsyncpa [#allocation4], 0 }
   0x8   :  { %15 = vsyncpa [#allocation4 + $0x1], 0  ;;  %s22423_s15 = smov 0   ;;  %s22425_s16 = smov 0  }
   0x9   :  { %s22427_s17 = smov 0   ;;  %s22429_s18 = smov 0  }
   0xa   :  { %s22431_s19 = smov 0   ;;  %s22433_s20 = smov 0  }
   0xb   :  { %s22435_s21 = smov 0   ;;  %s22437_s22 = smov 0  }
   0xc   :  { %s22439_s23 = smov 0   ;;  %s22441_s24 = smov 0  }
   0xd   :  { %s22443_s25 = smov 0  }
   0xe LB: > { %27022 = sst [smem:[#allocation14_spill]] %s22340_s15  ;;  %s15290_s26 = sadd.s32 4294967295, %s22380_s25   ;;  %s22380_s25 = sphi %s22443_s25, %s21_s25   ;;  %s22376_s24 = sphi %s22441_s24, %s27763_s24   ;;  %s22372_s23 = sphi %s22439_s23, %s27762_s23   ;;  %s22368_s22 = sphi %s22437_s22, %s27761_s22   ;;  %s22364_s21 = sphi %s22435_s21, %s27760_s21   ;;  %s22360_s20 = sphi %s22433_s20, %s27759_s20   ;;  %s22356_s19 = sphi %s22431_s19, %s27758_s19   ;;  %s22352_s18 = sphi %s22429_s18, %s27757_s18   ;;  %s22348_s17 = sphi %s22427_s17, %s27756_s17   ;;  %s22344_s16 = sphi %s22425_s16, %s27755_s16   ;;  %s22340_s15 = sphi %s22423_s15, %s27754_s15  }
   0xf   : > { %s15291_s27 = sadd.s32 4294967294, %s22380_s25   ;;  %p79_p0 = scmp.ne.s32.totalorder %s22356_s19, %s22352_s18 }
  0x10   : > { %p22479_p1 = scmp.eq.s32.totalorder %s15290_s26, 0  ;;  %p146_p2 = scmp.ne.s32.totalorder %s22348_s17, %s22344_s16 }
  0x11   : > { %p147_p3 = scmp.eq.s32.totalorder %s15290_s26, 15  ;;  %p152_p5 = scmp.ne.s32.totalorder %s22344_s16, %s22340_s15 }
  0x12   : > { %s27023_s28 = scalar_select %p22479_p1, 1, 0 }
  0x13   : > { %p22487_p4 = por %p22479_p1, %p79_p0  ;;  %p22493_p6 = por %p147_p3, %p146_p2 }
  0x14   : > { %p153_p7 = scmp.eq.s32.totalorder %s15291_s27, 15  ;;  %p15292_p8 = scmp.ge.s32.totalorder %s22380_s25, 1 }
  0x15   : > { %s27024_s29 = scalar_select %p22487_p4, 1, 0 }
  0x16   : > { %s27025_s30 = scalar_select %p22493_p6, 1, 0 }
  0x17   : > { %p160_p9 = scmp.lt.s32.totalorder %s22380_s25, 17  ;;  %p22499_p10 = por %p153_p7, %p152_p5 }
  0x18   : > { %s22382_s7 = smov [#allocation5]   ;;  %s22383_s10 = smov [#allocation7]  }
  0x19   : > { %s27026_s5 = scalar_select %p22499_p10, 1, 0 }
  0x1a   : > { %p22503_p11 = pnand %p15292_p8, %p160_p9  ;;  %s172_s8 = sshll.u32 %s22382_s7, 4  ;;  %s173_s8 = int_to_ptr.vmem [resolvable:$true] %s172_s8 }
  0x1b   : > { %27027 = sst [smem:[#allocation15_spill]] %s27026_s5  ;;  %s185_s11 = sshll.u32 %s22383_s10, 4  ;;  %s22515_s11 = int_to_ptr.vmem [resolvable:$true] %s185_s11 }
  0x1c   : > { %s27028_s6 = scalar_select %p22503_p11, 1, 0 }
  0x1d   : > { %p22050_p12 = pneg %p22503_p11  ;;  %s27030_s2 = sld [smem:[#allocation368_spill]] }
  0x1f   : > { %p22511_p13 = pnand %p22050_p12, %p22479_p1 }
  0x21   : > { %p22198_p2 = pneg %p22511_p13 }
  0x23   : > { %s22196_s14 = scalar_lea.hbm %s27030_s2, 1024 }
  0x24   : > { %p22197_p0 = scmp.ne.s32.totalorder %s27030_s2, %s22196_s14  ;;  %p22203_p7 = scmp.lt.u32.totalorder %s22196_s14, %s27030_s2 }
  0x26   : > { %p22199_p3 = pnand %p22198_p2, %p22197_p0 }
  0x28   : > { %p22200_p5 = pneg %p22199_p3 }
  0x2a   : > { %p22205_p8 = pnand %p22203_p7, %p22200_p5 }
  0x2c   : > { %22208 = shalt.err (!%p22205_p8)
}
  0x2d   : > { %s22209_s10 = scalar_lea.vmem %s173_s8, 1024  ;;  %p22217_p6 = scmp.lt.s32.totalorder %s173_s8, %s173_s8 }
  0x2e   : > { %p22210_p9 = scmp.ne.s32.totalorder %s173_s8, %s22209_s10  ;;  %p22218_p1 = scmp.lt.s32.totalorder %s22209_s10, %s22209_s10 }
  0x30   : > { %p22212_p12 = pnand %p22210_p9, %p22198_p2  ;;  %p22219_p4 = por %p22218_p1, %p22217_p6 }
  0x32   : > { %p22213_p10 = pneg %p22212_p12 }
  0x34   : > { %p22220_p11 = pnand %p22219_p4, %p22213_p10 }
  0x36   : > { %22223 = shalt.err (!%p22220_p11)
}
  0x37   : > { %s22384_s12 = smov 64   ;;  %s22385_s13 = smov 4  }
  0x38   : > { %22053 = dma.hbm_to_vmem [thread:$0]  (!%p22511_p13), %s27030_s2, 1024, %s173_s8, [#allocation6], %s22384_s12, %s22384_s12, %s22385_s13  }
  0x39   : > { %s27031_s3 = sld [smem:[#allocation369_spill]] }
  0x3f   : > { %s22224_s7 = scalar_lea.hbm %s27031_s3, 1024 }
  0x40   : > { %p22225_p0 = scmp.ne.s32.totalorder %s27031_s3, %s22224_s7  ;;  %p22231_p6 = scmp.lt.u32.totalorder %s22224_s7, %s27031_s3 }
  0x42   : > { %p22227_p1 = pnand %p22225_p0, %p22198_p2 }
  0x44   : > { %p22228_p4 = pneg %p22227_p1 }
  0x46   : > { %p22233_p10 = pnand %p22231_p6, %p22228_p4 }
  0x48   : > { %22236 = shalt.err (!%p22233_p10)
}
  0x49   : > { %s22237_s8 = scalar_lea.vmem %s22515_s11, 1024  ;;  %p22245_p7 = scmp.lt.s32.totalorder %s22515_s11, %s22515_s11 }
  0x4a   : > { %p22238_p11 = scmp.ne.s32.totalorder %s22515_s11, %s22237_s8  ;;  %p22246_p8 = scmp.lt.s32.totalorder %s22237_s8, %s22237_s8 }
  0x4c   : > { %p22240_p3 = pnand %p22238_p11, %p22198_p2  ;;  %p22247_p9 = por %p22246_p8, %p22245_p7 }
  0x4e   : > { %p22241_p5 = pneg %p22240_p3 }
  0x50   : > { %p22248_p12 = pnand %p22247_p9, %p22241_p5 }
  0x52   : > { %22251 = shalt.err (!%p22248_p12)
}
  0x53   : > { %22056 = dma.hbm_to_vmem [thread:$0]  (!%p22511_p13), %s27031_s3, 1024, %s22515_s11, [#allocation6], %s22384_s12, %s22384_s12, %s22385_s13  }
  0x54   : > { %s30_s5 = sadd.s32 1, %s22372_s23  ;;  %s33_s9 = sadd.s32 1, %s22376_s24 }
  0x55   : > { %p31_p2 = scmp.ge.s32.totalorder %s30_s5, 2  ;;  %s66_s14 = sadd.s32 1, %s22360_s20 }
  0x56   : > { %p73_p0 = scmp.ne.s32.totalorder %s22360_s20, %s22356_s19  ;;  %p74_p1 = scmp.eq.s32.totalorder %s22380_s25, 0 }
  0x57   : > { %s27765_s5 = smov (%p31_p2, %s30_s5), 0  ;;  %s27767_s9 = smov (!%p31_p2, %s33_s9), %s22376_s24 }
  0x58   : > { %27032 = sst [smem:[#allocation16_spill]] %s27765_s5  ;;  %s63_s18 = ssub.s32 %s22372_s23, %s27765_s5 }
  0x59   : > { %p35_p4 = scmp.ge.s32.totalorder %s27767_s9, 8  ;;  %p64_p6 = scmp.eq.s32.totalorder %s63_s18, 0 }
  0x5a   : > { %p22575_p10 = por %p74_p1, %p73_p0  ;;  %s136_s12 = sadd.s32 1, %s22348_s17 }
  0x5b   : > { %s27769_s9 = smov (%p35_p4, %s27767_s9), 0  ;;  %p22067_p13 = scmp.lt.s32.totalorder %s22380_s25, 16 }
  0x5c   : > { %s22583_s13 = scalar_select %p64_p6, %s22360_s20, %s66_s14  }
  0x5d   : > { %s131_s26 = ssub.s32 %s22376_s24, %s27769_s9  ;;  %s208_s7 = sand.u32 1, %s22360_s20  }
  0x5e   : > { %s133_s27 = sor.u32 %s131_s26, %s63_s18  ;;  %s15296_s10 = sshll.u32 %s208_s7, 2 }
  0x5f   : > { %p134_p11 = scmp.eq.s32.totalorder %s133_s27, 0  ;;  %s15297_s8 = sshll.u32 %s22372_s23, 6 }
  0x60   : > { %s22596_s3 = scalar_lea.hbm %s26981_s1, %s15297_s8  ;;  %s212_s14 = scalar_lea.vmem [#allocation2], %s15296_s10 }
  0x61   : > { %s22591_s4 = scalar_select %p134_p11, %s22348_s17, %s136_s12  }
  0x62   : > { %s219_s5 = sshll.u32 %s212_s14, 4  ;;  %p22600_p3 = pnand %p22067_p13, %p22575_p10  ;;  %s22604_s5 = int_to_ptr.vmem [resolvable:$true] %s219_s5 }
  0x63   : > { %s209_s12 = scalar_lea.sflag [#allocation3], %s208_s7  ;;  %s22252_s26 = scalar_lea.hbm %s22596_s3, 64 }
  0x64   : > { %p22253_p5 = scmp.ne.s32.totalorder %s22596_s3, %s22252_s26  ;;  %p22254_p7 = pneg %p22600_p3 }
  0x65   : > { %s22257_s11 = scalar_lea.hbm %s26981_s1, 128  ;;  %p22258_p12 = scmp.lt.u32.totalorder %s22596_s3, %s26981_s1 }
  0x66   : > { %p22255_p8 = pnand %p22254_p7, %p22253_p5  ;;  %p22259_p2 = scmp.lt.u32.totalorder %s22257_s11, %s22252_s26 }
  0x67   : > { %p22261_p1 = scmp.lt.u32.totalorder %s22252_s26, %s22596_s3 }
  0x68   : > { %p22256_p9 = pneg %p22255_p8  ;;  %p22260_p0 = por %p22259_p2, %p22258_p12 }
  0x6a   : > { %p22262_p4 = por %p22261_p1, %p22260_p0 }
  0x6c   : > { %p22263_p6 = pnand %p22262_p4, %p22256_p9 }
  0x6e   : > { %22266 = shalt.err (!%p22263_p6)
}
  0x6f   : > { %s22267_s7 = scalar_lea.vmem %s22604_s5, 64  ;;  %s22386_s15 = smov [#allocation2]  }
  0x70   : > { %p22268_p10 = scmp.ne.s32.totalorder %s22604_s5, %s22267_s7  ;;  %s22272_s14 = sshll.u32 %s22386_s15, 4  ;;  %s22273_s14 = int_to_ptr.vmem [resolvable:$false] %s22272_s14 }
  0x71   : > { %s22274_s2 = scalar_lea.vmem %s22273_s14, 128  ;;  %p22275_p5 = scmp.lt.s32.totalorder %s22604_s5, %s22273_s14 }
  0x72   : > { %p22270_p13 = pnand %p22268_p10, %p22254_p7  ;;  %p22276_p8 = scmp.lt.s32.totalorder %s22274_s2, %s22267_s7 }
  0x74   : > { %p22271_p11 = pneg %p22270_p13  ;;  %p22277_p12 = por %p22276_p8, %p22275_p5 }
  0x76   : > { %p22278_p2 = pnand %p22277_p12, %p22271_p11 }
  0x78   : > { %22281 = shalt.err (!%p22278_p2)
}
  0x79   : > { %22060 = dma.hbm_to_vmem [thread:$0]  (!%p22600_p3), %s22596_s3, 64, %s22604_s5, %s209_s12  }
  0x7a   : > { %p27035_p9 = scmp.ne.s32.totalorder %s27028_s6, 0 }
  0x7c   : > { %228 = sbr.rel (%p27035_p9) target bundleno = 2688 (0xa80), region = 36 }
  0x83   : > { %s230_s26 = sand.u32 1, %s22356_s19   ;;  %p27036_p7 = scmp.ne.s32.totalorder %s27024_s29, 0 }
  0x84   : > { %s22634_s27 = sshll.u32 %s230_s26, 2  ;;  %s231_s11 = scalar_lea.sflag [#allocation3], %s230_s26 }
  0x85   : > { %s234_s10 = scalar_lea.vmem [#allocation2], %s22634_s27 }
  0x86   : > { %22327 = dma.done.wait (%p27036_p7), %s231_s11, 64  }
  0x87   : > { %22329 = vsyncadd (%p27036_p7), %s231_s11, 4294967232  ;;  %p27037_p0 = scmp.ne.s32.totalorder %s27023_s28, 0 }
  0x89   : > { %22331 = dma.done.wait (%p27037_p0), [#allocation6], 2048  }
  0x8a   : > { %22333 = vsyncadd (%p27037_p0), [#allocation6], 4294965248  ;;  %s15303_s3 = sshll.u32 %s22368_s22, 2  ;;  %v22387_v0 = vmov 1   ;;  %v22388_v5 = vmov 0   ;;  %v22389_v6 = vmov 2   ;;  %v298_v10 = vlaneseq }
  0x8b   : > { %22175 = vset.pattern.permute.xlu1 %v22387_v0  ;;  %22174 = vset.pattern.permute.xlu0 %v22387_v0  ;;  %p273_p3 = scmp.lt.s32.totalorder %s15303_s3, 31  ;;  %v22180_v7 = vld [vmem:[#allocation5] sm:$0xff]   ;;  %v22181_v8 = vld [vmem:[#allocation5 + $0x8] sm:$0xff]   ;;  %v22182_v9 = vld [vmem:[#allocation5 + $0x10] sm:$0xff]   ;;  %s269_s28 = sand.u32 1, %s22344_s16  }
  0x8c   : > { %20992 = vmatprep.subr.bf16.mxu0 %v22180_v7  ;;  %v22183_v11 = vld [vmem:[#allocation5 + $0x18] sm:$0xff]   ;;  %v299_v12 = vshrl.u32 %v298_v10, 7  ;;  %v22184_v15 = vld [vmem:[#allocation5 + $0x20] sm:$0xff]   ;;  %v22185_v21 = vld [vmem:[#allocation5 + $0x28] sm:$0xff]   ;;  %s15302_s29 = sshll.u32 %s269_s28, 11  ;;  %s15127_s7 = scalar_lea.sflag [#allocation4], %s269_s28 }
  0x8d   : > { %s27771_s3 = smov (!%p273_p3, %s15303_s3), 31  ;;  %20993 = vmatpush3.bf16.msra.mxu0 %v22180_v7  ;;  %v285_v18 = vld [vmem:[%s234_s10] sm:$0x7]  ;;  %v22186_v24 = vld [vmem:[#allocation5 + $0x30] sm:$0xff]   ;;  %s24974_s8 = scalar_lea.vmem [#allocation8], %s15302_s29 }
  0x8e   : > { %s15304_s6 = sshll.u32 %s27771_s3, 3  ;;  %20994 = vmatprep.subr.bf16.mxu0 %v22181_v8  ;;  %v22652_v16 = vsub.s32 0, %v299_v12  ;;  %v22654_v17 = vsub.s32 1, %v299_v12  ;;  %v22666_v29 = vsub.s32 2, %v299_v12  ;;  %v22676_v31 = vsub.s32 3, %v299_v12  ;;  %v22187_v35 = vld [vmem:[#allocation5 + $0x38] sm:$0xff]  }
  0x8f   : > { %s276_s12 = scalar_lea.vmem %s26980_s0, %s15304_s6  ;;  %v22686_v36 = vsub.s32 4, %v299_v12  ;;  %v22688_v37 = vsub.s32 5, %v299_v12  ;;  %v22690_v38 = vsub.s32 6, %v299_v12  ;;  %v22699_v46 = vsub.s32 7, %v299_v12 }
  0x90   : > { %v283_v1 = vld [vmem:[%s276_s12 + $0x10] sm:$0xff]  ;;  %v281_v2 = vld [vmem:[%s276_s12] sm:$0xff]  ;;  %v284_v3 = vld [vmem:[%s276_s12 + $0x18] sm:$0xff]  ;;  %v321_v22 = vrot.slane %v285_v18, %v22652_v16  ;;  %v22662_v23 = vrot.slane %v285_v18, %v22654_v17  ;;  %v22721_v56 = vrot.slane %v285_v18, %v22666_v29 }
  0x91   : > { %293 = vperm.xlu1 %22175, %v283_v1   ;;  %287 = vperm.xlu0 %22174, %v281_v2   ;;  %v282_v4 = vld [vmem:[%s276_s12 + $0x8] sm:$0xff] }
  0x92   : > { %20995 = vmatpush3.bf16.msra.mxu0 %v22181_v8 }
  0x93   : > { %20996 = vmatprep.subr.bf16.mxu0 %v22182_v9 }
  0x95   : > { %296 = vperm.xlu1 %22175, %v284_v3   ;;  %290 = vperm.xlu0 %22174, %v282_v4  }
  0x96   : > { %20997 = vmatpush3.bf16.msra.mxu0 %v22182_v9 }
  0x97   : > { %20998 = vmatprep.subr.bf16.mxu0 %v22183_v11 }
  0x99   : > { %22177 = vset.pattern.permute.xlu1 %v22388_v5  ;;  %22176 = vset.pattern.permute.xlu0 %v22388_v5 }
  0x9a   : > { %310 = vperm.xlu1 %22177, %v282_v4   ;;  %307 = vperm.xlu0 %22176, %v281_v2  }
  0x9b   : > { %20999 = vmatpush3.bf16.msra.mxu0 %v22183_v11 }
  0x9c   : > { %21000 = vmatprep.subr.bf16.mxu0 %v22184_v15 }
  0x9e   : > { %313 = vperm.xlu1 %22177, %v283_v1   ;;  %316 = vperm.xlu0 %22176, %v284_v3  }
  0x9f   : > { %21001 = vmatpush3.bf16.msra.mxu0 %v22184_v15 }
  0xa0   : > { %21002 = vmatprep.subr.bf16.mxu0 %v22185_v21 }
  0xa2   : > { %22178 = vset.pattern.permute.xlu1 %v22389_v6  ;;  %22179 = vset.pattern.permute.xlu0 %v22389_v6 }
  0xa3   : > { %355 = vperm.xlu1 %22178, %v281_v2   ;;  %358 = vperm.xlu0 %22179, %v282_v4  }
  0xa4   : > { %21003 = vmatpush3.bf16.msra.mxu0 %v22185_v21 }
  0xa5   : > { %21004 = vmatprep.subr.bf16.mxu0 %v22186_v24 }
  0xa7   : > { %361 = vperm.xlu1 %22178, %v283_v1  }
  0xa8   : > { %21005 = vmatpush3.bf16.msra.mxu0 %v22186_v24 }
  0xa9   : > { %21006 = vmatprep.subr.bf16.mxu0 %v22187_v35 }
  0xab   : > { %364 = vperm.xlu1 %22178, %v284_v3  }
  0xac   : > { %21007 = vmatpush3.bf16.msra.mxu0 %v22187_v35 }
 0x110   : > { %v288_v13 = vpop.permute.xlu0 %287  ;;  %v22650_v14 = vpop.permute.xlu1 %293 }
 0x111   : > { %vm302_vm3 = vcmp.eq.s32.totalorder %v288_v13, %v22662_v23  ;;  %vm304_vm7 = vcmp.eq.s32.totalorder %v22650_v14, %v22662_v23 }
 0x114   : > { %v291_v19 = vpop.permute.xlu0 %290  ;;  %v22658_v20 = vpop.permute.xlu1 %296 }
 0x115   : > { %vm303_vm0 = vcmp.eq.s32.totalorder %v291_v19, %v22662_v23  ;;  %vm305_vm5 = vcmp.eq.s32.totalorder %v22658_v20, %v22662_v23 }
 0x119   : > { %v311_v25 = vpop.permute.xlu1 %310  ;;  %v308_v26 = vpop.permute.xlu0 %307 }
 0x11a   : > { %vm323_vm1 = vcmp.eq.s32.totalorder %v311_v25, %v321_v22  ;;  %v327_v27 = vsub.s32 %v311_v25, %v321_v22  ;;  %vm322_vm2 = vcmp.eq.s32.totalorder %v308_v26, %v321_v22  ;;  %v326_v28 = vsub.s32 %v308_v26, %v321_v22 }
 0x11b   : > { %vm22670_vm4 = vmand %vm303_vm0, %vm323_vm1 }
 0x11c   : > { %v331_v32 = vadd.s32 32, %v327_v27  ;;  %v330_v33 = vadd.s32 32, %v326_v28  ;;  %vm22680_vm6 = vmand %vm302_vm3, %vm322_vm2 }
 0x11d   : > { %v317_v39 = vpop.permute.xlu0 %316  ;;  %v314_v40 = vpop.permute.xlu1 %313 }
 0x11e   : > { %vm336_vm8 = vcmp.gt.s32.totalorder %v331_v32, 0  ;;  %vm334_vm9 = vcmp.gt.s32.totalorder %v330_v33, 0  ;;  %vm325_vm10 = vcmp.eq.s32.totalorder %v317_v39, %v321_v22  ;;  %v329_v41 = vsub.s32 %v317_v39, %v321_v22 }
 0x11f   : > { %v337_v42 = vsel %vm336_vm8, %v331_v32, 0  ;;  %v335_v43 = vsel %vm334_vm9, %v330_v33, 0  ;;  %vm22695_vm11 = vmand %vm305_vm5, %vm325_vm10  ;;  %vm324_vm12 = vcmp.eq.s32.totalorder %v314_v40, %v321_v22  ;;  %v328_v45 = vsub.s32 %v314_v40, %v321_v22 }
 0x120   : > { %vm344_vm13 = vcmp.lt.s32.totalorder %v337_v42, 64  ;;  %vm342_vm14 = vcmp.lt.s32.totalorder %v335_v43, 64  ;;  %v333_v47 = vadd.s32 32, %v329_v41  ;;  %vm22704_vm15 = vmand %vm304_vm7, %vm324_vm12 }
 0x121   : > { %v345_v49 = vsel %vm344_vm13, %v337_v42, 64  ;;  %v343_v50 = vsel %vm342_vm14, %v335_v43, 64  ;;  %v332_v55 = vadd.s32 32, %v328_v45 }
 0x122   : > { %v22710_v51 = vsel %vm303_vm0, %v345_v49, 65  ;;  %v22714_v52 = vsel %vm302_vm3, %v343_v50, 65  ;;  %v356_v53 = vpop.permute.xlu1 %355  ;;  %vm340_vm1 = vcmp.gt.s32.totalorder %v333_v47, 0  ;;  %v359_v61 = vpop.permute.xlu0 %358 }
 0x123   : > { %v22718_v54 = vrot.slane %v22710_v51, %v22676_v31  ;;  %v22725_v57 = vrot.slane %v22710_v51, %v22686_v36  ;;  %v22729_v58 = vrot.slane %v22710_v51, %v22688_v37  ;;  %v22733_v59 = vrot.slane %v22710_v51, %v22690_v38 }
 0x124   : > { %v22737_v60 = vrot.slane %v22710_v51, %v22699_v46  ;;  %v22741_v62 = vrot.slane %v22714_v52, %v22652_v16  ;;  %v22745_v63 = vrot.slane %v22714_v52, %v22676_v31  ;;  %v22749_v0 = vrot.slane %v22714_v52, %v22686_v36 }
 0x125   : > { %v22753_v1 = vrot.slane %v22714_v52, %v22688_v37  ;;  %v22757_v2 = vrot.slane %v22714_v52, %v22690_v38  ;;  %v22761_v3 = vrot.slane %v22714_v52, %v22699_v46  ;;  %v341_v4 = vsel %vm340_vm1, %v333_v47, 0 }
 0x126   : > { %vm338_vm0 = vcmp.gt.s32.totalorder %v332_v55, 0  ;;  %v370_v5 = vsub.s32 %v356_v53, %v22721_v56  ;;  %v371_v6 = vsub.s32 %v359_v61, %v22721_v56  ;;  %413 = vbcast.lane.b32.xlu1 %v22741_v62, 264  ;;  %409 = vbcast.lane.b32.xlu0 %v22741_v62, 256  ;;  %v362_v7 = vpop.permute.xlu1 %361  ;;  %vm348_vm2 = vcmp.lt.s32.totalorder %v341_v4, 64 }
 0x127   : > { %v339_v8 = vsel %vm338_vm0, %v332_v55, 0  ;;  %v372_v9 = vsub.s32 %v362_v7, %v22721_v56  ;;  %v349_v11 = vsel %vm348_vm2, %v341_v4, 64 }
 0x128   : > { %vm346_vm3 = vcmp.lt.s32.totalorder %v339_v8, 64  ;;  %v374_v12 = vadd.s32 32, %v370_v5  ;;  %v375_v13 = vadd.s32 32, %v371_v6  ;;  %v22771_v15 = vsel %vm305_vm5, %v349_v11, 65 }
 0x129   : > { %27046 = vst [vmem:[#allocation17_spill] sm:$0xff] %v22771_v15  ;;  %v347_v18 = vsel %vm346_vm3, %v339_v8, 64  ;;  %v376_v19 = vadd.s32 32, %v372_v9  ;;  %v22775_v21 = vrot.slane %v22771_v15, %v22676_v31  ;;  %v22780_v22 = vrot.slane %v22771_v15, %v22686_v36 }
 0x12a   : > { %421 = vbcast.lane.b32.xlu1 %v22741_v62, 280  ;;  %v22784_v24 = vrot.slane %v22771_v15, %v22688_v37  ;;  %v22788_v20 = vrot.slane %v22771_v15, %v22690_v38  ;;  %v22792_v25 = vrot.slane %v22771_v15, %v22699_v46  ;;  %417 = vbcast.lane.b32.xlu0 %v22741_v62, 272  ;;  %v22798_v26 = vsel %vm304_vm7, %v347_v18, 65  ;;  %v365_v33 = vpop.permute.xlu1 %364 }
 0x12b   : > { %27047 = vst [vmem:[#allocation18_spill] sm:$0xff] %v22775_v21  ;;  %27048 = vst [vmem:[#allocation19_spill] sm:$0xff] %v22780_v22  ;;  %vm378_vm5 = vcmp.gt.s32.totalorder %v374_v12, 0  ;;  %vm380_vm8 = vcmp.gt.s32.totalorder %v375_v13, 0  ;;  %vm382_vm9 = vcmp.gt.s32.totalorder %v376_v19, 0  ;;  %v22802_v27 = vrot.slane %v22798_v26, %v22676_v31 }
 0x12c   : > { %27049 = vst [vmem:[#allocation20_spill] sm:$0xff] %v22784_v24  ;;  %27050 = vst [vmem:[#allocation21_spill] sm:$0xff] %v22788_v20  ;;  %v22806_v28 = vrot.slane %v22798_v26, %v22686_v36  ;;  %v22810_v32 = vrot.slane %v22798_v26, %v22688_v37  ;;  %v22814_v14 = vrot.slane %v22798_v26, %v22690_v38  ;;  %v379_v35 = vsel %vm378_vm5, %v374_v12, 0 }
 0x12d   : > { %27051 = vst [vmem:[#allocation22_spill] sm:$0xff] %v22792_v25  ;;  %v22818_v23 = vrot.slane %v22798_v26, %v22699_v46  ;;  %v381_v39 = vsel %vm380_vm8, %v375_v13, 0  ;;  %v383_v40 = vsel %vm382_vm9, %v376_v19, 0  ;;  %vm386_vm7 = vcmp.lt.s32.totalorder %v379_v35, 64 }
 0x12e   : > { %429 = vbcast.lane.b32.xlu1 %v22741_v62, 296  ;;  %425 = vbcast.lane.b32.xlu0 %v22741_v62, 288  ;;  %vm388_vm10 = vcmp.lt.s32.totalorder %v381_v39, 64  ;;  %vm390_vm12 = vcmp.lt.s32.totalorder %v383_v40, 64  ;;  %v387_v41 = vsel %vm386_vm7, %v379_v35, 64  ;;  %v373_v45 = vsub.s32 %v365_v33, %v22721_v56 }
 0x12f   : > { %27052 = vst [vmem:[#allocation23_spill] sm:$0xff] %v22818_v23  ;;  %v389_v42 = vsel %vm388_vm10, %v381_v39, 64  ;;  %v391_v43 = vsel %vm390_vm12, %v383_v40, 64  ;;  %v22825_v47 = vsel %vm22680_vm6, %v387_v41, 65 }
 0x130   : > { %v22829_v49 = vsel %vm22670_vm4, %v389_v42, 65  ;;  %v22833_v50 = vsel %vm22704_vm15, %v391_v43, 65  ;;  %v22838_v53 = vrot.slane %v22825_v47, %v22676_v31  ;;  %v22843_v34 = vrot.slane %v22825_v47, %v22686_v36 }
 0x131   : > { %27053 = vst [vmem:[#allocation24_spill] sm:$0xff] %v22833_v50  ;;  %v22847_v30 = vrot.slane %v22825_v47, %v22688_v37  ;;  %v22851_v48 = vrot.slane %v22825_v47, %v22690_v38  ;;  %v22855_v55 = vrot.slane %v22825_v47, %v22699_v46  ;;  %v22859_v56 = vrot.slane %v22829_v49, %v22676_v31 }
 0x132   : > { %437 = vbcast.lane.b32.xlu1 %v22741_v62, 312  ;;  %433 = vbcast.lane.b32.xlu0 %v22741_v62, 304  ;;  %v377_v61 = vadd.s32 32, %v373_v45  ;;  %v22863_v4 = vrot.slane %v22829_v49, %v22686_v36  ;;  %v22867_v5 = vrot.slane %v22829_v49, %v22688_v37  ;;  %v22871_v6 = vrot.slane %v22829_v49, %v22690_v38 }
 0x133   : > { %v22875_v7 = vrot.slane %v22829_v49, %v22699_v46  ;;  %v22880_v8 = vrot.slane %v22833_v50, %v22676_v31  ;;  %v22885_v9 = vrot.slane %v22833_v50, %v22686_v36  ;;  %v22889_v11 = vrot.slane %v22833_v50, %v22688_v37 }
 0x134   : > { %27054 = vst [vmem:[#allocation25_spill] sm:$0xff] %v22867_v5  ;;  %27055 = vst [vmem:[#allocation26_spill] sm:$0xff] %v22871_v6  ;;  %v22893_v12 = vrot.slane %v22833_v50, %v22690_v38  ;;  %v22897_v13 = vrot.slane %v22833_v50, %v22699_v46  ;;  %vm384_vm4 = vcmp.gt.s32.totalorder %v377_v61, 0 }
 0x135   : > { %27056 = vst [vmem:[#allocation27_spill] sm:$0xff] %v22875_v7  ;;  %27057 = vst [vmem:[#allocation28_spill] sm:$0xff] %v22880_v8  ;;  %v385_v18 = vsel %vm384_vm4, %v377_v61, 0 }
 0x136   : > { %445 = vbcast.lane.b32.xlu1 %v22741_v62, 328  ;;  %441 = vbcast.lane.b32.xlu0 %v22741_v62, 320  ;;  %27058 = vst [vmem:[#allocation29_spill] sm:$0xff] %v22885_v9  ;;  %27059 = vst [vmem:[#allocation30_spill] sm:$0xff] %v22889_v11  ;;  %vm392_vm6 = vcmp.lt.s32.totalorder %v385_v18, 64 }
 0x137   : > { %27060 = vst [vmem:[#allocation31_spill] sm:$0xff] %v22893_v12  ;;  %27061 = vst [vmem:[#allocation32_spill] sm:$0xff] %v22897_v13  ;;  %v393_v19 = vsel %vm392_vm6, %v385_v18, 64 }
 0x138   : > { %v22903_v33 = vsel %vm22695_vm11, %v393_v19, 65 }
 0x139   : > { %27062 = vst [vmem:[#allocation33_spill] sm:$0xff] %v22903_v33  ;;  %v22907_v35 = vrot.slane %v22903_v33, %v22676_v31  ;;  %v22912_v39 = vrot.slane %v22903_v33, %v22686_v36  ;;  %v22916_v40 = vrot.slane %v22903_v33, %v22688_v37  ;;  %v22920_v41 = vrot.slane %v22903_v33, %v22690_v38 }
 0x13a   : > { %453 = vbcast.lane.b32.xlu1 %v22741_v62, 344  ;;  %449 = vbcast.lane.b32.xlu0 %v22741_v62, 336  ;;  %v22924_v44 = vrot.slane %v22903_v33, %v22699_v46  ;;  %v474_v31 = vrot.slane %v22714_v52, %v22654_v17  ;;  %v541_v36 = vrot.slane %v22714_v52, %v22666_v29  ;;  %v22942_v37 = vand.u32 127, %v298_v10 }
 0x13b   : > { %27063 = vst [vmem:[#allocation34_spill] sm:$0xff] %v22907_v35  ;;  %27064 = vst [vmem:[#allocation35_spill] sm:$0xff] %v22912_v39  ;;  %v22390_v52 = vmov 1.0|1.0  }
 0x13c   : > { %27065 = vst [vmem:[#allocation36_spill] sm:$0xff] %v22916_v40  ;;  %27066 = vst [vmem:[#allocation37_spill] sm:$0xff] %v22920_v41 }
 0x13d   : > { %27067 = vst [vmem:[#allocation38_spill] sm:$0xff] %v22924_v44 }
 0x13e   : > { %461 = vbcast.lane.b32.xlu1 %v22741_v62, 360  ;;  %457 = vbcast.lane.b32.xlu0 %v22741_v62, 352 }
 0x142   : > { %469 = vbcast.lane.b32.xlu1 %v22741_v62, 376  ;;  %465 = vbcast.lane.b32.xlu0 %v22741_v62, 368 }
 0x146   : > { %480 = vbcast.lane.b32.xlu1 %v474_v31, 264  ;;  %476 = vbcast.lane.b32.xlu0 %v474_v31, 256 }
 0x14a   : > { %488 = vbcast.lane.b32.xlu1 %v474_v31, 280  ;;  %484 = vbcast.lane.b32.xlu0 %v474_v31, 272 }
 0x14e   : > { %496 = vbcast.lane.b32.xlu1 %v474_v31, 296  ;;  %492 = vbcast.lane.b32.xlu0 %v474_v31, 288 }
 0x152   : > { %504 = vbcast.lane.b32.xlu1 %v474_v31, 312  ;;  %500 = vbcast.lane.b32.xlu0 %v474_v31, 304 }
 0x156   : > { %512 = vbcast.lane.b32.xlu1 %v474_v31, 328  ;;  %508 = vbcast.lane.b32.xlu0 %v474_v31, 320 }
 0x15a   : > { %520 = vbcast.lane.b32.xlu1 %v474_v31, 344  ;;  %516 = vbcast.lane.b32.xlu0 %v474_v31, 336 }
 0x15e   : > { %528 = vbcast.lane.b32.xlu1 %v474_v31, 360  ;;  %524 = vbcast.lane.b32.xlu0 %v474_v31, 352 }
 0x162   : > { %536 = vbcast.lane.b32.xlu1 %v474_v31, 376  ;;  %532 = vbcast.lane.b32.xlu0 %v474_v31, 368 }
 0x166   : > { %547 = vbcast.lane.b32.xlu1 %v541_v36, 264  ;;  %543 = vbcast.lane.b32.xlu0 %v541_v36, 256 }
 0x16a   : > { %555 = vbcast.lane.b32.xlu1 %v541_v36, 280  ;;  %551 = vbcast.lane.b32.xlu0 %v541_v36, 272 }
 0x16e   : > { %563 = vbcast.lane.b32.xlu1 %v541_v36, 296  ;;  %559 = vbcast.lane.b32.xlu0 %v541_v36, 288 }
 0x172   : > { %571 = vbcast.lane.b32.xlu1 %v541_v36, 312  ;;  %567 = vbcast.lane.b32.xlu0 %v541_v36, 304 }
 0x176   : > { %579 = vbcast.lane.b32.xlu1 %v541_v36, 328  ;;  %575 = vbcast.lane.b32.xlu0 %v541_v36, 320 }
 0x17a   : > { %587 = vbcast.lane.b32.xlu1 %v541_v36, 344  ;;  %583 = vbcast.lane.b32.xlu0 %v541_v36, 336 }
 0x17e   : > { %595 = vbcast.lane.b32.xlu1 %v541_v36, 360  ;;  %591 = vbcast.lane.b32.xlu0 %v541_v36, 352 }
 0x182   : > { %603 = vbcast.lane.b32.xlu1 %v541_v36, 376  ;;  %599 = vbcast.lane.b32.xlu0 %v541_v36, 368 }
 0x186   : > { %614 = vbcast.lane.b32.xlu1 %v22745_v63, 264  ;;  %610 = vbcast.lane.b32.xlu0 %v22745_v63, 256 }
 0x18a   : > { %622 = vbcast.lane.b32.xlu1 %v22745_v63, 280  ;;  %618 = vbcast.lane.b32.xlu0 %v22745_v63, 272 }
 0x18e   : > { %630 = vbcast.lane.b32.xlu1 %v22745_v63, 296  ;;  %626 = vbcast.lane.b32.xlu0 %v22745_v63, 288 }
 0x192   : > { %638 = vbcast.lane.b32.xlu1 %v22745_v63, 312  ;;  %634 = vbcast.lane.b32.xlu0 %v22745_v63, 304 }
 0x196   : > { %646 = vbcast.lane.b32.xlu1 %v22745_v63, 328  ;;  %642 = vbcast.lane.b32.xlu0 %v22745_v63, 320 }
 0x198   : > { %v414_v38 = vpop.permute.xlu1 %413  ;;  %v410_v46 = vpop.permute.xlu0 %409 }
 0x199   : > { %vm2548_vm11 = vcmp.eq.s32.totalorder %v22942_v37, %v410_v46  ;;  %vm2549_vm13 = vcmp.eq.s32.totalorder %v22942_v37, %v414_v38 }
 0x19a   : > { %654 = vbcast.lane.b32.xlu1 %v22745_v63, 344  ;;  %vm16857_vm14 = vmpackc.low %vm2549_vm13, %vm2548_vm11  ;;  %650 = vbcast.lane.b32.xlu0 %v22745_v63, 336 }
 0x19b   : > { %21008 = vmatprep.mubr.msk.bf16.mxu0 %vm16857_vm14, %v22390_v52 }
 0x19c   : > { %v422_v10 = vpop.permute.xlu1 %421  ;;  %v418_v62 = vpop.permute.xlu0 %417 }
 0x19d   : > { %vm2551_vm15 = vcmp.eq.s32.totalorder %v22942_v37, %v422_v10  ;;  %vm2550_vm1 = vcmp.eq.s32.totalorder %v22942_v37, %v418_v62 }
 0x19e   : > { %662 = vbcast.lane.b32.xlu1 %v22745_v63, 360  ;;  %vm16859_vm0 = vmpackc.low %vm2551_vm15, %vm2550_vm1  ;;  %658 = vbcast.lane.b32.xlu0 %v22745_v63, 352 }
 0x19f   : > { %21009 = vmatmul.mubr.msk.bf16.vlgmr.msra.gmra.mrb[0].mxu0 %vm16859_vm0, %v22390_v52 }
 0x1a0   : > { %v430_v42 = vpop.permute.xlu1 %429  ;;  %v426_v43 = vpop.permute.xlu0 %425 }
 0x1a1   : > { %vm2553_vm2 = vcmp.eq.s32.totalorder %v22942_v37, %v430_v42  ;;  %vm2552_vm3 = vcmp.eq.s32.totalorder %v22942_v37, %v426_v43 }
 0x1a2   : > { %670 = vbcast.lane.b32.xlu1 %v22745_v63, 376  ;;  %vm16861_vm5 = vmpackc.low %vm2553_vm2, %vm2552_vm3  ;;  %666 = vbcast.lane.b32.xlu0 %v22745_v63, 368 }
 0x1a3   : > { %21012 = vmatprep.mubr.msk.bf16.mxu0 %vm16861_vm5, %v22390_v52 }
 0x1a4   : > { %v438_v45 = vpop.permute.xlu1 %437  ;;  %v434_v61 = vpop.permute.xlu0 %433 }
 0x1a5   : > { %vm2555_vm8 = vcmp.eq.s32.totalorder %v22942_v37, %v438_v45  ;;  %vm2554_vm9 = vcmp.eq.s32.totalorder %v22942_v37, %v434_v61 }
 0x1a6   : > { %681 = vbcast.lane.b32.xlu1 %v22749_v0, 264  ;;  %vm16863_vm7 = vmpackc.low %vm2555_vm8, %vm2554_vm9  ;;  %677 = vbcast.lane.b32.xlu0 %v22749_v0, 256 }
 0x1a7   : > { %21013 = vmatmul.mubr.msk.bf16.gmra.mrb[4].mxu0 %vm16863_vm7, %v22390_v52 }
 0x1a8   : > { %v446_v18 = vpop.permute.xlu1 %445  ;;  %v442_v19 = vpop.permute.xlu0 %441 }
 0x1a9   : > { %vm2557_vm10 = vcmp.eq.s32.totalorder %v22942_v37, %v446_v18  ;;  %vm2556_vm12 = vcmp.eq.s32.totalorder %v22942_v37, %v442_v19 }
 0x1aa   : > { %689 = vbcast.lane.b32.xlu1 %v22749_v0, 280  ;;  %vm16865_vm4 = vmpackc.low %vm2557_vm10, %vm2556_vm12  ;;  %685 = vbcast.lane.b32.xlu0 %v22749_v0, 272 }
 0x1ab   : > { %21016 = vmatprep.mubr.msk.bf16.mxu0 %vm16865_vm4, %v22390_v52 }
 0x1ac   : > { %v454_v63 = vpop.permute.xlu1 %453  ;;  %v450_v31 = vpop.permute.xlu0 %449 }
 0x1ad   : > { %vm2559_vm6 = vcmp.eq.s32.totalorder %v22942_v37, %v454_v63  ;;  %vm2558_vm11 = vcmp.eq.s32.totalorder %v22942_v37, %v450_v31 }
 0x1ae   : > { %697 = vbcast.lane.b32.xlu1 %v22749_v0, 296  ;;  %vm16867_vm13 = vmpackc.low %vm2559_vm6, %vm2558_vm11  ;;  %693 = vbcast.lane.b32.xlu0 %v22749_v0, 288 }
 0x1af   : > { %21017 = vmatmul.mubr.msk.bf16.gmra.mrb[8].mxu0 %vm16867_vm13, %v22390_v52 }
 0x1b0   : > { %v462_v36 = vpop.permute.xlu1 %461  ;;  %v458_v38 = vpop.permute.xlu0 %457 }
 0x1b1   : > { %vm2561_vm14 = vcmp.eq.s32.totalorder %v22942_v37, %v462_v36  ;;  %vm2560_vm15 = vcmp.eq.s32.totalorder %v22942_v37, %v458_v38 }
 0x1b2   : > { %705 = vbcast.lane.b32.xlu1 %v22749_v0, 312  ;;  %vm16869_vm1 = vmpackc.low %vm2561_vm14, %vm2560_vm15  ;;  %701 = vbcast.lane.b32.xlu0 %v22749_v0, 304 }
 0x1b3   : > { %21020 = vmatprep.mubr.msk.bf16.mxu0 %vm16869_vm1, %v22390_v52 }
 0x1b4   : > { %v470_v46 = vpop.permute.xlu1 %469  ;;  %v466_v10 = vpop.permute.xlu0 %465 }
 0x1b5   : > { %vm2563_vm0 = vcmp.eq.s32.totalorder %v22942_v37, %v470_v46  ;;  %vm2562_vm2 = vcmp.eq.s32.totalorder %v22942_v37, %v466_v10 }
 0x1b6   : > { %713 = vbcast.lane.b32.xlu1 %v22749_v0, 328  ;;  %vm16871_vm3 = vmpackc.low %vm2563_vm0, %vm2562_vm2  ;;  %709 = vbcast.lane.b32.xlu0 %v22749_v0, 320 }
 0x1b7   : > { %21021 = vmatmul.mubr.msk.bf16.gmra.mrb[12].mxu0 %vm16871_vm3, %v22390_v52 }
 0x1b8   : > { %v481_v62 = vpop.permute.xlu1 %480  ;;  %v477_v42 = vpop.permute.xlu0 %476 }
 0x1b9   : > { %vm2565_vm5 = vcmp.eq.s32.totalorder %v22942_v37, %v481_v62  ;;  %vm2564_vm8 = vcmp.eq.s32.totalorder %v22942_v37, %v477_v42 }
 0x1ba   : > { %721 = vbcast.lane.b32.xlu1 %v22749_v0, 344  ;;  %vm16873_vm9 = vmpackc.low %vm2565_vm5, %vm2564_vm8  ;;  %717 = vbcast.lane.b32.xlu0 %v22749_v0, 336 }
 0x1bb   : > { %21024 = vmatprep.mubr.msk.bf16.mxu0 %vm16873_vm9, %v22390_v52 }
 0x1bc   : > { %v489_v43 = vpop.permute.xlu1 %488  ;;  %v485_v45 = vpop.permute.xlu0 %484 }
 0x1bd   : > { %vm2567_vm7 = vcmp.eq.s32.totalorder %v22942_v37, %v489_v43  ;;  %vm2566_vm10 = vcmp.eq.s32.totalorder %v22942_v37, %v485_v45 }
 0x1be   : > { %729 = vbcast.lane.b32.xlu1 %v22749_v0, 360  ;;  %vm16875_vm12 = vmpackc.low %vm2567_vm7, %vm2566_vm10  ;;  %725 = vbcast.lane.b32.xlu0 %v22749_v0, 352 }
 0x1bf   : > { %21025 = vmatmul.mubr.msk.bf16.gmra.mrb[16].mxu0 %vm16875_vm12, %v22390_v52 }
 0x1c0   : > { %v497_v61 = vpop.permute.xlu1 %496  ;;  %v493_v18 = vpop.permute.xlu0 %492 }
 0x1c1   : > { %vm2569_vm4 = vcmp.eq.s32.totalorder %v22942_v37, %v497_v61  ;;  %vm2568_vm6 = vcmp.eq.s32.totalorder %v22942_v37, %v493_v18 }
 0x1c2   : > { %737 = vbcast.lane.b32.xlu1 %v22749_v0, 376  ;;  %vm16877_vm11 = vmpackc.low %vm2569_vm4, %vm2568_vm6  ;;  %733 = vbcast.lane.b32.xlu0 %v22749_v0, 368 }
 0x1c3   : > { %21028 = vmatprep.mubr.msk.bf16.mxu0 %vm16877_vm11, %v22390_v52 }
 0x1c4   : > { %v505_v19 = vpop.permute.xlu1 %504  ;;  %v501_v63 = vpop.permute.xlu0 %500 }
 0x1c5   : > { %vm2571_vm13 = vcmp.eq.s32.totalorder %v22942_v37, %v505_v19  ;;  %vm2570_vm14 = vcmp.eq.s32.totalorder %v22942_v37, %v501_v63 }
 0x1c6   : > { %748 = vbcast.lane.b32.xlu1 %v22753_v1, 264  ;;  %vm16879_vm15 = vmpackc.low %vm2571_vm13, %vm2570_vm14  ;;  %744 = vbcast.lane.b32.xlu0 %v22753_v1, 256 }
 0x1c7   : > { %21029 = vmatmul.mubr.msk.bf16.gmra.mrb[20].mxu0 %vm16879_vm15, %v22390_v52 }
 0x1c8   : > { %v513_v31 = vpop.permute.xlu1 %512  ;;  %v509_v36 = vpop.permute.xlu0 %508 }
 0x1c9   : > { %vm2573_vm1 = vcmp.eq.s32.totalorder %v22942_v37, %v513_v31  ;;  %vm2572_vm0 = vcmp.eq.s32.totalorder %v22942_v37, %v509_v36 }
 0x1ca   : > { %756 = vbcast.lane.b32.xlu1 %v22753_v1, 280  ;;  %vm16881_vm2 = vmpackc.low %vm2573_vm1, %vm2572_vm0  ;;  %752 = vbcast.lane.b32.xlu0 %v22753_v1, 272 }
 0x1cb   : > { %21032 = vmatprep.mubr.msk.bf16.mxu0 %vm16881_vm2, %v22390_v52 }
 0x1cc   : > { %v521_v0 = vpop.permute.xlu1 %520  ;;  %v517_v38 = vpop.permute.xlu0 %516 }
 0x1cd   : > { %vm2575_vm3 = vcmp.eq.s32.totalorder %v22942_v37, %v521_v0  ;;  %vm2574_vm5 = vcmp.eq.s32.totalorder %v22942_v37, %v517_v38 }
 0x1ce   : > { %764 = vbcast.lane.b32.xlu1 %v22753_v1, 296  ;;  %vm16883_vm8 = vmpackc.low %vm2575_vm3, %vm2574_vm5  ;;  %760 = vbcast.lane.b32.xlu0 %v22753_v1, 288 }
 0x1cf   : > { %21033 = vmatmul.mubr.msk.bf16.gmra.mrb[24].mxu0 %vm16883_vm8, %v22390_v52 }
 0x1d0   : > { %v529_v46 = vpop.permute.xlu1 %528  ;;  %v525_v10 = vpop.permute.xlu0 %524 }
 0x1d1   : > { %vm2577_vm9 = vcmp.eq.s32.totalorder %v22942_v37, %v529_v46  ;;  %vm2576_vm7 = vcmp.eq.s32.totalorder %v22942_v37, %v525_v10 }
 0x1d2   : > { %772 = vbcast.lane.b32.xlu1 %v22753_v1, 312  ;;  %vm16885_vm10 = vmpackc.low %vm2577_vm9, %vm2576_vm7  ;;  %768 = vbcast.lane.b32.xlu0 %v22753_v1, 304 }
 0x1d3   : > { %21036 = vmatprep.mubr.msk.bf16.mxu0 %vm16885_vm10, %v22390_v52 }
 0x1d4   : > { %v537_v62 = vpop.permute.xlu1 %536  ;;  %v533_v42 = vpop.permute.xlu0 %532 }
 0x1d5   : > { %vm2579_vm12 = vcmp.eq.s32.totalorder %v22942_v37, %v537_v62  ;;  %vm2578_vm4 = vcmp.eq.s32.totalorder %v22942_v37, %v533_v42 }
 0x1d6   : > { %780 = vbcast.lane.b32.xlu1 %v22753_v1, 328  ;;  %vm16887_vm6 = vmpackc.low %vm2579_vm12, %vm2578_vm4  ;;  %776 = vbcast.lane.b32.xlu0 %v22753_v1, 320 }
 0x1d7   : > { %21037 = vmatmul.mubr.msk.bf16.gmra.mrb[28].mxu0 %vm16887_vm6, %v22390_v52 }
 0x1d8   : > { %v548_v43 = vpop.permute.xlu1 %547  ;;  %v544_v45 = vpop.permute.xlu0 %543 }
 0x1d9   : > { %vm2581_vm11 = vcmp.eq.s32.totalorder %v22942_v37, %v548_v43  ;;  %vm2580_vm13 = vcmp.eq.s32.totalorder %v22942_v37, %v544_v45 }
 0x1da   : > { %788 = vbcast.lane.b32.xlu1 %v22753_v1, 344  ;;  %vm16889_vm14 = vmpackc.low %vm2581_vm11, %vm2580_vm13  ;;  %784 = vbcast.lane.b32.xlu0 %v22753_v1, 336 }
 0x1db   : > { %21040 = vmatprep.mubr.msk.bf16.mxu0 %vm16889_vm14, %v22390_v52 }
 0x1dc   : > { %v556_v61 = vpop.permute.xlu1 %555  ;;  %v552_v18 = vpop.permute.xlu0 %551 }
 0x1dd   : > { %vm2583_vm15 = vcmp.eq.s32.totalorder %v22942_v37, %v556_v61  ;;  %vm2582_vm1 = vcmp.eq.s32.totalorder %v22942_v37, %v552_v18 }
 0x1de   : > { %796 = vbcast.lane.b32.xlu1 %v22753_v1, 360  ;;  %vm16891_vm0 = vmpackc.low %vm2583_vm15, %vm2582_vm1  ;;  %792 = vbcast.lane.b32.xlu0 %v22753_v1, 352 }
 0x1df   : > { %21041 = vmatmul.mubr.msk.bf16.gmra.mrb[32].mxu0 %vm16891_vm0, %v22390_v52 }
 0x1e0   : > { %v564_v19 = vpop.permute.xlu1 %563  ;;  %v560_v63 = vpop.permute.xlu0 %559 }
 0x1e1   : > { %vm2585_vm2 = vcmp.eq.s32.totalorder %v22942_v37, %v564_v19  ;;  %vm2584_vm3 = vcmp.eq.s32.totalorder %v22942_v37, %v560_v63 }
 0x1e2   : > { %804 = vbcast.lane.b32.xlu1 %v22753_v1, 376  ;;  %vm16893_vm5 = vmpackc.low %vm2585_vm2, %vm2584_vm3  ;;  %800 = vbcast.lane.b32.xlu0 %v22753_v1, 368 }
 0x1e3   : > { %21044 = vmatprep.mubr.msk.bf16.mxu0 %vm16893_vm5, %v22390_v52 }
 0x1e4   : > { %v572_v31 = vpop.permute.xlu1 %571  ;;  %v568_v36 = vpop.permute.xlu0 %567 }
 0x1e5   : > { %vm2587_vm8 = vcmp.eq.s32.totalorder %v22942_v37, %v572_v31  ;;  %vm2586_vm9 = vcmp.eq.s32.totalorder %v22942_v37, %v568_v36 }
 0x1e6   : > { %815 = vbcast.lane.b32.xlu1 %v22757_v2, 264  ;;  %vm16895_vm7 = vmpackc.low %vm2587_vm8, %vm2586_vm9  ;;  %811 = vbcast.lane.b32.xlu0 %v22757_v2, 256 }
 0x1e7   : > { %21045 = vmatmul.mubr.msk.bf16.gmra.mrb[36].mxu0 %vm16895_vm7, %v22390_v52 }
 0x1e8   : > { %v580_v0 = vpop.permute.xlu1 %579  ;;  %v576_v38 = vpop.permute.xlu0 %575 }
 0x1e9   : > { %vm2589_vm10 = vcmp.eq.s32.totalorder %v22942_v37, %v580_v0  ;;  %vm2588_vm12 = vcmp.eq.s32.totalorder %v22942_v37, %v576_v38 }
 0x1ea   : > { %823 = vbcast.lane.b32.xlu1 %v22757_v2, 280  ;;  %vm16897_vm4 = vmpackc.low %vm2589_vm10, %vm2588_vm12  ;;  %819 = vbcast.lane.b32.xlu0 %v22757_v2, 272 }
 0x1eb   : > { %21048 = vmatprep.mubr.msk.bf16.mxu0 %vm16897_vm4, %v22390_v52 }
 0x1ec   : > { %v588_v1 = vpop.permute.xlu1 %587  ;;  %v584_v46 = vpop.permute.xlu0 %583 }
 0x1ed   : > { %vm2591_vm6 = vcmp.eq.s32.totalorder %v22942_v37, %v588_v1  ;;  %vm2590_vm11 = vcmp.eq.s32.totalorder %v22942_v37, %v584_v46 }
 0x1ee   : > { %831 = vbcast.lane.b32.xlu1 %v22757_v2, 296  ;;  %vm16899_vm13 = vmpackc.low %vm2591_vm6, %vm2590_vm11  ;;  %827 = vbcast.lane.b32.xlu0 %v22757_v2, 288 }
 0x1ef   : > { %21049 = vmatmul.mubr.msk.bf16.gmra.mrb[40].mxu0 %vm16899_vm13, %v22390_v52 }
 0x1f0   : > { %v596_v10 = vpop.permute.xlu1 %595  ;;  %v592_v62 = vpop.permute.xlu0 %591 }
 0x1f1   : > { %vm2593_vm14 = vcmp.eq.s32.totalorder %v22942_v37, %v596_v10  ;;  %vm2592_vm15 = vcmp.eq.s32.totalorder %v22942_v37, %v592_v62 }
 0x1f2   : > { %839 = vbcast.lane.b32.xlu1 %v22757_v2, 312  ;;  %vm16901_vm1 = vmpackc.low %vm2593_vm14, %vm2592_vm15  ;;  %835 = vbcast.lane.b32.xlu0 %v22757_v2, 304 }
 0x1f3   : > { %21052 = vmatprep.mubr.msk.bf16.mxu0 %vm16901_vm1, %v22390_v52 }
 0x1f4   : > { %v604_v42 = vpop.permute.xlu1 %603  ;;  %v600_v43 = vpop.permute.xlu0 %599 }
 0x1f5   : > { %vm2595_vm0 = vcmp.eq.s32.totalorder %v22942_v37, %v604_v42  ;;  %vm2594_vm2 = vcmp.eq.s32.totalorder %v22942_v37, %v600_v43 }
 0x1f6   : > { %847 = vbcast.lane.b32.xlu1 %v22757_v2, 328  ;;  %vm16903_vm3 = vmpackc.low %vm2595_vm0, %vm2594_vm2  ;;  %843 = vbcast.lane.b32.xlu0 %v22757_v2, 320 }
 0x1f7   : > { %21053 = vmatmul.mubr.msk.bf16.gmra.mrb[44].mxu0 %vm16903_vm3, %v22390_v52 }
 0x1f8   : > { %v615_v45 = vpop.permute.xlu1 %614  ;;  %v611_v61 = vpop.permute.xlu0 %610 }
 0x1f9   : > { %vm2597_vm5 = vcmp.eq.s32.totalorder %v22942_v37, %v615_v45  ;;  %vm2596_vm8 = vcmp.eq.s32.totalorder %v22942_v37, %v611_v61 }
 0x1fa   : > { %855 = vbcast.lane.b32.xlu1 %v22757_v2, 344  ;;  %vm16905_vm9 = vmpackc.low %vm2597_vm5, %vm2596_vm8  ;;  %851 = vbcast.lane.b32.xlu0 %v22757_v2, 336 }
 0x1fb   : > { %21056 = vmatprep.mubr.msk.bf16.mxu0 %vm16905_vm9, %v22390_v52 }
 0x1fc   : > { %v623_v18 = vpop.permute.xlu1 %622  ;;  %v619_v19 = vpop.permute.xlu0 %618 }
 0x1fd   : > { %vm2599_vm7 = vcmp.eq.s32.totalorder %v22942_v37, %v623_v18  ;;  %vm2598_vm10 = vcmp.eq.s32.totalorder %v22942_v37, %v619_v19 }
 0x1fe   : > { %863 = vbcast.lane.b32.xlu1 %v22757_v2, 360  ;;  %vm16907_vm12 = vmpackc.low %vm2599_vm7, %vm2598_vm10  ;;  %859 = vbcast.lane.b32.xlu0 %v22757_v2, 352 }
 0x1ff   : > { %21057 = vmatmul.mubr.msk.bf16.gmra.mrb[48].mxu0 %vm16907_vm12, %v22390_v52 }
 0x200   : > { %v631_v63 = vpop.permute.xlu1 %630  ;;  %v627_v31 = vpop.permute.xlu0 %626 }
 0x201   : > { %vm2601_vm4 = vcmp.eq.s32.totalorder %v22942_v37, %v631_v63  ;;  %vm2600_vm6 = vcmp.eq.s32.totalorder %v22942_v37, %v627_v31 }
 0x202   : > { %871 = vbcast.lane.b32.xlu1 %v22757_v2, 376  ;;  %vm16909_vm11 = vmpackc.low %vm2601_vm4, %vm2600_vm6  ;;  %867 = vbcast.lane.b32.xlu0 %v22757_v2, 368 }
 0x203   : > { %21060 = vmatprep.mubr.msk.bf16.mxu0 %vm16909_vm11, %v22390_v52 }
 0x204   : > { %v639_v36 = vpop.permute.xlu1 %638  ;;  %v635_v0 = vpop.permute.xlu0 %634 }
 0x205   : > { %vm2603_vm13 = vcmp.eq.s32.totalorder %v22942_v37, %v639_v36  ;;  %vm2602_vm14 = vcmp.eq.s32.totalorder %v22942_v37, %v635_v0  ;;  %v23122_v36 = vrot.slane %v22710_v51, %v22652_v16 }
 0x206   : > { %882 = vbcast.lane.b32.xlu1 %v22761_v3, 264  ;;  %vm16911_vm15 = vmpackc.low %vm2603_vm13, %vm2602_vm14  ;;  %878 = vbcast.lane.b32.xlu0 %v22761_v3, 256 }
 0x207   : > { %21061 = vmatmul.mubr.msk.bf16.gmra.mrb[52].mxu0 %vm16911_vm15, %v22390_v52 }
 0x208   : > { %v647_v38 = vpop.permute.xlu1 %646  ;;  %v643_v1 = vpop.permute.xlu0 %642 }
 0x209   : > { %vm2605_vm1 = vcmp.eq.s32.totalorder %v22942_v37, %v647_v38  ;;  %vm2604_vm0 = vcmp.eq.s32.totalorder %v22942_v37, %v643_v1 }
 0x20a   : > { %890 = vbcast.lane.b32.xlu1 %v22761_v3, 280  ;;  %vm16913_vm2 = vmpackc.low %vm2605_vm1, %vm2604_vm0  ;;  %886 = vbcast.lane.b32.xlu0 %v22761_v3, 272 }
 0x20b   : > { %21064 = vmatprep.mubr.msk.bf16.mxu0 %vm16913_vm2, %v22390_v52 }
 0x20c   : > { %v655_v2 = vpop.permute.xlu1 %654  ;;  %v651_v46 = vpop.permute.xlu0 %650 }
 0x20d   : > { %vm2607_vm3 = vcmp.eq.s32.totalorder %v22942_v37, %v655_v2  ;;  %vm2606_vm5 = vcmp.eq.s32.totalorder %v22942_v37, %v651_v46 }
 0x20e   : > { %898 = vbcast.lane.b32.xlu1 %v22761_v3, 296  ;;  %vm16915_vm8 = vmpackc.low %vm2607_vm3, %vm2606_vm5  ;;  %894 = vbcast.lane.b32.xlu0 %v22761_v3, 288 }
 0x20f   : > { %21065 = vmatmul.mubr.msk.bf16.gmra.mrb[56].mxu0 %vm16915_vm8, %v22390_v52 }
 0x210   : > { %v663_v10 = vpop.permute.xlu1 %662  ;;  %v659_v62 = vpop.permute.xlu0 %658 }
 0x211   : > { %vm2609_vm9 = vcmp.eq.s32.totalorder %v22942_v37, %v663_v10  ;;  %vm2608_vm7 = vcmp.eq.s32.totalorder %v22942_v37, %v659_v62 }
 0x212   : > { %906 = vbcast.lane.b32.xlu1 %v22761_v3, 312  ;;  %vm16917_vm10 = vmpackc.low %vm2609_vm9, %vm2608_vm7  ;;  %902 = vbcast.lane.b32.xlu0 %v22761_v3, 304 }
 0x213   : > { %21068 = vmatprep.mubr.msk.bf16.mxu0 %vm16917_vm10, %v22390_v52 }
 0x214   : > { %v671_v42 = vpop.permute.xlu1 %670  ;;  %v667_v43 = vpop.permute.xlu0 %666 }
 0x215   : > { %vm2611_vm12 = vcmp.eq.s32.totalorder %v22942_v37, %v671_v42  ;;  %vm2610_vm4 = vcmp.eq.s32.totalorder %v22942_v37, %v667_v43 }
 0x216   : > { %914 = vbcast.lane.b32.xlu1 %v22761_v3, 328  ;;  %vm16919_vm6 = vmpackc.low %vm2611_vm12, %vm2610_vm4  ;;  %910 = vbcast.lane.b32.xlu0 %v22761_v3, 320 }
 0x217   : > { %21069 = vmatmul.mubr.msk.bf16.gmra.mrb[60].mxu0 %vm16919_vm6, %v22390_v52 }
 0x218   : > { %v682_v45 = vpop.permute.xlu1 %681  ;;  %v678_v61 = vpop.permute.xlu0 %677 }
 0x219   : > { %vm2613_vm11 = vcmp.eq.s32.totalorder %v22942_v37, %v682_v45  ;;  %vm2612_vm13 = vcmp.eq.s32.totalorder %v22942_v37, %v678_v61 }
 0x21a   : > { %922 = vbcast.lane.b32.xlu1 %v22761_v3, 344  ;;  %vm16921_vm14 = vmpackc.low %vm2613_vm11, %vm2612_vm13  ;;  %918 = vbcast.lane.b32.xlu0 %v22761_v3, 336 }
 0x21b   : > { %21072 = vmatprep.mubr.msk.bf16.mxu0 %vm16921_vm14, %v22390_v52 }
 0x21c   : > { %v690_v18 = vpop.permute.xlu1 %689  ;;  %v686_v19 = vpop.permute.xlu0 %685 }
 0x21d   : > { %vm2615_vm15 = vcmp.eq.s32.totalorder %v22942_v37, %v690_v18  ;;  %vm2614_vm1 = vcmp.eq.s32.totalorder %v22942_v37, %v686_v19 }
 0x21e   : > { %930 = vbcast.lane.b32.xlu1 %v22761_v3, 360  ;;  %vm16923_vm0 = vmpackc.low %vm2615_vm15, %vm2614_vm1  ;;  %926 = vbcast.lane.b32.xlu0 %v22761_v3, 352 }
 0x21f   : > { %21073 = vmatmul.mubr.msk.bf16.gmra.mrb[64].mxu0 %vm16923_vm0, %v22390_v52 }
 0x220   : > { %v698_v63 = vpop.permute.xlu1 %697  ;;  %v694_v31 = vpop.permute.xlu0 %693 }
 0x221   : > { %vm2617_vm2 = vcmp.eq.s32.totalorder %v22942_v37, %v698_v63  ;;  %vm2616_vm3 = vcmp.eq.s32.totalorder %v22942_v37, %v694_v31 }
 0x222   : > { %938 = vbcast.lane.b32.xlu1 %v22761_v3, 376  ;;  %vm16925_vm5 = vmpackc.low %vm2617_vm2, %vm2616_vm3  ;;  %934 = vbcast.lane.b32.xlu0 %v22761_v3, 368 }
 0x223   : > { %21076 = vmatprep.mubr.msk.bf16.mxu0 %vm16925_vm5, %v22390_v52 }
 0x224   : > { %v706_v0 = vpop.permute.xlu1 %705  ;;  %v702_v38 = vpop.permute.xlu0 %701 }
 0x225   : > { %vm2619_vm8 = vcmp.eq.s32.totalorder %v22942_v37, %v706_v0  ;;  %vm2618_vm9 = vcmp.eq.s32.totalorder %v22942_v37, %v702_v38  ;;  %v23166_v0 = vrot.slane %v22710_v51, %v22654_v17 }
 0x226   : > { %949 = vbcast.lane.b32.xlu1 %v23122_v36, 264  ;;  %vm16927_vm7 = vmpackc.low %vm2619_vm8, %vm2618_vm9  ;;  %945 = vbcast.lane.b32.xlu0 %v23122_v36, 256 }
 0x227   : > { %21077 = vmatmul.mubr.msk.bf16.gmra.mrb[68].mxu0 %vm16927_vm7, %v22390_v52 }
 0x228   : > { %v714_v3 = vpop.permute.xlu1 %713  ;;  %v710_v1 = vpop.permute.xlu0 %709 }
 0x229   : > { %vm2621_vm10 = vcmp.eq.s32.totalorder %v22942_v37, %v714_v3  ;;  %vm2620_vm12 = vcmp.eq.s32.totalorder %v22942_v37, %v710_v1 }
 0x22a   : > { %957 = vbcast.lane.b32.xlu1 %v23122_v36, 280  ;;  %vm16929_vm4 = vmpackc.low %vm2621_vm10, %vm2620_vm12  ;;  %953 = vbcast.lane.b32.xlu0 %v23122_v36, 272 }
 0x22b   : > { %21080 = vmatprep.mubr.msk.bf16.mxu0 %vm16929_vm4, %v22390_v52 }
 0x22c   : > { %v722_v2 = vpop.permute.xlu1 %721  ;;  %v718_v46 = vpop.permute.xlu0 %717 }
 0x22d   : > { %vm2623_vm6 = vcmp.eq.s32.totalorder %v22942_v37, %v722_v2  ;;  %vm2622_vm11 = vcmp.eq.s32.totalorder %v22942_v37, %v718_v46 }
 0x22e   : > { %965 = vbcast.lane.b32.xlu1 %v23122_v36, 296  ;;  %vm16931_vm13 = vmpackc.low %vm2623_vm6, %vm2622_vm11  ;;  %961 = vbcast.lane.b32.xlu0 %v23122_v36, 288 }
 0x22f   : > { %21081 = vmatmul.mubr.msk.bf16.gmra.mrb[72].mxu0 %vm16931_vm13, %v22390_v52 }
 0x230   : > { %v730_v10 = vpop.permute.xlu1 %729  ;;  %v726_v62 = vpop.permute.xlu0 %725 }
 0x231   : > { %vm2625_vm14 = vcmp.eq.s32.totalorder %v22942_v37, %v730_v10  ;;  %vm2624_vm15 = vcmp.eq.s32.totalorder %v22942_v37, %v726_v62 }
 0x232   : > { %973 = vbcast.lane.b32.xlu1 %v23122_v36, 312  ;;  %vm16933_vm1 = vmpackc.low %vm2625_vm14, %vm2624_vm15  ;;  %969 = vbcast.lane.b32.xlu0 %v23122_v36, 304 }
 0x233   : > { %21084 = vmatprep.mubr.msk.bf16.mxu0 %vm16933_vm1, %v22390_v52 }
 0x234   : > { %v738_v42 = vpop.permute.xlu1 %737  ;;  %v734_v43 = vpop.permute.xlu0 %733 }
 0x235   : > { %vm2627_vm0 = vcmp.eq.s32.totalorder %v22942_v37, %v738_v42  ;;  %vm2626_vm2 = vcmp.eq.s32.totalorder %v22942_v37, %v734_v43 }
 0x236   : > { %981 = vbcast.lane.b32.xlu1 %v23122_v36, 328  ;;  %vm16935_vm3 = vmpackc.low %vm2627_vm0, %vm2626_vm2  ;;  %977 = vbcast.lane.b32.xlu0 %v23122_v36, 320 }
 0x237   : > { %21085 = vmatmul.mubr.msk.bf16.gmra.mrb[76].mxu0 %vm16935_vm3, %v22390_v52 }
 0x238   : > { %v749_v45 = vpop.permute.xlu1 %748  ;;  %v745_v61 = vpop.permute.xlu0 %744 }
 0x239   : > { %vm2629_vm5 = vcmp.eq.s32.totalorder %v22942_v37, %v749_v45  ;;  %vm2628_vm8 = vcmp.eq.s32.totalorder %v22942_v37, %v745_v61 }
 0x23a   : > { %989 = vbcast.lane.b32.xlu1 %v23122_v36, 344  ;;  %vm16937_vm9 = vmpackc.low %vm2629_vm5, %vm2628_vm8  ;;  %985 = vbcast.lane.b32.xlu0 %v23122_v36, 336 }
 0x23b   : > { %21088 = vmatprep.mubr.msk.bf16.mxu0 %vm16937_vm9, %v22390_v52 }
 0x23c   : > { %v757_v18 = vpop.permute.xlu1 %756  ;;  %v753_v19 = vpop.permute.xlu0 %752 }
 0x23d   : > { %vm2631_vm7 = vcmp.eq.s32.totalorder %v22942_v37, %v757_v18  ;;  %vm2630_vm10 = vcmp.eq.s32.totalorder %v22942_v37, %v753_v19 }
 0x23e   : > { %997 = vbcast.lane.b32.xlu1 %v23122_v36, 360  ;;  %vm16939_vm12 = vmpackc.low %vm2631_vm7, %vm2630_vm10  ;;  %993 = vbcast.lane.b32.xlu0 %v23122_v36, 352 }
 0x23f   : > { %21089 = vmatmul.mubr.msk.bf16.gmra.mrb[80].mxu0 %vm16939_vm12, %v22390_v52 }
 0x240   : > { %v765_v63 = vpop.permute.xlu1 %764  ;;  %v761_v31 = vpop.permute.xlu0 %760 }
 0x241   : > { %vm2633_vm4 = vcmp.eq.s32.totalorder %v22942_v37, %v765_v63  ;;  %vm2632_vm6 = vcmp.eq.s32.totalorder %v22942_v37, %v761_v31 }
 0x242   : > { %1005 = vbcast.lane.b32.xlu1 %v23122_v36, 376  ;;  %vm16941_vm11 = vmpackc.low %vm2633_vm4, %vm2632_vm6  ;;  %1001 = vbcast.lane.b32.xlu0 %v23122_v36, 368 }
 0x243   : > { %21092 = vmatprep.mubr.msk.bf16.mxu0 %vm16941_vm11, %v22390_v52 }
 0x244   : > { %v773_v38 = vpop.permute.xlu1 %772  ;;  %v769_v3 = vpop.permute.xlu0 %768 }
 0x245   : > { %vm2635_vm13 = vcmp.eq.s32.totalorder %v22942_v37, %v773_v38  ;;  %vm2634_vm14 = vcmp.eq.s32.totalorder %v22942_v37, %v769_v3  ;;  %v23210_v38 = vrot.slane %v22710_v51, %v22666_v29 }
 0x246   : > { %1016 = vbcast.lane.b32.xlu1 %v23166_v0, 264  ;;  %vm16943_vm15 = vmpackc.low %vm2635_vm13, %vm2634_vm14  ;;  %1012 = vbcast.lane.b32.xlu0 %v23166_v0, 256 }
 0x247   : > { %21093 = vmatmul.mubr.msk.bf16.gmra.mrb[84].mxu0 %vm16943_vm15, %v22390_v52 }
 0x248   : > { %v781_v36 = vpop.permute.xlu1 %780  ;;  %v777_v1 = vpop.permute.xlu0 %776 }
 0x249   : > { %vm2637_vm1 = vcmp.eq.s32.totalorder %v22942_v37, %v781_v36  ;;  %vm2636_vm0 = vcmp.eq.s32.totalorder %v22942_v37, %v777_v1 }
 0x24a   : > { %1024 = vbcast.lane.b32.xlu1 %v23166_v0, 280  ;;  %vm16945_vm2 = vmpackc.low %vm2637_vm1, %vm2636_vm0  ;;  %1020 = vbcast.lane.b32.xlu0 %v23166_v0, 272 }
 0x24b   : > { %21096 = vmatprep.mubr.msk.bf16.mxu0 %vm16945_vm2, %v22390_v52 }
 0x24c   : > { %v789_v2 = vpop.permute.xlu1 %788  ;;  %v785_v46 = vpop.permute.xlu0 %784 }
 0x24d   : > { %vm2639_vm3 = vcmp.eq.s32.totalorder %v22942_v37, %v789_v2  ;;  %vm2638_vm5 = vcmp.eq.s32.totalorder %v22942_v37, %v785_v46 }
 0x24e   : > { %1032 = vbcast.lane.b32.xlu1 %v23166_v0, 296  ;;  %vm16947_vm8 = vmpackc.low %vm2639_vm3, %vm2638_vm5  ;;  %1028 = vbcast.lane.b32.xlu0 %v23166_v0, 288 }
 0x24f   : > { %21097 = vmatmul.mubr.msk.bf16.gmra.mrb[88].mxu0 %vm16947_vm8, %v22390_v52 }
 0x250   : > { %v797_v10 = vpop.permute.xlu1 %796  ;;  %v793_v62 = vpop.permute.xlu0 %792 }
 0x251   : > { %vm2641_vm9 = vcmp.eq.s32.totalorder %v22942_v37, %v797_v10  ;;  %vm2640_vm7 = vcmp.eq.s32.totalorder %v22942_v37, %v793_v62 }
 0x252   : > { %1040 = vbcast.lane.b32.xlu1 %v23166_v0, 312  ;;  %vm16949_vm10 = vmpackc.low %vm2641_vm9, %vm2640_vm7  ;;  %1036 = vbcast.lane.b32.xlu0 %v23166_v0, 304 }
 0x253   : > { %21100 = vmatprep.mubr.msk.bf16.mxu0 %vm16949_vm10, %v22390_v52 }
 0x254   : > { %v805_v42 = vpop.permute.xlu1 %804  ;;  %v801_v43 = vpop.permute.xlu0 %800 }
 0x255   : > { %vm2643_vm12 = vcmp.eq.s32.totalorder %v22942_v37, %v805_v42  ;;  %vm2642_vm4 = vcmp.eq.s32.totalorder %v22942_v37, %v801_v43 }
 0x256   : > { %1048 = vbcast.lane.b32.xlu1 %v23166_v0, 328  ;;  %vm16951_vm6 = vmpackc.low %vm2643_vm12, %vm2642_vm4  ;;  %1044 = vbcast.lane.b32.xlu0 %v23166_v0, 320 }
 0x257   : > { %21101 = vmatmul.mubr.msk.bf16.gmra.mrb[92].mxu0 %vm16951_vm6, %v22390_v52 }
 0x258   : > { %v816_v45 = vpop.permute.xlu1 %815  ;;  %v812_v61 = vpop.permute.xlu0 %811 }
 0x259   : > { %vm2645_vm11 = vcmp.eq.s32.totalorder %v22942_v37, %v816_v45  ;;  %vm2644_vm13 = vcmp.eq.s32.totalorder %v22942_v37, %v812_v61 }
 0x25a   : > { %1056 = vbcast.lane.b32.xlu1 %v23166_v0, 344  ;;  %vm16953_vm14 = vmpackc.low %vm2645_vm11, %vm2644_vm13  ;;  %1052 = vbcast.lane.b32.xlu0 %v23166_v0, 336 }
 0x25b   : > { %21104 = vmatprep.mubr.msk.bf16.mxu0 %vm16953_vm14, %v22390_v52 }
 0x25c   : > { %v824_v18 = vpop.permute.xlu1 %823  ;;  %v820_v19 = vpop.permute.xlu0 %819 }
 0x25d   : > { %vm2647_vm15 = vcmp.eq.s32.totalorder %v22942_v37, %v824_v18  ;;  %vm2646_vm1 = vcmp.eq.s32.totalorder %v22942_v37, %v820_v19 }
 0x25e   : > { %1064 = vbcast.lane.b32.xlu1 %v23166_v0, 360  ;;  %vm16955_vm0 = vmpackc.low %vm2647_vm15, %vm2646_vm1  ;;  %1060 = vbcast.lane.b32.xlu0 %v23166_v0, 352 }
 0x25f   : > { %21105 = vmatmul.mubr.msk.bf16.gmra.mrb[96].mxu0 %vm16955_vm0, %v22390_v52 }
 0x260   : > { %v832_v63 = vpop.permute.xlu1 %831  ;;  %v828_v31 = vpop.permute.xlu0 %827 }
 0x261   : > { %vm2649_vm2 = vcmp.eq.s32.totalorder %v22942_v37, %v832_v63  ;;  %vm2648_vm3 = vcmp.eq.s32.totalorder %v22942_v37, %v828_v31 }
 0x262   : > { %1072 = vbcast.lane.b32.xlu1 %v23166_v0, 376  ;;  %vm16957_vm5 = vmpackc.low %vm2649_vm2, %vm2648_vm3  ;;  %1068 = vbcast.lane.b32.xlu0 %v23166_v0, 368 }
 0x263   : > { %21108 = vmatprep.mubr.msk.bf16.mxu0 %vm16957_vm5, %v22390_v52 }
 0x264   : > { %v840_v3 = vpop.permute.xlu1 %839  ;;  %v836_v36 = vpop.permute.xlu0 %835 }
 0x265   : > { %vm2651_vm8 = vcmp.eq.s32.totalorder %v22942_v37, %v840_v3  ;;  %vm2650_vm9 = vcmp.eq.s32.totalorder %v22942_v37, %v836_v36 }
 0x266   : > { %1083 = vbcast.lane.b32.xlu1 %v23210_v38, 264  ;;  %vm16959_vm7 = vmpackc.low %vm2651_vm8, %vm2650_vm9  ;;  %1079 = vbcast.lane.b32.xlu0 %v23210_v38, 256 }
 0x267   : > { %21109 = vmatmul.mubr.msk.bf16.gmra.mrb[100].mxu0 %vm16959_vm7, %v22390_v52 }
 0x268   : > { %v848_v0 = vpop.permute.xlu1 %847  ;;  %v844_v51 = vpop.permute.xlu0 %843 }
 0x269   : > { %vm2653_vm10 = vcmp.eq.s32.totalorder %v22942_v37, %v848_v0  ;;  %vm2652_vm12 = vcmp.eq.s32.totalorder %v22942_v37, %v844_v51 }
 0x26a   : > { %1091 = vbcast.lane.b32.xlu1 %v23210_v38, 280  ;;  %vm16961_vm4 = vmpackc.low %vm2653_vm10, %vm2652_vm12  ;;  %1087 = vbcast.lane.b32.xlu0 %v23210_v38, 272 }
 0x26b   : > { %21112 = vmatprep.mubr.msk.bf16.mxu0 %vm16961_vm4, %v22390_v52 }
 0x26c   : > { %v856_v1 = vpop.permute.xlu1 %855  ;;  %v852_v2 = vpop.permute.xlu0 %851 }
 0x26d   : > { %vm2655_vm6 = vcmp.eq.s32.totalorder %v22942_v37, %v856_v1  ;;  %vm2654_vm11 = vcmp.eq.s32.totalorder %v22942_v37, %v852_v2 }
 0x26e   : > { %1099 = vbcast.lane.b32.xlu1 %v23210_v38, 296  ;;  %vm16963_vm13 = vmpackc.low %vm2655_vm6, %vm2654_vm11  ;;  %1095 = vbcast.lane.b32.xlu0 %v23210_v38, 288 }
 0x26f   : > { %21113 = vmatmul.mubr.msk.bf16.gmra.mrb[104].mxu0 %vm16963_vm13, %v22390_v52 }
 0x270   : > { %v864_v46 = vpop.permute.xlu1 %863  ;;  %v860_v10 = vpop.permute.xlu0 %859 }
 0x271   : > { %vm2657_vm14 = vcmp.eq.s32.totalorder %v22942_v37, %v864_v46  ;;  %vm2656_vm15 = vcmp.eq.s32.totalorder %v22942_v37, %v860_v10 }
 0x272   : > { %1107 = vbcast.lane.b32.xlu1 %v23210_v38, 312  ;;  %vm16965_vm1 = vmpackc.low %vm2657_vm14, %vm2656_vm15  ;;  %v23231_v62 = vpop.f32.mrb[0].mxu0  ;;  %1103 = vbcast.lane.b32.xlu0 %v23210_v38, 304 }
 0x273   : > { %v23234_v42 = vpop.f32.mrb[1].mxu0  ;;  %21116 = vmatprep.mubr.msk.bf16.mxu0 %vm16965_vm1, %v22390_v52 }
 0x274   : > { %v872_v43 = vpop.permute.xlu1 %871  ;;  %v23238_v45 = vpop.f32.mrb[2].mxu0 }
 0x275   : > { %vm2659_vm0 = vcmp.eq.s32.totalorder %v22942_v37, %v872_v43  ;;  %v868_v61 = vpop.permute.xlu0 %867  ;;  %v23241_v18 = vpop.f32.mrb[3].mxu0 }
 0x276   : > { %vm2658_vm2 = vcmp.eq.s32.totalorder %v22942_v37, %v868_v61  ;;  %1115 = vbcast.lane.b32.xlu1 %v23210_v38, 328  ;;  %1111 = vbcast.lane.b32.xlu0 %v23210_v38, 320 }
 0x277   : > { %vm16967_vm3 = vmpackc.low %vm2659_vm0, %vm2658_vm2 }
 0x278   : > { %21117 = vmatmul.mubr.msk.bf16.gmra.mrb[108].mxu0 %vm16967_vm3, %v22390_v52  ;;  %v883_v19 = vpop.permute.xlu1 %882 }
 0x279   : > { %vm2661_vm5 = vcmp.eq.s32.totalorder %v22942_v37, %v883_v19  ;;  %v879_v63 = vpop.permute.xlu0 %878 }
 0x27a   : > { %vm2660_vm8 = vcmp.eq.s32.totalorder %v22942_v37, %v879_v63  ;;  %1123 = vbcast.lane.b32.xlu1 %v23210_v38, 344  ;;  %v23249_v31 = vpop.f32.mrb[4].mxu0  ;;  %1119 = vbcast.lane.b32.xlu0 %v23210_v38, 336 }
 0x27b   : > { %vm16969_vm9 = vmpackc.low %vm2661_vm5, %vm2660_vm8  ;;  %v23252_v3 = vpop.f32.mrb[5].mxu0 }
 0x27c   : > { %21120 = vmatprep.mubr.msk.bf16.mxu0 %vm16969_vm9, %v22390_v52  ;;  %v891_v36 = vpop.permute.xlu1 %890  ;;  %v23256_v0 = vpop.f32.mrb[6].mxu0 }
 0x27d   : > { %vm2663_vm7 = vcmp.eq.s32.totalorder %v22942_v37, %v891_v36  ;;  %v887_v51 = vpop.permute.xlu0 %886  ;;  %v23259_v1 = vpop.f32.mrb[7].mxu0 }
 0x27e   : > { %vm2662_vm10 = vcmp.eq.s32.totalorder %v22942_v37, %v887_v51  ;;  %1131 = vbcast.lane.b32.xlu1 %v23210_v38, 360  ;;  %1127 = vbcast.lane.b32.xlu0 %v23210_v38, 352 }
 0x27f   : > { %vm16971_vm12 = vmpackc.low %vm2663_vm7, %vm2662_vm10 }
 0x280   : > { %21121 = vmatmul.mubr.msk.bf16.gmra.mrb[112].mxu0 %vm16971_vm12, %v22390_v52  ;;  %v899_v2 = vpop.permute.xlu1 %898 }
 0x281   : > { %vm2665_vm4 = vcmp.eq.s32.totalorder %v22942_v37, %v899_v2  ;;  %v895_v46 = vpop.permute.xlu0 %894 }
 0x282   : > { %vm2664_vm6 = vcmp.eq.s32.totalorder %v22942_v37, %v895_v46  ;;  %1139 = vbcast.lane.b32.xlu1 %v23210_v38, 376  ;;  %v23267_v10 = vpop.f32.mrb[8].mxu0  ;;  %1135 = vbcast.lane.b32.xlu0 %v23210_v38, 368 }
 0x283   : > { %vm16973_vm11 = vmpackc.low %vm2665_vm4, %vm2664_vm6  ;;  %v23270_v43 = vpop.f32.mrb[9].mxu0 }
 0x284   : > { %21124 = vmatprep.mubr.msk.bf16.mxu0 %vm16973_vm11, %v22390_v52  ;;  %v907_v61 = vpop.permute.xlu1 %906  ;;  %v23274_v19 = vpop.f32.mrb[10].mxu0 }
 0x285   : > { %vm2667_vm13 = vcmp.eq.s32.totalorder %v22942_v37, %v907_v61  ;;  %v903_v63 = vpop.permute.xlu0 %902  ;;  %v23277_v36 = vpop.f32.mrb[11].mxu0 }
 0x286   : > { %vm2666_vm14 = vcmp.eq.s32.totalorder %v22942_v37, %v903_v63  ;;  %1150 = vbcast.lane.b32.xlu1 %v22718_v54, 264  ;;  %1146 = vbcast.lane.b32.xlu0 %v22718_v54, 256 }
 0x287   : > { %vm16975_vm15 = vmpackc.low %vm2667_vm13, %vm2666_vm14 }
 0x288   : > { %21125 = vmatmul.mubr.msk.bf16.gmra.mrb[116].mxu0 %vm16975_vm15, %v22390_v52  ;;  %v915_v38 = vpop.permute.xlu1 %914 }
 0x289   : > { %vm2669_vm1 = vcmp.eq.s32.totalorder %v22942_v37, %v915_v38  ;;  %v911_v51 = vpop.permute.xlu0 %910 }
 0x28a   : > { %vm2668_vm0 = vcmp.eq.s32.totalorder %v22942_v37, %v911_v51  ;;  %1158 = vbcast.lane.b32.xlu1 %v22718_v54, 280  ;;  %v23285_v2 = vpop.f32.mrb[12].mxu0  ;;  %1154 = vbcast.lane.b32.xlu0 %v22718_v54, 272 }
 0x28b   : > { %vm16977_vm2 = vmpackc.low %vm2669_vm1, %vm2668_vm0  ;;  %v23288_v46 = vpop.f32.mrb[13].mxu0 }
 0x28c   : > { %21128 = vmatprep.mubr.msk.bf16.mxu0 %vm16977_vm2, %v22390_v52  ;;  %v923_v61 = vpop.permute.xlu1 %922  ;;  %v23292_v63 = vpop.f32.mrb[14].mxu0 }
 0x28d   : > { %vm2671_vm3 = vcmp.eq.s32.totalorder %v22942_v37, %v923_v61  ;;  %v919_v38 = vpop.permute.xlu0 %918  ;;  %v23295_v51 = vpop.f32.mrb[15].mxu0 }
 0x28e   : > { %vm2670_vm5 = vcmp.eq.s32.totalorder %v22942_v37, %v919_v38  ;;  %1166 = vbcast.lane.b32.xlu1 %v22718_v54, 296  ;;  %1162 = vbcast.lane.b32.xlu0 %v22718_v54, 288 }
 0x28f   : > { %vm16979_vm8 = vmpackc.low %vm2671_vm3, %vm2670_vm5 }
 0x290   : > { %21129 = vmatmul.mubr.msk.bf16.gmra.mrb[120].mxu0 %vm16979_vm8, %v22390_v52  ;;  %v931_v44 = vpop.permute.xlu1 %930 }
 0x291   : > { %vm2673_vm9 = vcmp.eq.s32.totalorder %v22942_v37, %v931_v44  ;;  %v927_v25 = vpop.permute.xlu0 %926 }
 0x292   : > { %vm2672_vm7 = vcmp.eq.s32.totalorder %v22942_v37, %v927_v25  ;;  %1174 = vbcast.lane.b32.xlu1 %v22718_v54, 312  ;;  %v23303_v61 = vpop.f32.mrb[16].mxu0  ;;  %1170 = vbcast.lane.b32.xlu0 %v22718_v54, 304 }
 0x293   : > { %vm16981_vm10 = vmpackc.low %vm2673_vm9, %vm2672_vm7  ;;  %v23306_v38 = vpop.f32.mrb[17].mxu0 }
 0x294   : > { %21132 = vmatprep.mubr.msk.bf16.mxu0 %vm16981_vm10, %v22390_v52  ;;  %v939_v41 = vpop.permute.xlu1 %938  ;;  %v23310_v20 = vpop.f32.mrb[18].mxu0 }
 0x295   : > { %vm2675_vm12 = vcmp.eq.s32.totalorder %v22942_v37, %v939_v41  ;;  %v935_v44 = vpop.permute.xlu0 %934  ;;  %v23313_v25 = vpop.f32.mrb[19].mxu0 }
 0x296   : > { %vm2674_vm4 = vcmp.eq.s32.totalorder %v22942_v37, %v935_v44  ;;  %1182 = vbcast.lane.b32.xlu1 %v22718_v54, 328  ;;  %1178 = vbcast.lane.b32.xlu0 %v22718_v54, 320 }
 0x297   : > { %vm16983_vm6 = vmpackc.low %vm2675_vm12, %vm2674_vm4 }
 0x298   : > { %21133 = vmatmul.mubr.msk.bf16.gmra.mrb[124].mxu0 %vm16983_vm6, %v22390_v52  ;;  %v950_v40 = vpop.permute.xlu1 %949 }
 0x299   : > { %vm2677_vm11 = vcmp.eq.s32.totalorder %v22942_v37, %v950_v40  ;;  %v946_v24 = vpop.permute.xlu0 %945 }
 0x29a   : > { %vm2676_vm13 = vcmp.eq.s32.totalorder %v22942_v37, %v946_v24  ;;  %1190 = vbcast.lane.b32.xlu1 %v22718_v54, 344  ;;  %v23321_v41 = vpop.f32.mrb[20].mxu0  ;;  %1186 = vbcast.lane.b32.xlu0 %v22718_v54, 336 }
 0x29b   : > { %vm16985_vm14 = vmpackc.low %vm2677_vm11, %vm2676_vm13  ;;  %v23324_v44 = vpop.f32.mrb[21].mxu0 }
 0x29c   : > { %21136 = vmatprep.mubr.msk.bf16.mxu0 %vm16985_vm14, %v22390_v52  ;;  %v958_v39 = vpop.permute.xlu1 %957  ;;  %v23328_v22 = vpop.f32.mrb[22].mxu0 }
 0x29d   : > { %vm2679_vm15 = vcmp.eq.s32.totalorder %v22942_v37, %v958_v39  ;;  %v954_v40 = vpop.permute.xlu0 %953  ;;  %v23331_v24 = vpop.f32.mrb[23].mxu0 }
 0x29e   : > { %vm2678_vm1 = vcmp.eq.s32.totalorder %v22942_v37, %v954_v40  ;;  %1198 = vbcast.lane.b32.xlu1 %v22718_v54, 360  ;;  %1194 = vbcast.lane.b32.xlu0 %v22718_v54, 352 }
 0x29f   : > { %vm16987_vm0 = vmpackc.low %vm2679_vm15, %vm2678_vm1 }
 0x2a0   : > { %21137 = vmatmul.mubr.msk.bf16.gmra.mrb[128].mxu0 %vm16987_vm0, %v22390_v52  ;;  %v966_v35 = vpop.permute.xlu1 %965 }
 0x2a1   : > { %vm2681_vm2 = vcmp.eq.s32.totalorder %v22942_v37, %v966_v35  ;;  %v962_v21 = vpop.permute.xlu0 %961 }
 0x2a2   : > { %vm2680_vm3 = vcmp.eq.s32.totalorder %v22942_v37, %v962_v21  ;;  %1206 = vbcast.lane.b32.xlu1 %v22718_v54, 376  ;;  %v23339_v39 = vpop.f32.mrb[24].mxu0  ;;  %1202 = vbcast.lane.b32.xlu0 %v22718_v54, 368 }
 0x2a3   : > { %vm16989_vm5 = vmpackc.low %vm2681_vm2, %vm2680_vm3  ;;  %v23342_v40 = vpop.f32.mrb[25].mxu0 }
 0x2a4   : > { %21140 = vmatprep.mubr.msk.bf16.mxu0 %vm16989_vm5, %v22390_v52  ;;  %v974_v33 = vpop.permute.xlu1 %973  ;;  %v23346_v15 = vpop.f32.mrb[26].mxu0 }
 0x2a5   : > { %vm2683_vm8 = vcmp.eq.s32.totalorder %v22942_v37, %v974_v33  ;;  %v970_v35 = vpop.permute.xlu0 %969  ;;  %v23349_v21 = vpop.f32.mrb[27].mxu0 }
 0x2a6   : > { %vm2682_vm9 = vcmp.eq.s32.totalorder %v22942_v37, %v970_v35  ;;  %1217 = vbcast.lane.b32.xlu1 %v22725_v57, 264  ;;  %1213 = vbcast.lane.b32.xlu0 %v22725_v57, 256 }
 0x2a7   : > { %vm16991_vm7 = vmpackc.low %vm2683_vm8, %vm2682_vm9 }
 0x2a8   : > { %21141 = vmatmul.mubr.msk.bf16.gmra.mrb[132].mxu0 %vm16991_vm7, %v22390_v52  ;;  %v982_v54 = vpop.permute.xlu1 %981 }
 0x2a9   : > { %vm2685_vm10 = vcmp.eq.s32.totalorder %v22942_v37, %v982_v54  ;;  %v978_v13 = vpop.permute.xlu0 %977 }
 0x2aa   : > { %vm2684_vm12 = vcmp.eq.s32.totalorder %v22942_v37, %v978_v13  ;;  %1225 = vbcast.lane.b32.xlu1 %v22725_v57, 280  ;;  %v23357_v33 = vpop.f32.mrb[28].mxu0  ;;  %1221 = vbcast.lane.b32.xlu0 %v22725_v57, 272 }
 0x2ab   : > { %vm16993_vm4 = vmpackc.low %vm2685_vm10, %vm2684_vm12  ;;  %v23360_v35 = vpop.f32.mrb[29].mxu0 }
 0x2ac   : > { %21144 = vmatprep.mubr.msk.bf16.mxu0 %vm16993_vm4, %v22390_v52  ;;  %v990_v12 = vpop.permute.xlu1 %989  ;;  %v23364_v11 = vpop.f32.mrb[30].mxu0 }
 0x2ad   : > { %vm2687_vm6 = vcmp.eq.s32.totalorder %v22942_v37, %v990_v12  ;;  %v986_v54 = vpop.permute.xlu0 %985  ;;  %v23367_v13 = vpop.f32.mrb[31].mxu0 }
 0x2ae   : > { %vm2686_vm11 = vcmp.eq.s32.totalorder %v22942_v37, %v986_v54  ;;  %1233 = vbcast.lane.b32.xlu1 %v22725_v57, 296  ;;  %1229 = vbcast.lane.b32.xlu0 %v22725_v57, 288 }
 0x2af   : > { %vm16995_vm13 = vmpackc.low %vm2687_vm6, %vm2686_vm11 }
 0x2b0   : > { %21145 = vmatmul.mubr.msk.bf16.gmra.mrb[136].mxu0 %vm16995_vm13, %v22390_v52  ;;  %v998_v9 = vpop.permute.xlu1 %997 }
 0x2b1   : > { %vm2689_vm14 = vcmp.eq.s32.totalorder %v22942_v37, %v998_v9  ;;  %v994_v8 = vpop.permute.xlu0 %993 }
 0x2b2   : > { %vm2688_vm15 = vcmp.eq.s32.totalorder %v22942_v37, %v994_v8  ;;  %1241 = vbcast.lane.b32.xlu1 %v22725_v57, 312  ;;  %v23375_v12 = vpop.f32.mrb[32].mxu0  ;;  %1237 = vbcast.lane.b32.xlu0 %v22725_v57, 304 }
 0x2b3   : > { %vm16997_vm1 = vmpackc.low %vm2689_vm14, %vm2688_vm15  ;;  %v23378_v54 = vpop.f32.mrb[33].mxu0 }
 0x2b4   : > { %21148 = vmatprep.mubr.msk.bf16.mxu0 %vm16997_vm1, %v22390_v52  ;;  %v1006_v50 = vpop.permute.xlu1 %1005  ;;  %v23382_v7 = vpop.f32.mrb[34].mxu0 }
 0x2b5   : > { %vm2691_vm0 = vcmp.eq.s32.totalorder %v22942_v37, %v1006_v50  ;;  %27068 = vst [vmem:[#allocation39_spill] sm:$0xff] %v23382_v7  ;;  %v1002_v9 = vpop.permute.xlu0 %1001  ;;  %v23385_v8 = vpop.f32.mrb[35].mxu0 }
 0x2b6   : > { %vm2690_vm2 = vcmp.eq.s32.totalorder %v22942_v37, %v1002_v9  ;;  %27069 = vst [vmem:[#allocation40_spill] sm:$0xff] %v23385_v8  ;;  %1249 = vbcast.lane.b32.xlu1 %v22725_v57, 328  ;;  %1245 = vbcast.lane.b32.xlu0 %v22725_v57, 320 }
 0x2b7   : > { %vm16999_vm3 = vmpackc.low %vm2691_vm0, %vm2690_vm2 }
 0x2b8   : > { %21149 = vmatmul.mubr.msk.bf16.gmra.mrb[140].mxu0 %vm16999_vm3, %v22390_v52  ;;  %v1017_v6 = vpop.permute.xlu1 %1016 }
 0x2b9   : > { %vm2693_vm5 = vcmp.eq.s32.totalorder %v22942_v37, %v1017_v6  ;;  %v1013_v5 = vpop.permute.xlu0 %1012 }
 0x2ba   : > { %vm2692_vm8 = vcmp.eq.s32.totalorder %v22942_v37, %v1013_v5  ;;  %1257 = vbcast.lane.b32.xlu1 %v22725_v57, 344  ;;  %v23393_v50 = vpop.f32.mrb[36].mxu0  ;;  %1253 = vbcast.lane.b32.xlu0 %v22725_v57, 336 }
 0x2bb   : > { %vm17001_vm9 = vmpackc.low %vm2693_vm5, %vm2692_vm8  ;;  %27070 = vst [vmem:[#allocation41_spill] sm:$0xff] %v23393_v50  ;;  %v23396_v9 = vpop.f32.mrb[37].mxu0 }
 0x2bc   : > { %27071 = vst [vmem:[#allocation42_spill] sm:$0xff] %v23396_v9  ;;  %21152 = vmatprep.mubr.msk.bf16.mxu0 %vm17001_vm9, %v22390_v52  ;;  %v1025_v8 = vpop.permute.xlu1 %1024  ;;  %v23400_v7 = vpop.f32.mrb[38].mxu0 }
 0x2bd   : > { %vm2695_vm7 = vcmp.eq.s32.totalorder %v22942_v37, %v1025_v8  ;;  %27072 = vst [vmem:[#allocation43_spill] sm:$0xff] %v23400_v7  ;;  %v1021_v6 = vpop.permute.xlu0 %1020  ;;  %v23403_v5 = vpop.f32.mrb[39].mxu0 }
 0x2be   : > { %vm2694_vm10 = vcmp.eq.s32.totalorder %v22942_v37, %v1021_v6  ;;  %27073 = vst [vmem:[#allocation44_spill] sm:$0xff] %v23403_v5  ;;  %1265 = vbcast.lane.b32.xlu1 %v22725_v57, 360  ;;  %1261 = vbcast.lane.b32.xlu0 %v22725_v57, 352 }
 0x2bf   : > { %vm17003_vm12 = vmpackc.low %vm2695_vm7, %vm2694_vm10 }
 0x2c0   : > { %21153 = vmatmul.mubr.msk.bf16.gmra.mrb[144].mxu0 %vm17003_vm12, %v22390_v52  ;;  %v1033_v9 = vpop.permute.xlu1 %1032 }
 0x2c1   : > { %vm2697_vm4 = vcmp.eq.s32.totalorder %v22942_v37, %v1033_v9  ;;  %v1029_v50 = vpop.permute.xlu0 %1028 }
 0x2c2   : > { %vm2696_vm6 = vcmp.eq.s32.totalorder %v22942_v37, %v1029_v50  ;;  %1273 = vbcast.lane.b32.xlu1 %v22725_v57, 376  ;;  %v23411_v8 = vpop.f32.mrb[40].mxu0  ;;  %1269 = vbcast.lane.b32.xlu0 %v22725_v57, 368 }
 0x2c3   : > { %vm17005_vm11 = vmpackc.low %vm2697_vm4, %vm2696_vm6  ;;  %v23414_v6 = vpop.f32.mrb[41].mxu0 }
 0x2c4   : > { %27074 = vst [vmem:[#allocation45_spill] sm:$0xff] %v23414_v6  ;;  %21156 = vmatprep.mubr.msk.bf16.mxu0 %vm17005_vm11, %v22390_v52  ;;  %v1041_v5 = vpop.permute.xlu1 %1040  ;;  %v23418_v7 = vpop.f32.mrb[42].mxu0 }
 0x2c5   : > { %vm2699_vm13 = vcmp.eq.s32.totalorder %v22942_v37, %v1041_v5  ;;  %27075 = vst [vmem:[#allocation46_spill] sm:$0xff] %v23418_v7  ;;  %v1037_v9 = vpop.permute.xlu0 %1036  ;;  %v23421_v50 = vpop.f32.mrb[43].mxu0 }
 0x2c6   : > { %vm2698_vm14 = vcmp.eq.s32.totalorder %v22942_v37, %v1037_v9  ;;  %27076 = vst [vmem:[#allocation47_spill] sm:$0xff] %v23421_v50  ;;  %1284 = vbcast.lane.b32.xlu1 %v22729_v58, 264  ;;  %1280 = vbcast.lane.b32.xlu0 %v22729_v58, 256 }
 0x2c7   : > { %vm17007_vm15 = vmpackc.low %vm2699_vm13, %vm2698_vm14 }
 0x2c8   : > { %21157 = vmatmul.mubr.msk.bf16.gmra.mrb[148].mxu0 %vm17007_vm15, %v22390_v52  ;;  %v1049_v57 = vpop.permute.xlu1 %1048 }
 0x2c9   : > { %vm2701_vm1 = vcmp.eq.s32.totalorder %v22942_v37, %v1049_v57  ;;  %v1045_v6 = vpop.permute.xlu0 %1044 }
 0x2ca   : > { %vm2700_vm0 = vcmp.eq.s32.totalorder %v22942_v37, %v1045_v6  ;;  %1292 = vbcast.lane.b32.xlu1 %v22729_v58, 280  ;;  %v23429_v5 = vpop.f32.mrb[44].mxu0  ;;  %1288 = vbcast.lane.b32.xlu0 %v22729_v58, 272 }
 0x2cb   : > { %vm17009_vm2 = vmpackc.low %vm2701_vm1, %vm2700_vm0  ;;  %27077 = vst [vmem:[#allocation48_spill] sm:$0xff] %v23429_v5  ;;  %v23432_v9 = vpop.f32.mrb[45].mxu0 }
 0x2cc   : > { %27078 = vst [vmem:[#allocation49_spill] sm:$0xff] %v23432_v9  ;;  %21160 = vmatprep.mubr.msk.bf16.mxu0 %vm17009_vm2, %v22390_v52  ;;  %v1057_v50 = vpop.permute.xlu1 %1056  ;;  %v23436_v7 = vpop.f32.mrb[46].mxu0 }
 0x2cd   : > { %vm2703_vm3 = vcmp.eq.s32.totalorder %v22942_v37, %v1057_v50  ;;  %27079 = vst [vmem:[#allocation50_spill] sm:$0xff] %v23436_v7  ;;  %v1053_v57 = vpop.permute.xlu0 %1052  ;;  %v23439_v6 = vpop.f32.mrb[47].mxu0 }
 0x2ce   : > { %vm2702_vm5 = vcmp.eq.s32.totalorder %v22942_v37, %v1053_v57  ;;  %27080 = vst [vmem:[#allocation51_spill] sm:$0xff] %v23439_v6  ;;  %1300 = vbcast.lane.b32.xlu1 %v22729_v58, 296  ;;  %1296 = vbcast.lane.b32.xlu0 %v22729_v58, 288 }
 0x2cf   : > { %vm17011_vm8 = vmpackc.low %vm2703_vm3, %vm2702_vm5 }
 0x2d0   : > { %21161 = vmatmul.mubr.msk.bf16.gmra.mrb[152].mxu0 %vm17011_vm8, %v22390_v52  ;;  %v1065_v9 = vpop.permute.xlu1 %1064 }
 0x2d1   : > { %vm2705_vm9 = vcmp.eq.s32.totalorder %v22942_v37, %v1065_v9  ;;  %v1061_v5 = vpop.permute.xlu0 %1060 }
 0x2d2   : > { %vm2704_vm7 = vcmp.eq.s32.totalorder %v22942_v37, %v1061_v5  ;;  %1308 = vbcast.lane.b32.xlu1 %v22729_v58, 312  ;;  %v23447_v50 = vpop.f32.mrb[48].mxu0  ;;  %1304 = vbcast.lane.b32.xlu0 %v22729_v58, 304 }
 0x2d3   : > { %vm17013_vm10 = vmpackc.low %vm2705_vm9, %vm2704_vm7  ;;  %27081 = vst [vmem:[#allocation52_spill] sm:$0xff] %v23447_v50  ;;  %v23450_v57 = vpop.f32.mrb[49].mxu0 }
 0x2d4   : > { %27082 = vst [vmem:[#allocation53_spill] sm:$0xff] %v23450_v57  ;;  %21164 = vmatprep.mubr.msk.bf16.mxu0 %vm17013_vm10, %v22390_v52  ;;  %v1073_v6 = vpop.permute.xlu1 %1072  ;;  %v23454_v7 = vpop.f32.mrb[50].mxu0 }
 0x2d5   : > { %vm2707_vm12 = vcmp.eq.s32.totalorder %v22942_v37, %v1073_v6  ;;  %27083 = vst [vmem:[#allocation54_spill] sm:$0xff] %v23454_v7  ;;  %v1069_v9 = vpop.permute.xlu0 %1068  ;;  %v23457_v5 = vpop.f32.mrb[51].mxu0 }
 0x2d6   : > { %vm2706_vm4 = vcmp.eq.s32.totalorder %v22942_v37, %v1069_v9  ;;  %27084 = vst [vmem:[#allocation55_spill] sm:$0xff] %v23457_v5  ;;  %1316 = vbcast.lane.b32.xlu1 %v22729_v58, 328  ;;  %1312 = vbcast.lane.b32.xlu0 %v22729_v58, 320 }
 0x2d7   : > { %vm17015_vm6 = vmpackc.low %vm2707_vm12, %vm2706_vm4 }
 0x2d8   : > { %21165 = vmatmul.mubr.msk.bf16.gmra.mrb[156].mxu0 %vm17015_vm6, %v22390_v52  ;;  %v1084_v57 = vpop.permute.xlu1 %1083 }
 0x2d9   : > { %vm2709_vm11 = vcmp.eq.s32.totalorder %v22942_v37, %v1084_v57  ;;  %v1080_v50 = vpop.permute.xlu0 %1079 }
 0x2da   : > { %vm2708_vm13 = vcmp.eq.s32.totalorder %v22942_v37, %v1080_v50  ;;  %1324 = vbcast.lane.b32.xlu1 %v22729_v58, 344  ;;  %v23465_v6 = vpop.f32.mrb[52].mxu0  ;;  %1320 = vbcast.lane.b32.xlu0 %v22729_v58, 336 }
 0x2db   : > { %vm17017_vm14 = vmpackc.low %vm2709_vm11, %vm2708_vm13  ;;  %27085 = vst [vmem:[#allocation56_spill] sm:$0xff] %v23465_v6  ;;  %v23468_v9 = vpop.f32.mrb[53].mxu0 }
 0x2dc   : > { %27086 = vst [vmem:[#allocation57_spill] sm:$0xff] %v23468_v9  ;;  %21168 = vmatprep.mubr.msk.bf16.mxu0 %vm17017_vm14, %v22390_v52  ;;  %v1092_v5 = vpop.permute.xlu1 %1091  ;;  %v23472_v7 = vpop.f32.mrb[54].mxu0 }
 0x2dd   : > { %vm2711_vm15 = vcmp.eq.s32.totalorder %v22942_v37, %v1092_v5  ;;  %27087 = vst [vmem:[#allocation58_spill] sm:$0xff] %v23472_v7  ;;  %v1088_v57 = vpop.permute.xlu0 %1087  ;;  %v23475_v50 = vpop.f32.mrb[55].mxu0 }
 0x2de   : > { %vm2710_vm1 = vcmp.eq.s32.totalorder %v22942_v37, %v1088_v57  ;;  %27088 = vst [vmem:[#allocation59_spill] sm:$0xff] %v23475_v50  ;;  %1332 = vbcast.lane.b32.xlu1 %v22729_v58, 360  ;;  %1328 = vbcast.lane.b32.xlu0 %v22729_v58, 352 }
 0x2df   : > { %vm17019_vm0 = vmpackc.low %vm2711_vm15, %vm2710_vm1 }
 0x2e0   : > { %21169 = vmatmul.mubr.msk.bf16.gmra.mrb[160].mxu0 %vm17019_vm0, %v22390_v52  ;;  %v1100_v9 = vpop.permute.xlu1 %1099 }
 0x2e1   : > { %vm2713_vm2 = vcmp.eq.s32.totalorder %v22942_v37, %v1100_v9  ;;  %v1096_v6 = vpop.permute.xlu0 %1095 }
 0x2e2   : > { %vm2712_vm3 = vcmp.eq.s32.totalorder %v22942_v37, %v1096_v6  ;;  %1340 = vbcast.lane.b32.xlu1 %v22729_v58, 376  ;;  %v23483_v5 = vpop.f32.mrb[56].mxu0  ;;  %1336 = vbcast.lane.b32.xlu0 %v22729_v58, 368 }
 0x2e3   : > { %vm17021_vm5 = vmpackc.low %vm2713_vm2, %vm2712_vm3  ;;  %v23486_v57 = vpop.f32.mrb[57].mxu0 }
 0x2e4   : > { %27089 = vst [vmem:[#allocation60_spill] sm:$0xff] %v23486_v57  ;;  %21172 = vmatprep.mubr.msk.bf16.mxu0 %vm17021_vm5, %v22390_v52  ;;  %v1108_v50 = vpop.permute.xlu1 %1107  ;;  %v23490_v7 = vpop.f32.mrb[58].mxu0 }
 0x2e5   : > { %vm2715_vm8 = vcmp.eq.s32.totalorder %v22942_v37, %v1108_v50  ;;  %27090 = vst [vmem:[#allocation61_spill] sm:$0xff] %v23490_v7  ;;  %v1104_v9 = vpop.permute.xlu0 %1103  ;;  %v23493_v6 = vpop.f32.mrb[59].mxu0 }
 0x2e6   : > { %vm2714_vm9 = vcmp.eq.s32.totalorder %v22942_v37, %v1104_v9  ;;  %27091 = vst [vmem:[#allocation62_spill] sm:$0xff] %v23493_v6  ;;  %1351 = vbcast.lane.b32.xlu1 %v22733_v59, 264  ;;  %1347 = vbcast.lane.b32.xlu0 %v22733_v59, 256 }
 0x2e7   : > { %vm17023_vm7 = vmpackc.low %vm2715_vm8, %vm2714_vm9 }
 0x2e8   : > { %21173 = vmatmul.mubr.msk.bf16.gmra.mrb[164].mxu0 %vm17023_vm7, %v22390_v52  ;;  %v1116_v58 = vpop.permute.xlu1 %1115 }
 0x2e9   : > { %vm2717_vm10 = vcmp.eq.s32.totalorder %v22942_v37, %v1116_v58  ;;  %v1112_v57 = vpop.permute.xlu0 %1111 }
 0x2ea   : > { %vm2716_vm12 = vcmp.eq.s32.totalorder %v22942_v37, %v1112_v57  ;;  %1359 = vbcast.lane.b32.xlu1 %v22733_v59, 280  ;;  %v23501_v50 = vpop.f32.mrb[60].mxu0  ;;  %1355 = vbcast.lane.b32.xlu0 %v22733_v59, 272 }
 0x2eb   : > { %vm17025_vm4 = vmpackc.low %vm2717_vm10, %vm2716_vm12  ;;  %27092 = vst [vmem:[#allocation63_spill] sm:$0xff] %v23501_v50  ;;  %v23504_v9 = vpop.f32.mrb[61].mxu0 }
 0x2ec   : > { %27093 = vst [vmem:[#allocation64_spill] sm:$0xff] %v23504_v9  ;;  %21176 = vmatprep.mubr.msk.bf16.mxu0 %vm17025_vm4, %v22390_v52  ;;  %v1124_v6 = vpop.permute.xlu1 %1123  ;;  %v23508_v7 = vpop.f32.mrb[62].mxu0 }
 0x2ed   : > { %vm2719_vm6 = vcmp.eq.s32.totalorder %v22942_v37, %v1124_v6  ;;  %27094 = vst [vmem:[#allocation65_spill] sm:$0xff] %v23508_v7  ;;  %v1120_v58 = vpop.permute.xlu0 %1119  ;;  %v23511_v57 = vpop.f32.mrb[63].mxu0 }
 0x2ee   : > { %vm2718_vm11 = vcmp.eq.s32.totalorder %v22942_v37, %v1120_v58  ;;  %27095 = vst [vmem:[#allocation66_spill] sm:$0xff] %v23511_v57  ;;  %1367 = vbcast.lane.b32.xlu1 %v22733_v59, 296  ;;  %1363 = vbcast.lane.b32.xlu0 %v22733_v59, 288 }
 0x2ef   : > { %vm17027_vm13 = vmpackc.low %vm2719_vm6, %vm2718_vm11 }
 0x2f0   : > { %21177 = vmatmul.mubr.msk.bf16.gmra.mrb[168].mxu0 %vm17027_vm13, %v22390_v52  ;;  %v1132_v9 = vpop.permute.xlu1 %1131 }
 0x2f1   : > { %vm2721_vm14 = vcmp.eq.s32.totalorder %v22942_v37, %v1132_v9  ;;  %v1128_v50 = vpop.permute.xlu0 %1127 }
 0x2f2   : > { %vm2720_vm15 = vcmp.eq.s32.totalorder %v22942_v37, %v1128_v50  ;;  %1375 = vbcast.lane.b32.xlu1 %v22733_v59, 312  ;;  %v23519_v6 = vpop.f32.mrb[64].mxu0  ;;  %1371 = vbcast.lane.b32.xlu0 %v22733_v59, 304 }
 0x2f3   : > { %vm17029_vm1 = vmpackc.low %vm2721_vm14, %vm2720_vm15  ;;  %27096 = vst [vmem:[#allocation67_spill] sm:$0xff] %v23519_v6  ;;  %v23522_v58 = vpop.f32.mrb[65].mxu0 }
 0x2f4   : > { %27097 = vst [vmem:[#allocation68_spill] sm:$0xff] %v23522_v58  ;;  %21180 = vmatprep.mubr.msk.bf16.mxu0 %vm17029_vm1, %v22390_v52  ;;  %v1140_v57 = vpop.permute.xlu1 %1139  ;;  %v23526_v7 = vpop.f32.mrb[66].mxu0 }
 0x2f5   : > { %vm2723_vm0 = vcmp.eq.s32.totalorder %v22942_v37, %v1140_v57  ;;  %27098 = vst [vmem:[#allocation69_spill] sm:$0xff] %v23526_v7  ;;  %v1136_v9 = vpop.permute.xlu0 %1135  ;;  %v23529_v50 = vpop.f32.mrb[67].mxu0 }
 0x2f6   : > { %vm2722_vm2 = vcmp.eq.s32.totalorder %v22942_v37, %v1136_v9  ;;  %27099 = vst [vmem:[#allocation70_spill] sm:$0xff] %v23529_v50  ;;  %1383 = vbcast.lane.b32.xlu1 %v22733_v59, 328  ;;  %1379 = vbcast.lane.b32.xlu0 %v22733_v59, 320 }
 0x2f7   : > { %vm17031_vm3 = vmpackc.low %vm2723_vm0, %vm2722_vm2 }
 0x2f8   : > { %21181 = vmatmul.mubr.msk.bf16.gmra.mrb[172].mxu0 %vm17031_vm3, %v22390_v52  ;;  %v1151_v58 = vpop.permute.xlu1 %1150 }
 0x2f9   : > { %vm2725_vm5 = vcmp.eq.s32.totalorder %v22942_v37, %v1151_v58  ;;  %v1147_v6 = vpop.permute.xlu0 %1146 }
 0x2fa   : > { %vm2724_vm8 = vcmp.eq.s32.totalorder %v22942_v37, %v1147_v6  ;;  %1391 = vbcast.lane.b32.xlu1 %v22733_v59, 344  ;;  %v23537_v57 = vpop.f32.mrb[68].mxu0  ;;  %1387 = vbcast.lane.b32.xlu0 %v22733_v59, 336 }
 0x2fb   : > { %vm17033_vm9 = vmpackc.low %vm2725_vm5, %vm2724_vm8  ;;  %27100 = vst [vmem:[#allocation71_spill] sm:$0xff] %v23537_v57  ;;  %v23540_v9 = vpop.f32.mrb[69].mxu0 }
 0x2fc   : > { %27101 = vst [vmem:[#allocation72_spill] sm:$0xff] %v23540_v9  ;;  %21184 = vmatprep.mubr.msk.bf16.mxu0 %vm17033_vm9, %v22390_v52  ;;  %v1159_v50 = vpop.permute.xlu1 %1158  ;;  %v23544_v7 = vpop.f32.mrb[70].mxu0 }
 0x2fd   : > { %vm2727_vm7 = vcmp.eq.s32.totalorder %v22942_v37, %v1159_v50  ;;  %27102 = vst [vmem:[#allocation73_spill] sm:$0xff] %v23544_v7  ;;  %v1155_v58 = vpop.permute.xlu0 %1154  ;;  %v23547_v6 = vpop.f32.mrb[71].mxu0 }
 0x2fe   : > { %vm2726_vm10 = vcmp.eq.s32.totalorder %v22942_v37, %v1155_v58  ;;  %27103 = vst [vmem:[#allocation74_spill] sm:$0xff] %v23547_v6  ;;  %1399 = vbcast.lane.b32.xlu1 %v22733_v59, 360  ;;  %1395 = vbcast.lane.b32.xlu0 %v22733_v59, 352 }
 0x2ff   : > { %vm17035_vm12 = vmpackc.low %vm2727_vm7, %vm2726_vm10 }
 0x300   : > { %21185 = vmatmul.mubr.msk.bf16.gmra.mrb[176].mxu0 %vm17035_vm12, %v22390_v52  ;;  %v1167_v9 = vpop.permute.xlu1 %1166 }
 0x301   : > { %vm2729_vm4 = vcmp.eq.s32.totalorder %v22942_v37, %v1167_v9  ;;  %v1163_v57 = vpop.permute.xlu0 %1162 }
 0x302   : > { %vm2728_vm6 = vcmp.eq.s32.totalorder %v22942_v37, %v1163_v57  ;;  %1407 = vbcast.lane.b32.xlu1 %v22733_v59, 376  ;;  %v23555_v50 = vpop.f32.mrb[72].mxu0  ;;  %1403 = vbcast.lane.b32.xlu0 %v22733_v59, 368 }
 0x303   : > { %vm17037_vm11 = vmpackc.low %vm2729_vm4, %vm2728_vm6  ;;  %27104 = vst [vmem:[#allocation75_spill] sm:$0xff] %v23555_v50  ;;  %v23558_v58 = vpop.f32.mrb[73].mxu0 }
 0x304   : > { %27105 = vst [vmem:[#allocation76_spill] sm:$0xff] %v23558_v58  ;;  %21188 = vmatprep.mubr.msk.bf16.mxu0 %vm17037_vm11, %v22390_v52  ;;  %v1175_v6 = vpop.permute.xlu1 %1174  ;;  %v23562_v7 = vpop.f32.mrb[74].mxu0 }
 0x305   : > { %vm2731_vm13 = vcmp.eq.s32.totalorder %v22942_v37, %v1175_v6  ;;  %27106 = vst [vmem:[#allocation77_spill] sm:$0xff] %v23562_v7  ;;  %v1171_v9 = vpop.permute.xlu0 %1170  ;;  %v23565_v57 = vpop.f32.mrb[75].mxu0 }
 0x306   : > { %vm2730_vm14 = vcmp.eq.s32.totalorder %v22942_v37, %v1171_v9  ;;  %27107 = vst [vmem:[#allocation78_spill] sm:$0xff] %v23565_v57  ;;  %1418 = vbcast.lane.b32.xlu1 %v22737_v60, 264  ;;  %1414 = vbcast.lane.b32.xlu0 %v22737_v60, 256 }
 0x307   : > { %vm17039_vm15 = vmpackc.low %vm2731_vm13, %vm2730_vm14 }
 0x308   : > { %21189 = vmatmul.mubr.msk.bf16.gmra.mrb[180].mxu0 %vm17039_vm15, %v22390_v52  ;;  %v1183_v59 = vpop.permute.xlu1 %1182 }
 0x309   : > { %vm2733_vm1 = vcmp.eq.s32.totalorder %v22942_v37, %v1183_v59  ;;  %v1179_v58 = vpop.permute.xlu0 %1178 }
 0x30a   : > { %vm2732_vm0 = vcmp.eq.s32.totalorder %v22942_v37, %v1179_v58  ;;  %1426 = vbcast.lane.b32.xlu1 %v22737_v60, 280  ;;  %v23573_v6 = vpop.f32.mrb[76].mxu0  ;;  %1422 = vbcast.lane.b32.xlu0 %v22737_v60, 272 }
 0x30b   : > { %vm17041_vm2 = vmpackc.low %vm2733_vm1, %vm2732_vm0  ;;  %27108 = vst [vmem:[#allocation79_spill] sm:$0xff] %v23573_v6  ;;  %v23576_v9 = vpop.f32.mrb[77].mxu0 }
 0x30c   : > { %27109 = vst [vmem:[#allocation80_spill] sm:$0xff] %v23576_v9  ;;  %21192 = vmatprep.mubr.msk.bf16.mxu0 %vm17041_vm2, %v22390_v52  ;;  %v1191_v57 = vpop.permute.xlu1 %1190  ;;  %v23580_v7 = vpop.f32.mrb[78].mxu0 }
 0x30d   : > { %vm2735_vm3 = vcmp.eq.s32.totalorder %v22942_v37, %v1191_v57  ;;  %27110 = vst [vmem:[#allocation81_spill] sm:$0xff] %v23580_v7  ;;  %v1187_v59 = vpop.permute.xlu0 %1186  ;;  %v23583_v58 = vpop.f32.mrb[79].mxu0 }
 0x30e   : > { %vm2734_vm5 = vcmp.eq.s32.totalorder %v22942_v37, %v1187_v59  ;;  %27111 = vst [vmem:[#allocation82_spill] sm:$0xff] %v23583_v58  ;;  %1434 = vbcast.lane.b32.xlu1 %v22737_v60, 296  ;;  %1430 = vbcast.lane.b32.xlu0 %v22737_v60, 288 }
 0x30f   : > { %vm17043_vm8 = vmpackc.low %vm2735_vm3, %vm2734_vm5 }
 0x310   : > { %21193 = vmatmul.mubr.msk.bf16.gmra.mrb[184].mxu0 %vm17043_vm8, %v22390_v52  ;;  %v1199_v9 = vpop.permute.xlu1 %1198 }
 0x311   : > { %vm2737_vm9 = vcmp.eq.s32.totalorder %v22942_v37, %v1199_v9  ;;  %v1195_v6 = vpop.permute.xlu0 %1194 }
 0x312   : > { %vm2736_vm7 = vcmp.eq.s32.totalorder %v22942_v37, %v1195_v6  ;;  %1442 = vbcast.lane.b32.xlu1 %v22737_v60, 312  ;;  %v23591_v57 = vpop.f32.mrb[80].mxu0  ;;  %1438 = vbcast.lane.b32.xlu0 %v22737_v60, 304 }
 0x313   : > { %vm17045_vm10 = vmpackc.low %vm2737_vm9, %vm2736_vm7  ;;  %27112 = vst [vmem:[#allocation83_spill] sm:$0xff] %v23591_v57  ;;  %v23594_v59 = vpop.f32.mrb[81].mxu0 }
 0x314   : > { %27113 = vst [vmem:[#allocation84_spill] sm:$0xff] %v23594_v59  ;;  %21196 = vmatprep.mubr.msk.bf16.mxu0 %vm17045_vm10, %v22390_v52  ;;  %v1207_v58 = vpop.permute.xlu1 %1206  ;;  %v23598_v7 = vpop.f32.mrb[82].mxu0 }
 0x315   : > { %vm2739_vm12 = vcmp.eq.s32.totalorder %v22942_v37, %v1207_v58  ;;  %27114 = vst [vmem:[#allocation85_spill] sm:$0xff] %v23598_v7  ;;  %v1203_v9 = vpop.permute.xlu0 %1202  ;;  %v23601_v6 = vpop.f32.mrb[83].mxu0 }
 0x316   : > { %vm2738_vm4 = vcmp.eq.s32.totalorder %v22942_v37, %v1203_v9  ;;  %27115 = vst [vmem:[#allocation86_spill] sm:$0xff] %v23601_v6  ;;  %1450 = vbcast.lane.b32.xlu1 %v22737_v60, 328  ;;  %1446 = vbcast.lane.b32.xlu0 %v22737_v60, 320 }
 0x317   : > { %vm17047_vm6 = vmpackc.low %vm2739_vm12, %vm2738_vm4 }
 0x318   : > { %21197 = vmatmul.mubr.msk.bf16.gmra.mrb[188].mxu0 %vm17047_vm6, %v22390_v52  ;;  %v1218_v59 = vpop.permute.xlu1 %1217 }
 0x319   : > { %vm2741_vm11 = vcmp.eq.s32.totalorder %v22942_v37, %v1218_v59  ;;  %v1214_v57 = vpop.permute.xlu0 %1213 }
 0x31a   : > { %vm2740_vm13 = vcmp.eq.s32.totalorder %v22942_v37, %v1214_v57  ;;  %1458 = vbcast.lane.b32.xlu1 %v22737_v60, 344  ;;  %v23609_v58 = vpop.f32.mrb[84].mxu0  ;;  %1454 = vbcast.lane.b32.xlu0 %v22737_v60, 336 }
 0x31b   : > { %vm17049_vm14 = vmpackc.low %vm2741_vm11, %vm2740_vm13  ;;  %27116 = vst [vmem:[#allocation87_spill] sm:$0xff] %v23609_v58  ;;  %v23612_v9 = vpop.f32.mrb[85].mxu0 }
 0x31c   : > { %27117 = vst [vmem:[#allocation88_spill] sm:$0xff] %v23612_v9  ;;  %21200 = vmatprep.mubr.msk.bf16.mxu0 %vm17049_vm14, %v22390_v52  ;;  %v1226_v6 = vpop.permute.xlu1 %1225  ;;  %v23616_v7 = vpop.f32.mrb[86].mxu0 }
 0x31d   : > { %vm2743_vm15 = vcmp.eq.s32.totalorder %v22942_v37, %v1226_v6  ;;  %27118 = vst [vmem:[#allocation89_spill] sm:$0xff] %v23616_v7  ;;  %v1222_v59 = vpop.permute.xlu0 %1221  ;;  %v23619_v57 = vpop.f32.mrb[87].mxu0 }
 0x31e   : > { %vm2742_vm1 = vcmp.eq.s32.totalorder %v22942_v37, %v1222_v59  ;;  %27119 = vst [vmem:[#allocation90_spill] sm:$0xff] %v23619_v57  ;;  %1466 = vbcast.lane.b32.xlu1 %v22737_v60, 360  ;;  %1462 = vbcast.lane.b32.xlu0 %v22737_v60, 352  ;;  %v23632_v59 = vrot.slane %v22798_v26, %v22652_v16 }
 0x31f   : > { %vm17051_vm0 = vmpackc.low %vm2743_vm15, %vm2742_vm1 }
 0x320   : > { %21201 = vmatmul.mubr.msk.bf16.gmra.mrb[192].mxu0 %vm17051_vm0, %v22390_v52  ;;  %v1234_v9 = vpop.permute.xlu1 %1233 }
 0x321   : > { %vm2745_vm2 = vcmp.eq.s32.totalorder %v22942_v37, %v1234_v9  ;;  %v1230_v58 = vpop.permute.xlu0 %1229 }
 0x322   : > { %vm2744_vm3 = vcmp.eq.s32.totalorder %v22942_v37, %v1230_v58  ;;  %1474 = vbcast.lane.b32.xlu1 %v22737_v60, 376  ;;  %v23627_v6 = vpop.f32.mrb[88].mxu0  ;;  %1470 = vbcast.lane.b32.xlu0 %v22737_v60, 368 }
 0x323   : > { %vm17053_vm5 = vmpackc.low %vm2745_vm2, %vm2744_vm3  ;;  %27120 = vst [vmem:[#allocation91_spill] sm:$0xff] %v23627_v6  ;;  %v23634_v57 = vpop.f32.mrb[89].mxu0 }
 0x324   : > { %27121 = vst [vmem:[#allocation92_spill] sm:$0xff] %v23634_v57  ;;  %21204 = vmatprep.mubr.msk.bf16.mxu0 %vm17053_vm5, %v22390_v52  ;;  %v1242_v7 = vpop.permute.xlu1 %1241  ;;  %v23638_v9 = vpop.f32.mrb[90].mxu0 }
 0x325   : > { %vm2747_vm8 = vcmp.eq.s32.totalorder %v22942_v37, %v1242_v7  ;;  %27122 = vst [vmem:[#allocation93_spill] sm:$0xff] %v23638_v9  ;;  %v1238_v58 = vpop.permute.xlu0 %1237  ;;  %v23641_v50 = vpop.f32.mrb[91].mxu0 }
 0x326   : > { %vm2746_vm9 = vcmp.eq.s32.totalorder %v22942_v37, %v1238_v58  ;;  %27123 = vst [vmem:[#allocation94_spill] sm:$0xff] %v23641_v50  ;;  %1485 = vbcast.lane.b32.xlu1 %v23632_v59, 264  ;;  %1481 = vbcast.lane.b32.xlu0 %v23632_v59, 256 }
 0x327   : > { %vm17055_vm7 = vmpackc.low %vm2747_vm8, %vm2746_vm9 }
 0x328   : > { %21205 = vmatmul.mubr.msk.bf16.gmra.mrb[196].mxu0 %vm17055_vm7, %v22390_v52  ;;  %v1250_v60 = vpop.permute.xlu1 %1249 }
 0x329   : > { %vm2749_vm10 = vcmp.eq.s32.totalorder %v22942_v37, %v1250_v60  ;;  %v1246_v57 = vpop.permute.xlu0 %1245 }
 0x32a   : > { %vm2748_vm12 = vcmp.eq.s32.totalorder %v22942_v37, %v1246_v57  ;;  %1493 = vbcast.lane.b32.xlu1 %v23632_v59, 280  ;;  %v23649_v7 = vpop.f32.mrb[92].mxu0  ;;  %1489 = vbcast.lane.b32.xlu0 %v23632_v59, 272 }
 0x32b   : > { %vm17057_vm4 = vmpackc.low %vm2749_vm10, %vm2748_vm12  ;;  %27124 = vst [vmem:[#allocation95_spill] sm:$0xff] %v23649_v7  ;;  %v23652_v58 = vpop.f32.mrb[93].mxu0 }
 0x32c   : > { %27125 = vst [vmem:[#allocation96_spill] sm:$0xff] %v23652_v58  ;;  %21208 = vmatprep.mubr.msk.bf16.mxu0 %vm17057_vm4, %v22390_v52  ;;  %v1258_v50 = vpop.permute.xlu1 %1257  ;;  %v23656_v9 = vpop.f32.mrb[94].mxu0 }
 0x32d   : > { %vm2751_vm6 = vcmp.eq.s32.totalorder %v22942_v37, %v1258_v50  ;;  %27126 = vst [vmem:[#allocation97_spill] sm:$0xff] %v23656_v9  ;;  %v1254_v60 = vpop.permute.xlu0 %1253  ;;  %v23659_v57 = vpop.f32.mrb[95].mxu0 }
 0x32e   : > { %vm2750_vm11 = vcmp.eq.s32.totalorder %v22942_v37, %v1254_v60  ;;  %27127 = vst [vmem:[#allocation98_spill] sm:$0xff] %v23659_v57  ;;  %1501 = vbcast.lane.b32.xlu1 %v23632_v59, 296  ;;  %1497 = vbcast.lane.b32.xlu0 %v23632_v59, 288 }
 0x32f   : > { %vm17059_vm13 = vmpackc.low %vm2751_vm6, %vm2750_vm11 }
 0x330   : > { %21209 = vmatmul.mubr.msk.bf16.gmra.mrb[200].mxu0 %vm17059_vm13, %v22390_v52  ;;  %v1266_v58 = vpop.permute.xlu1 %1265 }
 0x331   : > { %vm2753_vm14 = vcmp.eq.s32.totalorder %v22942_v37, %v1266_v58  ;;  %v1262_v7 = vpop.permute.xlu0 %1261 }
 0x332   : > { %vm2752_vm15 = vcmp.eq.s32.totalorder %v22942_v37, %v1262_v7  ;;  %1509 = vbcast.lane.b32.xlu1 %v23632_v59, 312  ;;  %v23667_v50 = vpop.f32.mrb[96].mxu0  ;;  %1505 = vbcast.lane.b32.xlu0 %v23632_v59, 304 }
 0x333   : > { %vm17061_vm1 = vmpackc.low %vm2753_vm14, %vm2752_vm15  ;;  %27128 = vst [vmem:[#allocation99_spill] sm:$0xff] %v23667_v50  ;;  %v23670_v60 = vpop.f32.mrb[97].mxu0 }
 0x334   : > { %27129 = vst [vmem:[#allocation100_spill] sm:$0xff] %v23670_v60  ;;  %21212 = vmatprep.mubr.msk.bf16.mxu0 %vm17061_vm1, %v22390_v52  ;;  %v1274_v57 = vpop.permute.xlu1 %1273  ;;  %v23674_v9 = vpop.f32.mrb[98].mxu0 }
 0x335   : > { %vm2755_vm0 = vcmp.eq.s32.totalorder %v22942_v37, %v1274_v57  ;;  %27130 = vst [vmem:[#allocation101_spill] sm:$0xff] %v23674_v9  ;;  %v1270_v58 = vpop.permute.xlu0 %1269  ;;  %v23677_v7 = vpop.f32.mrb[99].mxu0 }
 0x336   : > { %vm2754_vm2 = vcmp.eq.s32.totalorder %v22942_v37, %v1270_v58  ;;  %27131 = vst [vmem:[#allocation102_spill] sm:$0xff] %v23677_v7  ;;  %1517 = vbcast.lane.b32.xlu1 %v23632_v59, 328  ;;  %1513 = vbcast.lane.b32.xlu0 %v23632_v59, 320 }
 0x337   : > { %vm17063_vm3 = vmpackc.low %vm2755_vm0, %vm2754_vm2 }
 0x338   : > { %21213 = vmatmul.mubr.msk.bf16.gmra.mrb[204].mxu0 %vm17063_vm3, %v22390_v52  ;;  %v1285_v60 = vpop.permute.xlu1 %1284 }
 0x339   : > { %vm2757_vm5 = vcmp.eq.s32.totalorder %v22942_v37, %v1285_v60  ;;  %v1281_v50 = vpop.permute.xlu0 %1280 }
 0x33a   : > { %vm2756_vm8 = vcmp.eq.s32.totalorder %v22942_v37, %v1281_v50  ;;  %1525 = vbcast.lane.b32.xlu1 %v23632_v59, 344  ;;  %v23685_v57 = vpop.f32.mrb[100].mxu0  ;;  %1521 = vbcast.lane.b32.xlu0 %v23632_v59, 336 }
 0x33b   : > { %vm17065_vm9 = vmpackc.low %vm2757_vm5, %vm2756_vm8  ;;  %27132 = vst [vmem:[#allocation103_spill] sm:$0xff] %v23685_v57  ;;  %v23688_v58 = vpop.f32.mrb[101].mxu0 }
 0x33c   : > { %27133 = vst [vmem:[#allocation104_spill] sm:$0xff] %v23688_v58  ;;  %21216 = vmatprep.mubr.msk.bf16.mxu0 %vm17065_vm9, %v22390_v52  ;;  %v1293_v7 = vpop.permute.xlu1 %1292  ;;  %v23692_v9 = vpop.f32.mrb[102].mxu0 }
 0x33d   : > { %vm2759_vm7 = vcmp.eq.s32.totalorder %v22942_v37, %v1293_v7  ;;  %27134 = vst [vmem:[#allocation105_spill] sm:$0xff] %v23692_v9  ;;  %v1289_v60 = vpop.permute.xlu0 %1288  ;;  %v23695_v50 = vpop.f32.mrb[103].mxu0 }
 0x33e   : > { %vm2758_vm10 = vcmp.eq.s32.totalorder %v22942_v37, %v1289_v60  ;;  %27135 = vst [vmem:[#allocation106_spill] sm:$0xff] %v23695_v50  ;;  %1533 = vbcast.lane.b32.xlu1 %v23632_v59, 360  ;;  %1529 = vbcast.lane.b32.xlu0 %v23632_v59, 352  ;;  %v23708_v60 = vrot.slane %v22798_v26, %v22654_v17 }
 0x33f   : > { %vm17067_vm12 = vmpackc.low %vm2759_vm7, %vm2758_vm10 }
 0x340   : > { %21217 = vmatmul.mubr.msk.bf16.gmra.mrb[208].mxu0 %vm17067_vm12, %v22390_v52  ;;  %v1301_v58 = vpop.permute.xlu1 %1300 }
 0x341   : > { %vm2761_vm4 = vcmp.eq.s32.totalorder %v22942_v37, %v1301_v58  ;;  %v1297_v57 = vpop.permute.xlu0 %1296 }
 0x342   : > { %vm2760_vm6 = vcmp.eq.s32.totalorder %v22942_v37, %v1297_v57  ;;  %1541 = vbcast.lane.b32.xlu1 %v23632_v59, 376  ;;  %v23703_v7 = vpop.f32.mrb[104].mxu0  ;;  %1537 = vbcast.lane.b32.xlu0 %v23632_v59, 368 }
 0x343   : > { %vm17069_vm11 = vmpackc.low %vm2761_vm4, %vm2760_vm6  ;;  %27136 = vst [vmem:[#allocation107_spill] sm:$0xff] %v23703_v7  ;;  %v23710_v50 = vpop.f32.mrb[105].mxu0 }
 0x344   : > { %27137 = vst [vmem:[#allocation108_spill] sm:$0xff] %v23710_v50  ;;  %21220 = vmatprep.mubr.msk.bf16.mxu0 %vm17069_vm11, %v22390_v52  ;;  %v1309_v9 = vpop.permute.xlu1 %1308  ;;  %v23714_v58 = vpop.f32.mrb[106].mxu0 }
 0x345   : > { %vm2763_vm13 = vcmp.eq.s32.totalorder %v22942_v37, %v1309_v9  ;;  %27138 = vst [vmem:[#allocation109_spill] sm:$0xff] %v23714_v58  ;;  %v1305_v57 = vpop.permute.xlu0 %1304  ;;  %v23717_v6 = vpop.f32.mrb[107].mxu0 }
 0x346   : > { %vm2762_vm14 = vcmp.eq.s32.totalorder %v22942_v37, %v1305_v57  ;;  %27139 = vst [vmem:[#allocation110_spill] sm:$0xff] %v23717_v6  ;;  %1552 = vbcast.lane.b32.xlu1 %v23708_v60, 264  ;;  %1548 = vbcast.lane.b32.xlu0 %v23708_v60, 256 }
 0x347   : > { %vm17071_vm15 = vmpackc.low %vm2763_vm13, %vm2762_vm14 }
 0x348   : > { %21221 = vmatmul.mubr.msk.bf16.gmra.mrb[212].mxu0 %vm17071_vm15, %v22390_v52  ;;  %v1317_v59 = vpop.permute.xlu1 %1316 }
 0x349   : > { %vm2765_vm1 = vcmp.eq.s32.totalorder %v22942_v37, %v1317_v59  ;;  %v1313_v50 = vpop.permute.xlu0 %1312 }
 0x34a   : > { %vm2764_vm0 = vcmp.eq.s32.totalorder %v22942_v37, %v1313_v50  ;;  %1560 = vbcast.lane.b32.xlu1 %v23708_v60, 280  ;;  %1556 = vbcast.lane.b32.xlu0 %v23708_v60, 272 }
 0x34b   : > { %vm17073_vm2 = vmpackc.low %vm2765_vm1, %vm2764_vm0  ;;  %v23725_v9 = vpop.f32.mrb[108].mxu0 }
 0x34c   : > { %27140 = vst [vmem:[#allocation111_spill] sm:$0xff] %v23725_v9  ;;  %v23728_v57 = vpop.f32.mrb[109].mxu0  ;;  %21224 = vmatprep.mubr.msk.bf16.mxu0 %vm17073_vm2, %v22390_v52  ;;  %v1325_v6 = vpop.permute.xlu1 %1324 }
 0x34d   : > { %27141 = vst [vmem:[#allocation112_spill] sm:$0xff] %v23728_v57  ;;  %vm2767_vm3 = vcmp.eq.s32.totalorder %v22942_v37, %v1325_v6  ;;  %v23732_v58 = vpop.f32.mrb[110].mxu0  ;;  %v1321_v59 = vpop.permute.xlu0 %1320 }
 0x34e   : > { %27142 = vst [vmem:[#allocation113_spill] sm:$0xff] %v23732_v58  ;;  %vm2766_vm5 = vcmp.eq.s32.totalorder %v22942_v37, %v1321_v59  ;;  %v23735_v50 = vpop.f32.mrb[111].mxu0  ;;  %1568 = vbcast.lane.b32.xlu1 %v23708_v60, 296  ;;  %1564 = vbcast.lane.b32.xlu0 %v23708_v60, 288 }
 0x34f   : > { %27143 = vst [vmem:[#allocation114_spill] sm:$0xff] %v23735_v50  ;;  %vm17075_vm8 = vmpackc.low %vm2767_vm3, %vm2766_vm5 }
 0x350   : > { %21225 = vmatmul.mubr.msk.bf16.gmra.mrb[216].mxu0 %vm17075_vm8, %v22390_v52  ;;  %v1333_v57 = vpop.permute.xlu1 %1332 }
 0x351   : > { %vm2769_vm9 = vcmp.eq.s32.totalorder %v22942_v37, %v1333_v57  ;;  %v1329_v9 = vpop.permute.xlu0 %1328 }
 0x352   : > { %vm2768_vm7 = vcmp.eq.s32.totalorder %v22942_v37, %v1329_v9  ;;  %1576 = vbcast.lane.b32.xlu1 %v23708_v60, 312  ;;  %1572 = vbcast.lane.b32.xlu0 %v23708_v60, 304 }
 0x353   : > { %vm17077_vm10 = vmpackc.low %vm2769_vm9, %vm2768_vm7  ;;  %v23743_v6 = vpop.f32.mrb[112].mxu0 }
 0x354   : > { %27144 = vst [vmem:[#allocation115_spill] sm:$0xff] %v23743_v6  ;;  %v23746_v59 = vpop.f32.mrb[113].mxu0  ;;  %21228 = vmatprep.mubr.msk.bf16.mxu0 %vm17077_vm10, %v22390_v52  ;;  %v1341_v50 = vpop.permute.xlu1 %1340 }
 0x355   : > { %27145 = vst [vmem:[#allocation116_spill] sm:$0xff] %v23746_v59  ;;  %vm2771_vm12 = vcmp.eq.s32.totalorder %v22942_v37, %v1341_v50  ;;  %v23750_v58 = vpop.f32.mrb[114].mxu0  ;;  %v1337_v57 = vpop.permute.xlu0 %1336 }
 0x356   : > { %27146 = vst [vmem:[#allocation117_spill] sm:$0xff] %v23750_v58  ;;  %vm2770_vm4 = vcmp.eq.s32.totalorder %v22942_v37, %v1337_v57  ;;  %v23753_v9 = vpop.f32.mrb[115].mxu0  ;;  %1584 = vbcast.lane.b32.xlu1 %v23708_v60, 328  ;;  %1580 = vbcast.lane.b32.xlu0 %v23708_v60, 320 }
 0x357   : > { %27147 = vst [vmem:[#allocation118_spill] sm:$0xff] %v23753_v9  ;;  %vm17079_vm6 = vmpackc.low %vm2771_vm12, %vm2770_vm4 }
 0x358   : > { %21229 = vmatmul.mubr.msk.bf16.gmra.mrb[220].mxu0 %vm17079_vm6, %v22390_v52  ;;  %v1352_v59 = vpop.permute.xlu1 %1351 }
 0x359   : > { %vm2773_vm11 = vcmp.eq.s32.totalorder %v22942_v37, %v1352_v59  ;;  %v1348_v6 = vpop.permute.xlu0 %1347 }
 0x35a   : > { %vm2772_vm13 = vcmp.eq.s32.totalorder %v22942_v37, %v1348_v6  ;;  %1592 = vbcast.lane.b32.xlu1 %v23708_v60, 344  ;;  %1588 = vbcast.lane.b32.xlu0 %v23708_v60, 336 }
 0x35b   : > { %vm17081_vm14 = vmpackc.low %vm2773_vm11, %vm2772_vm13  ;;  %v23761_v50 = vpop.f32.mrb[116].mxu0 }
 0x35c   : > { %27148 = vst [vmem:[#allocation119_spill] sm:$0xff] %v23761_v50  ;;  %v23764_v57 = vpop.f32.mrb[117].mxu0  ;;  %21232 = vmatprep.mubr.msk.bf16.mxu0 %vm17081_vm14, %v22390_v52  ;;  %v1360_v9 = vpop.permute.xlu1 %1359 }
 0x35d   : > { %27149 = vst [vmem:[#allocation120_spill] sm:$0xff] %v23764_v57  ;;  %vm2775_vm15 = vcmp.eq.s32.totalorder %v22942_v37, %v1360_v9  ;;  %v23768_v58 = vpop.f32.mrb[118].mxu0  ;;  %v1356_v59 = vpop.permute.xlu0 %1355 }
 0x35e   : > { %27150 = vst [vmem:[#allocation121_spill] sm:$0xff] %v23768_v58  ;;  %vm2774_vm1 = vcmp.eq.s32.totalorder %v22942_v37, %v1356_v59  ;;  %v23771_v6 = vpop.f32.mrb[119].mxu0  ;;  %1600 = vbcast.lane.b32.xlu1 %v23708_v60, 360  ;;  %1596 = vbcast.lane.b32.xlu0 %v23708_v60, 352  ;;  %v23784_v59 = vrot.slane %v22798_v26, %v22666_v29 }
 0x35f   : > { %27151 = vst [vmem:[#allocation122_spill] sm:$0xff] %v23771_v6  ;;  %vm17083_vm0 = vmpackc.low %vm2775_vm15, %vm2774_vm1 }
 0x360   : > { %21233 = vmatmul.mubr.msk.bf16.gmra.mrb[224].mxu0 %vm17083_vm0, %v22390_v52  ;;  %v1368_v57 = vpop.permute.xlu1 %1367 }
 0x361   : > { %vm2777_vm2 = vcmp.eq.s32.totalorder %v22942_v37, %v1368_v57  ;;  %v1364_v50 = vpop.permute.xlu0 %1363 }
 0x362   : > { %vm2776_vm3 = vcmp.eq.s32.totalorder %v22942_v37, %v1364_v50  ;;  %1608 = vbcast.lane.b32.xlu1 %v23708_v60, 376  ;;  %1604 = vbcast.lane.b32.xlu0 %v23708_v60, 368 }
 0x363   : > { %vm17085_vm5 = vmpackc.low %vm2777_vm2, %vm2776_vm3  ;;  %v23779_v9 = vpop.f32.mrb[120].mxu0 }
 0x364   : > { %v23786_v6 = vpop.f32.mrb[121].mxu0  ;;  %21236 = vmatprep.mubr.msk.bf16.mxu0 %vm17085_vm5, %v22390_v52  ;;  %v1376_v58 = vpop.permute.xlu1 %1375 }
 0x365   : > { %vm2779_vm8 = vcmp.eq.s32.totalorder %v22942_v37, %v1376_v58  ;;  %v23790_v57 = vpop.f32.mrb[122].mxu0  ;;  %v1372_v50 = vpop.permute.xlu0 %1371 }
 0x366   : > { %27152 = vst [vmem:[#allocation123_spill] sm:$0xff] %v23790_v57  ;;  %vm2778_vm9 = vcmp.eq.s32.totalorder %v22942_v37, %v1372_v50  ;;  %v23793_v7 = vpop.f32.mrb[123].mxu0  ;;  %1619 = vbcast.lane.b32.xlu1 %v23784_v59, 264  ;;  %1615 = vbcast.lane.b32.xlu0 %v23784_v59, 256 }
 0x367   : > { %27153 = vst [vmem:[#allocation124_spill] sm:$0xff] %v23793_v7  ;;  %vm17087_vm7 = vmpackc.low %vm2779_vm8, %vm2778_vm9 }
 0x368   : > { %21237 = vmatmul.mubr.msk.bf16.gmra.mrb[228].mxu0 %vm17087_vm7, %v22390_v52  ;;  %v1384_v26 = vpop.permute.xlu1 %1383 }
 0x369   : > { %vm2781_vm10 = vcmp.eq.s32.totalorder %v22942_v37, %v1384_v26  ;;  %v1380_v60 = vpop.permute.xlu0 %1379 }
 0x36a   : > { %vm2780_vm12 = vcmp.eq.s32.totalorder %v22942_v37, %v1380_v60  ;;  %1627 = vbcast.lane.b32.xlu1 %v23784_v59, 280  ;;  %1623 = vbcast.lane.b32.xlu0 %v23784_v59, 272 }
 0x36b   : > { %vm17089_vm4 = vmpackc.low %vm2781_vm10, %vm2780_vm12  ;;  %v23801_v58 = vpop.f32.mrb[124].mxu0 }
 0x36c   : > { %27154 = vst [vmem:[#allocation125_spill] sm:$0xff] %v23801_v58  ;;  %v23804_v50 = vpop.f32.mrb[125].mxu0  ;;  %21240 = vmatprep.mubr.msk.bf16.mxu0 %vm17089_vm4, %v22390_v52  ;;  %v1392_v7 = vpop.permute.xlu1 %1391 }
 0x36d   : > { %27155 = vst [vmem:[#allocation126_spill] sm:$0xff] %v23804_v50  ;;  %vm2783_vm6 = vcmp.eq.s32.totalorder %v22942_v37, %v1392_v7  ;;  %v23808_v57 = vpop.f32.mrb[126].mxu0  ;;  %v1388_v26 = vpop.permute.xlu0 %1387 }
 0x36e   : > { %27156 = vst [vmem:[#allocation127_spill] sm:$0xff] %v23808_v57  ;;  %vm2782_vm11 = vcmp.eq.s32.totalorder %v22942_v37, %v1388_v26  ;;  %v23811_v60 = vpop.f32.mrb[127].mxu0  ;;  %1635 = vbcast.lane.b32.xlu1 %v23784_v59, 296  ;;  %1631 = vbcast.lane.b32.xlu0 %v23784_v59, 288 }
 0x36f   : > { %27157 = vst [vmem:[#allocation128_spill] sm:$0xff] %v23811_v60  ;;  %vm17091_vm13 = vmpackc.low %vm2783_vm6, %vm2782_vm11 }
 0x370   : > { %21241 = vmatmul.mubr.msk.bf16.gmra.mrb[232].mxu0 %vm17091_vm13, %v22390_v52  ;;  %v1400_v50 = vpop.permute.xlu1 %1399 }
 0x371   : > { %vm2785_vm14 = vcmp.eq.s32.totalorder %v22942_v37, %v1400_v50  ;;  %v1396_v58 = vpop.permute.xlu0 %1395 }
 0x372   : > { %vm2784_vm15 = vcmp.eq.s32.totalorder %v22942_v37, %v1396_v58  ;;  %1643 = vbcast.lane.b32.xlu1 %v23784_v59, 312  ;;  %1639 = vbcast.lane.b32.xlu0 %v23784_v59, 304 }
 0x373   : > { %vm17093_vm1 = vmpackc.low %vm2785_vm14, %vm2784_vm15  ;;  %v23819_v7 = vpop.f32.mrb[128].mxu0 }
 0x374   : > { %27158 = vst [vmem:[#allocation129_spill] sm:$0xff] %v23819_v7  ;;  %v23822_v26 = vpop.f32.mrb[129].mxu0  ;;  %21244 = vmatprep.mubr.msk.bf16.mxu0 %vm17093_vm1, %v22390_v52  ;;  %v1408_v60 = vpop.permute.xlu1 %1407 }
 0x375   : > { %27159 = vst [vmem:[#allocation130_spill] sm:$0xff] %v23822_v26  ;;  %vm2787_vm0 = vcmp.eq.s32.totalorder %v22942_v37, %v1408_v60  ;;  %v23826_v57 = vpop.f32.mrb[130].mxu0  ;;  %v1404_v50 = vpop.permute.xlu0 %1403 }
 0x376   : > { %27160 = vst [vmem:[#allocation131_spill] sm:$0xff] %v23826_v57  ;;  %vm2786_vm2 = vcmp.eq.s32.totalorder %v22942_v37, %v1404_v50  ;;  %v23829_v58 = vpop.f32.mrb[131].mxu0  ;;  %1651 = vbcast.lane.b32.xlu1 %v23784_v59, 328  ;;  %1647 = vbcast.lane.b32.xlu0 %v23784_v59, 320 }
 0x377   : > { %27161 = vst [vmem:[#allocation132_spill] sm:$0xff] %v23829_v58  ;;  %vm17095_vm3 = vmpackc.low %vm2787_vm0, %vm2786_vm2 }
 0x378   : > { %21245 = vmatmul.mubr.msk.bf16.gmra.mrb[236].mxu0 %vm17095_vm3, %v22390_v52  ;;  %v1419_v26 = vpop.permute.xlu1 %1418 }
 0x379   : > { %vm2789_vm5 = vcmp.eq.s32.totalorder %v22942_v37, %v1419_v26  ;;  %v1415_v7 = vpop.permute.xlu0 %1414 }
 0x37a   : > { %vm2788_vm8 = vcmp.eq.s32.totalorder %v22942_v37, %v1415_v7  ;;  %1659 = vbcast.lane.b32.xlu1 %v23784_v59, 344  ;;  %1655 = vbcast.lane.b32.xlu0 %v23784_v59, 336 }
 0x37b   : > { %vm17097_vm9 = vmpackc.low %vm2789_vm5, %vm2788_vm8  ;;  %v23837_v60 = vpop.f32.mrb[132].mxu0 }
 0x37c   : > { %27162 = vst [vmem:[#allocation133_spill] sm:$0xff] %v23837_v60  ;;  %v23840_v50 = vpop.f32.mrb[133].mxu0  ;;  %21248 = vmatprep.mubr.msk.bf16.mxu0 %vm17097_vm9, %v22390_v52  ;;  %v1427_v58 = vpop.permute.xlu1 %1426 }
 0x37d   : > { %27163 = vst [vmem:[#allocation134_spill] sm:$0xff] %v23840_v50  ;;  %vm2791_vm7 = vcmp.eq.s32.totalorder %v22942_v37, %v1427_v58  ;;  %v23844_v57 = vpop.f32.mrb[134].mxu0  ;;  %v1423_v26 = vpop.permute.xlu0 %1422 }
 0x37e   : > { %27164 = vst [vmem:[#allocation135_spill] sm:$0xff] %v23844_v57  ;;  %vm2790_vm10 = vcmp.eq.s32.totalorder %v22942_v37, %v1423_v26  ;;  %v23847_v7 = vpop.f32.mrb[135].mxu0  ;;  %1667 = vbcast.lane.b32.xlu1 %v23784_v59, 360  ;;  %1663 = vbcast.lane.b32.xlu0 %v23784_v59, 352 }
 0x37f   : > { %27165 = vst [vmem:[#allocation136_spill] sm:$0xff] %v23847_v7  ;;  %vm17099_vm12 = vmpackc.low %vm2791_vm7, %vm2790_vm10 }
 0x380   : > { %21249 = vmatmul.mubr.msk.bf16.gmra.mrb[240].mxu0 %vm17099_vm12, %v22390_v52  ;;  %v1435_v50 = vpop.permute.xlu1 %1434 }
 0x381   : > { %vm2793_vm4 = vcmp.eq.s32.totalorder %v22942_v37, %v1435_v50  ;;  %v1431_v60 = vpop.permute.xlu0 %1430 }
 0x382   : > { %vm2792_vm6 = vcmp.eq.s32.totalorder %v22942_v37, %v1431_v60  ;;  %1675 = vbcast.lane.b32.xlu1 %v23784_v59, 376  ;;  %1671 = vbcast.lane.b32.xlu0 %v23784_v59, 368 }
 0x383   : > { %vm17101_vm11 = vmpackc.low %vm2793_vm4, %vm2792_vm6  ;;  %v23855_v58 = vpop.f32.mrb[136].mxu0 }
 0x384   : > { %v23858_v26 = vpop.f32.mrb[137].mxu0  ;;  %21252 = vmatprep.mubr.msk.bf16.mxu0 %vm17101_vm11, %v22390_v52  ;;  %v1443_v7 = vpop.permute.xlu1 %1442 }
 0x385   : > { %27166 = vst [vmem:[#allocation137_spill] sm:$0xff] %v23858_v26  ;;  %vm2795_vm13 = vcmp.eq.s32.totalorder %v22942_v37, %v1443_v7  ;;  %v23862_v57 = vpop.f32.mrb[138].mxu0  ;;  %v1439_v50 = vpop.permute.xlu0 %1438 }
 0x386   : > { %27167 = vst [vmem:[#allocation138_spill] sm:$0xff] %v23862_v57  ;;  %vm2794_vm14 = vcmp.eq.s32.totalorder %v22942_v37, %v1439_v50  ;;  %v23865_v60 = vpop.f32.mrb[139].mxu0  ;;  %1686 = vbcast.lane.b32.xlu1 %v22802_v27, 264  ;;  %1682 = vbcast.lane.b32.xlu0 %v22802_v27, 256 }
 0x387   : > { %27168 = vst [vmem:[#allocation139_spill] sm:$0xff] %v23865_v60  ;;  %vm17103_vm15 = vmpackc.low %vm2795_vm13, %vm2794_vm14 }
 0x388   : > { %21253 = vmatmul.mubr.msk.bf16.gmra.mrb[244].mxu0 %vm17103_vm15, %v22390_v52  ;;  %v1451_v59 = vpop.permute.xlu1 %1450 }
 0x389   : > { %vm2797_vm1 = vcmp.eq.s32.totalorder %v22942_v37, %v1451_v59  ;;  %v1447_v26 = vpop.permute.xlu0 %1446 }
 0x38a   : > { %vm2796_vm0 = vcmp.eq.s32.totalorder %v22942_v37, %v1447_v26  ;;  %1694 = vbcast.lane.b32.xlu1 %v22802_v27, 280  ;;  %1690 = vbcast.lane.b32.xlu0 %v22802_v27, 272 }
 0x38b   : > { %vm17105_vm2 = vmpackc.low %vm2797_vm1, %vm2796_vm0  ;;  %v23873_v7 = vpop.f32.mrb[140].mxu0 }
 0x38c   : > { %27169 = vst [vmem:[#allocation140_spill] sm:$0xff] %v23873_v7  ;;  %v23876_v50 = vpop.f32.mrb[141].mxu0  ;;  %21256 = vmatprep.mubr.msk.bf16.mxu0 %vm17105_vm2, %v22390_v52  ;;  %v1459_v60 = vpop.permute.xlu1 %1458 }
 0x38d   : > { %27170 = vst [vmem:[#allocation141_spill] sm:$0xff] %v23876_v50  ;;  %vm2799_vm3 = vcmp.eq.s32.totalorder %v22942_v37, %v1459_v60  ;;  %v23880_v57 = vpop.f32.mrb[142].mxu0  ;;  %v1455_v59 = vpop.permute.xlu0 %1454 }
 0x38e   : > { %27171 = vst [vmem:[#allocation142_spill] sm:$0xff] %v23880_v57  ;;  %vm2798_vm5 = vcmp.eq.s32.totalorder %v22942_v37, %v1455_v59  ;;  %v23883_v26 = vpop.f32.mrb[143].mxu0  ;;  %1702 = vbcast.lane.b32.xlu1 %v22802_v27, 296  ;;  %1698 = vbcast.lane.b32.xlu0 %v22802_v27, 288 }
 0x38f   : > { %27172 = vst [vmem:[#allocation143_spill] sm:$0xff] %v23883_v26  ;;  %vm17107_vm8 = vmpackc.low %vm2799_vm3, %vm2798_vm5 }
 0x390   : > { %21257 = vmatmul.mubr.msk.bf16.gmra.mrb[248].mxu0 %vm17107_vm8, %v22390_v52  ;;  %v1467_v50 = vpop.permute.xlu1 %1466 }
 0x391   : > { %vm2801_vm9 = vcmp.eq.s32.totalorder %v22942_v37, %v1467_v50  ;;  %v1463_v7 = vpop.permute.xlu0 %1462 }
 0x392   : > { %vm2800_vm7 = vcmp.eq.s32.totalorder %v22942_v37, %v1463_v7  ;;  %1710 = vbcast.lane.b32.xlu1 %v22802_v27, 312  ;;  %1706 = vbcast.lane.b32.xlu0 %v22802_v27, 304 }
 0x393   : > { %vm17109_vm10 = vmpackc.low %vm2801_vm9, %vm2800_vm7  ;;  %v23891_v60 = vpop.f32.mrb[144].mxu0 }
 0x394   : > { %27173 = vst [vmem:[#allocation144_spill] sm:$0xff] %v23891_v60  ;;  %v23894_v59 = vpop.f32.mrb[145].mxu0  ;;  %21260 = vmatprep.mubr.msk.bf16.mxu0 %vm17109_vm10, %v22390_v52  ;;  %v1475_v26 = vpop.permute.xlu1 %1474 }
 0x395   : > { %27174 = vst [vmem:[#allocation145_spill] sm:$0xff] %v23894_v59  ;;  %vm2803_vm12 = vcmp.eq.s32.totalorder %v22942_v37, %v1475_v26  ;;  %v23898_v57 = vpop.f32.mrb[146].mxu0  ;;  %v1471_v50 = vpop.permute.xlu0 %1470 }
 0x396   : > { %27175 = vst [vmem:[#allocation146_spill] sm:$0xff] %v23898_v57  ;;  %vm2802_vm4 = vcmp.eq.s32.totalorder %v22942_v37, %v1471_v50  ;;  %v23901_v7 = vpop.f32.mrb[147].mxu0  ;;  %1718 = vbcast.lane.b32.xlu1 %v22802_v27, 328  ;;  %1714 = vbcast.lane.b32.xlu0 %v22802_v27, 320 }
 0x397   : > { %27176 = vst [vmem:[#allocation147_spill] sm:$0xff] %v23901_v7  ;;  %vm17111_vm6 = vmpackc.low %vm2803_vm12, %vm2802_vm4 }
 0x398   : > { %21261 = vmatmul.mubr.msk.bf16.gmra.mrb[252].mxu0 %vm17111_vm6, %v22390_v52  ;;  %v1486_v59 = vpop.permute.xlu1 %1485 }
 0x399   : > { %vm2805_vm11 = vcmp.eq.s32.totalorder %v22942_v37, %v1486_v59  ;;  %v1482_v60 = vpop.permute.xlu0 %1481 }
 0x39a   : > { %vm2804_vm13 = vcmp.eq.s32.totalorder %v22942_v37, %v1482_v60  ;;  %1726 = vbcast.lane.b32.xlu1 %v22802_v27, 344  ;;  %1722 = vbcast.lane.b32.xlu0 %v22802_v27, 336 }
 0x39b   : > { %vm17113_vm14 = vmpackc.low %vm2805_vm11, %vm2804_vm13  ;;  %v23909_v26 = vpop.f32.mrb[148].mxu0 }
 0x39c   : > { %27177 = vst [vmem:[#allocation148_spill] sm:$0xff] %v23909_v26  ;;  %v23912_v50 = vpop.f32.mrb[149].mxu0  ;;  %21264 = vmatprep.mubr.msk.bf16.mxu0 %vm17113_vm14, %v22390_v52  ;;  %v1494_v7 = vpop.permute.xlu1 %1493 }
 0x39d   : > { %27178 = vst [vmem:[#allocation149_spill] sm:$0xff] %v23912_v50  ;;  %vm2807_vm15 = vcmp.eq.s32.totalorder %v22942_v37, %v1494_v7  ;;  %v23916_v57 = vpop.f32.mrb[150].mxu0  ;;  %v1490_v59 = vpop.permute.xlu0 %1489 }
 0x39e   : > { %27179 = vst [vmem:[#allocation150_spill] sm:$0xff] %v23916_v57  ;;  %vm2806_vm1 = vcmp.eq.s32.totalorder %v22942_v37, %v1490_v59  ;;  %v23919_v60 = vpop.f32.mrb[151].mxu0  ;;  %1734 = vbcast.lane.b32.xlu1 %v22802_v27, 360  ;;  %1730 = vbcast.lane.b32.xlu0 %v22802_v27, 352 }
 0x39f   : > { %27180 = vst [vmem:[#allocation151_spill] sm:$0xff] %v23919_v60  ;;  %vm17115_vm0 = vmpackc.low %vm2807_vm15, %vm2806_vm1 }
 0x3a0   : > { %21265 = vmatmul.mubr.msk.bf16.gmra.mrb[0].mxu0 %vm17115_vm0, %v22390_v52  ;;  %v1502_v50 = vpop.permute.xlu1 %1501 }
 0x3a1   : > { %vm2809_vm2 = vcmp.eq.s32.totalorder %v22942_v37, %v1502_v50  ;;  %v1498_v26 = vpop.permute.xlu0 %1497 }
 0x3a2   : > { %vm2808_vm3 = vcmp.eq.s32.totalorder %v22942_v37, %v1498_v26  ;;  %1742 = vbcast.lane.b32.xlu1 %v22802_v27, 376  ;;  %1738 = vbcast.lane.b32.xlu0 %v22802_v27, 368 }
 0x3a3   : > { %vm17117_vm5 = vmpackc.low %vm2809_vm2, %vm2808_vm3  ;;  %v23927_v7 = vpop.f32.mrb[152].mxu0 }
 0x3a4   : > { %v23930_v59 = vpop.f32.mrb[153].mxu0  ;;  %21268 = vmatprep.mubr.msk.bf16.mxu0 %vm17117_vm5, %v22390_v52  ;;  %v1510_v60 = vpop.permute.xlu1 %1509 }
 0x3a5   : > { %27181 = vst [vmem:[#allocation152_spill] sm:$0xff] %v23930_v59  ;;  %vm2811_vm8 = vcmp.eq.s32.totalorder %v22942_v37, %v1510_v60  ;;  %v23934_v57 = vpop.f32.mrb[154].mxu0  ;;  %v1506_v50 = vpop.permute.xlu0 %1505 }
 0x3a6   : > { %27182 = vst [vmem:[#allocation153_spill] sm:$0xff] %v23934_v57  ;;  %vm2810_vm9 = vcmp.eq.s32.totalorder %v22942_v37, %v1506_v50  ;;  %v23937_v26 = vpop.f32.mrb[155].mxu0  ;;  %1753 = vbcast.lane.b32.xlu1 %v22806_v28, 264  ;;  %1749 = vbcast.lane.b32.xlu0 %v22806_v28, 256 }
 0x3a7   : > { %27183 = vst [vmem:[#allocation154_spill] sm:$0xff] %v23937_v26  ;;  %vm17119_vm7 = vmpackc.low %vm2811_vm8, %vm2810_vm9 }
 0x3a8   : > { %21269 = vmatmul.mubr.msk.bf16.gmra.mrb[4].mxu0 %vm17119_vm7, %v22390_v52  ;;  %v1518_v27 = vpop.permute.xlu1 %1517 }
 0x3a9   : > { %vm2813_vm10 = vcmp.eq.s32.totalorder %v22942_v37, %v1518_v27  ;;  %v1514_v59 = vpop.permute.xlu0 %1513 }
 0x3aa   : > { %vm2812_vm12 = vcmp.eq.s32.totalorder %v22942_v37, %v1514_v59  ;;  %1761 = vbcast.lane.b32.xlu1 %v22806_v28, 280  ;;  %1757 = vbcast.lane.b32.xlu0 %v22806_v28, 272 }
 0x3ab   : > { %vm17121_vm4 = vmpackc.low %vm2813_vm10, %vm2812_vm12  ;;  %v23945_v60 = vpop.f32.mrb[156].mxu0 }
 0x3ac   : > { %27184 = vst [vmem:[#allocation155_spill] sm:$0xff] %v23945_v60  ;;  %v23948_v50 = vpop.f32.mrb[157].mxu0  ;;  %21272 = vmatprep.mubr.msk.bf16.mxu0 %vm17121_vm4, %v22390_v52  ;;  %v1526_v26 = vpop.permute.xlu1 %1525 }
 0x3ad   : > { %27185 = vst [vmem:[#allocation156_spill] sm:$0xff] %v23948_v50  ;;  %vm2815_vm6 = vcmp.eq.s32.totalorder %v22942_v37, %v1526_v26  ;;  %v23952_v57 = vpop.f32.mrb[158].mxu0  ;;  %v1522_v27 = vpop.permute.xlu0 %1521 }
 0x3ae   : > { %27186 = vst [vmem:[#allocation157_spill] sm:$0xff] %v23952_v57  ;;  %vm2814_vm11 = vcmp.eq.s32.totalorder %v22942_v37, %v1522_v27  ;;  %v23955_v59 = vpop.f32.mrb[159].mxu0  ;;  %1769 = vbcast.lane.b32.xlu1 %v22806_v28, 296  ;;  %1765 = vbcast.lane.b32.xlu0 %v22806_v28, 288 }
 0x3af   : > { %27187 = vst [vmem:[#allocation158_spill] sm:$0xff] %v23955_v59  ;;  %vm17123_vm13 = vmpackc.low %vm2815_vm6, %vm2814_vm11 }
 0x3b0   : > { %21273 = vmatmul.mubr.msk.bf16.gmra.mrb[8].mxu0 %vm17123_vm13, %v22390_v52  ;;  %v1534_v50 = vpop.permute.xlu1 %1533 }
 0x3b1   : > { %vm2817_vm14 = vcmp.eq.s32.totalorder %v22942_v37, %v1534_v50  ;;  %v1530_v60 = vpop.permute.xlu0 %1529 }
 0x3b2   : > { %vm2816_vm15 = vcmp.eq.s32.totalorder %v22942_v37, %v1530_v60  ;;  %1777 = vbcast.lane.b32.xlu1 %v22806_v28, 312  ;;  %1773 = vbcast.lane.b32.xlu0 %v22806_v28, 304 }
 0x3b3   : > { %vm17125_vm1 = vmpackc.low %vm2817_vm14, %vm2816_vm15  ;;  %v23963_v26 = vpop.f32.mrb[160].mxu0 }
 0x3b4   : > { %27188 = vst [vmem:[#allocation159_spill] sm:$0xff] %v23963_v26  ;;  %v23966_v27 = vpop.f32.mrb[161].mxu0  ;;  %21276 = vmatprep.mubr.msk.bf16.mxu0 %vm17125_vm1, %v22390_v52  ;;  %v1542_v59 = vpop.permute.xlu1 %1541 }
 0x3b5   : > { %27189 = vst [vmem:[#allocation160_spill] sm:$0xff] %v23966_v27  ;;  %vm2819_vm0 = vcmp.eq.s32.totalorder %v22942_v37, %v1542_v59  ;;  %v23970_v57 = vpop.f32.mrb[162].mxu0  ;;  %v1538_v50 = vpop.permute.xlu0 %1537 }
 0x3b6   : > { %27190 = vst [vmem:[#allocation161_spill] sm:$0xff] %v23970_v57  ;;  %vm2818_vm2 = vcmp.eq.s32.totalorder %v22942_v37, %v1538_v50  ;;  %v23973_v60 = vpop.f32.mrb[163].mxu0  ;;  %1785 = vbcast.lane.b32.xlu1 %v22806_v28, 328  ;;  %1781 = vbcast.lane.b32.xlu0 %v22806_v28, 320 }
 0x3b7   : > { %27191 = vst [vmem:[#allocation162_spill] sm:$0xff] %v23973_v60  ;;  %vm17127_vm3 = vmpackc.low %vm2819_vm0, %vm2818_vm2 }
 0x3b8   : > { %21277 = vmatmul.mubr.msk.bf16.gmra.mrb[12].mxu0 %vm17127_vm3, %v22390_v52  ;;  %v1553_v27 = vpop.permute.xlu1 %1552 }
 0x3b9   : > { %vm2821_vm5 = vcmp.eq.s32.totalorder %v22942_v37, %v1553_v27  ;;  %v1549_v26 = vpop.permute.xlu0 %1548 }
 0x3ba   : > { %vm2820_vm8 = vcmp.eq.s32.totalorder %v22942_v37, %v1549_v26  ;;  %1793 = vbcast.lane.b32.xlu1 %v22806_v28, 344  ;;  %1789 = vbcast.lane.b32.xlu0 %v22806_v28, 336 }
 0x3bb   : > { %vm17129_vm9 = vmpackc.low %vm2821_vm5, %vm2820_vm8  ;;  %v23981_v59 = vpop.f32.mrb[164].mxu0 }
 0x3bc   : > { %27192 = vst [vmem:[#allocation163_spill] sm:$0xff] %v23981_v59  ;;  %v23984_v50 = vpop.f32.mrb[165].mxu0  ;;  %21280 = vmatprep.mubr.msk.bf16.mxu0 %vm17129_vm9, %v22390_v52  ;;  %v1561_v60 = vpop.permute.xlu1 %1560 }
 0x3bd   : > { %27193 = vst [vmem:[#allocation164_spill] sm:$0xff] %v23984_v50  ;;  %vm2823_vm7 = vcmp.eq.s32.totalorder %v22942_v37, %v1561_v60  ;;  %v23988_v57 = vpop.f32.mrb[166].mxu0  ;;  %v1557_v27 = vpop.permute.xlu0 %1556 }
 0x3be   : > { %27194 = vst [vmem:[#allocation165_spill] sm:$0xff] %v23988_v57  ;;  %vm2822_vm10 = vcmp.eq.s32.totalorder %v22942_v37, %v1557_v27  ;;  %v23991_v26 = vpop.f32.mrb[167].mxu0  ;;  %1801 = vbcast.lane.b32.xlu1 %v22806_v28, 360  ;;  %1797 = vbcast.lane.b32.xlu0 %v22806_v28, 352 }
 0x3bf   : > { %27195 = vst [vmem:[#allocation166_spill] sm:$0xff] %v23991_v26  ;;  %vm17131_vm12 = vmpackc.low %vm2823_vm7, %vm2822_vm10 }
 0x3c0   : > { %21281 = vmatmul.mubr.msk.bf16.gmra.mrb[16].mxu0 %vm17131_vm12, %v22390_v52  ;;  %v1569_v50 = vpop.permute.xlu1 %1568 }
 0x3c1   : > { %vm2825_vm4 = vcmp.eq.s32.totalorder %v22942_v37, %v1569_v50  ;;  %v1565_v59 = vpop.permute.xlu0 %1564 }
 0x3c2   : > { %vm2824_vm6 = vcmp.eq.s32.totalorder %v22942_v37, %v1565_v59  ;;  %1809 = vbcast.lane.b32.xlu1 %v22806_v28, 376  ;;  %1805 = vbcast.lane.b32.xlu0 %v22806_v28, 368 }
 0x3c3   : > { %vm17133_vm11 = vmpackc.low %vm2825_vm4, %vm2824_vm6  ;;  %v23999_v60 = vpop.f32.mrb[168].mxu0 }
 0x3c4   : > { %27196 = vst [vmem:[#allocation167_spill] sm:$0xff] %v23999_v60  ;;  %v24002_v27 = vpop.f32.mrb[169].mxu0  ;;  %21284 = vmatprep.mubr.msk.bf16.mxu0 %vm17133_vm11, %v22390_v52  ;;  %v1577_v26 = vpop.permute.xlu1 %1576 }
 0x3c5   : > { %27197 = vst [vmem:[#allocation168_spill] sm:$0xff] %v24002_v27  ;;  %vm2827_vm13 = vcmp.eq.s32.totalorder %v22942_v37, %v1577_v26  ;;  %v24006_v57 = vpop.f32.mrb[170].mxu0  ;;  %v1573_v50 = vpop.permute.xlu0 %1572 }
 0x3c6   : > { %27198 = vst [vmem:[#allocation169_spill] sm:$0xff] %v24006_v57  ;;  %vm2826_vm14 = vcmp.eq.s32.totalorder %v22942_v37, %v1573_v50  ;;  %v24009_v59 = vpop.f32.mrb[171].mxu0  ;;  %1820 = vbcast.lane.b32.xlu1 %v22810_v32, 264  ;;  %1816 = vbcast.lane.b32.xlu0 %v22810_v32, 256 }
 0x3c7   : > { %27199 = vst [vmem:[#allocation170_spill] sm:$0xff] %v24009_v59  ;;  %vm17135_vm15 = vmpackc.low %vm2827_vm13, %vm2826_vm14 }
 0x3c8   : > { %21285 = vmatmul.mubr.msk.bf16.gmra.mrb[20].mxu0 %vm17135_vm15, %v22390_v52  ;;  %v1585_v28 = vpop.permute.xlu1 %1584 }
 0x3c9   : > { %vm2829_vm1 = vcmp.eq.s32.totalorder %v22942_v37, %v1585_v28  ;;  %v1581_v27 = vpop.permute.xlu0 %1580 }
 0x3ca   : > { %vm2828_vm0 = vcmp.eq.s32.totalorder %v22942_v37, %v1581_v27  ;;  %1828 = vbcast.lane.b32.xlu1 %v22810_v32, 280  ;;  %1824 = vbcast.lane.b32.xlu0 %v22810_v32, 272 }
 0x3cb   : > { %vm17137_vm2 = vmpackc.low %vm2829_vm1, %vm2828_vm0  ;;  %v24017_v26 = vpop.f32.mrb[172].mxu0 }
 0x3cc   : > { %27200 = vst [vmem:[#allocation171_spill] sm:$0xff] %v24017_v26  ;;  %v24020_v50 = vpop.f32.mrb[173].mxu0  ;;  %21288 = vmatprep.mubr.msk.bf16.mxu0 %vm17137_vm2, %v22390_v52  ;;  %v1593_v59 = vpop.permute.xlu1 %1592 }
 0x3cd   : > { %27201 = vst [vmem:[#allocation172_spill] sm:$0xff] %v24020_v50  ;;  %vm2831_vm3 = vcmp.eq.s32.totalorder %v22942_v37, %v1593_v59  ;;  %v24024_v57 = vpop.f32.mrb[174].mxu0  ;;  %v1589_v28 = vpop.permute.xlu0 %1588 }
 0x3ce   : > { %27202 = vst [vmem:[#allocation173_spill] sm:$0xff] %v24024_v57  ;;  %vm2830_vm5 = vcmp.eq.s32.totalorder %v22942_v37, %v1589_v28  ;;  %v24027_v27 = vpop.f32.mrb[175].mxu0  ;;  %1836 = vbcast.lane.b32.xlu1 %v22810_v32, 296  ;;  %1832 = vbcast.lane.b32.xlu0 %v22810_v32, 288 }
 0x3cf   : > { %27203 = vst [vmem:[#allocation174_spill] sm:$0xff] %v24027_v27  ;;  %vm17139_vm8 = vmpackc.low %vm2831_vm3, %vm2830_vm5 }
 0x3d0   : > { %21289 = vmatmul.mubr.msk.bf16.gmra.mrb[24].mxu0 %vm17139_vm8, %v22390_v52  ;;  %v1601_v50 = vpop.permute.xlu1 %1600 }
 0x3d1   : > { %vm2833_vm9 = vcmp.eq.s32.totalorder %v22942_v37, %v1601_v50  ;;  %v1597_v26 = vpop.permute.xlu0 %1596 }
 0x3d2   : > { %vm2832_vm7 = vcmp.eq.s32.totalorder %v22942_v37, %v1597_v26  ;;  %1844 = vbcast.lane.b32.xlu1 %v22810_v32, 312  ;;  %1840 = vbcast.lane.b32.xlu0 %v22810_v32, 304 }
 0x3d3   : > { %vm17141_vm10 = vmpackc.low %vm2833_vm9, %vm2832_vm7  ;;  %v24035_v59 = vpop.f32.mrb[176].mxu0 }
 0x3d4   : > { %27204 = vst [vmem:[#allocation175_spill] sm:$0xff] %v24035_v59  ;;  %v24038_v28 = vpop.f32.mrb[177].mxu0  ;;  %21292 = vmatprep.mubr.msk.bf16.mxu0 %vm17141_vm10, %v22390_v52  ;;  %v1609_v27 = vpop.permute.xlu1 %1608 }
 0x3d5   : > { %27205 = vst [vmem:[#allocation176_spill] sm:$0xff] %v24038_v28  ;;  %vm2835_vm12 = vcmp.eq.s32.totalorder %v22942_v37, %v1609_v27  ;;  %v24042_v57 = vpop.f32.mrb[178].mxu0  ;;  %v1605_v50 = vpop.permute.xlu0 %1604 }
 0x3d6   : > { %27206 = vst [vmem:[#allocation177_spill] sm:$0xff] %v24042_v57  ;;  %vm2834_vm4 = vcmp.eq.s32.totalorder %v22942_v37, %v1605_v50  ;;  %v24045_v26 = vpop.f32.mrb[179].mxu0  ;;  %1852 = vbcast.lane.b32.xlu1 %v22810_v32, 328  ;;  %1848 = vbcast.lane.b32.xlu0 %v22810_v32, 320 }
 0x3d7   : > { %27207 = vst [vmem:[#allocation178_spill] sm:$0xff] %v24045_v26  ;;  %vm17143_vm6 = vmpackc.low %vm2835_vm12, %vm2834_vm4 }
 0x3d8   : > { %21293 = vmatmul.mubr.msk.bf16.gmra.mrb[28].mxu0 %vm17143_vm6, %v22390_v52  ;;  %v1620_v28 = vpop.permute.xlu1 %1619 }
 0x3d9   : > { %vm2837_vm11 = vcmp.eq.s32.totalorder %v22942_v37, %v1620_v28  ;;  %v1616_v59 = vpop.permute.xlu0 %1615 }
 0x3da   : > { %vm2836_vm13 = vcmp.eq.s32.totalorder %v22942_v37, %v1616_v59  ;;  %1860 = vbcast.lane.b32.xlu1 %v22810_v32, 344  ;;  %1856 = vbcast.lane.b32.xlu0 %v22810_v32, 336 }
 0x3db   : > { %vm17145_vm14 = vmpackc.low %vm2837_vm11, %vm2836_vm13  ;;  %v24053_v27 = vpop.f32.mrb[180].mxu0 }
 0x3dc   : > { %27208 = vst [vmem:[#allocation179_spill] sm:$0xff] %v24053_v27  ;;  %v24056_v50 = vpop.f32.mrb[181].mxu0  ;;  %21296 = vmatprep.mubr.msk.bf16.mxu0 %vm17145_vm14, %v22390_v52  ;;  %v1628_v26 = vpop.permute.xlu1 %1627 }
 0x3dd   : > { %27209 = vst [vmem:[#allocation180_spill] sm:$0xff] %v24056_v50  ;;  %vm2839_vm15 = vcmp.eq.s32.totalorder %v22942_v37, %v1628_v26  ;;  %v24060_v57 = vpop.f32.mrb[182].mxu0  ;;  %v1624_v28 = vpop.permute.xlu0 %1623 }
 0x3de   : > { %27210 = vst [vmem:[#allocation181_spill] sm:$0xff] %v24060_v57  ;;  %vm2838_vm1 = vcmp.eq.s32.totalorder %v22942_v37, %v1624_v28  ;;  %v24063_v59 = vpop.f32.mrb[183].mxu0  ;;  %1868 = vbcast.lane.b32.xlu1 %v22810_v32, 360  ;;  %1864 = vbcast.lane.b32.xlu0 %v22810_v32, 352 }
 0x3df   : > { %27211 = vst [vmem:[#allocation182_spill] sm:$0xff] %v24063_v59  ;;  %vm17147_vm0 = vmpackc.low %vm2839_vm15, %vm2838_vm1 }
 0x3e0   : > { %21297 = vmatmul.mubr.msk.bf16.gmra.mrb[32].mxu0 %vm17147_vm0, %v22390_v52  ;;  %v1636_v50 = vpop.permute.xlu1 %1635 }
 0x3e1   : > { %vm2841_vm2 = vcmp.eq.s32.totalorder %v22942_v37, %v1636_v50  ;;  %v1632_v27 = vpop.permute.xlu0 %1631 }
 0x3e2   : > { %vm2840_vm3 = vcmp.eq.s32.totalorder %v22942_v37, %v1632_v27  ;;  %1876 = vbcast.lane.b32.xlu1 %v22810_v32, 376  ;;  %1872 = vbcast.lane.b32.xlu0 %v22810_v32, 368 }
 0x3e3   : > { %vm17149_vm5 = vmpackc.low %vm2841_vm2, %vm2840_vm3  ;;  %v24071_v26 = vpop.f32.mrb[184].mxu0 }
 0x3e4   : > { %27212 = vst [vmem:[#allocation183_spill] sm:$0xff] %v24071_v26  ;;  %v24074_v28 = vpop.f32.mrb[185].mxu0  ;;  %21300 = vmatprep.mubr.msk.bf16.mxu0 %vm17149_vm5, %v22390_v52  ;;  %v1644_v59 = vpop.permute.xlu1 %1643 }
 0x3e5   : > { %27213 = vst [vmem:[#allocation184_spill] sm:$0xff] %v24074_v28  ;;  %vm2843_vm8 = vcmp.eq.s32.totalorder %v22942_v37, %v1644_v59  ;;  %v24078_v57 = vpop.f32.mrb[186].mxu0  ;;  %v1640_v50 = vpop.permute.xlu0 %1639 }
 0x3e6   : > { %27214 = vst [vmem:[#allocation185_spill] sm:$0xff] %v24078_v57  ;;  %vm2842_vm9 = vcmp.eq.s32.totalorder %v22942_v37, %v1640_v50  ;;  %v24081_v27 = vpop.f32.mrb[187].mxu0  ;;  %1887 = vbcast.lane.b32.xlu1 %v22814_v14, 264  ;;  %1883 = vbcast.lane.b32.xlu0 %v22814_v14, 256 }
 0x3e7   : > { %27215 = vst [vmem:[#allocation186_spill] sm:$0xff] %v24081_v27  ;;  %vm17151_vm7 = vmpackc.low %vm2843_vm8, %vm2842_vm9 }
 0x3e8   : > { %21301 = vmatmul.mubr.msk.bf16.gmra.mrb[36].mxu0 %vm17151_vm7, %v22390_v52  ;;  %v1652_v32 = vpop.permute.xlu1 %1651 }
 0x3e9   : > { %vm2845_vm10 = vcmp.eq.s32.totalorder %v22942_v37, %v1652_v32  ;;  %v1648_v28 = vpop.permute.xlu0 %1647 }
 0x3ea   : > { %vm2844_vm12 = vcmp.eq.s32.totalorder %v22942_v37, %v1648_v28  ;;  %1895 = vbcast.lane.b32.xlu1 %v22814_v14, 280  ;;  %1891 = vbcast.lane.b32.xlu0 %v22814_v14, 272 }
 0x3eb   : > { %vm17153_vm4 = vmpackc.low %vm2845_vm10, %vm2844_vm12  ;;  %v24089_v59 = vpop.f32.mrb[188].mxu0 }
 0x3ec   : > { %27216 = vst [vmem:[#allocation187_spill] sm:$0xff] %v24089_v59  ;;  %v24092_v50 = vpop.f32.mrb[189].mxu0  ;;  %21304 = vmatprep.mubr.msk.bf16.mxu0 %vm17153_vm4, %v22390_v52  ;;  %v1660_v27 = vpop.permute.xlu1 %1659  ;;  %v22188_v59 = vld [vmem:[#allocation7] sm:$0xff]  }
 0x3ed   : > { %27217 = vst [vmem:[#allocation188_spill] sm:$0xff] %v24092_v50  ;;  %vm2847_vm6 = vcmp.eq.s32.totalorder %v22942_v37, %v1660_v27  ;;  %v24096_v57 = vpop.f32.mrb[190].mxu0  ;;  %v1656_v32 = vpop.permute.xlu0 %1655  ;;  %20464 = vmatprep.subr.bf16.mxu1 %v22188_v59 }
 0x3ee   : > { %27218 = vst [vmem:[#allocation189_spill] sm:$0xff] %v24096_v57  ;;  %vm2846_vm11 = vcmp.eq.s32.totalorder %v22942_v37, %v1656_v32  ;;  %v24099_v28 = vpop.f32.mrb[191].mxu0  ;;  %1903 = vbcast.lane.b32.xlu1 %v22814_v14, 296  ;;  %1899 = vbcast.lane.b32.xlu0 %v22814_v14, 288  ;;  %v22189_v32 = vld [vmem:[#allocation7 + $0x8] sm:$0xff]  }
 0x3ef   : > { %27219 = vst [vmem:[#allocation190_spill] sm:$0xff] %v24099_v28  ;;  %vm17155_vm13 = vmpackc.low %vm2847_vm6, %vm2846_vm11  ;;  %20465 = vmatpush3.bf16.msra.mxu1 %v22188_v59  ;;  %v22190_v59 = vld [vmem:[#allocation7 + $0x10] sm:$0xff]  }
 0x3f0   : > { %21305 = vmatmul.mubr.msk.bf16.gmra.mrb[40].mxu0 %vm17155_vm13, %v22390_v52  ;;  %v1668_v50 = vpop.permute.xlu1 %1667  ;;  %20466 = vmatprep.subr.bf16.mxu1 %v22189_v32 }
 0x3f1   : > { %vm2849_vm14 = vcmp.eq.s32.totalorder %v22942_v37, %v1668_v50  ;;  %v1664_v26 = vpop.permute.xlu0 %1663 }
 0x3f2   : > { %vm2848_vm15 = vcmp.eq.s32.totalorder %v22942_v37, %v1664_v26  ;;  %1911 = vbcast.lane.b32.xlu1 %v22814_v14, 312  ;;  %1907 = vbcast.lane.b32.xlu0 %v22814_v14, 304 }
 0x3f3   : > { %vm17157_vm1 = vmpackc.low %vm2849_vm14, %vm2848_vm15  ;;  %v24107_v27 = vpop.f32.mrb[192].mxu0  ;;  %20467 = vmatpush3.bf16.msra.mxu1 %v22189_v32  ;;  %v22191_v32 = vld [vmem:[#allocation7 + $0x18] sm:$0xff]  }
 0x3f4   : > { %27220 = vst [vmem:[#allocation191_spill] sm:$0xff] %v24107_v27  ;;  %v24110_v28 = vpop.f32.mrb[193].mxu0  ;;  %21308 = vmatprep.mubr.msk.bf16.mxu0 %vm17157_vm1, %v22390_v52  ;;  %v1676_v57 = vpop.permute.xlu1 %1675  ;;  %20468 = vmatprep.subr.bf16.mxu1 %v22190_v59 }
 0x3f5   : > { %27221 = vst [vmem:[#allocation192_spill] sm:$0xff] %v24110_v28  ;;  %vm2851_vm0 = vcmp.eq.s32.totalorder %v22942_v37, %v1676_v57  ;;  %v24114_v50 = vpop.f32.mrb[194].mxu0  ;;  %v1672_v60 = vpop.permute.xlu0 %1671 }
 0x3f6   : > { %27222 = vst [vmem:[#allocation193_spill] sm:$0xff] %v24114_v50  ;;  %vm2850_vm2 = vcmp.eq.s32.totalorder %v22942_v37, %v1672_v60  ;;  %v24117_v26 = vpop.f32.mrb[195].mxu0  ;;  %1919 = vbcast.lane.b32.xlu1 %v22814_v14, 328  ;;  %1915 = vbcast.lane.b32.xlu0 %v22814_v14, 320 }
 0x3f7   : > { %27223 = vst [vmem:[#allocation194_spill] sm:$0xff] %v24117_v26  ;;  %vm17159_vm3 = vmpackc.low %vm2851_vm0, %vm2850_vm2  ;;  %20469 = vmatpush3.bf16.msra.mxu1 %v22190_v59 }
 0x3f8   : > { %21309 = vmatmul.mubr.msk.bf16.gmra.mrb[44].mxu0 %vm17159_vm3, %v22390_v52  ;;  %v1687_v28 = vpop.permute.xlu1 %1686  ;;  %20470 = vmatprep.subr.bf16.mxu1 %v22191_v32 }
 0x3f9   : > { %vm2853_vm5 = vcmp.eq.s32.totalorder %v22942_v37, %v1687_v28  ;;  %v1683_v57 = vpop.permute.xlu0 %1682 }
 0x3fa   : > { %vm2852_vm8 = vcmp.eq.s32.totalorder %v22942_v37, %v1683_v57  ;;  %1927 = vbcast.lane.b32.xlu1 %v22814_v14, 344  ;;  %1923 = vbcast.lane.b32.xlu0 %v22814_v14, 336  ;;  %v22192_v57 = vld [vmem:[#allocation7 + $0x20] sm:$0xff]  }
 0x3fb   : > { %vm17161_vm9 = vmpackc.low %vm2853_vm5, %vm2852_vm8  ;;  %v24125_v60 = vpop.f32.mrb[196].mxu0  ;;  %20471 = vmatpush3.bf16.msra.mxu1 %v22191_v32  ;;  %v22193_v32 = vld [vmem:[#allocation7 + $0x28] sm:$0xff]  }
 0x3fc   : > { %27224 = vst [vmem:[#allocation195_spill] sm:$0xff] %v24125_v60  ;;  %v24128_v26 = vpop.f32.mrb[197].mxu0  ;;  %21312 = vmatprep.mubr.msk.bf16.mxu0 %vm17161_vm9, %v22390_v52  ;;  %v1695_v50 = vpop.permute.xlu1 %1694  ;;  %20472 = vmatprep.subr.bf16.mxu1 %v22192_v57 }
 0x3fd   : > { %27225 = vst [vmem:[#allocation196_spill] sm:$0xff] %v24128_v26  ;;  %vm2855_vm7 = vcmp.eq.s32.totalorder %v22942_v37, %v1695_v50  ;;  %v24132_v28 = vpop.f32.mrb[198].mxu0  ;;  %v1691_v27 = vpop.permute.xlu0 %1690 }
 0x3fe   : > { %27226 = vst [vmem:[#allocation197_spill] sm:$0xff] %v24132_v28  ;;  %vm2854_vm10 = vcmp.eq.s32.totalorder %v22942_v37, %v1691_v27  ;;  %v24135_v59 = vpop.f32.mrb[199].mxu0  ;;  %1935 = vbcast.lane.b32.xlu1 %v22814_v14, 360  ;;  %1931 = vbcast.lane.b32.xlu0 %v22814_v14, 352 }
 0x3ff   : > { %27227 = vst [vmem:[#allocation198_spill] sm:$0xff] %v24135_v59  ;;  %vm17163_vm12 = vmpackc.low %vm2855_vm7, %vm2854_vm10  ;;  %20473 = vmatpush3.bf16.msra.mxu1 %v22192_v57 }
 0x400   : > { %21313 = vmatmul.mubr.msk.bf16.gmra.mrb[48].mxu0 %vm17163_vm12, %v22390_v52  ;;  %v1703_v26 = vpop.permute.xlu1 %1702  ;;  %20474 = vmatprep.subr.bf16.mxu1 %v22193_v32 }
 0x401   : > { %vm2857_vm4 = vcmp.eq.s32.totalorder %v22942_v37, %v1703_v26  ;;  %v1699_v50 = vpop.permute.xlu0 %1698 }
 0x402   : > { %vm2856_vm6 = vcmp.eq.s32.totalorder %v22942_v37, %v1699_v50  ;;  %1943 = vbcast.lane.b32.xlu1 %v22814_v14, 376  ;;  %1939 = vbcast.lane.b32.xlu0 %v22814_v14, 368  ;;  %v22194_v14 = vld [vmem:[#allocation7 + $0x30] sm:$0xff]  }
 0x403   : > { %vm17165_vm11 = vmpackc.low %vm2857_vm4, %vm2856_vm6  ;;  %v24143_v27 = vpop.f32.mrb[200].mxu0  ;;  %20475 = vmatpush3.bf16.msra.mxu1 %v22193_v32  ;;  %v22195_v32 = vld [vmem:[#allocation7 + $0x38] sm:$0xff]  }
 0x404   : > { %v24146_v59 = vpop.f32.mrb[201].mxu0  ;;  %21316 = vmatprep.mubr.msk.bf16.mxu0 %vm17165_vm11, %v22390_v52  ;;  %v1711_v28 = vpop.permute.xlu1 %1710  ;;  %20476 = vmatprep.subr.bf16.mxu1 %v22194_v14 }
 0x405   : > { %27228 = vst [vmem:[#allocation199_spill] sm:$0xff] %v24146_v59  ;;  %vm2859_vm13 = vcmp.eq.s32.totalorder %v22942_v37, %v1711_v28  ;;  %v24150_v26 = vpop.f32.mrb[202].mxu0  ;;  %v1707_v60 = vpop.permute.xlu0 %1706 }
 0x406   : > { %27229 = vst [vmem:[#allocation200_spill] sm:$0xff] %v24150_v26  ;;  %vm2858_vm14 = vcmp.eq.s32.totalorder %v22942_v37, %v1707_v60  ;;  %v24153_v57 = vpop.f32.mrb[203].mxu0  ;;  %1954 = vbcast.lane.b32.xlu1 %v22818_v23, 264  ;;  %1950 = vbcast.lane.b32.xlu0 %v22818_v23, 256 }
 0x407   : > { %27230 = vst [vmem:[#allocation201_spill] sm:$0xff] %v24153_v57  ;;  %vm17167_vm15 = vmpackc.low %vm2859_vm13, %vm2858_vm14  ;;  %20477 = vmatpush3.bf16.msra.mxu1 %v22194_v14 }
 0x408   : > { %21317 = vmatmul.mubr.msk.bf16.gmra.mrb[52].mxu0 %vm17167_vm15, %v22390_v52  ;;  %v1719_v50 = vpop.permute.xlu1 %1718  ;;  %20478 = vmatprep.subr.bf16.mxu1 %v22195_v32 }
 0x409   : > { %vm2861_vm1 = vcmp.eq.s32.totalorder %v22942_v37, %v1719_v50  ;;  %v1715_v28 = vpop.permute.xlu0 %1714 }
 0x40a   : > { %vm2860_vm0 = vcmp.eq.s32.totalorder %v22942_v37, %v1715_v28  ;;  %1962 = vbcast.lane.b32.xlu1 %v22818_v23, 280  ;;  %1958 = vbcast.lane.b32.xlu0 %v22818_v23, 272 }
 0x40b   : > { %vm17169_vm2 = vmpackc.low %vm2861_vm1, %vm2860_vm0  ;;  %v24161_v60 = vpop.f32.mrb[204].mxu0  ;;  %20479 = vmatpush3.bf16.msra.mxu1 %v22195_v32  ;;  %v24184_v32 = vrot.slane %v22825_v47, %v22652_v16 }
 0x40c   : > { %v24164_v57 = vpop.f32.mrb[205].mxu0  ;;  %21320 = vmatprep.mubr.msk.bf16.mxu0 %vm17169_vm2, %v22390_v52  ;;  %v1727_v26 = vpop.permute.xlu1 %1726 }
 0x40d   : > { %27231 = vst [vmem:[#allocation202_spill] sm:$0xff] %v24164_v57  ;;  %vm2863_vm3 = vcmp.eq.s32.totalorder %v22942_v37, %v1727_v26  ;;  %v24168_v50 = vpop.f32.mrb[206].mxu0  ;;  %v1723_v59 = vpop.permute.xlu0 %1722 }
 0x40e   : > { %27232 = vst [vmem:[#allocation203_spill] sm:$0xff] %v24168_v50  ;;  %vm2862_vm5 = vcmp.eq.s32.totalorder %v22942_v37, %v1723_v59  ;;  %v24171_v14 = vpop.f32.mrb[207].mxu0  ;;  %1970 = vbcast.lane.b32.xlu1 %v22818_v23, 296  ;;  %1966 = vbcast.lane.b32.xlu0 %v22818_v23, 288 }
 0x40f   : > { %27233 = vst [vmem:[#allocation204_spill] sm:$0xff] %v24171_v14  ;;  %vm17171_vm8 = vmpackc.low %vm2863_vm3, %vm2862_vm5 }
 0x410   : > { %21321 = vmatmul.mubr.msk.bf16.gmra.mrb[56].mxu0 %vm17171_vm8, %v22390_v52  ;;  %v1735_v28 = vpop.permute.xlu1 %1734 }
 0x411   : > { %vm2865_vm9 = vcmp.eq.s32.totalorder %v22942_v37, %v1735_v28  ;;  %v1731_v26 = vpop.permute.xlu0 %1730 }
 0x412   : > { %vm2864_vm7 = vcmp.eq.s32.totalorder %v22942_v37, %v1731_v26  ;;  %1978 = vbcast.lane.b32.xlu1 %v22818_v23, 312  ;;  %1974 = vbcast.lane.b32.xlu0 %v22818_v23, 304 }
 0x413   : > { %vm17173_vm10 = vmpackc.low %vm2865_vm9, %vm2864_vm7  ;;  %v24179_v59 = vpop.f32.mrb[208].mxu0 }
 0x414   : > { %27234 = vst [vmem:[#allocation205_spill] sm:$0xff] %v24179_v59  ;;  %v24186_v14 = vpop.f32.mrb[209].mxu0  ;;  %21324 = vmatprep.mubr.msk.bf16.mxu0 %vm17173_vm10, %v22390_v52  ;;  %v1743_v50 = vpop.permute.xlu1 %1742 }
 0x415   : > { %27235 = vst [vmem:[#allocation206_spill] sm:$0xff] %v24186_v14  ;;  %vm2867_vm12 = vcmp.eq.s32.totalorder %v22942_v37, %v1743_v50  ;;  %v24190_v28 = vpop.f32.mrb[210].mxu0  ;;  %v1739_v26 = vpop.permute.xlu0 %1738 }
 0x416   : > { %27236 = vst [vmem:[#allocation207_spill] sm:$0xff] %v24190_v28  ;;  %vm2866_vm4 = vcmp.eq.s32.totalorder %v22942_v37, %v1739_v26  ;;  %v24193_v57 = vpop.f32.mrb[211].mxu0  ;;  %4365 = vbcast.lane.b32.xlu1 %v24184_v32, 264  ;;  %4361 = vbcast.lane.b32.xlu0 %v24184_v32, 256 }
 0x417   : > { %27237 = vst [vmem:[#allocation208_spill] sm:$0xff] %v24193_v57  ;;  %vm17175_vm6 = vmpackc.low %vm2867_vm12, %vm2866_vm4 }
 0x418   : > { %21325 = vmatmul.mubr.msk.bf16.gmra.mrb[60].mxu0 %vm17175_vm6, %v22390_v52  ;;  %v1754_v23 = vpop.permute.xlu1 %1753 }
 0x419   : > { %vm2869_vm11 = vcmp.eq.s32.totalorder %v22942_v37, %v1754_v23  ;;  %v1750_v14 = vpop.permute.xlu0 %1749 }
 0x41a   : > { %vm2868_vm13 = vcmp.eq.s32.totalorder %v22942_v37, %v1750_v14  ;;  %4373 = vbcast.lane.b32.xlu1 %v24184_v32, 280  ;;  %4369 = vbcast.lane.b32.xlu0 %v24184_v32, 272 }
 0x41b   : > { %vm17177_vm14 = vmpackc.low %vm2869_vm11, %vm2868_vm13  ;;  %v24201_v50 = vpop.f32.mrb[212].mxu0 }
 0x41c   : > { %27238 = vst [vmem:[#allocation209_spill] sm:$0xff] %v24201_v50  ;;  %v24204_v26 = vpop.f32.mrb[213].mxu0  ;;  %21328 = vmatprep.mubr.msk.bf16.mxu0 %vm17177_vm14, %v22390_v52  ;;  %v1762_v57 = vpop.permute.xlu1 %1761 }
 0x41d   : > { %27239 = vst [vmem:[#allocation210_spill] sm:$0xff] %v24204_v26  ;;  %vm2871_vm15 = vcmp.eq.s32.totalorder %v22942_v37, %v1762_v57  ;;  %v24208_v28 = vpop.f32.mrb[214].mxu0  ;;  %v1758_v23 = vpop.permute.xlu0 %1757 }
 0x41e   : > { %27240 = vst [vmem:[#allocation211_spill] sm:$0xff] %v24208_v28  ;;  %vm2870_vm1 = vcmp.eq.s32.totalorder %v22942_v37, %v1758_v23  ;;  %v24211_v14 = vpop.f32.mrb[215].mxu0  ;;  %4381 = vbcast.lane.b32.xlu1 %v24184_v32, 296  ;;  %4377 = vbcast.lane.b32.xlu0 %v24184_v32, 288 }
 0x41f   : > { %27241 = vst [vmem:[#allocation212_spill] sm:$0xff] %v24211_v14  ;;  %vm17179_vm0 = vmpackc.low %vm2871_vm15, %vm2870_vm1 }
 0x420   : > { %21329 = vmatmul.mubr.msk.bf16.gmra.mrb[64].mxu0 %vm17179_vm0, %v22390_v52  ;;  %v1770_v26 = vpop.permute.xlu1 %1769 }
 0x421   : > { %vm2873_vm2 = vcmp.eq.s32.totalorder %v22942_v37, %v1770_v26  ;;  %v1766_v50 = vpop.permute.xlu0 %1765 }
 0x422   : > { %vm2872_vm3 = vcmp.eq.s32.totalorder %v22942_v37, %v1766_v50  ;;  %4389 = vbcast.lane.b32.xlu1 %v24184_v32, 312  ;;  %4385 = vbcast.lane.b32.xlu0 %v24184_v32, 304 }
 0x423   : > { %vm17181_vm5 = vmpackc.low %vm2873_vm2, %vm2872_vm3  ;;  %v24219_v57 = vpop.f32.mrb[216].mxu0 }
 0x424   : > { %27242 = vst [vmem:[#allocation213_spill] sm:$0xff] %v24219_v57  ;;  %v24222_v23 = vpop.f32.mrb[217].mxu0  ;;  %21332 = vmatprep.mubr.msk.bf16.mxu0 %vm17181_vm5, %v22390_v52  ;;  %v1778_v14 = vpop.permute.xlu1 %1777 }
 0x425   : > { %27243 = vst [vmem:[#allocation214_spill] sm:$0xff] %v24222_v23  ;;  %vm2875_vm8 = vcmp.eq.s32.totalorder %v22942_v37, %v1778_v14  ;;  %v24226_v28 = vpop.f32.mrb[218].mxu0  ;;  %v1774_v26 = vpop.permute.xlu0 %1773 }
 0x426   : > { %27244 = vst [vmem:[#allocation215_spill] sm:$0xff] %v24226_v28  ;;  %vm2874_vm9 = vcmp.eq.s32.totalorder %v22942_v37, %v1774_v26  ;;  %v24229_v50 = vpop.f32.mrb[219].mxu0  ;;  %4397 = vbcast.lane.b32.xlu1 %v24184_v32, 328  ;;  %4393 = vbcast.lane.b32.xlu0 %v24184_v32, 320 }
 0x427   : > { %27245 = vst [vmem:[#allocation216_spill] sm:$0xff] %v24229_v50  ;;  %vm17183_vm7 = vmpackc.low %vm2875_vm8, %vm2874_vm9 }
 0x428   : > { %21333 = vmatmul.mubr.msk.bf16.gmra.mrb[68].mxu0 %vm17183_vm7, %v22390_v52  ;;  %v1786_v23 = vpop.permute.xlu1 %1785 }
 0x429   : > { %vm2877_vm10 = vcmp.eq.s32.totalorder %v22942_v37, %v1786_v23  ;;  %v1782_v57 = vpop.permute.xlu0 %1781 }
 0x42a   : > { %vm2876_vm12 = vcmp.eq.s32.totalorder %v22942_v37, %v1782_v57  ;;  %4405 = vbcast.lane.b32.xlu1 %v24184_v32, 344  ;;  %4401 = vbcast.lane.b32.xlu0 %v24184_v32, 336 }
 0x42b   : > { %vm17185_vm4 = vmpackc.low %vm2877_vm10, %vm2876_vm12  ;;  %v24237_v14 = vpop.f32.mrb[220].mxu0 }
 0x42c   : > { %27246 = vst [vmem:[#allocation217_spill] sm:$0xff] %v24237_v14  ;;  %v24240_v26 = vpop.f32.mrb[221].mxu0  ;;  %21336 = vmatprep.mubr.msk.bf16.mxu0 %vm17185_vm4, %v22390_v52  ;;  %v1794_v50 = vpop.permute.xlu1 %1793 }
 0x42d   : > { %27247 = vst [vmem:[#allocation218_spill] sm:$0xff] %v24240_v26  ;;  %vm2879_vm6 = vcmp.eq.s32.totalorder %v22942_v37, %v1794_v50  ;;  %v24244_v28 = vpop.f32.mrb[222].mxu0  ;;  %v1790_v23 = vpop.permute.xlu0 %1789 }
 0x42e   : > { %27248 = vst [vmem:[#allocation219_spill] sm:$0xff] %v24244_v28  ;;  %vm2878_vm11 = vcmp.eq.s32.totalorder %v22942_v37, %v1790_v23  ;;  %v24247_v57 = vpop.f32.mrb[223].mxu0  ;;  %4413 = vbcast.lane.b32.xlu1 %v24184_v32, 360  ;;  %4409 = vbcast.lane.b32.xlu0 %v24184_v32, 352  ;;  %v24260_v23 = vrot.slane %v22825_v47, %v22654_v17 }
 0x42f   : > { %27249 = vst [vmem:[#allocation220_spill] sm:$0xff] %v24247_v57  ;;  %vm17187_vm13 = vmpackc.low %vm2879_vm6, %vm2878_vm11 }
 0x430   : > { %21337 = vmatmul.mubr.msk.bf16.gmra.mrb[72].mxu0 %vm17187_vm13, %v22390_v52  ;;  %v1802_v26 = vpop.permute.xlu1 %1801 }
 0x431   : > { %vm2881_vm14 = vcmp.eq.s32.totalorder %v22942_v37, %v1802_v26  ;;  %v1798_v14 = vpop.permute.xlu0 %1797 }
 0x432   : > { %vm2880_vm15 = vcmp.eq.s32.totalorder %v22942_v37, %v1798_v14  ;;  %4421 = vbcast.lane.b32.xlu1 %v24184_v32, 376  ;;  %4417 = vbcast.lane.b32.xlu0 %v24184_v32, 368 }
 0x433   : > { %vm17189_vm1 = vmpackc.low %vm2881_vm14, %vm2880_vm15  ;;  %v24255_v50 = vpop.f32.mrb[224].mxu0 }
 0x434   : > { %27250 = vst [vmem:[#allocation221_spill] sm:$0xff] %v24255_v50  ;;  %v24262_v57 = vpop.f32.mrb[225].mxu0  ;;  %21340 = vmatprep.mubr.msk.bf16.mxu0 %vm17189_vm1, %v22390_v52  ;;  %v1810_v28 = vpop.permute.xlu1 %1809 }
 0x435   : > { %27251 = vst [vmem:[#allocation222_spill] sm:$0xff] %v24262_v57  ;;  %vm2883_vm0 = vcmp.eq.s32.totalorder %v22942_v37, %v1810_v28  ;;  %v24266_v26 = vpop.f32.mrb[226].mxu0  ;;  %v1806_v14 = vpop.permute.xlu0 %1805 }
 0x436   : > { %27252 = vst [vmem:[#allocation223_spill] sm:$0xff] %v24266_v26  ;;  %vm2882_vm2 = vcmp.eq.s32.totalorder %v22942_v37, %v1806_v14  ;;  %v24269_v59 = vpop.f32.mrb[227].mxu0  ;;  %4432 = vbcast.lane.b32.xlu1 %v24260_v23, 264  ;;  %4428 = vbcast.lane.b32.xlu0 %v24260_v23, 256 }
 0x437   : > { %27253 = vst [vmem:[#allocation224_spill] sm:$0xff] %v24269_v59  ;;  %vm17191_vm3 = vmpackc.low %vm2883_vm0, %vm2882_vm2 }
 0x438   : > { %21341 = vmatmul.mubr.msk.bf16.gmra.mrb[76].mxu0 %vm17191_vm3, %v22390_v52  ;;  %v1821_v32 = vpop.permute.xlu1 %1820 }
 0x439   : > { %vm2885_vm5 = vcmp.eq.s32.totalorder %v22942_v37, %v1821_v32  ;;  %v1817_v57 = vpop.permute.xlu0 %1816 }
 0x43a   : > { %vm2884_vm8 = vcmp.eq.s32.totalorder %v22942_v37, %v1817_v57  ;;  %4440 = vbcast.lane.b32.xlu1 %v24260_v23, 280  ;;  %4436 = vbcast.lane.b32.xlu0 %v24260_v23, 272 }
 0x43b   : > { %vm17193_vm9 = vmpackc.low %vm2885_vm5, %vm2884_vm8  ;;  %v24277_v28 = vpop.f32.mrb[228].mxu0 }
 0x43c   : > { %27254 = vst [vmem:[#allocation225_spill] sm:$0xff] %v24277_v28  ;;  %v24280_v14 = vpop.f32.mrb[229].mxu0  ;;  %21344 = vmatprep.mubr.msk.bf16.mxu0 %vm17193_vm9, %v22390_v52  ;;  %v1829_v59 = vpop.permute.xlu1 %1828 }
 0x43d   : > { %27255 = vst [vmem:[#allocation226_spill] sm:$0xff] %v24280_v14  ;;  %vm2887_vm7 = vcmp.eq.s32.totalorder %v22942_v37, %v1829_v59  ;;  %v24284_v26 = vpop.f32.mrb[230].mxu0  ;;  %v1825_v32 = vpop.permute.xlu0 %1824 }
 0x43e   : > { %27256 = vst [vmem:[#allocation227_spill] sm:$0xff] %v24284_v26  ;;  %vm2886_vm10 = vcmp.eq.s32.totalorder %v22942_v37, %v1825_v32  ;;  %v24287_v57 = vpop.f32.mrb[231].mxu0  ;;  %4448 = vbcast.lane.b32.xlu1 %v24260_v23, 296  ;;  %4444 = vbcast.lane.b32.xlu0 %v24260_v23, 288 }
 0x43f   : > { %27257 = vst [vmem:[#allocation228_spill] sm:$0xff] %v24287_v57  ;;  %vm17195_vm12 = vmpackc.low %vm2887_vm7, %vm2886_vm10 }
 0x440   : > { %21345 = vmatmul.mubr.msk.bf16.gmra.mrb[80].mxu0 %vm17195_vm12, %v22390_v52  ;;  %v1837_v14 = vpop.permute.xlu1 %1836 }
 0x441   : > { %vm2889_vm4 = vcmp.eq.s32.totalorder %v22942_v37, %v1837_v14  ;;  %v1833_v28 = vpop.permute.xlu0 %1832 }
 0x442   : > { %vm2888_vm6 = vcmp.eq.s32.totalorder %v22942_v37, %v1833_v28  ;;  %4456 = vbcast.lane.b32.xlu1 %v24260_v23, 312  ;;  %4452 = vbcast.lane.b32.xlu0 %v24260_v23, 304 }
 0x443   : > { %vm17197_vm11 = vmpackc.low %vm2889_vm4, %vm2888_vm6  ;;  %v24295_v59 = vpop.f32.mrb[232].mxu0 }
 0x444   : > { %27258 = vst [vmem:[#allocation229_spill] sm:$0xff] %v24295_v59  ;;  %v24298_v32 = vpop.f32.mrb[233].mxu0  ;;  %21348 = vmatprep.mubr.msk.bf16.mxu0 %vm17197_vm11, %v22390_v52  ;;  %v1845_v57 = vpop.permute.xlu1 %1844 }
 0x445   : > { %27259 = vst [vmem:[#allocation230_spill] sm:$0xff] %v24298_v32  ;;  %vm2891_vm13 = vcmp.eq.s32.totalorder %v22942_v37, %v1845_v57  ;;  %v24302_v26 = vpop.f32.mrb[234].mxu0  ;;  %v1841_v14 = vpop.permute.xlu0 %1840 }
 0x446   : > { %27260 = vst [vmem:[#allocation231_spill] sm:$0xff] %v24302_v26  ;;  %vm2890_vm14 = vcmp.eq.s32.totalorder %v22942_v37, %v1841_v14  ;;  %v24305_v28 = vpop.f32.mrb[235].mxu0  ;;  %4464 = vbcast.lane.b32.xlu1 %v24260_v23, 328  ;;  %4460 = vbcast.lane.b32.xlu0 %v24260_v23, 320 }
 0x447   : > { %27261 = vst [vmem:[#allocation232_spill] sm:$0xff] %v24305_v28  ;;  %vm17199_vm15 = vmpackc.low %vm2891_vm13, %vm2890_vm14 }
 0x448   : > { %21349 = vmatmul.mubr.msk.bf16.gmra.mrb[84].mxu0 %vm17199_vm15, %v22390_v52  ;;  %v1853_v32 = vpop.permute.xlu1 %1852 }
 0x449   : > { %vm2893_vm1 = vcmp.eq.s32.totalorder %v22942_v37, %v1853_v32  ;;  %v1849_v59 = vpop.permute.xlu0 %1848 }
 0x44a   : > { %vm2892_vm0 = vcmp.eq.s32.totalorder %v22942_v37, %v1849_v59  ;;  %4472 = vbcast.lane.b32.xlu1 %v24260_v23, 344  ;;  %4468 = vbcast.lane.b32.xlu0 %v24260_v23, 336 }
 0x44b   : > { %vm17201_vm2 = vmpackc.low %vm2893_vm1, %vm2892_vm0  ;;  %v24313_v57 = vpop.f32.mrb[236].mxu0 }
 0x44c   : > { %27262 = vst [vmem:[#allocation233_spill] sm:$0xff] %v24313_v57  ;;  %v24316_v14 = vpop.f32.mrb[237].mxu0  ;;  %21352 = vmatprep.mubr.msk.bf16.mxu0 %vm17201_vm2, %v22390_v52  ;;  %v1861_v28 = vpop.permute.xlu1 %1860 }
 0x44d   : > { %27263 = vst [vmem:[#allocation234_spill] sm:$0xff] %v24316_v14  ;;  %vm2895_vm3 = vcmp.eq.s32.totalorder %v22942_v37, %v1861_v28  ;;  %v24320_v26 = vpop.f32.mrb[238].mxu0  ;;  %v1857_v32 = vpop.permute.xlu0 %1856 }
 0x44e   : > { %27264 = vst [vmem:[#allocation235_spill] sm:$0xff] %v24320_v26  ;;  %vm2894_vm5 = vcmp.eq.s32.totalorder %v22942_v37, %v1857_v32  ;;  %v24323_v59 = vpop.f32.mrb[239].mxu0  ;;  %4480 = vbcast.lane.b32.xlu1 %v24260_v23, 360  ;;  %4476 = vbcast.lane.b32.xlu0 %v24260_v23, 352  ;;  %v24336_v32 = vrot.slane %v22825_v47, %v22666_v29 }
 0x44f   : > { %27265 = vst [vmem:[#allocation236_spill] sm:$0xff] %v24323_v59  ;;  %vm17203_vm8 = vmpackc.low %vm2895_vm3, %vm2894_vm5 }
 0x450   : > { %21353 = vmatmul.mubr.msk.bf16.gmra.mrb[88].mxu0 %vm17203_vm8, %v22390_v52  ;;  %v1869_v14 = vpop.permute.xlu1 %1868 }
 0x451   : > { %vm2897_vm9 = vcmp.eq.s32.totalorder %v22942_v37, %v1869_v14  ;;  %v1865_v57 = vpop.permute.xlu0 %1864 }
 0x452   : > { %vm2896_vm7 = vcmp.eq.s32.totalorder %v22942_v37, %v1865_v57  ;;  %4488 = vbcast.lane.b32.xlu1 %v24260_v23, 376  ;;  %4484 = vbcast.lane.b32.xlu0 %v24260_v23, 368 }
 0x453   : > { %vm17205_vm10 = vmpackc.low %vm2897_vm9, %vm2896_vm7  ;;  %v24331_v28 = vpop.f32.mrb[240].mxu0 }
 0x454   : > { %v24338_v59 = vpop.f32.mrb[241].mxu0  ;;  %21356 = vmatprep.mubr.msk.bf16.mxu0 %vm17205_vm10, %v22390_v52  ;;  %v1877_v26 = vpop.permute.xlu1 %1876 }
 0x455   : > { %vm2899_vm12 = vcmp.eq.s32.totalorder %v22942_v37, %v1877_v26  ;;  %v24342_v14 = vpop.f32.mrb[242].mxu0  ;;  %v1873_v57 = vpop.permute.xlu0 %1872 }
 0x456   : > { %27266 = vst [vmem:[#allocation237_spill] sm:$0xff] %v24342_v14  ;;  %vm2898_vm4 = vcmp.eq.s32.totalorder %v22942_v37, %v1873_v57  ;;  %v24345_v50 = vpop.f32.mrb[243].mxu0  ;;  %4499 = vbcast.lane.b32.xlu1 %v24336_v32, 264  ;;  %4495 = vbcast.lane.b32.xlu0 %v24336_v32, 256 }
 0x457   : > { %27267 = vst [vmem:[#allocation238_spill] sm:$0xff] %v24345_v50  ;;  %vm17207_vm6 = vmpackc.low %vm2899_vm12, %vm2898_vm4 }
 0x458   : > { %21357 = vmatmul.mubr.msk.bf16.gmra.mrb[92].mxu0 %vm17207_vm6, %v22390_v52  ;;  %v1888_v47 = vpop.permute.xlu1 %1887 }
 0x459   : > { %vm2901_vm11 = vcmp.eq.s32.totalorder %v22942_v37, %v1888_v47  ;;  %v1884_v23 = vpop.permute.xlu0 %1883 }
 0x45a   : > { %vm2900_vm13 = vcmp.eq.s32.totalorder %v22942_v37, %v1884_v23  ;;  %4507 = vbcast.lane.b32.xlu1 %v24336_v32, 280  ;;  %4503 = vbcast.lane.b32.xlu0 %v24336_v32, 272 }
 0x45b   : > { %vm17209_vm14 = vmpackc.low %vm2901_vm11, %vm2900_vm13  ;;  %v24353_v26 = vpop.f32.mrb[244].mxu0 }
 0x45c   : > { %27268 = vst [vmem:[#allocation239_spill] sm:$0xff] %v24353_v26  ;;  %v24356_v57 = vpop.f32.mrb[245].mxu0  ;;  %21360 = vmatprep.mubr.msk.bf16.mxu0 %vm17209_vm14, %v22390_v52  ;;  %v1896_v50 = vpop.permute.xlu1 %1895 }
 0x45d   : > { %27269 = vst [vmem:[#allocation240_spill] sm:$0xff] %v24356_v57  ;;  %vm2903_vm15 = vcmp.eq.s32.totalorder %v22942_v37, %v1896_v50  ;;  %v24360_v14 = vpop.f32.mrb[246].mxu0  ;;  %v1892_v47 = vpop.permute.xlu0 %1891 }
 0x45e   : > { %27270 = vst [vmem:[#allocation241_spill] sm:$0xff] %v24360_v14  ;;  %vm2902_vm1 = vcmp.eq.s32.totalorder %v22942_v37, %v1892_v47  ;;  %v24363_v23 = vpop.f32.mrb[247].mxu0  ;;  %4515 = vbcast.lane.b32.xlu1 %v24336_v32, 296  ;;  %4511 = vbcast.lane.b32.xlu0 %v24336_v32, 288 }
 0x45f   : > { %27271 = vst [vmem:[#allocation242_spill] sm:$0xff] %v24363_v23  ;;  %vm17211_vm0 = vmpackc.low %vm2903_vm15, %vm2902_vm1 }
 0x460   : > { %21361 = vmatmul.mubr.msk.bf16.gmra.mrb[96].mxu0 %vm17211_vm0, %v22390_v52  ;;  %v1904_v57 = vpop.permute.xlu1 %1903 }
 0x461   : > { %vm2905_vm2 = vcmp.eq.s32.totalorder %v22942_v37, %v1904_v57  ;;  %v1900_v26 = vpop.permute.xlu0 %1899 }
 0x462   : > { %vm2904_vm3 = vcmp.eq.s32.totalorder %v22942_v37, %v1900_v26  ;;  %4523 = vbcast.lane.b32.xlu1 %v24336_v32, 312  ;;  %4519 = vbcast.lane.b32.xlu0 %v24336_v32, 304 }
 0x463   : > { %vm17213_vm5 = vmpackc.low %vm2905_vm2, %vm2904_vm3  ;;  %v24371_v50 = vpop.f32.mrb[248].mxu0 }
 0x464   : > { %27272 = vst [vmem:[#allocation243_spill] sm:$0xff] %v24371_v50  ;;  %v24374_v47 = vpop.f32.mrb[249].mxu0  ;;  %21364 = vmatprep.mubr.msk.bf16.mxu0 %vm17213_vm5, %v22390_v52  ;;  %v1912_v23 = vpop.permute.xlu1 %1911 }
 0x465   : > { %27273 = vst [vmem:[#allocation244_spill] sm:$0xff] %v24374_v47  ;;  %vm2907_vm8 = vcmp.eq.s32.totalorder %v22942_v37, %v1912_v23  ;;  %v24378_v14 = vpop.f32.mrb[250].mxu0  ;;  %v1908_v57 = vpop.permute.xlu0 %1907 }
 0x466   : > { %27274 = vst [vmem:[#allocation245_spill] sm:$0xff] %v24378_v14  ;;  %vm2906_vm9 = vcmp.eq.s32.totalorder %v22942_v37, %v1908_v57  ;;  %v24381_v26 = vpop.f32.mrb[251].mxu0  ;;  %4531 = vbcast.lane.b32.xlu1 %v24336_v32, 328  ;;  %4527 = vbcast.lane.b32.xlu0 %v24336_v32, 320 }
 0x467   : > { %27275 = vst [vmem:[#allocation246_spill] sm:$0xff] %v24381_v26  ;;  %vm17215_vm7 = vmpackc.low %vm2907_vm8, %vm2906_vm9 }
 0x468   : > { %21365 = vmatmul.mubr.msk.bf16.gmra.mrb[100].mxu0 %vm17215_vm7, %v22390_v52  ;;  %v1920_v47 = vpop.permute.xlu1 %1919 }
 0x469   : > { %vm2909_vm10 = vcmp.eq.s32.totalorder %v22942_v37, %v1920_v47  ;;  %v1916_v50 = vpop.permute.xlu0 %1915 }
 0x46a   : > { %vm2908_vm12 = vcmp.eq.s32.totalorder %v22942_v37, %v1916_v50  ;;  %4539 = vbcast.lane.b32.xlu1 %v24336_v32, 344  ;;  %4535 = vbcast.lane.b32.xlu0 %v24336_v32, 336 }
 0x46b   : > { %vm17217_vm4 = vmpackc.low %vm2909_vm10, %vm2908_vm12  ;;  %v24389_v23 = vpop.f32.mrb[252].mxu0 }
 0x46c   : > { %27276 = vst [vmem:[#allocation247_spill] sm:$0xff] %v24389_v23  ;;  %v24392_v57 = vpop.f32.mrb[253].mxu0  ;;  %21368 = vmatprep.mubr.msk.bf16.mxu0 %vm17217_vm4, %v22390_v52  ;;  %v1928_v26 = vpop.permute.xlu1 %1927 }
 0x46d   : > { %27277 = vst [vmem:[#allocation248_spill] sm:$0xff] %v24392_v57  ;;  %vm2911_vm6 = vcmp.eq.s32.totalorder %v22942_v37, %v1928_v26  ;;  %v24396_v14 = vpop.f32.mrb[254].mxu0  ;;  %v1924_v47 = vpop.permute.xlu0 %1923 }
 0x46e   : > { %27278 = vst [vmem:[#allocation249_spill] sm:$0xff] %v24396_v14  ;;  %vm2910_vm11 = vcmp.eq.s32.totalorder %v22942_v37, %v1924_v47  ;;  %v24399_v50 = vpop.f32.mrb[255].mxu0  ;;  %4547 = vbcast.lane.b32.xlu1 %v24336_v32, 360  ;;  %4543 = vbcast.lane.b32.xlu0 %v24336_v32, 352 }
 0x46f   : > { %27279 = vst [vmem:[#allocation250_spill] sm:$0xff] %v24399_v50  ;;  %vm17219_vm13 = vmpackc.low %vm2911_vm6, %vm2910_vm11 }
 0x470   : > { %21369 = vmatmul.mubr.msk.bf16.gmra.mrb[104].mxu0 %vm17219_vm13, %v22390_v52  ;;  %v1936_v57 = vpop.permute.xlu1 %1935 }
 0x471   : > { %vm2913_vm14 = vcmp.eq.s32.totalorder %v22942_v37, %v1936_v57  ;;  %v1932_v23 = vpop.permute.xlu0 %1931 }
 0x472   : > { %vm2912_vm15 = vcmp.eq.s32.totalorder %v22942_v37, %v1932_v23  ;;  %4555 = vbcast.lane.b32.xlu1 %v24336_v32, 376  ;;  %4551 = vbcast.lane.b32.xlu0 %v24336_v32, 368 }
 0x473   : > { %vm17221_vm1 = vmpackc.low %vm2913_vm14, %vm2912_vm15  ;;  %v24407_v26 = vpop.f32.mrb[0].mxu0 }
 0x474   : > { %27280 = vst [vmem:[#allocation251_spill] sm:$0xff] %v24407_v26  ;;  %v24410_v47 = vpop.f32.mrb[1].mxu0  ;;  %21372 = vmatprep.mubr.msk.bf16.mxu0 %vm17221_vm1, %v22390_v52  ;;  %v1944_v50 = vpop.permute.xlu1 %1943 }
 0x475   : > { %27281 = vst [vmem:[#allocation252_spill] sm:$0xff] %v24410_v47  ;;  %vm2915_vm0 = vcmp.eq.s32.totalorder %v22942_v37, %v1944_v50  ;;  %v24414_v14 = vpop.f32.mrb[2].mxu0  ;;  %v1940_v57 = vpop.permute.xlu0 %1939 }
 0x476   : > { %27282 = vst [vmem:[#allocation253_spill] sm:$0xff] %v24414_v14  ;;  %vm2914_vm2 = vcmp.eq.s32.totalorder %v22942_v37, %v1940_v57  ;;  %v24417_v23 = vpop.f32.mrb[3].mxu0  ;;  %4566 = vbcast.lane.b32.xlu1 %v22838_v53, 264  ;;  %4562 = vbcast.lane.b32.xlu0 %v22838_v53, 256 }
 0x477   : > { %27283 = vst [vmem:[#allocation254_spill] sm:$0xff] %v24417_v23  ;;  %vm17223_vm3 = vmpackc.low %vm2915_vm0, %vm2914_vm2 }
 0x478   : > { %21373 = vmatmul.mubr.msk.bf16.gmra.mrb[108].mxu0 %vm17223_vm3, %v22390_v52  ;;  %v1955_v32 = vpop.permute.xlu1 %1954 }
 0x479   : > { %vm2917_vm5 = vcmp.eq.s32.totalorder %v22942_v37, %v1955_v32  ;;  %v1951_v47 = vpop.permute.xlu0 %1950 }
 0x47a   : > { %vm2916_vm8 = vcmp.eq.s32.totalorder %v22942_v37, %v1951_v47  ;;  %4574 = vbcast.lane.b32.xlu1 %v22838_v53, 280  ;;  %4570 = vbcast.lane.b32.xlu0 %v22838_v53, 272 }
 0x47b   : > { %vm17225_vm9 = vmpackc.low %vm2917_vm5, %vm2916_vm8  ;;  %v24425_v50 = vpop.f32.mrb[4].mxu0 }
 0x47c   : > { %27284 = vst [vmem:[#allocation255_spill] sm:$0xff] %v24425_v50  ;;  %v24428_v57 = vpop.f32.mrb[5].mxu0  ;;  %21376 = vmatprep.mubr.msk.bf16.mxu0 %vm17225_vm9, %v22390_v52  ;;  %v1963_v23 = vpop.permute.xlu1 %1962 }
 0x47d   : > { %27285 = vst [vmem:[#allocation256_spill] sm:$0xff] %v24428_v57  ;;  %vm2919_vm7 = vcmp.eq.s32.totalorder %v22942_v37, %v1963_v23  ;;  %v24432_v14 = vpop.f32.mrb[6].mxu0  ;;  %v1959_v32 = vpop.permute.xlu0 %1958 }
 0x47e   : > { %27286 = vst [vmem:[#allocation257_spill] sm:$0xff] %v24432_v14  ;;  %vm2918_vm10 = vcmp.eq.s32.totalorder %v22942_v37, %v1959_v32  ;;  %v24435_v47 = vpop.f32.mrb[7].mxu0  ;;  %4582 = vbcast.lane.b32.xlu1 %v22838_v53, 296  ;;  %4578 = vbcast.lane.b32.xlu0 %v22838_v53, 288 }
 0x47f   : > { %27287 = vst [vmem:[#allocation258_spill] sm:$0xff] %v24435_v47  ;;  %vm17227_vm12 = vmpackc.low %vm2919_vm7, %vm2918_vm10 }
 0x480   : > { %21377 = vmatmul.mubr.msk.bf16.gmra.mrb[112].mxu0 %vm17227_vm12, %v22390_v52  ;;  %v1971_v57 = vpop.permute.xlu1 %1970 }
 0x481   : > { %vm2921_vm4 = vcmp.eq.s32.totalorder %v22942_v37, %v1971_v57  ;;  %v1967_v50 = vpop.permute.xlu0 %1966 }
 0x482   : > { %vm2920_vm6 = vcmp.eq.s32.totalorder %v22942_v37, %v1967_v50  ;;  %4590 = vbcast.lane.b32.xlu1 %v22838_v53, 312  ;;  %4586 = vbcast.lane.b32.xlu0 %v22838_v53, 304 }
 0x483   : > { %vm17229_vm11 = vmpackc.low %vm2921_vm4, %vm2920_vm6  ;;  %v24443_v23 = vpop.f32.mrb[8].mxu0 }
 0x484   : > { %27288 = vst [vmem:[#allocation259_spill] sm:$0xff] %v24443_v23  ;;  %v24446_v32 = vpop.f32.mrb[9].mxu0  ;;  %21380 = vmatprep.mubr.msk.bf16.mxu0 %vm17229_vm11, %v22390_v52  ;;  %v1979_v47 = vpop.permute.xlu1 %1978 }
 0x485   : > { %27289 = vst [vmem:[#allocation260_spill] sm:$0xff] %v24446_v32  ;;  %vm2923_vm13 = vcmp.eq.s32.totalorder %v22942_v37, %v1979_v47  ;;  %v24450_v14 = vpop.f32.mrb[10].mxu0  ;;  %v1975_v57 = vpop.permute.xlu0 %1974 }
 0x486   : > { %27290 = vst [vmem:[#allocation261_spill] sm:$0xff] %v24450_v14  ;;  %vm2922_vm14 = vcmp.eq.s32.totalorder %v22942_v37, %v1975_v57  ;;  %v24453_v50 = vpop.f32.mrb[11].mxu0  ;;  %4598 = vbcast.lane.b32.xlu1 %v22838_v53, 328  ;;  %4594 = vbcast.lane.b32.xlu0 %v22838_v53, 320 }
 0x487   : > { %27291 = vst [vmem:[#allocation262_spill] sm:$0xff] %v24453_v50  ;;  %vm17231_vm15 = vmpackc.low %vm2923_vm13, %vm2922_vm14 }
 0x488   : > { %21381 = vmatmul.mubr.msk.bf16.gmra.mrb[116].mxu0 %vm17231_vm15, %v22390_v52  ;;  %v4366_v32 = vpop.permute.xlu1 %4365 }
 0x489   : > { %v4362_v23 = vpop.permute.xlu0 %4361  ;;  %vm6501_vm1 = vcmp.eq.s32.totalorder %v22942_v37, %v4366_v32 }
 0x48a   : > { %4606 = vbcast.lane.b32.xlu1 %v22838_v53, 344  ;;  %vm6500_vm0 = vcmp.eq.s32.totalorder %v22942_v37, %v4362_v23  ;;  %4602 = vbcast.lane.b32.xlu0 %v22838_v53, 336 }
 0x48b   : > { %v24461_v47 = vpop.f32.mrb[12].mxu0  ;;  %vm16337_vm2 = vmpackc.low %vm6501_vm1, %vm6500_vm0 }
 0x48c   : > { %20480 = vmatprep.mubr.msk.bf16.mxu1 %vm16337_vm2, %v22390_v52  ;;  %v24465_v57 = vpop.f32.mrb[13].mxu0  ;;  %v4374_v50 = vpop.permute.xlu1 %4373 }
 0x48d   : > { %27292 = vst [vmem:[#allocation263_spill] sm:$0xff] %v24465_v57  ;;  %vm6503_vm3 = vcmp.eq.s32.totalorder %v22942_v37, %v4374_v50  ;;  %v24468_v14 = vpop.f32.mrb[14].mxu0  ;;  %v4370_v26 = vpop.permute.xlu0 %4369 }
 0x48e   : > { %27293 = vst [vmem:[#allocation264_spill] sm:$0xff] %v24468_v14  ;;  %vm6502_vm5 = vcmp.eq.s32.totalorder %v22942_v37, %v4370_v26  ;;  %v24471_v32 = vpop.f32.mrb[15].mxu0  ;;  %4614 = vbcast.lane.b32.xlu1 %v22838_v53, 360  ;;  %4610 = vbcast.lane.b32.xlu0 %v22838_v53, 352 }
 0x48f   : > { %27294 = vst [vmem:[#allocation265_spill] sm:$0xff] %v24471_v32  ;;  %vm16339_vm8 = vmpackc.low %vm6503_vm3, %vm6502_vm5 }
 0x490   : > { %20481 = vmatmul.mubr.msk.bf16.vlgmr.msra.gmra.mrb[0].mxu1 %vm16339_vm8, %v22390_v52  ;;  %v4382_v23 = vpop.permute.xlu1 %4381 }
 0x491   : > { %vm6505_vm9 = vcmp.eq.s32.totalorder %v22942_v37, %v4382_v23  ;;  %v4378_v57 = vpop.permute.xlu0 %4377 }
 0x492   : > { %vm6504_vm7 = vcmp.eq.s32.totalorder %v22942_v37, %v4378_v57  ;;  %4622 = vbcast.lane.b32.xlu1 %v22838_v53, 376  ;;  %4618 = vbcast.lane.b32.xlu0 %v22838_v53, 368 }
 0x493   : > { %vm16341_vm10 = vmpackc.low %vm6505_vm9, %vm6504_vm7  ;;  %v24479_v50 = vpop.f32.mrb[16].mxu0 }
 0x494   : > { %20484 = vmatprep.mubr.msk.bf16.mxu1 %vm16341_vm10, %v22390_v52  ;;  %v24483_v26 = vpop.f32.mrb[17].mxu0  ;;  %v4390_v32 = vpop.permute.xlu1 %4389 }
 0x495   : > { %27295 = vst [vmem:[#allocation266_spill] sm:$0xff] %v24483_v26  ;;  %vm6507_vm12 = vcmp.eq.s32.totalorder %v22942_v37, %v4390_v32  ;;  %v24486_v14 = vpop.f32.mrb[18].mxu0  ;;  %v4386_v23 = vpop.permute.xlu0 %4385 }
 0x496   : > { %27296 = vst [vmem:[#allocation267_spill] sm:$0xff] %v24486_v14  ;;  %vm6506_vm4 = vcmp.eq.s32.totalorder %v22942_v37, %v4386_v23  ;;  %v24489_v57 = vpop.f32.mrb[19].mxu0  ;;  %4633 = vbcast.lane.b32.xlu1 %v22843_v34, 264  ;;  %4629 = vbcast.lane.b32.xlu0 %v22843_v34, 256 }
 0x497   : > { %27297 = vst [vmem:[#allocation268_spill] sm:$0xff] %v24489_v57  ;;  %vm16343_vm6 = vmpackc.low %vm6507_vm12, %vm6506_vm4 }
 0x498   : > { %20485 = vmatmul.mubr.msk.bf16.gmra.mrb[4].mxu1 %vm16343_vm6, %v22390_v52  ;;  %v4398_v53 = vpop.permute.xlu1 %4397 }
 0x499   : > { %vm6509_vm11 = vcmp.eq.s32.totalorder %v22942_v37, %v4398_v53  ;;  %v4394_v26 = vpop.permute.xlu0 %4393 }
 0x49a   : > { %vm6508_vm13 = vcmp.eq.s32.totalorder %v22942_v37, %v4394_v26  ;;  %4641 = vbcast.lane.b32.xlu1 %v22843_v34, 280  ;;  %4637 = vbcast.lane.b32.xlu0 %v22843_v34, 272 }
 0x49b   : > { %vm16345_vm14 = vmpackc.low %vm6509_vm11, %vm6508_vm13  ;;  %v24497_v32 = vpop.f32.mrb[20].mxu0 }
 0x49c   : > { %27298 = vst [vmem:[#allocation269_spill] sm:$0xff] %v24497_v32  ;;  %20488 = vmatprep.mubr.msk.bf16.mxu1 %vm16345_vm14, %v22390_v52  ;;  %v24501_v23 = vpop.f32.mrb[21].mxu0  ;;  %v4406_v57 = vpop.permute.xlu1 %4405 }
 0x49d   : > { %27299 = vst [vmem:[#allocation270_spill] sm:$0xff] %v24501_v23  ;;  %vm6511_vm15 = vcmp.eq.s32.totalorder %v22942_v37, %v4406_v57  ;;  %v24504_v14 = vpop.f32.mrb[22].mxu0  ;;  %v4402_v53 = vpop.permute.xlu0 %4401 }
 0x49e   : > { %27300 = vst [vmem:[#allocation271_spill] sm:$0xff] %v24504_v14  ;;  %vm6510_vm1 = vcmp.eq.s32.totalorder %v22942_v37, %v4402_v53  ;;  %v24507_v26 = vpop.f32.mrb[23].mxu0  ;;  %4649 = vbcast.lane.b32.xlu1 %v22843_v34, 296  ;;  %4645 = vbcast.lane.b32.xlu0 %v22843_v34, 288 }
 0x49f   : > { %27301 = vst [vmem:[#allocation272_spill] sm:$0xff] %v24507_v26  ;;  %vm16347_vm0 = vmpackc.low %vm6511_vm15, %vm6510_vm1 }
 0x4a0   : > { %20489 = vmatmul.mubr.msk.bf16.gmra.mrb[8].mxu1 %vm16347_vm0, %v22390_v52  ;;  %v4414_v32 = vpop.permute.xlu1 %4413 }
 0x4a1   : > { %vm6513_vm2 = vcmp.eq.s32.totalorder %v22942_v37, %v4414_v32  ;;  %v4410_v23 = vpop.permute.xlu0 %4409 }
 0x4a2   : > { %vm6512_vm3 = vcmp.eq.s32.totalorder %v22942_v37, %v4410_v23  ;;  %4657 = vbcast.lane.b32.xlu1 %v22843_v34, 312  ;;  %4653 = vbcast.lane.b32.xlu0 %v22843_v34, 304 }
 0x4a3   : > { %vm16349_vm5 = vmpackc.low %vm6513_vm2, %vm6512_vm3  ;;  %v24515_v57 = vpop.f32.mrb[24].mxu0 }
 0x4a4   : > { %27302 = vst [vmem:[#allocation273_spill] sm:$0xff] %v24515_v57  ;;  %20492 = vmatprep.mubr.msk.bf16.mxu1 %vm16349_vm5, %v22390_v52  ;;  %v24519_v53 = vpop.f32.mrb[25].mxu0  ;;  %v4422_v26 = vpop.permute.xlu1 %4421 }
 0x4a5   : > { %27303 = vst [vmem:[#allocation274_spill] sm:$0xff] %v24519_v53  ;;  %vm6515_vm8 = vcmp.eq.s32.totalorder %v22942_v37, %v4422_v26  ;;  %v24522_v14 = vpop.f32.mrb[26].mxu0  ;;  %v4418_v32 = vpop.permute.xlu0 %4417 }
 0x4a6   : > { %27304 = vst [vmem:[#allocation275_spill] sm:$0xff] %v24522_v14  ;;  %vm6514_vm9 = vcmp.eq.s32.totalorder %v22942_v37, %v4418_v32  ;;  %v24525_v23 = vpop.f32.mrb[27].mxu0  ;;  %4665 = vbcast.lane.b32.xlu1 %v22843_v34, 328  ;;  %4661 = vbcast.lane.b32.xlu0 %v22843_v34, 320 }
 0x4a7   : > { %27305 = vst [vmem:[#allocation276_spill] sm:$0xff] %v24525_v23  ;;  %vm16351_vm7 = vmpackc.low %vm6515_vm8, %vm6514_vm9 }
 0x4a8   : > { %20493 = vmatmul.mubr.msk.bf16.gmra.mrb[12].mxu1 %vm16351_vm7, %v22390_v52  ;;  %v4433_v57 = vpop.permute.xlu1 %4432 }
 0x4a9   : > { %vm6517_vm10 = vcmp.eq.s32.totalorder %v22942_v37, %v4433_v57  ;;  %v4429_v53 = vpop.permute.xlu0 %4428 }
 0x4aa   : > { %vm6516_vm12 = vcmp.eq.s32.totalorder %v22942_v37, %v4429_v53  ;;  %4673 = vbcast.lane.b32.xlu1 %v22843_v34, 344  ;;  %4669 = vbcast.lane.b32.xlu0 %v22843_v34, 336 }
 0x4ab   : > { %vm16353_vm4 = vmpackc.low %vm6517_vm10, %vm6516_vm12  ;;  %v24533_v26 = vpop.f32.mrb[28].mxu0 }
 0x4ac   : > { %27306 = vst [vmem:[#allocation277_spill] sm:$0xff] %v24533_v26  ;;  %20496 = vmatprep.mubr.msk.bf16.mxu1 %vm16353_vm4, %v22390_v52  ;;  %v24537_v32 = vpop.f32.mrb[29].mxu0  ;;  %v4441_v23 = vpop.permute.xlu1 %4440 }
 0x4ad   : > { %27307 = vst [vmem:[#allocation278_spill] sm:$0xff] %v24537_v32  ;;  %vm6519_vm6 = vcmp.eq.s32.totalorder %v22942_v37, %v4441_v23  ;;  %v24540_v14 = vpop.f32.mrb[30].mxu0  ;;  %v4437_v57 = vpop.permute.xlu0 %4436 }
 0x4ae   : > { %27308 = vst [vmem:[#allocation279_spill] sm:$0xff] %v24540_v14  ;;  %vm6518_vm11 = vcmp.eq.s32.totalorder %v22942_v37, %v4437_v57  ;;  %v24543_v53 = vpop.f32.mrb[31].mxu0  ;;  %4681 = vbcast.lane.b32.xlu1 %v22843_v34, 360  ;;  %4677 = vbcast.lane.b32.xlu0 %v22843_v34, 352 }
 0x4af   : > { %27309 = vst [vmem:[#allocation280_spill] sm:$0xff] %v24543_v53  ;;  %vm16355_vm13 = vmpackc.low %vm6519_vm6, %vm6518_vm11 }
 0x4b0   : > { %20497 = vmatmul.mubr.msk.bf16.gmra.mrb[16].mxu1 %vm16355_vm13, %v22390_v52  ;;  %v4449_v26 = vpop.permute.xlu1 %4448 }
 0x4b1   : > { %vm6521_vm14 = vcmp.eq.s32.totalorder %v22942_v37, %v4449_v26  ;;  %v4445_v32 = vpop.permute.xlu0 %4444 }
 0x4b2   : > { %vm6520_vm15 = vcmp.eq.s32.totalorder %v22942_v37, %v4445_v32  ;;  %4689 = vbcast.lane.b32.xlu1 %v22843_v34, 376  ;;  %4685 = vbcast.lane.b32.xlu0 %v22843_v34, 368 }
 0x4b3   : > { %vm16357_vm1 = vmpackc.low %vm6521_vm14, %vm6520_vm15  ;;  %v24551_v23 = vpop.f32.mrb[32].mxu0 }
 0x4b4   : > { %20500 = vmatprep.mubr.msk.bf16.mxu1 %vm16357_vm1, %v22390_v52  ;;  %v24555_v57 = vpop.f32.mrb[33].mxu0  ;;  %v4457_v53 = vpop.permute.xlu1 %4456 }
 0x4b5   : > { %27310 = vst [vmem:[#allocation281_spill] sm:$0xff] %v24555_v57  ;;  %vm6523_vm0 = vcmp.eq.s32.totalorder %v22942_v37, %v4457_v53  ;;  %v24558_v14 = vpop.f32.mrb[34].mxu0  ;;  %v4453_v26 = vpop.permute.xlu0 %4452 }
 0x4b6   : > { %27311 = vst [vmem:[#allocation282_spill] sm:$0xff] %v24558_v14  ;;  %vm6522_vm2 = vcmp.eq.s32.totalorder %v22942_v37, %v4453_v26  ;;  %v24561_v32 = vpop.f32.mrb[35].mxu0  ;;  %4700 = vbcast.lane.b32.xlu1 %v22847_v30, 264  ;;  %4696 = vbcast.lane.b32.xlu0 %v22847_v30, 256 }
 0x4b7   : > { %27312 = vst [vmem:[#allocation283_spill] sm:$0xff] %v24561_v32  ;;  %vm16359_vm3 = vmpackc.low %vm6523_vm0, %vm6522_vm2 }
 0x4b8   : > { %20501 = vmatmul.mubr.msk.bf16.gmra.mrb[20].mxu1 %vm16359_vm3, %v22390_v52  ;;  %v4465_v34 = vpop.permute.xlu1 %4464 }
 0x4b9   : > { %vm6525_vm5 = vcmp.eq.s32.totalorder %v22942_v37, %v4465_v34  ;;  %v4461_v57 = vpop.permute.xlu0 %4460 }
 0x4ba   : > { %vm6524_vm8 = vcmp.eq.s32.totalorder %v22942_v37, %v4461_v57  ;;  %4708 = vbcast.lane.b32.xlu1 %v22847_v30, 280  ;;  %4704 = vbcast.lane.b32.xlu0 %v22847_v30, 272 }
 0x4bb   : > { %vm16361_vm9 = vmpackc.low %vm6525_vm5, %vm6524_vm8  ;;  %v24569_v53 = vpop.f32.mrb[36].mxu0 }
 0x4bc   : > { %27313 = vst [vmem:[#allocation284_spill] sm:$0xff] %v24569_v53  ;;  %20504 = vmatprep.mubr.msk.bf16.mxu1 %vm16361_vm9, %v22390_v52  ;;  %v24573_v26 = vpop.f32.mrb[37].mxu0  ;;  %v4473_v32 = vpop.permute.xlu1 %4472 }
 0x4bd   : > { %27314 = vst [vmem:[#allocation285_spill] sm:$0xff] %v24573_v26  ;;  %vm6527_vm7 = vcmp.eq.s32.totalorder %v22942_v37, %v4473_v32  ;;  %v24576_v14 = vpop.f32.mrb[38].mxu0  ;;  %v4469_v34 = vpop.permute.xlu0 %4468 }
 0x4be   : > { %27315 = vst [vmem:[#allocation286_spill] sm:$0xff] %v24576_v14  ;;  %vm6526_vm10 = vcmp.eq.s32.totalorder %v22942_v37, %v4469_v34  ;;  %v24579_v57 = vpop.f32.mrb[39].mxu0  ;;  %4716 = vbcast.lane.b32.xlu1 %v22847_v30, 296  ;;  %4712 = vbcast.lane.b32.xlu0 %v22847_v30, 288 }
 0x4bf   : > { %27316 = vst [vmem:[#allocation287_spill] sm:$0xff] %v24579_v57  ;;  %vm16363_vm12 = vmpackc.low %vm6527_vm7, %vm6526_vm10 }
 0x4c0   : > { %20505 = vmatmul.mubr.msk.bf16.gmra.mrb[24].mxu1 %vm16363_vm12, %v22390_v52  ;;  %v4481_v53 = vpop.permute.xlu1 %4480 }
 0x4c1   : > { %vm6529_vm4 = vcmp.eq.s32.totalorder %v22942_v37, %v4481_v53  ;;  %v4477_v26 = vpop.permute.xlu0 %4476 }
 0x4c2   : > { %vm6528_vm6 = vcmp.eq.s32.totalorder %v22942_v37, %v4477_v26  ;;  %4724 = vbcast.lane.b32.xlu1 %v22847_v30, 312  ;;  %4720 = vbcast.lane.b32.xlu0 %v22847_v30, 304 }
 0x4c3   : > { %vm16365_vm11 = vmpackc.low %vm6529_vm4, %vm6528_vm6  ;;  %v24587_v32 = vpop.f32.mrb[40].mxu0 }
 0x4c4   : > { %27317 = vst [vmem:[#allocation288_spill] sm:$0xff] %v24587_v32  ;;  %20508 = vmatprep.mubr.msk.bf16.mxu1 %vm16365_vm11, %v22390_v52  ;;  %v24591_v34 = vpop.f32.mrb[41].mxu0  ;;  %v4489_v57 = vpop.permute.xlu1 %4488 }
 0x4c5   : > { %27318 = vst [vmem:[#allocation289_spill] sm:$0xff] %v24591_v34  ;;  %vm6531_vm13 = vcmp.eq.s32.totalorder %v22942_v37, %v4489_v57  ;;  %v24594_v14 = vpop.f32.mrb[42].mxu0  ;;  %v4485_v53 = vpop.permute.xlu0 %4484 }
 0x4c6   : > { %27319 = vst [vmem:[#allocation290_spill] sm:$0xff] %v24594_v14  ;;  %vm6530_vm14 = vcmp.eq.s32.totalorder %v22942_v37, %v4485_v53  ;;  %v24597_v26 = vpop.f32.mrb[43].mxu0  ;;  %4732 = vbcast.lane.b32.xlu1 %v22847_v30, 328  ;;  %4728 = vbcast.lane.b32.xlu0 %v22847_v30, 320 }
 0x4c7   : > { %27320 = vst [vmem:[#allocation291_spill] sm:$0xff] %v24597_v26  ;;  %vm16367_vm15 = vmpackc.low %vm6531_vm13, %vm6530_vm14 }
 0x4c8   : > { %20509 = vmatmul.mubr.msk.bf16.gmra.mrb[28].mxu1 %vm16367_vm15, %v22390_v52  ;;  %v4500_v32 = vpop.permute.xlu1 %4499 }
 0x4c9   : > { %vm6533_vm1 = vcmp.eq.s32.totalorder %v22942_v37, %v4500_v32  ;;  %v4496_v34 = vpop.permute.xlu0 %4495 }
 0x4ca   : > { %vm6532_vm0 = vcmp.eq.s32.totalorder %v22942_v37, %v4496_v34  ;;  %4740 = vbcast.lane.b32.xlu1 %v22847_v30, 344  ;;  %4736 = vbcast.lane.b32.xlu0 %v22847_v30, 336 }
 0x4cb   : > { %vm16369_vm2 = vmpackc.low %vm6533_vm1, %vm6532_vm0  ;;  %v24605_v57 = vpop.f32.mrb[44].mxu0 }
 0x4cc   : > { %27321 = vst [vmem:[#allocation292_spill] sm:$0xff] %v24605_v57  ;;  %20512 = vmatprep.mubr.msk.bf16.mxu1 %vm16369_vm2, %v22390_v52  ;;  %v24609_v53 = vpop.f32.mrb[45].mxu0  ;;  %v4508_v26 = vpop.permute.xlu1 %4507 }
 0x4cd   : > { %27322 = vst [vmem:[#allocation293_spill] sm:$0xff] %v24609_v53  ;;  %vm6535_vm3 = vcmp.eq.s32.totalorder %v22942_v37, %v4508_v26  ;;  %v24612_v14 = vpop.f32.mrb[46].mxu0  ;;  %v4504_v32 = vpop.permute.xlu0 %4503 }
 0x4ce   : > { %27323 = vst [vmem:[#allocation294_spill] sm:$0xff] %v24612_v14  ;;  %vm6534_vm5 = vcmp.eq.s32.totalorder %v22942_v37, %v4504_v32  ;;  %v24615_v34 = vpop.f32.mrb[47].mxu0  ;;  %4748 = vbcast.lane.b32.xlu1 %v22847_v30, 360  ;;  %4744 = vbcast.lane.b32.xlu0 %v22847_v30, 352 }
 0x4cf   : > { %27324 = vst [vmem:[#allocation295_spill] sm:$0xff] %v24615_v34  ;;  %vm16371_vm8 = vmpackc.low %vm6535_vm3, %vm6534_vm5 }
 0x4d0   : > { %20513 = vmatmul.mubr.msk.bf16.gmra.mrb[32].mxu1 %vm16371_vm8, %v22390_v52  ;;  %v4516_v57 = vpop.permute.xlu1 %4515 }
 0x4d1   : > { %vm6537_vm9 = vcmp.eq.s32.totalorder %v22942_v37, %v4516_v57  ;;  %v4512_v53 = vpop.permute.xlu0 %4511 }
 0x4d2   : > { %vm6536_vm7 = vcmp.eq.s32.totalorder %v22942_v37, %v4512_v53  ;;  %4756 = vbcast.lane.b32.xlu1 %v22847_v30, 376  ;;  %4752 = vbcast.lane.b32.xlu0 %v22847_v30, 368 }
 0x4d3   : > { %vm16373_vm10 = vmpackc.low %vm6537_vm9, %vm6536_vm7  ;;  %v24623_v26 = vpop.f32.mrb[48].mxu0 }
 0x4d4   : > { %27325 = vst [vmem:[#allocation296_spill] sm:$0xff] %v24623_v26  ;;  %20516 = vmatprep.mubr.msk.bf16.mxu1 %vm16373_vm10, %v22390_v52  ;;  %v24627_v32 = vpop.f32.mrb[49].mxu0  ;;  %v4524_v34 = vpop.permute.xlu1 %4523 }
 0x4d5   : > { %27326 = vst [vmem:[#allocation297_spill] sm:$0xff] %v24627_v32  ;;  %vm6539_vm12 = vcmp.eq.s32.totalorder %v22942_v37, %v4524_v34  ;;  %v24630_v14 = vpop.f32.mrb[50].mxu0  ;;  %v4520_v57 = vpop.permute.xlu0 %4519 }
 0x4d6   : > { %27327 = vst [vmem:[#allocation298_spill] sm:$0xff] %v24630_v14  ;;  %vm6538_vm4 = vcmp.eq.s32.totalorder %v22942_v37, %v4520_v57  ;;  %v24633_v53 = vpop.f32.mrb[51].mxu0  ;;  %4767 = vbcast.lane.b32.xlu1 %v22851_v48, 264  ;;  %4763 = vbcast.lane.b32.xlu0 %v22851_v48, 256 }
 0x4d7   : > { %27328 = vst [vmem:[#allocation299_spill] sm:$0xff] %v24633_v53  ;;  %vm16375_vm6 = vmpackc.low %vm6539_vm12, %vm6538_vm4 }
 0x4d8   : > { %20517 = vmatmul.mubr.msk.bf16.gmra.mrb[36].mxu1 %vm16375_vm6, %v22390_v52  ;;  %v4532_v30 = vpop.permute.xlu1 %4531 }
 0x4d9   : > { %vm6541_vm11 = vcmp.eq.s32.totalorder %v22942_v37, %v4532_v30  ;;  %v4528_v32 = vpop.permute.xlu0 %4527 }
 0x4da   : > { %vm6540_vm13 = vcmp.eq.s32.totalorder %v22942_v37, %v4528_v32  ;;  %4775 = vbcast.lane.b32.xlu1 %v22851_v48, 280  ;;  %4771 = vbcast.lane.b32.xlu0 %v22851_v48, 272 }
 0x4db   : > { %vm16377_vm14 = vmpackc.low %vm6541_vm11, %vm6540_vm13  ;;  %v24641_v34 = vpop.f32.mrb[52].mxu0 }
 0x4dc   : > { %27329 = vst [vmem:[#allocation300_spill] sm:$0xff] %v24641_v34  ;;  %20520 = vmatprep.mubr.msk.bf16.mxu1 %vm16377_vm14, %v22390_v52  ;;  %v24645_v57 = vpop.f32.mrb[53].mxu0  ;;  %v4540_v53 = vpop.permute.xlu1 %4539 }
 0x4dd   : > { %27330 = vst [vmem:[#allocation301_spill] sm:$0xff] %v24645_v57  ;;  %vm6543_vm15 = vcmp.eq.s32.totalorder %v22942_v37, %v4540_v53  ;;  %v24648_v14 = vpop.f32.mrb[54].mxu0  ;;  %v4536_v30 = vpop.permute.xlu0 %4535 }
 0x4de   : > { %27331 = vst [vmem:[#allocation302_spill] sm:$0xff] %v24648_v14  ;;  %vm6542_vm1 = vcmp.eq.s32.totalorder %v22942_v37, %v4536_v30  ;;  %v24651_v32 = vpop.f32.mrb[55].mxu0  ;;  %4783 = vbcast.lane.b32.xlu1 %v22851_v48, 296  ;;  %4779 = vbcast.lane.b32.xlu0 %v22851_v48, 288 }
 0x4df   : > { %27332 = vst [vmem:[#allocation303_spill] sm:$0xff] %v24651_v32  ;;  %vm16379_vm0 = vmpackc.low %vm6543_vm15, %vm6542_vm1 }
 0x4e0   : > { %20521 = vmatmul.mubr.msk.bf16.gmra.mrb[40].mxu1 %vm16379_vm0, %v22390_v52  ;;  %v4548_v34 = vpop.permute.xlu1 %4547 }
 0x4e1   : > { %vm6545_vm2 = vcmp.eq.s32.totalorder %v22942_v37, %v4548_v34  ;;  %v4544_v57 = vpop.permute.xlu0 %4543 }
 0x4e2   : > { %vm6544_vm3 = vcmp.eq.s32.totalorder %v22942_v37, %v4544_v57  ;;  %4791 = vbcast.lane.b32.xlu1 %v22851_v48, 312  ;;  %4787 = vbcast.lane.b32.xlu0 %v22851_v48, 304 }
 0x4e3   : > { %vm16381_vm5 = vmpackc.low %vm6545_vm2, %vm6544_vm3  ;;  %v24659_v53 = vpop.f32.mrb[56].mxu0 }
 0x4e4   : > { %27333 = vst [vmem:[#allocation304_spill] sm:$0xff] %v24659_v53  ;;  %20524 = vmatprep.mubr.msk.bf16.mxu1 %vm16381_vm5, %v22390_v52  ;;  %v24663_v30 = vpop.f32.mrb[57].mxu0  ;;  %v4556_v32 = vpop.permute.xlu1 %4555 }
 0x4e5   : > { %27334 = vst [vmem:[#allocation305_spill] sm:$0xff] %v24663_v30  ;;  %vm6547_vm8 = vcmp.eq.s32.totalorder %v22942_v37, %v4556_v32  ;;  %v24666_v14 = vpop.f32.mrb[58].mxu0  ;;  %v4552_v34 = vpop.permute.xlu0 %4551 }
 0x4e6   : > { %27335 = vst [vmem:[#allocation306_spill] sm:$0xff] %v24666_v14  ;;  %vm6546_vm9 = vcmp.eq.s32.totalorder %v22942_v37, %v4552_v34  ;;  %v24669_v57 = vpop.f32.mrb[59].mxu0  ;;  %4799 = vbcast.lane.b32.xlu1 %v22851_v48, 328  ;;  %4795 = vbcast.lane.b32.xlu0 %v22851_v48, 320 }
 0x4e7   : > { %27336 = vst [vmem:[#allocation307_spill] sm:$0xff] %v24669_v57  ;;  %vm16383_vm7 = vmpackc.low %vm6547_vm8, %vm6546_vm9 }
 0x4e8   : > { %20525 = vmatmul.mubr.msk.bf16.gmra.mrb[44].mxu1 %vm16383_vm7, %v22390_v52  ;;  %v4567_v53 = vpop.permute.xlu1 %4566 }
 0x4e9   : > { %vm6549_vm10 = vcmp.eq.s32.totalorder %v22942_v37, %v4567_v53  ;;  %v4563_v30 = vpop.permute.xlu0 %4562 }
 0x4ea   : > { %vm6548_vm12 = vcmp.eq.s32.totalorder %v22942_v37, %v4563_v30  ;;  %4807 = vbcast.lane.b32.xlu1 %v22851_v48, 344  ;;  %4803 = vbcast.lane.b32.xlu0 %v22851_v48, 336 }
 0x4eb   : > { %vm16385_vm4 = vmpackc.low %vm6549_vm10, %vm6548_vm12  ;;  %v24677_v32 = vpop.f32.mrb[60].mxu0 }
 0x4ec   : > { %27337 = vst [vmem:[#allocation308_spill] sm:$0xff] %v24677_v32  ;;  %20528 = vmatprep.mubr.msk.bf16.mxu1 %vm16385_vm4, %v22390_v52  ;;  %v24681_v34 = vpop.f32.mrb[61].mxu0  ;;  %v4575_v57 = vpop.permute.xlu1 %4574 }
 0x4ed   : > { %27338 = vst [vmem:[#allocation309_spill] sm:$0xff] %v24681_v34  ;;  %vm6551_vm6 = vcmp.eq.s32.totalorder %v22942_v37, %v4575_v57  ;;  %v24684_v14 = vpop.f32.mrb[62].mxu0  ;;  %v4571_v53 = vpop.permute.xlu0 %4570 }
 0x4ee   : > { %27339 = vst [vmem:[#allocation310_spill] sm:$0xff] %v24684_v14  ;;  %vm6550_vm11 = vcmp.eq.s32.totalorder %v22942_v37, %v4571_v53  ;;  %v24687_v30 = vpop.f32.mrb[63].mxu0  ;;  %4815 = vbcast.lane.b32.xlu1 %v22851_v48, 360  ;;  %4811 = vbcast.lane.b32.xlu0 %v22851_v48, 352 }
 0x4ef   : > { %27340 = vst [vmem:[#allocation311_spill] sm:$0xff] %v24687_v30  ;;  %vm16387_vm13 = vmpackc.low %vm6551_vm6, %vm6550_vm11 }
 0x4f0   : > { %20529 = vmatmul.mubr.msk.bf16.gmra.mrb[48].mxu1 %vm16387_vm13, %v22390_v52  ;;  %v4583_v32 = vpop.permute.xlu1 %4582 }
 0x4f1   : > { %vm6553_vm14 = vcmp.eq.s32.totalorder %v22942_v37, %v4583_v32  ;;  %v4579_v34 = vpop.permute.xlu0 %4578 }
 0x4f2   : > { %vm6552_vm15 = vcmp.eq.s32.totalorder %v22942_v37, %v4579_v34  ;;  %4823 = vbcast.lane.b32.xlu1 %v22851_v48, 376  ;;  %4819 = vbcast.lane.b32.xlu0 %v22851_v48, 368 }
 0x4f3   : > { %vm16389_vm1 = vmpackc.low %vm6553_vm14, %vm6552_vm15  ;;  %v24695_v57 = vpop.f32.mrb[64].mxu0 }
 0x4f4   : > { %27341 = vst [vmem:[#allocation312_spill] sm:$0xff] %v24695_v57  ;;  %20532 = vmatprep.mubr.msk.bf16.mxu1 %vm16389_vm1, %v22390_v52  ;;  %v24699_v53 = vpop.f32.mrb[65].mxu0  ;;  %v4591_v30 = vpop.permute.xlu1 %4590 }
 0x4f5   : > { %27342 = vst [vmem:[#allocation313_spill] sm:$0xff] %v24699_v53  ;;  %vm6555_vm0 = vcmp.eq.s32.totalorder %v22942_v37, %v4591_v30  ;;  %v24702_v14 = vpop.f32.mrb[66].mxu0  ;;  %v4587_v32 = vpop.permute.xlu0 %4586 }
 0x4f6   : > { %27343 = vst [vmem:[#allocation314_spill] sm:$0xff] %v24702_v14  ;;  %vm6554_vm2 = vcmp.eq.s32.totalorder %v22942_v37, %v4587_v32  ;;  %v24705_v34 = vpop.f32.mrb[67].mxu0  ;;  %4834 = vbcast.lane.b32.xlu1 %v22855_v55, 264  ;;  %4830 = vbcast.lane.b32.xlu0 %v22855_v55, 256 }
 0x4f7   : > { %27344 = vst [vmem:[#allocation315_spill] sm:$0xff] %v24705_v34  ;;  %vm16391_vm3 = vmpackc.low %vm6555_vm0, %vm6554_vm2 }
 0x4f8   : > { %20533 = vmatmul.mubr.msk.bf16.gmra.mrb[52].mxu1 %vm16391_vm3, %v22390_v52  ;;  %v4599_v48 = vpop.permute.xlu1 %4598 }
 0x4f9   : > { %vm6557_vm5 = vcmp.eq.s32.totalorder %v22942_v37, %v4599_v48  ;;  %v4595_v53 = vpop.permute.xlu0 %4594 }
 0x4fa   : > { %vm6556_vm8 = vcmp.eq.s32.totalorder %v22942_v37, %v4595_v53  ;;  %4842 = vbcast.lane.b32.xlu1 %v22855_v55, 280  ;;  %4838 = vbcast.lane.b32.xlu0 %v22855_v55, 272 }
 0x4fb   : > { %vm16393_vm9 = vmpackc.low %vm6557_vm5, %vm6556_vm8  ;;  %v24713_v30 = vpop.f32.mrb[68].mxu0 }
 0x4fc   : > { %27345 = vst [vmem:[#allocation316_spill] sm:$0xff] %v24713_v30  ;;  %20536 = vmatprep.mubr.msk.bf16.mxu1 %vm16393_vm9, %v22390_v52  ;;  %v24717_v32 = vpop.f32.mrb[69].mxu0  ;;  %v4607_v34 = vpop.permute.xlu1 %4606 }
 0x4fd   : > { %27346 = vst [vmem:[#allocation317_spill] sm:$0xff] %v24717_v32  ;;  %vm6559_vm7 = vcmp.eq.s32.totalorder %v22942_v37, %v4607_v34  ;;  %v24720_v14 = vpop.f32.mrb[70].mxu0  ;;  %v4603_v48 = vpop.permute.xlu0 %4602 }
 0x4fe   : > { %27347 = vst [vmem:[#allocation318_spill] sm:$0xff] %v24720_v14  ;;  %vm6558_vm10 = vcmp.eq.s32.totalorder %v22942_v37, %v4603_v48  ;;  %v24723_v53 = vpop.f32.mrb[71].mxu0  ;;  %4850 = vbcast.lane.b32.xlu1 %v22855_v55, 296  ;;  %4846 = vbcast.lane.b32.xlu0 %v22855_v55, 288 }
 0x4ff   : > { %27348 = vst [vmem:[#allocation319_spill] sm:$0xff] %v24723_v53  ;;  %vm16395_vm12 = vmpackc.low %vm6559_vm7, %vm6558_vm10 }
 0x500   : > { %20537 = vmatmul.mubr.msk.bf16.gmra.mrb[56].mxu1 %vm16395_vm12, %v22390_v52  ;;  %v4615_v30 = vpop.permute.xlu1 %4614 }
 0x501   : > { %vm6561_vm4 = vcmp.eq.s32.totalorder %v22942_v37, %v4615_v30  ;;  %v4611_v32 = vpop.permute.xlu0 %4610 }
 0x502   : > { %vm6560_vm6 = vcmp.eq.s32.totalorder %v22942_v37, %v4611_v32  ;;  %4858 = vbcast.lane.b32.xlu1 %v22855_v55, 312  ;;  %4854 = vbcast.lane.b32.xlu0 %v22855_v55, 304 }
 0x503   : > { %vm16397_vm11 = vmpackc.low %vm6561_vm4, %vm6560_vm6  ;;  %v24731_v34 = vpop.f32.mrb[72].mxu0 }
 0x504   : > { %27349 = vst [vmem:[#allocation320_spill] sm:$0xff] %v24731_v34  ;;  %20540 = vmatprep.mubr.msk.bf16.mxu1 %vm16397_vm11, %v22390_v52  ;;  %v24735_v48 = vpop.f32.mrb[73].mxu0  ;;  %v4623_v53 = vpop.permute.xlu1 %4622 }
 0x505   : > { %27350 = vst [vmem:[#allocation321_spill] sm:$0xff] %v24735_v48  ;;  %vm6563_vm13 = vcmp.eq.s32.totalorder %v22942_v37, %v4623_v53  ;;  %v24738_v14 = vpop.f32.mrb[74].mxu0  ;;  %v4619_v30 = vpop.permute.xlu0 %4618 }
 0x506   : > { %27351 = vst [vmem:[#allocation322_spill] sm:$0xff] %v24738_v14  ;;  %vm6562_vm14 = vcmp.eq.s32.totalorder %v22942_v37, %v4619_v30  ;;  %v24741_v32 = vpop.f32.mrb[75].mxu0  ;;  %4866 = vbcast.lane.b32.xlu1 %v22855_v55, 328  ;;  %4862 = vbcast.lane.b32.xlu0 %v22855_v55, 320 }
 0x507   : > { %27352 = vst [vmem:[#allocation323_spill] sm:$0xff] %v24741_v32  ;;  %vm16399_vm15 = vmpackc.low %vm6563_vm13, %vm6562_vm14 }
 0x508   : > { %20541 = vmatmul.mubr.msk.bf16.gmra.mrb[60].mxu1 %vm16399_vm15, %v22390_v52  ;;  %v4634_v34 = vpop.permute.xlu1 %4633 }
 0x509   : > { %vm6565_vm1 = vcmp.eq.s32.totalorder %v22942_v37, %v4634_v34  ;;  %v4630_v48 = vpop.permute.xlu0 %4629 }
 0x50a   : > { %vm6564_vm0 = vcmp.eq.s32.totalorder %v22942_v37, %v4630_v48  ;;  %4874 = vbcast.lane.b32.xlu1 %v22855_v55, 344  ;;  %4870 = vbcast.lane.b32.xlu0 %v22855_v55, 336 }
 0x50b   : > { %vm16401_vm2 = vmpackc.low %vm6565_vm1, %vm6564_vm0  ;;  %v24749_v53 = vpop.f32.mrb[76].mxu0 }
 0x50c   : > { %27353 = vst [vmem:[#allocation324_spill] sm:$0xff] %v24749_v53  ;;  %20544 = vmatprep.mubr.msk.bf16.mxu1 %vm16401_vm2, %v22390_v52  ;;  %v24753_v30 = vpop.f32.mrb[77].mxu0  ;;  %v4642_v32 = vpop.permute.xlu1 %4641 }
 0x50d   : > { %27354 = vst [vmem:[#allocation325_spill] sm:$0xff] %v24753_v30  ;;  %vm6567_vm3 = vcmp.eq.s32.totalorder %v22942_v37, %v4642_v32  ;;  %v24756_v14 = vpop.f32.mrb[78].mxu0  ;;  %v4638_v34 = vpop.permute.xlu0 %4637 }
 0x50e   : > { %27355 = vst [vmem:[#allocation326_spill] sm:$0xff] %v24756_v14  ;;  %vm6566_vm5 = vcmp.eq.s32.totalorder %v22942_v37, %v4638_v34  ;;  %v24759_v48 = vpop.f32.mrb[79].mxu0  ;;  %4882 = vbcast.lane.b32.xlu1 %v22855_v55, 360  ;;  %4878 = vbcast.lane.b32.xlu0 %v22855_v55, 352  ;;  %v24772_v34 = vrot.slane %v22829_v49, %v22652_v16 }
 0x50f   : > { %27356 = vst [vmem:[#allocation327_spill] sm:$0xff] %v24759_v48  ;;  %vm16403_vm8 = vmpackc.low %vm6567_vm3, %vm6566_vm5 }
 0x510   : > { %20545 = vmatmul.mubr.msk.bf16.gmra.mrb[64].mxu1 %vm16403_vm8, %v22390_v52  ;;  %v4650_v53 = vpop.permute.xlu1 %4649 }
 0x511   : > { %vm6569_vm9 = vcmp.eq.s32.totalorder %v22942_v37, %v4650_v53  ;;  %v4646_v30 = vpop.permute.xlu0 %4645 }
 0x512   : > { %vm6568_vm7 = vcmp.eq.s32.totalorder %v22942_v37, %v4646_v30  ;;  %4890 = vbcast.lane.b32.xlu1 %v22855_v55, 376  ;;  %4886 = vbcast.lane.b32.xlu0 %v22855_v55, 368 }
 0x513   : > { %vm16405_vm10 = vmpackc.low %vm6569_vm9, %vm6568_vm7  ;;  %v24767_v32 = vpop.f32.mrb[80].mxu0 }
 0x514   : > { %27357 = vst [vmem:[#allocation328_spill] sm:$0xff] %v24767_v32  ;;  %20548 = vmatprep.mubr.msk.bf16.mxu1 %vm16405_vm10, %v22390_v52  ;;  %v24775_v48 = vpop.f32.mrb[81].mxu0  ;;  %v4658_v14 = vpop.permute.xlu1 %4657 }
 0x515   : > { %27358 = vst [vmem:[#allocation329_spill] sm:$0xff] %v24775_v48  ;;  %vm6571_vm12 = vcmp.eq.s32.totalorder %v22942_v37, %v4658_v14  ;;  %v24778_v53 = vpop.f32.mrb[82].mxu0  ;;  %v4654_v30 = vpop.permute.xlu0 %4653 }
 0x516   : > { %27359 = vst [vmem:[#allocation330_spill] sm:$0xff] %v24778_v53  ;;  %vm6570_vm4 = vcmp.eq.s32.totalorder %v22942_v37, %v4654_v30  ;;  %v24781_v57 = vpop.f32.mrb[83].mxu0  ;;  %4901 = vbcast.lane.b32.xlu1 %v24772_v34, 264  ;;  %4897 = vbcast.lane.b32.xlu0 %v24772_v34, 256 }
 0x517   : > { %27360 = vst [vmem:[#allocation331_spill] sm:$0xff] %v24781_v57  ;;  %vm16407_vm6 = vmpackc.low %vm6571_vm12, %vm6570_vm4 }
 0x518   : > { %20549 = vmatmul.mubr.msk.bf16.gmra.mrb[68].mxu1 %vm16407_vm6, %v22390_v52  ;;  %v4666_v55 = vpop.permute.xlu1 %4665 }
 0x519   : > { %vm6573_vm11 = vcmp.eq.s32.totalorder %v22942_v37, %v4666_v55  ;;  %v4662_v48 = vpop.permute.xlu0 %4661 }
 0x51a   : > { %vm6572_vm13 = vcmp.eq.s32.totalorder %v22942_v37, %v4662_v48  ;;  %4909 = vbcast.lane.b32.xlu1 %v24772_v34, 280  ;;  %4905 = vbcast.lane.b32.xlu0 %v24772_v34, 272 }
 0x51b   : > { %vm16409_vm14 = vmpackc.low %vm6573_vm11, %vm6572_vm13  ;;  %v24789_v14 = vpop.f32.mrb[84].mxu0 }
 0x51c   : > { %27361 = vst [vmem:[#allocation332_spill] sm:$0xff] %v24789_v14  ;;  %20552 = vmatprep.mubr.msk.bf16.mxu1 %vm16409_vm14, %v22390_v52  ;;  %v24793_v30 = vpop.f32.mrb[85].mxu0  ;;  %v4674_v57 = vpop.permute.xlu1 %4673 }
 0x51d   : > { %27362 = vst [vmem:[#allocation333_spill] sm:$0xff] %v24793_v30  ;;  %vm6575_vm15 = vcmp.eq.s32.totalorder %v22942_v37, %v4674_v57  ;;  %v24796_v53 = vpop.f32.mrb[86].mxu0  ;;  %v4670_v55 = vpop.permute.xlu0 %4669 }
 0x51e   : > { %27363 = vst [vmem:[#allocation334_spill] sm:$0xff] %v24796_v53  ;;  %vm6574_vm1 = vcmp.eq.s32.totalorder %v22942_v37, %v4670_v55  ;;  %v24799_v48 = vpop.f32.mrb[87].mxu0  ;;  %4917 = vbcast.lane.b32.xlu1 %v24772_v34, 296  ;;  %4913 = vbcast.lane.b32.xlu0 %v24772_v34, 288 }
 0x51f   : > { %27364 = vst [vmem:[#allocation335_spill] sm:$0xff] %v24799_v48  ;;  %vm16411_vm0 = vmpackc.low %vm6575_vm15, %vm6574_vm1 }
 0x520   : > { %20553 = vmatmul.mubr.msk.bf16.gmra.mrb[72].mxu1 %vm16411_vm0, %v22390_v52  ;;  %v4682_v14 = vpop.permute.xlu1 %4681 }
 0x521   : > { %vm6577_vm2 = vcmp.eq.s32.totalorder %v22942_v37, %v4682_v14  ;;  %v4678_v30 = vpop.permute.xlu0 %4677 }
 0x522   : > { %vm6576_vm3 = vcmp.eq.s32.totalorder %v22942_v37, %v4678_v30  ;;  %4925 = vbcast.lane.b32.xlu1 %v24772_v34, 312  ;;  %4921 = vbcast.lane.b32.xlu0 %v24772_v34, 304 }
 0x523   : > { %vm16413_vm5 = vmpackc.low %vm6577_vm2, %vm6576_vm3  ;;  %v24807_v57 = vpop.f32.mrb[88].mxu0 }
 0x524   : > { %27365 = vst [vmem:[#allocation336_spill] sm:$0xff] %v24807_v57  ;;  %20556 = vmatprep.mubr.msk.bf16.mxu1 %vm16413_vm5, %v22390_v52  ;;  %v24811_v55 = vpop.f32.mrb[89].mxu0  ;;  %v4690_v48 = vpop.permute.xlu1 %4689 }
 0x525   : > { %27366 = vst [vmem:[#allocation337_spill] sm:$0xff] %v24811_v55  ;;  %vm6579_vm8 = vcmp.eq.s32.totalorder %v22942_v37, %v4690_v48  ;;  %v24814_v53 = vpop.f32.mrb[90].mxu0  ;;  %v4686_v14 = vpop.permute.xlu0 %4685 }
 0x526   : > { %27367 = vst [vmem:[#allocation338_spill] sm:$0xff] %v24814_v53  ;;  %vm6578_vm9 = vcmp.eq.s32.totalorder %v22942_v37, %v4686_v14  ;;  %v24817_v30 = vpop.f32.mrb[91].mxu0  ;;  %4933 = vbcast.lane.b32.xlu1 %v24772_v34, 328  ;;  %4929 = vbcast.lane.b32.xlu0 %v24772_v34, 320 }
 0x527   : > { %27368 = vst [vmem:[#allocation339_spill] sm:$0xff] %v24817_v30  ;;  %vm16415_vm7 = vmpackc.low %vm6579_vm8, %vm6578_vm9 }
 0x528   : > { %20557 = vmatmul.mubr.msk.bf16.gmra.mrb[76].mxu1 %vm16415_vm7, %v22390_v52  ;;  %v4701_v57 = vpop.permute.xlu1 %4700 }
 0x529   : > { %vm6581_vm10 = vcmp.eq.s32.totalorder %v22942_v37, %v4701_v57  ;;  %v4697_v55 = vpop.permute.xlu0 %4696 }
 0x52a   : > { %vm6580_vm12 = vcmp.eq.s32.totalorder %v22942_v37, %v4697_v55  ;;  %4941 = vbcast.lane.b32.xlu1 %v24772_v34, 344  ;;  %4937 = vbcast.lane.b32.xlu0 %v24772_v34, 336 }
 0x52b   : > { %vm16417_vm4 = vmpackc.low %vm6581_vm10, %vm6580_vm12  ;;  %v24825_v48 = vpop.f32.mrb[92].mxu0 }
 0x52c   : > { %27369 = vst [vmem:[#allocation340_spill] sm:$0xff] %v24825_v48  ;;  %20560 = vmatprep.mubr.msk.bf16.mxu1 %vm16417_vm4, %v22390_v52  ;;  %v24829_v14 = vpop.f32.mrb[93].mxu0  ;;  %v4709_v30 = vpop.permute.xlu1 %4708 }
 0x52d   : > { %27370 = vst [vmem:[#allocation341_spill] sm:$0xff] %v24829_v14  ;;  %vm6583_vm6 = vcmp.eq.s32.totalorder %v22942_v37, %v4709_v30  ;;  %v24832_v53 = vpop.f32.mrb[94].mxu0  ;;  %v4705_v57 = vpop.permute.xlu0 %4704 }
 0x52e   : > { %27371 = vst [vmem:[#allocation342_spill] sm:$0xff] %v24832_v53  ;;  %vm6582_vm11 = vcmp.eq.s32.totalorder %v22942_v37, %v4705_v57  ;;  %v24835_v55 = vpop.f32.mrb[95].mxu0  ;;  %4949 = vbcast.lane.b32.xlu1 %v24772_v34, 360  ;;  %4945 = vbcast.lane.b32.xlu0 %v24772_v34, 352  ;;  %v24848_v57 = vrot.slane %v22829_v49, %v22654_v17 }
 0x52f   : > { %27372 = vst [vmem:[#allocation343_spill] sm:$0xff] %v24835_v55  ;;  %vm16419_vm13 = vmpackc.low %vm6583_vm6, %vm6582_vm11 }
 0x530   : > { %20561 = vmatmul.mubr.msk.bf16.gmra.mrb[80].mxu1 %vm16419_vm13, %v22390_v52  ;;  %v4717_v48 = vpop.permute.xlu1 %4716 }
 0x531   : > { %vm6585_vm14 = vcmp.eq.s32.totalorder %v22942_v37, %v4717_v48  ;;  %v4713_v14 = vpop.permute.xlu0 %4712 }
 0x532   : > { %vm6584_vm15 = vcmp.eq.s32.totalorder %v22942_v37, %v4713_v14  ;;  %4957 = vbcast.lane.b32.xlu1 %v24772_v34, 376  ;;  %4953 = vbcast.lane.b32.xlu0 %v24772_v34, 368 }
 0x533   : > { %vm16421_vm1 = vmpackc.low %vm6585_vm14, %vm6584_vm15  ;;  %v24843_v30 = vpop.f32.mrb[96].mxu0 }
 0x534   : > { %27373 = vst [vmem:[#allocation344_spill] sm:$0xff] %v24843_v30  ;;  %20564 = vmatprep.mubr.msk.bf16.mxu1 %vm16421_vm1, %v22390_v52  ;;  %v24851_v55 = vpop.f32.mrb[97].mxu0  ;;  %v4725_v53 = vpop.permute.xlu1 %4724 }
 0x535   : > { %27374 = vst [vmem:[#allocation345_spill] sm:$0xff] %v24851_v55  ;;  %vm6587_vm0 = vcmp.eq.s32.totalorder %v22942_v37, %v4725_v53  ;;  %v24854_v48 = vpop.f32.mrb[98].mxu0  ;;  %v4721_v14 = vpop.permute.xlu0 %4720 }
 0x536   : > { %27375 = vst [vmem:[#allocation346_spill] sm:$0xff] %v24854_v48  ;;  %vm6586_vm2 = vcmp.eq.s32.totalorder %v22942_v37, %v4721_v14  ;;  %v24857_v32 = vpop.f32.mrb[99].mxu0  ;;  %4968 = vbcast.lane.b32.xlu1 %v24848_v57, 264  ;;  %4964 = vbcast.lane.b32.xlu0 %v24848_v57, 256 }
 0x537   : > { %27376 = vst [vmem:[#allocation347_spill] sm:$0xff] %v24857_v32  ;;  %vm16423_vm3 = vmpackc.low %vm6587_vm0, %vm6586_vm2 }
 0x538   : > { %20565 = vmatmul.mubr.msk.bf16.gmra.mrb[84].mxu1 %vm16423_vm3, %v22390_v52  ;;  %v4733_v34 = vpop.permute.xlu1 %4732 }
 0x539   : > { %vm6589_vm5 = vcmp.eq.s32.totalorder %v22942_v37, %v4733_v34  ;;  %v4729_v55 = vpop.permute.xlu0 %4728 }
 0x53a   : > { %vm6588_vm8 = vcmp.eq.s32.totalorder %v22942_v37, %v4729_v55  ;;  %4976 = vbcast.lane.b32.xlu1 %v24848_v57, 280  ;;  %4972 = vbcast.lane.b32.xlu0 %v24848_v57, 272 }
 0x53b   : > { %vm16425_vm9 = vmpackc.low %vm6589_vm5, %vm6588_vm8  ;;  %v24865_v53 = vpop.f32.mrb[100].mxu0 }
 0x53c   : > { %27377 = vst [vmem:[#allocation348_spill] sm:$0xff] %v24865_v53  ;;  %20568 = vmatprep.mubr.msk.bf16.mxu1 %vm16425_vm9, %v22390_v52  ;;  %v24869_v14 = vpop.f32.mrb[101].mxu0  ;;  %v4741_v32 = vpop.permute.xlu1 %4740 }
 0x53d   : > { %27378 = vst [vmem:[#allocation349_spill] sm:$0xff] %v24869_v14  ;;  %vm6591_vm7 = vcmp.eq.s32.totalorder %v22942_v37, %v4741_v32  ;;  %v24872_v48 = vpop.f32.mrb[102].mxu0  ;;  %v4737_v34 = vpop.permute.xlu0 %4736 }
 0x53e   : > { %27379 = vst [vmem:[#allocation350_spill] sm:$0xff] %v24872_v48  ;;  %vm6590_vm10 = vcmp.eq.s32.totalorder %v22942_v37, %v4737_v34  ;;  %v24875_v55 = vpop.f32.mrb[103].mxu0  ;;  %4984 = vbcast.lane.b32.xlu1 %v24848_v57, 296  ;;  %4980 = vbcast.lane.b32.xlu0 %v24848_v57, 288 }
 0x53f   : > { %27380 = vst [vmem:[#allocation351_spill] sm:$0xff] %v24875_v55  ;;  %vm16427_vm12 = vmpackc.low %vm6591_vm7, %vm6590_vm10 }
 0x540   : > { %20569 = vmatmul.mubr.msk.bf16.gmra.mrb[88].mxu1 %vm16427_vm12, %v22390_v52  ;;  %v4749_v53 = vpop.permute.xlu1 %4748 }
 0x541   : > { %vm6593_vm4 = vcmp.eq.s32.totalorder %v22942_v37, %v4749_v53  ;;  %v4745_v14 = vpop.permute.xlu0 %4744 }
 0x542   : > { %vm6592_vm6 = vcmp.eq.s32.totalorder %v22942_v37, %v4745_v14  ;;  %4992 = vbcast.lane.b32.xlu1 %v24848_v57, 312  ;;  %4988 = vbcast.lane.b32.xlu0 %v24848_v57, 304 }
 0x543   : > { %vm16429_vm11 = vmpackc.low %vm6593_vm4, %vm6592_vm6  ;;  %v24883_v32 = vpop.f32.mrb[104].mxu0 }
 0x544   : > { %27381 = vst [vmem:[#allocation352_spill] sm:$0xff] %v24883_v32  ;;  %20572 = vmatprep.mubr.msk.bf16.mxu1 %vm16429_vm11, %v22390_v52  ;;  %v24887_v34 = vpop.f32.mrb[105].mxu0  ;;  %v4757_v55 = vpop.permute.xlu1 %4756 }
 0x545   : > { %27382 = vst [vmem:[#allocation353_spill] sm:$0xff] %v24887_v34  ;;  %vm6595_vm13 = vcmp.eq.s32.totalorder %v22942_v37, %v4757_v55  ;;  %v24890_v48 = vpop.f32.mrb[106].mxu0  ;;  %v4753_v53 = vpop.permute.xlu0 %4752 }
 0x546   : > { %27383 = vst [vmem:[#allocation354_spill] sm:$0xff] %v24890_v48  ;;  %vm6594_vm14 = vcmp.eq.s32.totalorder %v22942_v37, %v4753_v53  ;;  %v24893_v14 = vpop.f32.mrb[107].mxu0  ;;  %5000 = vbcast.lane.b32.xlu1 %v24848_v57, 328  ;;  %4996 = vbcast.lane.b32.xlu0 %v24848_v57, 320 }
 0x547   : > { %27384 = vst [vmem:[#allocation355_spill] sm:$0xff] %v24893_v14  ;;  %vm16431_vm15 = vmpackc.low %vm6595_vm13, %vm6594_vm14 }
 0x548   : > { %20573 = vmatmul.mubr.msk.bf16.gmra.mrb[92].mxu1 %vm16431_vm15, %v22390_v52  ;;  %v4768_v32 = vpop.permute.xlu1 %4767 }
 0x549   : > { %vm6597_vm1 = vcmp.eq.s32.totalorder %v22942_v37, %v4768_v32  ;;  %v4764_v34 = vpop.permute.xlu0 %4763 }
 0x54a   : > { %vm6596_vm0 = vcmp.eq.s32.totalorder %v22942_v37, %v4764_v34  ;;  %5008 = vbcast.lane.b32.xlu1 %v24848_v57, 344  ;;  %5004 = vbcast.lane.b32.xlu0 %v24848_v57, 336 }
 0x54b   : > { %vm16433_vm2 = vmpackc.low %vm6597_vm1, %vm6596_vm0  ;;  %v24901_v55 = vpop.f32.mrb[108].mxu0 }
 0x54c   : > { %27385 = vst [vmem:[#allocation356_spill] sm:$0xff] %v24901_v55  ;;  %20576 = vmatprep.mubr.msk.bf16.mxu1 %vm16433_vm2, %v22390_v52  ;;  %v24905_v53 = vpop.f32.mrb[109].mxu0  ;;  %v4776_v14 = vpop.permute.xlu1 %4775 }
 0x54d   : > { %27386 = vst [vmem:[#allocation357_spill] sm:$0xff] %v24905_v53  ;;  %vm6599_vm3 = vcmp.eq.s32.totalorder %v22942_v37, %v4776_v14  ;;  %v24908_v48 = vpop.f32.mrb[110].mxu0  ;;  %v4772_v32 = vpop.permute.xlu0 %4771 }
 0x54e   : > { %27387 = vst [vmem:[#allocation358_spill] sm:$0xff] %v24908_v48  ;;  %vm6598_vm5 = vcmp.eq.s32.totalorder %v22942_v37, %v4772_v32  ;;  %v24911_v34 = vpop.f32.mrb[111].mxu0  ;;  %5016 = vbcast.lane.b32.xlu1 %v24848_v57, 360  ;;  %5012 = vbcast.lane.b32.xlu0 %v24848_v57, 352  ;;  %v24924_v32 = vrot.slane %v22829_v49, %v22666_v29 }
 0x54f   : > { %27388 = vst [vmem:[#allocation359_spill] sm:$0xff] %v24911_v34  ;;  %vm16435_vm8 = vmpackc.low %vm6599_vm3, %vm6598_vm5 }
 0x550   : > { %20577 = vmatmul.mubr.msk.bf16.gmra.mrb[96].mxu1 %vm16435_vm8, %v22390_v52  ;;  %v4784_v55 = vpop.permute.xlu1 %4783 }
 0x551   : > { %vm6601_vm9 = vcmp.eq.s32.totalorder %v22942_v37, %v4784_v55  ;;  %v4780_v53 = vpop.permute.xlu0 %4779 }
 0x552   : > { %vm6600_vm7 = vcmp.eq.s32.totalorder %v22942_v37, %v4780_v53  ;;  %5024 = vbcast.lane.b32.xlu1 %v24848_v57, 376  ;;  %5020 = vbcast.lane.b32.xlu0 %v24848_v57, 368 }
 0x553   : > { %vm16437_vm10 = vmpackc.low %vm6601_vm9, %vm6600_vm7  ;;  %v24919_v14 = vpop.f32.mrb[112].mxu0 }
 0x554   : > { %27389 = vst [vmem:[#allocation360_spill] sm:$0xff] %v24919_v14  ;;  %20580 = vmatprep.mubr.msk.bf16.mxu1 %vm16437_vm10, %v22390_v52  ;;  %v24927_v34 = vpop.f32.mrb[113].mxu0  ;;  %v4792_v48 = vpop.permute.xlu1 %4791 }
 0x555   : > { %27390 = vst [vmem:[#allocation361_spill] sm:$0xff] %v24927_v34  ;;  %vm6603_vm12 = vcmp.eq.s32.totalorder %v22942_v37, %v4792_v48  ;;  %v24930_v55 = vpop.f32.mrb[114].mxu0  ;;  %v4788_v53 = vpop.permute.xlu0 %4787 }
 0x556   : > { %27391 = vst [vmem:[#allocation362_spill] sm:$0xff] %v24930_v55  ;;  %vm6602_vm4 = vcmp.eq.s32.totalorder %v22942_v37, %v4788_v53  ;;  %v24933_v30 = vpop.f32.mrb[115].mxu0  ;;  %5035 = vbcast.lane.b32.xlu1 %v24924_v32, 264  ;;  %5031 = vbcast.lane.b32.xlu0 %v24924_v32, 256 }
 0x557   : > { %27392 = vst [vmem:[#allocation363_spill] sm:$0xff] %v24933_v30  ;;  %vm16439_vm6 = vmpackc.low %vm6603_vm12, %vm6602_vm4 }
 0x558   : > { %20581 = vmatmul.mubr.msk.bf16.gmra.mrb[100].mxu1 %vm16439_vm6, %v22390_v52  ;;  %v4800_v49 = vpop.permute.xlu1 %4799 }
 0x559   : > { %vm6605_vm11 = vcmp.eq.s32.totalorder %v22942_v37, %v4800_v49  ;;  %v4796_v57 = vpop.permute.xlu0 %4795 }
 0x55a   : > { %vm6604_vm13 = vcmp.eq.s32.totalorder %v22942_v37, %v4796_v57  ;;  %5043 = vbcast.lane.b32.xlu1 %v24924_v32, 280  ;;  %5039 = vbcast.lane.b32.xlu0 %v24924_v32, 272 }
 0x55b   : > { %vm16441_vm14 = vmpackc.low %vm6605_vm11, %vm6604_vm13  ;;  %v24941_v48 = vpop.f32.mrb[116].mxu0 }
 0x55c   : > { %27393 = vst [vmem:[#allocation364_spill] sm:$0xff] %v24941_v48  ;;  %20584 = vmatprep.mubr.msk.bf16.mxu1 %vm16441_vm14, %v22390_v52  ;;  %v24945_v53 = vpop.f32.mrb[117].mxu0  ;;  %v4808_v30 = vpop.permute.xlu1 %4807 }
 0x55d   : > { %27394 = vst [vmem:[#allocation365_spill] sm:$0xff] %v24945_v53  ;;  %vm6607_vm15 = vcmp.eq.s32.totalorder %v22942_v37, %v4808_v30  ;;  %v24948_v55 = vpop.f32.mrb[118].mxu0  ;;  %v4804_v49 = vpop.permute.xlu0 %4803 }
 0x55e   : > { %27395 = vst [vmem:[#allocation366_spill] sm:$0xff] %v24948_v55  ;;  %vm6606_vm1 = vcmp.eq.s32.totalorder %v22942_v37, %v4804_v49  ;;  %v24951_v57 = vpop.f32.mrb[119].mxu0  ;;  %5051 = vbcast.lane.b32.xlu1 %v24924_v32, 296  ;;  %5047 = vbcast.lane.b32.xlu0 %v24924_v32, 288 }
 0x55f   : > { %27396 = vst [vmem:[#allocation367_spill] sm:$0xff] %v24951_v57  ;;  %vm16443_vm0 = vmpackc.low %vm6607_vm15, %vm6606_vm1 }
 0x560   : > { %20585 = vmatmul.mubr.msk.bf16.gmra.mrb[104].mxu1 %vm16443_vm0, %v22390_v52  ;;  %v4816_v48 = vpop.permute.xlu1 %4815 }
 0x561   : > { %vm6609_vm2 = vcmp.eq.s32.totalorder %v22942_v37, %v4816_v48  ;;  %v4812_v53 = vpop.permute.xlu0 %4811 }
 0x562   : > { %vm6608_vm3 = vcmp.eq.s32.totalorder %v22942_v37, %v4812_v53  ;;  %5059 = vbcast.lane.b32.xlu1 %v24924_v32, 312  ;;  %5055 = vbcast.lane.b32.xlu0 %v24924_v32, 304 }
 0x563   : > { %vm16445_vm5 = vmpackc.low %vm6609_vm2, %vm6608_vm3  ;;  %v20482_v30 = vpop.f32.mrb[0].mxu1 }
 0x564   : > { %v10528_v49 = vadd.f32 %v23231_v62, %v20482_v30  ;;  %v8390_v57 = vpop.f32.mrb[1].mxu1  ;;  %20588 = vmatprep.mubr.msk.bf16.mxu1 %vm16445_vm5, %v22390_v52  ;;  %v4824_v55 = vpop.permute.xlu1 %4823 }
 0x565   : > { %v10520_v48 = vadd.f32 %v23234_v42, %v8390_v57  ;;  %vm6611_vm8 = vcmp.eq.s32.totalorder %v22942_v37, %v4824_v55  ;;  %v20483_v34 = vpop.f32.mrb[2].mxu1  ;;  %v4820_v53 = vpop.permute.xlu0 %4819 }
 0x566   : > { %v10531_v14 = vadd.f32 %v23238_v45, %v20483_v34  ;;  %vm6610_vm9 = vcmp.eq.s32.totalorder %v22942_v37, %v4820_v53  ;;  %v8393_v26 = vpop.f32.mrb[3].mxu1  ;;  %5067 = vbcast.lane.b32.xlu1 %v24924_v32, 328  ;;  %5063 = vbcast.lane.b32.xlu0 %v24924_v32, 320 }
 0x567   : > { %vm16447_vm7 = vmpackc.low %vm6611_vm8, %vm6610_vm9  ;;  %v10523_v62 = vadd.f32 %v23241_v18, %v8393_v26 }
 0x568   : > { %v18409_v30 = vpack.c.bf16 %v10531_v14, %v10528_v49  ;;  %20589 = vmatmul.mubr.msk.bf16.gmra.mrb[108].mxu1 %vm16447_vm7, %v22390_v52  ;;  %v4835_v42 = vpop.permute.xlu1 %4834 }
 0x569   : > { %v18404_v57 = vpack.c.bf16 %v10523_v62, %v10520_v48  ;;  %vm6613_vm10 = vcmp.eq.s32.totalorder %v22942_v37, %v4835_v42  ;;  %v4831_v55 = vpop.permute.xlu0 %4830 }
 0x56a   : > { %19681 = vst [vmem:[%s24974_s8 + $0x8] sm:$0xff] %v18409_v30   ;;  %vm6612_vm12 = vcmp.eq.s32.totalorder %v22942_v37, %v4831_v55  ;;  %5075 = vbcast.lane.b32.xlu1 %v24924_v32, 344  ;;  %5071 = vbcast.lane.b32.xlu0 %v24924_v32, 336 }
 0x56b   : > { %18405 = vst [vmem:[%s24974_s8] sm:$0xff] %v18404_v57   ;;  %vm16449_vm4 = vmpackc.low %vm6613_vm10, %vm6612_vm12  ;;  %v20486_v45 = vpop.f32.mrb[4].mxu1 }
 0x56c   : > { %v10544_v18 = vadd.f32 %v23249_v31, %v20486_v45  ;;  %v8406_v26 = vpop.f32.mrb[5].mxu1  ;;  %20592 = vmatprep.mubr.msk.bf16.mxu1 %vm16449_vm4, %v22390_v52  ;;  %v4843_v34 = vpop.permute.xlu1 %4842 }
 0x56d   : > { %v10536_v14 = vadd.f32 %v23252_v3, %v8406_v26  ;;  %vm6615_vm6 = vcmp.eq.s32.totalorder %v22942_v37, %v4843_v34  ;;  %v20487_v49 = vpop.f32.mrb[6].mxu1  ;;  %v4839_v48 = vpop.permute.xlu0 %4838 }
 0x56e   : > { %v10547_v53 = vadd.f32 %v23256_v0, %v20487_v49  ;;  %vm6614_vm11 = vcmp.eq.s32.totalorder %v22942_v37, %v4839_v48  ;;  %v8409_v62 = vpop.f32.mrb[7].mxu1  ;;  %5083 = vbcast.lane.b32.xlu1 %v24924_v32, 360  ;;  %5079 = vbcast.lane.b32.xlu0 %v24924_v32, 352 }
 0x56f   : > { %vm16451_vm13 = vmpackc.low %vm6615_vm6, %vm6614_vm11  ;;  %v10539_v31 = vadd.f32 %v23259_v1, %v8409_v62 }
 0x570   : > { %v18419_v30 = vpack.c.bf16 %v10547_v53, %v10544_v18  ;;  %20593 = vmatmul.mubr.msk.bf16.gmra.mrb[112].mxu1 %vm16451_vm13, %v22390_v52  ;;  %v4851_v3 = vpop.permute.xlu1 %4850 }
 0x571   : > { %v18414_v42 = vpack.c.bf16 %v10539_v31, %v10536_v14  ;;  %vm6617_vm14 = vcmp.eq.s32.totalorder %v22942_v37, %v4851_v3  ;;  %v4847_v57 = vpop.permute.xlu0 %4846 }
 0x572   : > { %19683 = vst [vmem:[%s24974_s8 + $0x18] sm:$0xff] %v18419_v30   ;;  %vm6616_vm15 = vcmp.eq.s32.totalorder %v22942_v37, %v4847_v57  ;;  %5091 = vbcast.lane.b32.xlu1 %v24924_v32, 376  ;;  %5087 = vbcast.lane.b32.xlu0 %v24924_v32, 368 }
 0x573   : > { %19682 = vst [vmem:[%s24974_s8 + $0x10] sm:$0xff] %v18414_v42   ;;  %vm16453_vm1 = vmpackc.low %vm6617_vm14, %vm6616_vm15  ;;  %v20490_v0 = vpop.f32.mrb[8].mxu1 }
 0x574   : > { %v10560_v1 = vadd.f32 %v23267_v10, %v20490_v0  ;;  %v8422_v55 = vpop.f32.mrb[9].mxu1  ;;  %20596 = vmatprep.mubr.msk.bf16.mxu1 %vm16453_vm1, %v22390_v52  ;;  %v4859_v45 = vpop.permute.xlu1 %4858 }
 0x575   : > { %v10552_v18 = vadd.f32 %v23270_v43, %v8422_v55  ;;  %vm6619_vm0 = vcmp.eq.s32.totalorder %v22942_v37, %v4859_v45  ;;  %v20491_v26 = vpop.f32.mrb[10].mxu1  ;;  %v4855_v34 = vpop.permute.xlu0 %4854 }
 0x576   : > { %v10563_v14 = vadd.f32 %v23274_v19, %v20491_v26  ;;  %vm6618_vm2 = vcmp.eq.s32.totalorder %v22942_v37, %v4855_v34  ;;  %v8425_v49 = vpop.f32.mrb[11].mxu1  ;;  %5102 = vbcast.lane.b32.xlu1 %v22859_v56, 264  ;;  %5098 = vbcast.lane.b32.xlu0 %v22859_v56, 256 }
 0x577   : > { %vm16455_vm3 = vmpackc.low %vm6619_vm0, %vm6618_vm2  ;;  %v10555_v10 = vadd.f32 %v23277_v36, %v8425_v49 }
 0x578   : > { %v18429_v32 = vpack.c.bf16 %v10563_v14, %v10560_v1  ;;  %20597 = vmatmul.mubr.msk.bf16.gmra.mrb[116].mxu1 %vm16455_vm3, %v22390_v52  ;;  %v4867_v43 = vpop.permute.xlu1 %4866 }
 0x579   : > { %v18424_v48 = vpack.c.bf16 %v10555_v10, %v10552_v18  ;;  %vm6621_vm5 = vcmp.eq.s32.totalorder %v22942_v37, %v4867_v43  ;;  %v4863_v53 = vpop.permute.xlu0 %4862 }
 0x57a   : > { %19685 = vst [vmem:[%s24974_s8 + $0x28] sm:$0xff] %v18429_v32   ;;  %vm6620_vm8 = vcmp.eq.s32.totalorder %v22942_v37, %v4863_v53  ;;  %5110 = vbcast.lane.b32.xlu1 %v22859_v56, 280  ;;  %5106 = vbcast.lane.b32.xlu0 %v22859_v56, 272 }
 0x57b   : > { %19684 = vst [vmem:[%s24974_s8 + $0x20] sm:$0xff] %v18424_v48   ;;  %vm16457_vm9 = vmpackc.low %vm6621_vm5, %vm6620_vm8  ;;  %v20494_v19 = vpop.f32.mrb[12].mxu1 }
 0x57c   : > { %v10576_v36 = vadd.f32 %v23285_v2, %v20494_v19  ;;  %v8438_v62 = vpop.f32.mrb[13].mxu1  ;;  %20600 = vmatprep.mubr.msk.bf16.mxu1 %vm16457_vm9, %v22390_v52  ;;  %v4875_v31 = vpop.permute.xlu1 %4874 }
 0x57d   : > { %v10568_v30 = vadd.f32 %v23288_v46, %v8438_v62  ;;  %vm6623_vm7 = vcmp.eq.s32.totalorder %v22942_v37, %v4875_v31  ;;  %v20495_v3 = vpop.f32.mrb[14].mxu1  ;;  %v4871_v42 = vpop.permute.xlu0 %4870 }
 0x57e   : > { %v10579_v57 = vadd.f32 %v23292_v63, %v20495_v3  ;;  %vm6622_vm10 = vcmp.eq.s32.totalorder %v22942_v37, %v4871_v42  ;;  %v8441_v0 = vpop.f32.mrb[15].mxu1  ;;  %5118 = vbcast.lane.b32.xlu1 %v22859_v56, 296  ;;  %5114 = vbcast.lane.b32.xlu0 %v22859_v56, 288 }
 0x57f   : > { %vm16459_vm12 = vmpackc.low %vm6623_vm7, %vm6622_vm10  ;;  %v10571_v2 = vadd.f32 %v23295_v51, %v8441_v0 }
 0x580   : > { %v18439_v1 = vpack.c.bf16 %v10579_v57, %v10576_v36  ;;  %20601 = vmatmul.mubr.msk.bf16.gmra.mrb[120].mxu1 %vm16459_vm12, %v22390_v52  ;;  %v4883_v46 = vpop.permute.xlu1 %4882 }
 0x581   : > { %v18434_v55 = vpack.c.bf16 %v10571_v2, %v10568_v30  ;;  %vm6625_vm4 = vcmp.eq.s32.totalorder %v22942_v37, %v4883_v46  ;;  %v4879_v45 = vpop.permute.xlu0 %4878 }
 0x582   : > { %19687 = vst [vmem:[%s24974_s8 + $0x38] sm:$0xff] %v18439_v1   ;;  %vm6624_vm6 = vcmp.eq.s32.totalorder %v22942_v37, %v4879_v45  ;;  %5126 = vbcast.lane.b32.xlu1 %v22859_v56, 312  ;;  %5122 = vbcast.lane.b32.xlu0 %v22859_v56, 304 }
 0x583   : > { %19686 = vst [vmem:[%s24974_s8 + $0x30] sm:$0xff] %v18434_v55   ;;  %vm16461_vm11 = vmpackc.low %vm6625_vm4, %vm6624_vm6  ;;  %v20498_v63 = vpop.f32.mrb[16].mxu1 }
 0x584   : > { %v10592_v51 = vadd.f32 %v23303_v61, %v20498_v63  ;;  %v8454_v18 = vpop.f32.mrb[17].mxu1  ;;  %20604 = vmatprep.mubr.msk.bf16.mxu1 %vm16461_vm11, %v22390_v52  ;;  %v4891_v26 = vpop.permute.xlu1 %4890 }
 0x585   : > { %v10584_v34 = vadd.f32 %v23306_v38, %v8454_v18  ;;  %vm6627_vm13 = vcmp.eq.s32.totalorder %v22942_v37, %v4891_v26  ;;  %v20499_v14 = vpop.f32.mrb[18].mxu1  ;;  %v4887_v49 = vpop.permute.xlu0 %4886 }
 0x586   : > { %v10595_v10 = vadd.f32 %v23310_v20, %v20499_v14  ;;  %vm6626_vm14 = vcmp.eq.s32.totalorder %v22942_v37, %v4887_v49  ;;  %v8457_v32 = vpop.f32.mrb[19].mxu1  ;;  %5134 = vbcast.lane.b32.xlu1 %v22859_v56, 328  ;;  %5130 = vbcast.lane.b32.xlu0 %v22859_v56, 320 }
 0x587   : > { %vm16463_vm15 = vmpackc.low %vm6627_vm13, %vm6626_vm14  ;;  %v10587_v61 = vadd.f32 %v23313_v25, %v8457_v32 }
 0x588   : > { %v18449_v43 = vpack.c.bf16 %v10595_v10, %v10592_v51  ;;  %20605 = vmatmul.mubr.msk.bf16.gmra.mrb[124].mxu1 %vm16463_vm15, %v22390_v52  ;;  %v4902_v38 = vpop.permute.xlu1 %4901 }
 0x589   : > { %v18444_v48 = vpack.c.bf16 %v10587_v61, %v10584_v34  ;;  %vm6629_vm1 = vcmp.eq.s32.totalorder %v22942_v37, %v4902_v38  ;;  %v4898_v53 = vpop.permute.xlu0 %4897 }
 0x58a   : > { %19689 = vst [vmem:[%s24974_s8 + $0x48] sm:$0xff] %v18449_v43   ;;  %vm6628_vm0 = vcmp.eq.s32.totalorder %v22942_v37, %v4898_v53  ;;  %5142 = vbcast.lane.b32.xlu1 %v22859_v56, 344  ;;  %5138 = vbcast.lane.b32.xlu0 %v22859_v56, 336 }
 0x58b   : > { %19688 = vst [vmem:[%s24974_s8 + $0x40] sm:$0xff] %v18444_v48   ;;  %vm16465_vm2 = vmpackc.low %vm6629_vm1, %vm6628_vm0  ;;  %v20502_v20 = vpop.f32.mrb[20].mxu1 }
 0x58c   : > { %v10608_v25 = vadd.f32 %v23321_v41, %v20502_v20  ;;  %v8470_v19 = vpop.f32.mrb[21].mxu1  ;;  %20608 = vmatprep.mubr.msk.bf16.mxu1 %vm16465_vm2, %v22390_v52  ;;  %v4910_v36 = vpop.permute.xlu1 %4909 }
 0x58d   : > { %v10600_v62 = vadd.f32 %v23324_v44, %v8470_v19  ;;  %vm6631_vm3 = vcmp.eq.s32.totalorder %v22942_v37, %v4910_v36  ;;  %v20503_v31 = vpop.f32.mrb[22].mxu1  ;;  %v4906_v30 = vpop.permute.xlu0 %4905 }
 0x58e   : > { %v10611_v3 = vadd.f32 %v23328_v22, %v20503_v31  ;;  %vm6630_vm5 = vcmp.eq.s32.totalorder %v22942_v37, %v4906_v30  ;;  %v8473_v42 = vpop.f32.mrb[23].mxu1  ;;  %5150 = vbcast.lane.b32.xlu1 %v22859_v56, 360  ;;  %5146 = vbcast.lane.b32.xlu0 %v22859_v56, 352  ;;  %v27397_v30 = vld [vmem:[#allocation39_spill] sm:$0xff] }
 0x58f   : > { %vm16467_vm8 = vmpackc.low %vm6631_vm3, %vm6630_vm5  ;;  %v10603_v41 = vadd.f32 %v23331_v24, %v8473_v42 }
 0x590   : > { %v18459_v57 = vpack.c.bf16 %v10611_v3, %v10608_v25  ;;  %20609 = vmatmul.mubr.msk.bf16.gmra.mrb[128].mxu1 %vm16467_vm8, %v22390_v52  ;;  %v4918_v44 = vpop.permute.xlu1 %4917 }
 0x591   : > { %v18454_v0 = vpack.c.bf16 %v10603_v41, %v10600_v62  ;;  %vm6633_vm9 = vcmp.eq.s32.totalorder %v22942_v37, %v4918_v44  ;;  %v4914_v2 = vpop.permute.xlu0 %4913 }
 0x592   : > { %19691 = vst [vmem:[%s24974_s8 + $0x58] sm:$0xff] %v18459_v57   ;;  %vm6632_vm7 = vcmp.eq.s32.totalorder %v22942_v37, %v4914_v2  ;;  %5158 = vbcast.lane.b32.xlu1 %v22859_v56, 376  ;;  %5154 = vbcast.lane.b32.xlu0 %v22859_v56, 368 }
 0x593   : > { %19690 = vst [vmem:[%s24974_s8 + $0x50] sm:$0xff] %v18454_v0   ;;  %vm16469_vm10 = vmpackc.low %vm6633_vm9, %vm6632_vm7  ;;  %v20506_v22 = vpop.f32.mrb[24].mxu1 }
 0x594   : > { %v10624_v24 = vadd.f32 %v23339_v39, %v20506_v22  ;;  %v8486_v1 = vpop.f32.mrb[25].mxu1  ;;  %20612 = vmatprep.mubr.msk.bf16.mxu1 %vm16469_vm10, %v22390_v52  ;;  %v4926_v46 = vpop.permute.xlu1 %4925  ;;  %v27399_v22 = vld [vmem:[#allocation41_spill] sm:$0xff] }
 0x595   : > { %v10616_v55 = vadd.f32 %v23342_v40, %v8486_v1  ;;  %vm6635_vm12 = vcmp.eq.s32.totalorder %v22942_v37, %v4926_v46  ;;  %v20507_v45 = vpop.f32.mrb[26].mxu1  ;;  %v4922_v63 = vpop.permute.xlu0 %4921 }
 0x596   : > { %v10627_v51 = vadd.f32 %v23346_v15, %v20507_v45  ;;  %vm6634_vm4 = vcmp.eq.s32.totalorder %v22942_v37, %v4922_v63  ;;  %v8489_v18 = vpop.f32.mrb[27].mxu1  ;;  %5169 = vbcast.lane.b32.xlu1 %v22863_v4, 264  ;;  %5165 = vbcast.lane.b32.xlu0 %v22863_v4, 256 }
 0x597   : > { %vm16471_vm6 = vmpackc.low %vm6635_vm12, %vm6634_vm4  ;;  %v10619_v56 = vadd.f32 %v23349_v21, %v8489_v18  ;;  %v27401_v18 = vld [vmem:[#allocation43_spill] sm:$0xff] }
 0x598   : > { %v18469_v39 = vpack.c.bf16 %v10627_v51, %v10624_v24  ;;  %20613 = vmatmul.mubr.msk.bf16.gmra.mrb[132].mxu1 %vm16471_vm6, %v22390_v52  ;;  %v4934_v40 = vpop.permute.xlu1 %4933 }
 0x599   : > { %v18464_v26 = vpack.c.bf16 %v10619_v56, %v10616_v55  ;;  %vm6637_vm11 = vcmp.eq.s32.totalorder %v22942_v37, %v4934_v40  ;;  %v4930_v34 = vpop.permute.xlu0 %4929  ;;  %v27400_v55 = vld [vmem:[#allocation42_spill] sm:$0xff]  ;;  %v27402_v40 = vld [vmem:[#allocation44_spill] sm:$0xff] }
 0x59a   : > { %19693 = vst [vmem:[%s24974_s8 + $0x68] sm:$0xff] %v18469_v39   ;;  %vm6636_vm13 = vcmp.eq.s32.totalorder %v22942_v37, %v4930_v34  ;;  %5177 = vbcast.lane.b32.xlu1 %v22863_v4, 280  ;;  %5173 = vbcast.lane.b32.xlu0 %v22863_v4, 272 }
 0x59b   : > { %19692 = vst [vmem:[%s24974_s8 + $0x60] sm:$0xff] %v18464_v26   ;;  %vm16473_vm14 = vmpackc.low %vm6637_vm11, %vm6636_vm13  ;;  %v20510_v15 = vpop.f32.mrb[28].mxu1 }
 0x59c   : > { %v10640_v21 = vadd.f32 %v23357_v33, %v20510_v15  ;;  %v8502_v14 = vpop.f32.mrb[29].mxu1  ;;  %20616 = vmatprep.mubr.msk.bf16.mxu1 %vm16473_vm14, %v22390_v52  ;;  %v4942_v49 = vpop.permute.xlu1 %4941 }
 0x59d   : > { %v10632_v10 = vadd.f32 %v23360_v35, %v8502_v14  ;;  %vm6639_vm15 = vcmp.eq.s32.totalorder %v22942_v37, %v4942_v49  ;;  %v20511_v32 = vpop.f32.mrb[30].mxu1  ;;  %v4938_v61 = vpop.permute.xlu0 %4937 }
 0x59e   : > { %v10643_v43 = vadd.f32 %v23364_v11, %v20511_v32  ;;  %vm6638_vm1 = vcmp.eq.s32.totalorder %v22942_v37, %v4938_v61  ;;  %v8505_v38 = vpop.f32.mrb[31].mxu1  ;;  %5185 = vbcast.lane.b32.xlu1 %v22863_v4, 296  ;;  %5181 = vbcast.lane.b32.xlu0 %v22863_v4, 288 }
 0x59f   : > { %vm16475_vm0 = vmpackc.low %vm6639_vm15, %vm6638_vm1  ;;  %v10635_v33 = vadd.f32 %v23367_v13, %v8505_v38 }
 0x5a0   : > { %v18479_v48 = vpack.c.bf16 %v10643_v43, %v10640_v21  ;;  %20617 = vmatmul.mubr.msk.bf16.gmra.mrb[136].mxu1 %vm16475_vm0, %v22390_v52  ;;  %v4950_v35 = vpop.permute.xlu1 %4949  ;;  %v27403_v43 = vld [vmem:[#allocation45_spill] sm:$0xff] }
 0x5a1   : > { %v18474_v53 = vpack.c.bf16 %v10635_v33, %v10632_v10  ;;  %vm6641_vm2 = vcmp.eq.s32.totalorder %v22942_v37, %v4950_v35  ;;  %v4946_v20 = vpop.permute.xlu0 %4945  ;;  %v27404_v35 = vld [vmem:[#allocation46_spill] sm:$0xff] }
 0x5a2   : > { %19695 = vst [vmem:[%s24974_s8 + $0x78] sm:$0xff] %v18479_v48   ;;  %vm6640_vm3 = vcmp.eq.s32.totalorder %v22942_v37, %v4946_v20  ;;  %5193 = vbcast.lane.b32.xlu1 %v22863_v4, 312  ;;  %5189 = vbcast.lane.b32.xlu0 %v22863_v4, 304 }
 0x5a3   : > { %19694 = vst [vmem:[%s24974_s8 + $0x70] sm:$0xff] %v18474_v53   ;;  %vm16477_vm5 = vmpackc.low %vm6641_vm2, %vm6640_vm3  ;;  %v20514_v11 = vpop.f32.mrb[32].mxu1 }
 0x5a4   : > { %v10656_v13 = vadd.f32 %v23375_v12, %v20514_v11  ;;  %v8518_v25 = vpop.f32.mrb[33].mxu1  ;;  %20620 = vmatprep.mubr.msk.bf16.mxu1 %vm16477_vm5, %v22390_v52  ;;  %v4958_v19 = vpop.permute.xlu1 %4957  ;;  %v27398_v12 = vld [vmem:[#allocation40_spill] sm:$0xff] }
 0x5a5   : > { %v10648_v36 = vadd.f32 %v23378_v54, %v8518_v25  ;;  %vm6643_vm8 = vcmp.eq.s32.totalorder %v22942_v37, %v4958_v19  ;;  %v20515_v62 = vpop.f32.mrb[34].mxu1  ;;  %v4954_v31 = vpop.permute.xlu0 %4953 }
 0x5a6   : > { %v10659_v3 = vadd.f32 %v27397_v30, %v20515_v62  ;;  %vm6642_vm9 = vcmp.eq.s32.totalorder %v22942_v37, %v4954_v31  ;;  %v8521_v42 = vpop.f32.mrb[35].mxu1  ;;  %5201 = vbcast.lane.b32.xlu1 %v22863_v4, 328  ;;  %5197 = vbcast.lane.b32.xlu0 %v22863_v4, 320  ;;  %v27407_v31 = vld [vmem:[#allocation48_spill] sm:$0xff] }
 0x5a7   : > { %vm16479_vm7 = vmpackc.low %vm6643_vm8, %vm6642_vm9  ;;  %v10651_v41 = vadd.f32 %v27398_v12, %v8521_v42  ;;  %v27408_v12 = vld [vmem:[#allocation49_spill] sm:$0xff] }
 0x5a8   : > { %v18489_v57 = vpack.c.bf16 %v10659_v3, %v10656_v13  ;;  %20621 = vmatmul.mubr.msk.bf16.gmra.mrb[140].mxu1 %vm16479_vm7, %v22390_v52  ;;  %v4969_v54 = vpop.permute.xlu1 %4968 }
 0x5a9   : > { %v18484_v44 = vpack.c.bf16 %v10651_v41, %v10648_v36  ;;  %vm6645_vm10 = vcmp.eq.s32.totalorder %v22942_v37, %v4969_v54  ;;  %v4965_v0 = vpop.permute.xlu0 %4964 }
 0x5aa   : > { %19697 = vst [vmem:[%s24974_s8 + $0x88] sm:$0xff] %v18489_v57   ;;  %vm6644_vm12 = vcmp.eq.s32.totalorder %v22942_v37, %v4965_v0  ;;  %5209 = vbcast.lane.b32.xlu1 %v22863_v4, 344  ;;  %5205 = vbcast.lane.b32.xlu0 %v22863_v4, 336 }
 0x5ab   : > { %19696 = vst [vmem:[%s24974_s8 + $0x80] sm:$0xff] %v18484_v44   ;;  %vm16481_vm4 = vmpackc.low %vm6645_vm10, %vm6644_vm12  ;;  %v20518_v2 = vpop.f32.mrb[36].mxu1  ;;  %v27409_v44 = vld [vmem:[#allocation50_spill] sm:$0xff] }
 0x5ac   : > { %v10672_v24 = vadd.f32 %v27399_v22, %v20518_v2  ;;  %v8534_v1 = vpop.f32.mrb[37].mxu1  ;;  %20624 = vmatprep.mubr.msk.bf16.mxu1 %vm16481_vm4, %v22390_v52  ;;  %v4977_v46 = vpop.permute.xlu1 %4976  ;;  %v27410_v22 = vld [vmem:[#allocation51_spill] sm:$0xff] }
 0x5ad   : > { %v10664_v45 = vadd.f32 %v27400_v55, %v8534_v1  ;;  %vm6647_vm6 = vcmp.eq.s32.totalorder %v22942_v37, %v4977_v46  ;;  %v20519_v63 = vpop.f32.mrb[38].mxu1  ;;  %v4973_v51 = vpop.permute.xlu0 %4972 }
 0x5ae   : > { %v10675_v56 = vadd.f32 %v27401_v18, %v20519_v63  ;;  %vm6646_vm11 = vcmp.eq.s32.totalorder %v22942_v37, %v4973_v51  ;;  %v8537_v39 = vpop.f32.mrb[39].mxu1  ;;  %5217 = vbcast.lane.b32.xlu1 %v22863_v4, 360  ;;  %5213 = vbcast.lane.b32.xlu0 %v22863_v4, 352  ;;  %v27411_v51 = vld [vmem:[#allocation52_spill] sm:$0xff] }
 0x5af   : > { %vm16483_vm13 = vmpackc.low %vm6647_vm6, %vm6646_vm11  ;;  %v10667_v26 = vadd.f32 %v27402_v40, %v8537_v39  ;;  %v27412_v40 = vld [vmem:[#allocation53_spill] sm:$0xff] }
 0x5b0   : > { %v18499_v34 = vpack.c.bf16 %v10675_v56, %v10672_v24  ;;  %20625 = vmatmul.mubr.msk.bf16.gmra.mrb[144].mxu1 %vm16483_vm13, %v22390_v52  ;;  %v4985_v15 = vpop.permute.xlu1 %4984 }
 0x5b1   : > { %v18494_v21 = vpack.c.bf16 %v10667_v26, %v10664_v45  ;;  %vm6649_vm14 = vcmp.eq.s32.totalorder %v22942_v37, %v4985_v15  ;;  %v4981_v14 = vpop.permute.xlu0 %4980 }
 0x5b2   : > { %19699 = vst [vmem:[%s24974_s8 + $0x98] sm:$0xff] %v18499_v34   ;;  %vm6648_vm15 = vcmp.eq.s32.totalorder %v22942_v37, %v4981_v14  ;;  %5225 = vbcast.lane.b32.xlu1 %v22863_v4, 376  ;;  %5221 = vbcast.lane.b32.xlu0 %v22863_v4, 368  ;;  %v27405_v4 = vld [vmem:[#allocation25_spill] sm:$0xff] }
 0x5b3   : > { %19698 = vst [vmem:[%s24974_s8 + $0x90] sm:$0xff] %v18494_v21   ;;  %vm16485_vm1 = vmpackc.low %vm6649_vm14, %vm6648_vm15  ;;  %v20522_v49 = vpop.f32.mrb[40].mxu1  ;;  %v27413_v21 = vld [vmem:[#allocation54_spill] sm:$0xff] }
 0x5b4   : > { %v10688_v10 = vadd.f32 %v23411_v8, %v20522_v49  ;;  %v8550_v32 = vpop.f32.mrb[41].mxu1  ;;  %20628 = vmatprep.mubr.msk.bf16.mxu1 %vm16485_vm1, %v22390_v52  ;;  %v4993_v61 = vpop.permute.xlu1 %4992  ;;  %v27406_v8 = vld [vmem:[#allocation47_spill] sm:$0xff] }
 0x5b5   : > { %v10680_v38 = vadd.f32 %v27403_v43, %v8550_v32  ;;  %vm6651_vm0 = vcmp.eq.s32.totalorder %v22942_v37, %v4993_v61  ;;  %v20523_v33 = vpop.f32.mrb[42].mxu1  ;;  %v4989_v48 = vpop.permute.xlu0 %4988 }
 0x5b6   : > { %v10691_v53 = vadd.f32 %v27404_v35, %v20523_v33  ;;  %vm6650_vm2 = vcmp.eq.s32.totalorder %v22942_v37, %v4989_v48  ;;  %v8553_v20 = vpop.f32.mrb[43].mxu1  ;;  %5236 = vbcast.lane.b32.xlu1 %v27405_v4, 264  ;;  %5232 = vbcast.lane.b32.xlu0 %v27405_v4, 256  ;;  %v27415_v35 = vld [vmem:[#allocation56_spill] sm:$0xff] }
 0x5b7   : > { %vm16487_vm3 = vmpackc.low %vm6651_vm0, %vm6650_vm2  ;;  %v10683_v11 = vadd.f32 %v27406_v8, %v8553_v20 }
 0x5b8   : > { %v18509_v13 = vpack.c.bf16 %v10691_v53, %v10688_v10  ;;  %20629 = vmatmul.mubr.msk.bf16.gmra.mrb[148].mxu1 %vm16487_vm3, %v22390_v52  ;;  %v5001_v25 = vpop.permute.xlu1 %5000  ;;  %v27414_v10 = vld [vmem:[#allocation55_spill] sm:$0xff] }
 0x5b9   : > { %v18504_v19 = vpack.c.bf16 %v10683_v11, %v10680_v38  ;;  %vm6653_vm5 = vcmp.eq.s32.totalorder %v22942_v37, %v5001_v25  ;;  %v4997_v36 = vpop.permute.xlu0 %4996  ;;  %v27416_v11 = vld [vmem:[#allocation57_spill] sm:$0xff] }
 0x5ba   : > { %19701 = vst [vmem:[%s24974_s8 + $0xa8] sm:$0xff] %v18509_v13   ;;  %vm6652_vm8 = vcmp.eq.s32.totalorder %v22942_v37, %v4997_v36  ;;  %5244 = vbcast.lane.b32.xlu1 %v27405_v4, 280  ;;  %5240 = vbcast.lane.b32.xlu0 %v27405_v4, 272  ;;  %v27417_v36 = vld [vmem:[#allocation58_spill] sm:$0xff] }
 0x5bb   : > { %19700 = vst [vmem:[%s24974_s8 + $0xa0] sm:$0xff] %v18504_v19   ;;  %vm16489_vm9 = vmpackc.low %vm6653_vm5, %vm6652_vm8  ;;  %v20526_v62 = vpop.f32.mrb[44].mxu1 }
 0x5bc   : > { %v10704_v30 = vadd.f32 %v27407_v31, %v20526_v62  ;;  %v8566_v3 = vpop.f32.mrb[45].mxu1  ;;  %20632 = vmatprep.mubr.msk.bf16.mxu1 %vm16489_vm9, %v22390_v52  ;;  %v5009_v42 = vpop.permute.xlu1 %5008 }
 0x5bd   : > { %v10696_v41 = vadd.f32 %v27408_v12, %v8566_v3  ;;  %vm6655_vm7 = vcmp.eq.s32.totalorder %v22942_v37, %v5009_v42  ;;  %v20527_v57 = vpop.f32.mrb[46].mxu1  ;;  %v5005_v54 = vpop.permute.xlu0 %5004 }
 0x5be   : > { %v10707_v0 = vadd.f32 %v27409_v44, %v20527_v57  ;;  %vm6654_vm10 = vcmp.eq.s32.totalorder %v22942_v37, %v5005_v54  ;;  %v8569_v2 = vpop.f32.mrb[47].mxu1  ;;  %5252 = vbcast.lane.b32.xlu1 %v27405_v4, 296  ;;  %5248 = vbcast.lane.b32.xlu0 %v27405_v4, 288 }
 0x5bf   : > { %vm16491_vm12 = vmpackc.low %vm6655_vm7, %vm6654_vm10  ;;  %v10699_v24 = vadd.f32 %v27410_v22, %v8569_v2  ;;  %v27419_v22 = vld [vmem:[#allocation60_spill] sm:$0xff] }
 0x5c0   : > { %v18519_v1 = vpack.c.bf16 %v10707_v0, %v10704_v30  ;;  %20633 = vmatmul.mubr.msk.bf16.gmra.mrb[152].mxu1 %vm16491_vm12, %v22390_v52  ;;  %v5017_v46 = vpop.permute.xlu1 %5016  ;;  %v27418_v30 = vld [vmem:[#allocation59_spill] sm:$0xff] }
 0x5c1   : > { %v18514_v55 = vpack.c.bf16 %v10699_v24, %v10696_v41  ;;  %vm6657_vm4 = vcmp.eq.s32.totalorder %v22942_v37, %v5017_v46  ;;  %v5013_v45 = vpop.permute.xlu0 %5012 }
 0x5c2   : > { %19703 = vst [vmem:[%s24974_s8 + $0xb8] sm:$0xff] %v18519_v1   ;;  %vm6656_vm6 = vcmp.eq.s32.totalorder %v22942_v37, %v5013_v45  ;;  %5260 = vbcast.lane.b32.xlu1 %v27405_v4, 312  ;;  %5256 = vbcast.lane.b32.xlu0 %v27405_v4, 304 }
 0x5c3   : > { %19702 = vst [vmem:[%s24974_s8 + $0xb0] sm:$0xff] %v18514_v55   ;;  %vm16493_vm11 = vmpackc.low %vm6657_vm4, %vm6656_vm6  ;;  %v20530_v63 = vpop.f32.mrb[48].mxu1  ;;  %v27420_v55 = vld [vmem:[#allocation61_spill] sm:$0xff] }
 0x5c4   : > { %v10720_v18 = vadd.f32 %v27411_v51, %v20530_v63  ;;  %v8582_v56 = vpop.f32.mrb[49].mxu1  ;;  %20636 = vmatprep.mubr.msk.bf16.mxu1 %vm16493_vm11, %v22390_v52  ;;  %v5025_v39 = vpop.permute.xlu1 %5024 }
 0x5c5   : > { %v10712_v26 = vadd.f32 %v27412_v40, %v8582_v56  ;;  %vm6659_vm13 = vcmp.eq.s32.totalorder %v22942_v37, %v5025_v39  ;;  %v20531_v34 = vpop.f32.mrb[50].mxu1  ;;  %v5021_v15 = vpop.permute.xlu0 %5020 }
 0x5c6   : > { %v10723_v14 = vadd.f32 %v27413_v21, %v20531_v34  ;;  %vm6658_vm14 = vcmp.eq.s32.totalorder %v22942_v37, %v5021_v15  ;;  %v8585_v49 = vpop.f32.mrb[51].mxu1  ;;  %5268 = vbcast.lane.b32.xlu1 %v27405_v4, 328  ;;  %5264 = vbcast.lane.b32.xlu0 %v27405_v4, 320  ;;  %v27423_v34 = vld [vmem:[#allocation63_spill] sm:$0xff] }
 0x5c7   : > { %vm16495_vm15 = vmpackc.low %vm6659_vm13, %vm6658_vm14  ;;  %v10715_v32 = vadd.f32 %v27414_v10, %v8585_v49  ;;  %v27424_v49 = vld [vmem:[#allocation64_spill] sm:$0xff] }
 0x5c8   : > { %v18529_v61 = vpack.c.bf16 %v10723_v14, %v10720_v18  ;;  %20637 = vmatmul.mubr.msk.bf16.gmra.mrb[156].mxu1 %vm16495_vm15, %v22390_v52  ;;  %v5036_v43 = vpop.permute.xlu1 %5035 }
 0x5c9   : > { %v18524_v38 = vpack.c.bf16 %v10715_v32, %v10712_v26  ;;  %vm6661_vm1 = vcmp.eq.s32.totalorder %v22942_v37, %v5036_v43  ;;  %v5032_v33 = vpop.permute.xlu0 %5031  ;;  %v27425_v43 = vld [vmem:[#allocation65_spill] sm:$0xff] }
 0x5ca   : > { %19705 = vst [vmem:[%s24974_s8 + $0xc8] sm:$0xff] %v18529_v61   ;;  %vm6660_vm0 = vcmp.eq.s32.totalorder %v22942_v37, %v5032_v33  ;;  %5276 = vbcast.lane.b32.xlu1 %v27405_v4, 344  ;;  %5272 = vbcast.lane.b32.xlu0 %v27405_v4, 336 }
 0x5cb   : > { %19704 = vst [vmem:[%s24974_s8 + $0xc0] sm:$0xff] %v18524_v38   ;;  %vm16497_vm2 = vmpackc.low %vm6661_vm1, %vm6660_vm0  ;;  %v20534_v48 = vpop.f32.mrb[52].mxu1 }
 0x5cc   : > { %v10736_v53 = vadd.f32 %v27415_v35, %v20534_v48  ;;  %v8598_v20 = vpop.f32.mrb[53].mxu1  ;;  %20640 = vmatprep.mubr.msk.bf16.mxu1 %vm16497_vm2, %v22390_v52  ;;  %v5044_v8 = vpop.permute.xlu1 %5043  ;;  %v27426_v48 = vld [vmem:[#allocation66_spill] sm:$0xff] }
 0x5cd   : > { %v10728_v13 = vadd.f32 %v27416_v11, %v8598_v20  ;;  %vm6663_vm3 = vcmp.eq.s32.totalorder %v22942_v37, %v5044_v8  ;;  %v20535_v25 = vpop.f32.mrb[54].mxu1  ;;  %v5040_v19 = vpop.permute.xlu0 %5039 }
 0x5ce   : > { %v10739_v62 = vadd.f32 %v27417_v36, %v20535_v25  ;;  %vm6662_vm5 = vcmp.eq.s32.totalorder %v22942_v37, %v5040_v19  ;;  %v8601_v31 = vpop.f32.mrb[55].mxu1  ;;  %5284 = vbcast.lane.b32.xlu1 %v27405_v4, 360  ;;  %5280 = vbcast.lane.b32.xlu0 %v27405_v4, 352  ;;  %v27427_v25 = vld [vmem:[#allocation67_spill] sm:$0xff] }
 0x5cf   : > { %vm16499_vm8 = vmpackc.low %vm6663_vm3, %vm6662_vm5  ;;  %v10731_v3 = vadd.f32 %v27418_v30, %v8601_v31  ;;  %v27428_v31 = vld [vmem:[#allocation68_spill] sm:$0xff] }
 0x5d0   : > { %v18539_v42 = vpack.c.bf16 %v10739_v62, %v10736_v53  ;;  %20641 = vmatmul.mubr.msk.bf16.gmra.mrb[160].mxu1 %vm16499_vm8, %v22390_v52  ;;  %v5052_v12 = vpop.permute.xlu1 %5051 }
 0x5d1   : > { %v18534_v41 = vpack.c.bf16 %v10731_v3, %v10728_v13  ;;  %vm6665_vm9 = vcmp.eq.s32.totalorder %v22942_v37, %v5052_v12  ;;  %v5048_v57 = vpop.permute.xlu0 %5047  ;;  %v27429_v12 = vld [vmem:[#allocation69_spill] sm:$0xff] }
 0x5d2   : > { %19707 = vst [vmem:[%s24974_s8 + $0xd8] sm:$0xff] %v18539_v42   ;;  %vm6664_vm7 = vcmp.eq.s32.totalorder %v22942_v37, %v5048_v57  ;;  %5292 = vbcast.lane.b32.xlu1 %v27405_v4, 376  ;;  %5288 = vbcast.lane.b32.xlu0 %v27405_v4, 368  ;;  %v27421_v4 = vld [vmem:[#allocation26_spill] sm:$0xff] }
 0x5d3   : > { %19706 = vst [vmem:[%s24974_s8 + $0xd0] sm:$0xff] %v18534_v41   ;;  %vm16501_vm10 = vmpackc.low %vm6665_vm9, %vm6664_vm7  ;;  %v20538_v54 = vpop.f32.mrb[56].mxu1 }
 0x5d4   : > { %v10752_v44 = vadd.f32 %v23483_v5, %v20538_v54  ;;  %v8614_v0 = vpop.f32.mrb[57].mxu1  ;;  %20644 = vmatprep.mubr.msk.bf16.mxu1 %vm16501_vm10, %v22390_v52  ;;  %v5060_v2 = vpop.permute.xlu1 %5059  ;;  %v27422_v5 = vld [vmem:[#allocation62_spill] sm:$0xff] }
 0x5d5   : > { %v10744_v24 = vadd.f32 %v27419_v22, %v8614_v0  ;;  %vm6667_vm12 = vcmp.eq.s32.totalorder %v22942_v37, %v5060_v2  ;;  %v20539_v1 = vpop.f32.mrb[58].mxu1  ;;  %v5056_v46 = vpop.permute.xlu0 %5055  ;;  %v27430_v54 = vld [vmem:[#allocation70_spill] sm:$0xff] }
 0x5d6   : > { %v10755_v45 = vadd.f32 %v27420_v55, %v20539_v1  ;;  %vm6666_vm4 = vcmp.eq.s32.totalorder %v22942_v37, %v5056_v46  ;;  %v8617_v63 = vpop.f32.mrb[59].mxu1  ;;  %5303 = vbcast.lane.b32.xlu1 %v27421_v4, 264  ;;  %5299 = vbcast.lane.b32.xlu0 %v27421_v4, 256  ;;  %v27431_v46 = vld [vmem:[#allocation71_spill] sm:$0xff] }
 0x5d7   : > { %vm16503_vm6 = vmpackc.low %vm6667_vm12, %vm6666_vm4  ;;  %v10747_v51 = vadd.f32 %v27422_v5, %v8617_v63  ;;  %v27432_v5 = vld [vmem:[#allocation72_spill] sm:$0xff] }
 0x5d8   : > { %v18549_v18 = vpack.c.bf16 %v10755_v45, %v10752_v44  ;;  %20645 = vmatmul.mubr.msk.bf16.gmra.mrb[164].mxu1 %vm16503_vm6, %v22390_v52  ;;  %v5068_v56 = vpop.permute.xlu1 %5067 }
 0x5d9   : > { %v18544_v39 = vpack.c.bf16 %v10747_v51, %v10744_v24  ;;  %vm6669_vm11 = vcmp.eq.s32.totalorder %v22942_v37, %v5068_v56  ;;  %v5064_v40 = vpop.permute.xlu0 %5063 }
 0x5da   : > { %19709 = vst [vmem:[%s24974_s8 + $0xe8] sm:$0xff] %v18549_v18   ;;  %vm6668_vm13 = vcmp.eq.s32.totalorder %v22942_v37, %v5064_v40  ;;  %5311 = vbcast.lane.b32.xlu1 %v27421_v4, 280  ;;  %5307 = vbcast.lane.b32.xlu0 %v27421_v4, 272 }
 0x5db   : > { %19708 = vst [vmem:[%s24974_s8 + $0xe0] sm:$0xff] %v18544_v39   ;;  %vm16505_vm14 = vmpackc.low %vm6669_vm11, %vm6668_vm13  ;;  %v20542_v26 = vpop.f32.mrb[60].mxu1  ;;  %v27433_v39 = vld [vmem:[#allocation73_spill] sm:$0xff] }
 0x5dc   : > { %v10768_v15 = vadd.f32 %v27423_v34, %v20542_v26  ;;  %v8630_v21 = vpop.f32.mrb[61].mxu1  ;;  %20648 = vmatprep.mubr.msk.bf16.mxu1 %vm16505_vm14, %v22390_v52  ;;  %v5076_v14 = vpop.permute.xlu1 %5075  ;;  %v27434_v34 = vld [vmem:[#allocation74_spill] sm:$0xff] }
 0x5dd   : > { %v10760_v10 = vadd.f32 %v27424_v49, %v8630_v21  ;;  %vm6671_vm15 = vcmp.eq.s32.totalorder %v22942_v37, %v5076_v14  ;;  %v20543_v32 = vpop.f32.mrb[62].mxu1  ;;  %v5072_v61 = vpop.permute.xlu0 %5071 }
 0x5de   : > { %v10771_v38 = vadd.f32 %v27425_v43, %v20543_v32  ;;  %vm6670_vm1 = vcmp.eq.s32.totalorder %v22942_v37, %v5072_v61  ;;  %v8633_v33 = vpop.f32.mrb[63].mxu1  ;;  %5319 = vbcast.lane.b32.xlu1 %v27421_v4, 296  ;;  %5315 = vbcast.lane.b32.xlu0 %v27421_v4, 288  ;;  %v27435_v61 = vld [vmem:[#allocation75_spill] sm:$0xff] }
 0x5df   : > { %vm16507_vm0 = vmpackc.low %vm6671_vm15, %vm6670_vm1  ;;  %v10763_v35 = vadd.f32 %v27426_v48, %v8633_v33  ;;  %v27436_v48 = vld [vmem:[#allocation76_spill] sm:$0xff] }
 0x5e0   : > { %v18559_v53 = vpack.c.bf16 %v10771_v38, %v10768_v15  ;;  %20649 = vmatmul.mubr.msk.bf16.gmra.mrb[168].mxu1 %vm16507_vm0, %v22390_v52  ;;  %v5084_v20 = vpop.permute.xlu1 %5083 }
 0x5e1   : > { %v18554_v8 = vpack.c.bf16 %v10763_v35, %v10760_v10  ;;  %vm6673_vm2 = vcmp.eq.s32.totalorder %v22942_v37, %v5084_v20  ;;  %v5080_v11 = vpop.permute.xlu0 %5079 }
 0x5e2   : > { %19711 = vst [vmem:[%s24974_s8 + $0xf8] sm:$0xff] %v18559_v53   ;;  %vm6672_vm3 = vcmp.eq.s32.totalorder %v22942_v37, %v5080_v11  ;;  %5327 = vbcast.lane.b32.xlu1 %v27421_v4, 312  ;;  %5323 = vbcast.lane.b32.xlu0 %v27421_v4, 304 }
 0x5e3   : > { %19710 = vst [vmem:[%s24974_s8 + $0xf0] sm:$0xff] %v18554_v8   ;;  %vm16509_vm5 = vmpackc.low %vm6673_vm2, %vm6672_vm3  ;;  %v20546_v13 = vpop.f32.mrb[64].mxu1  ;;  %v27437_v8 = vld [vmem:[#allocation77_spill] sm:$0xff] }
 0x5e4   : > { %v10784_v19 = vadd.f32 %v27427_v25, %v20546_v13  ;;  %v8646_v36 = vpop.f32.mrb[65].mxu1  ;;  %20652 = vmatprep.mubr.msk.bf16.mxu1 %vm16509_vm5, %v22390_v52  ;;  %v5092_v62 = vpop.permute.xlu1 %5091  ;;  %v27439_v25 = vld [vmem:[#allocation78_spill] sm:$0xff] }
 0x5e5   : > { %v10776_v30 = vadd.f32 %v27428_v31, %v8646_v36  ;;  %vm6675_vm8 = vcmp.eq.s32.totalorder %v22942_v37, %v5092_v62  ;;  %v20547_v3 = vpop.f32.mrb[66].mxu1  ;;  %v5088_v42 = vpop.permute.xlu0 %5087 }
 0x5e6   : > { %v10787_v41 = vadd.f32 %v27429_v12, %v20547_v3  ;;  %vm6674_vm9 = vcmp.eq.s32.totalorder %v22942_v37, %v5088_v42  ;;  %v8649_v57 = vpop.f32.mrb[67].mxu1  ;;  %5335 = vbcast.lane.b32.xlu1 %v27421_v4, 328  ;;  %5331 = vbcast.lane.b32.xlu0 %v27421_v4, 320  ;;  %v27440_v42 = vld [vmem:[#allocation79_spill] sm:$0xff] }
 0x5e7   : > { %vm16511_vm7 = vmpackc.low %vm6675_vm8, %vm6674_vm9  ;;  %v10779_v44 = vadd.f32 %v27430_v54, %v8649_v57  ;;  %v27441_v54 = vld [vmem:[#allocation80_spill] sm:$0xff] }
 0x5e8   : > { %v18569_v0 = vpack.c.bf16 %v10787_v41, %v10784_v19  ;;  %20653 = vmatmul.mubr.msk.bf16.gmra.mrb[172].mxu1 %vm16511_vm7, %v22390_v52  ;;  %v5103_v2 = vpop.permute.xlu1 %5102 }
 0x5e9   : > { %v18564_v22 = vpack.c.bf16 %v10779_v44, %v10776_v30  ;;  %vm6677_vm10 = vcmp.eq.s32.totalorder %v22942_v37, %v5103_v2  ;;  %v5099_v24 = vpop.permute.xlu0 %5098 }
 0x5ea   : > { %19713 = vst [vmem:[%s24974_s8 + $0x108] sm:$0xff] %v18569_v0   ;;  %vm6676_vm12 = vcmp.eq.s32.totalorder %v22942_v37, %v5099_v24  ;;  %5343 = vbcast.lane.b32.xlu1 %v27421_v4, 344  ;;  %5339 = vbcast.lane.b32.xlu0 %v27421_v4, 336 }
 0x5eb   : > { %19712 = vst [vmem:[%s24974_s8 + $0x100] sm:$0xff] %v18564_v22   ;;  %vm16513_vm4 = vmpackc.low %vm6677_vm10, %vm6676_vm12  ;;  %v20550_v1 = vpop.f32.mrb[68].mxu1  ;;  %v27442_v22 = vld [vmem:[#allocation81_spill] sm:$0xff] }
 0x5ec   : > { %v10800_v55 = vadd.f32 %v27431_v46, %v20550_v1  ;;  %v8662_v45 = vpop.f32.mrb[69].mxu1  ;;  %20656 = vmatprep.mubr.msk.bf16.mxu1 %vm16513_vm4, %v22390_v52  ;;  %v5111_v63 = vpop.permute.xlu1 %5110  ;;  %v27443_v46 = vld [vmem:[#allocation82_spill] sm:$0xff] }
 0x5ed   : > { %v10792_v51 = vadd.f32 %v27432_v5, %v8662_v45  ;;  %vm6679_vm6 = vcmp.eq.s32.totalorder %v22942_v37, %v5111_v63  ;;  %v20551_v18 = vpop.f32.mrb[70].mxu1  ;;  %v5107_v56 = vpop.permute.xlu0 %5106 }
 0x5ee   : > { %v10803_v40 = vadd.f32 %v27433_v39, %v20551_v18  ;;  %vm6678_vm11 = vcmp.eq.s32.totalorder %v22942_v37, %v5107_v56  ;;  %v8665_v26 = vpop.f32.mrb[71].mxu1  ;;  %5351 = vbcast.lane.b32.xlu1 %v27421_v4, 360  ;;  %5347 = vbcast.lane.b32.xlu0 %v27421_v4, 352  ;;  %v27444_v56 = vld [vmem:[#allocation83_spill] sm:$0xff] }
 0x5ef   : > { %vm16515_vm13 = vmpackc.low %vm6679_vm6, %vm6678_vm11  ;;  %v10795_v15 = vadd.f32 %v27434_v34, %v8665_v26  ;;  %v27445_v34 = vld [vmem:[#allocation84_spill] sm:$0xff] }
 0x5f0   : > { %v18579_v21 = vpack.c.bf16 %v10803_v40, %v10800_v55  ;;  %20657 = vmatmul.mubr.msk.bf16.gmra.mrb[176].mxu1 %vm16515_vm13, %v22390_v52  ;;  %v5119_v14 = vpop.permute.xlu1 %5118 }
 0x5f1   : > { %v18574_v49 = vpack.c.bf16 %v10795_v15, %v10792_v51  ;;  %vm6681_vm14 = vcmp.eq.s32.totalorder %v22942_v37, %v5119_v14  ;;  %v5115_v10 = vpop.permute.xlu0 %5114 }
 0x5f2   : > { %19715 = vst [vmem:[%s24974_s8 + $0x118] sm:$0xff] %v18579_v21   ;;  %vm6680_vm15 = vcmp.eq.s32.totalorder %v22942_v37, %v5115_v10  ;;  %5359 = vbcast.lane.b32.xlu1 %v27421_v4, 376  ;;  %5355 = vbcast.lane.b32.xlu0 %v27421_v4, 368  ;;  %v27438_v4 = vld [vmem:[#allocation27_spill] sm:$0xff] }
 0x5f3   : > { %19714 = vst [vmem:[%s24974_s8 + $0x110] sm:$0xff] %v18574_v49   ;;  %vm16517_vm1 = vmpackc.low %vm6681_vm14, %vm6680_vm15  ;;  %v20554_v32 = vpop.f32.mrb[72].mxu1  ;;  %v27446_v49 = vld [vmem:[#allocation85_spill] sm:$0xff] }
 0x5f4   : > { %v10816_v43 = vadd.f32 %v27435_v61, %v20554_v32  ;;  %v8678_v38 = vpop.f32.mrb[73].mxu1  ;;  %20660 = vmatprep.mubr.msk.bf16.mxu1 %vm16517_vm1, %v22390_v52  ;;  %v5127_v33 = vpop.permute.xlu1 %5126  ;;  %v27447_v61 = vld [vmem:[#allocation86_spill] sm:$0xff] }
 0x5f5   : > { %v10808_v35 = vadd.f32 %v27436_v48, %v8678_v38  ;;  %vm6683_vm0 = vcmp.eq.s32.totalorder %v22942_v37, %v5127_v33  ;;  %v20555_v53 = vpop.f32.mrb[74].mxu1  ;;  %v5123_v20 = vpop.permute.xlu0 %5122 }
 0x5f6   : > { %v10819_v11 = vadd.f32 %v27437_v8, %v20555_v53  ;;  %vm6682_vm2 = vcmp.eq.s32.totalorder %v22942_v37, %v5123_v20  ;;  %v8681_v13 = vpop.f32.mrb[75].mxu1  ;;  %5370 = vbcast.lane.b32.xlu1 %v27438_v4, 264  ;;  %5366 = vbcast.lane.b32.xlu0 %v27438_v4, 256  ;;  %v27448_v20 = vld [vmem:[#allocation87_spill] sm:$0xff] }
 0x5f7   : > { %vm16519_vm3 = vmpackc.low %vm6683_vm0, %vm6682_vm2  ;;  %v10811_v19 = vadd.f32 %v27439_v25, %v8681_v13  ;;  %v27449_v25 = vld [vmem:[#allocation88_spill] sm:$0xff] }
 0x5f8   : > { %v18589_v36 = vpack.c.bf16 %v10819_v11, %v10816_v43  ;;  %20661 = vmatmul.mubr.msk.bf16.gmra.mrb[180].mxu1 %vm16519_vm3, %v22390_v52  ;;  %v5135_v62 = vpop.permute.xlu1 %5134 }
 0x5f9   : > { %v18584_v31 = vpack.c.bf16 %v10811_v19, %v10808_v35  ;;  %vm6685_vm5 = vcmp.eq.s32.totalorder %v22942_v37, %v5135_v62  ;;  %v5131_v30 = vpop.permute.xlu0 %5130 }
 0x5fa   : > { %19717 = vst [vmem:[%s24974_s8 + $0x128] sm:$0xff] %v18589_v36   ;;  %vm6684_vm8 = vcmp.eq.s32.totalorder %v22942_v37, %v5131_v30  ;;  %5378 = vbcast.lane.b32.xlu1 %v27438_v4, 280  ;;  %5374 = vbcast.lane.b32.xlu0 %v27438_v4, 272 }
 0x5fb   : > { %19716 = vst [vmem:[%s24974_s8 + $0x120] sm:$0xff] %v18584_v31   ;;  %vm16521_vm9 = vmpackc.low %vm6685_vm5, %vm6684_vm8  ;;  %v20558_v3 = vpop.f32.mrb[76].mxu1  ;;  %v27450_v31 = vld [vmem:[#allocation89_spill] sm:$0xff] }
 0x5fc   : > { %v10832_v12 = vadd.f32 %v27440_v42, %v20558_v3  ;;  %v8694_v41 = vpop.f32.mrb[77].mxu1  ;;  %20664 = vmatprep.mubr.msk.bf16.mxu1 %vm16521_vm9, %v22390_v52  ;;  %v5143_v57 = vpop.permute.xlu1 %5142  ;;  %v27451_v42 = vld [vmem:[#allocation90_spill] sm:$0xff] }
 0x5fd   : > { %v10824_v44 = vadd.f32 %v27441_v54, %v8694_v41  ;;  %vm6687_vm7 = vcmp.eq.s32.totalorder %v22942_v37, %v5143_v57  ;;  %v20559_v0 = vpop.f32.mrb[78].mxu1  ;;  %v5139_v2 = vpop.permute.xlu0 %5138 }
 0x5fe   : > { %v10835_v24 = vadd.f32 %v27442_v22, %v20559_v0  ;;  %vm6686_vm10 = vcmp.eq.s32.totalorder %v22942_v37, %v5139_v2  ;;  %v8697_v1 = vpop.f32.mrb[79].mxu1  ;;  %5386 = vbcast.lane.b32.xlu1 %v27438_v4, 296  ;;  %5382 = vbcast.lane.b32.xlu0 %v27438_v4, 288  ;;  %v27452_v2 = vld [vmem:[#allocation24_spill] sm:$0xff] }
 0x5ff   : > { %vm16523_vm12 = vmpackc.low %vm6687_vm7, %vm6686_vm10  ;;  %v10827_v55 = vadd.f32 %v27443_v46, %v8697_v1  ;;  %v25319_v22 = vrot.slane %v27452_v2, %v22652_v16 }
 0x600   : > { %v18599_v45 = vpack.c.bf16 %v10835_v24, %v10832_v12  ;;  %20665 = vmatmul.mubr.msk.bf16.gmra.mrb[184].mxu1 %vm16523_vm12, %v22390_v52  ;;  %v5151_v63 = vpop.permute.xlu1 %5150  ;;  %v27453_v24 = vld [vmem:[#allocation91_spill] sm:$0xff] }
 0x601   : > { %v18594_v5 = vpack.c.bf16 %v10827_v55, %v10824_v44  ;;  %vm6689_vm4 = vcmp.eq.s32.totalorder %v22942_v37, %v5151_v63  ;;  %v5147_v51 = vpop.permute.xlu0 %5146 }
 0x602   : > { %19719 = vst [vmem:[%s24974_s8 + $0x138] sm:$0xff] %v18599_v45   ;;  %vm6688_vm6 = vcmp.eq.s32.totalorder %v22942_v37, %v5147_v51  ;;  %5394 = vbcast.lane.b32.xlu1 %v27438_v4, 312  ;;  %5390 = vbcast.lane.b32.xlu0 %v27438_v4, 304  ;;  %v27454_v45 = vld [vmem:[#allocation92_spill] sm:$0xff] }
 0x603   : > { %19718 = vst [vmem:[%s24974_s8 + $0x130] sm:$0xff] %v18594_v5   ;;  %vm16525_vm11 = vmpackc.low %vm6689_vm4, %vm6688_vm6  ;;  %v20562_v18 = vpop.f32.mrb[80].mxu1 }
 0x604   : > { %v10848_v39 = vadd.f32 %v27444_v56, %v20562_v18  ;;  %v8710_v40 = vpop.f32.mrb[81].mxu1  ;;  %20668 = vmatprep.mubr.msk.bf16.mxu1 %vm16525_vm11, %v22390_v52  ;;  %v5159_v26 = vpop.permute.xlu1 %5158  ;;  %v27455_v18 = vld [vmem:[#allocation93_spill] sm:$0xff] }
 0x605   : > { %v10840_v15 = vadd.f32 %v27445_v34, %v8710_v40  ;;  %vm6691_vm13 = vcmp.eq.s32.totalorder %v22942_v37, %v5159_v26  ;;  %v20563_v21 = vpop.f32.mrb[82].mxu1  ;;  %v5155_v14 = vpop.permute.xlu0 %5154 }
 0x606   : > { %v10851_v10 = vadd.f32 %v27446_v49, %v20563_v21  ;;  %vm6690_vm14 = vcmp.eq.s32.totalorder %v22942_v37, %v5155_v14  ;;  %v8713_v32 = vpop.f32.mrb[83].mxu1  ;;  %5402 = vbcast.lane.b32.xlu1 %v27438_v4, 328  ;;  %5398 = vbcast.lane.b32.xlu0 %v27438_v4, 320  ;;  %v27457_v49 = vld [vmem:[#allocation95_spill] sm:$0xff] }
 0x607   : > { %vm16527_vm15 = vmpackc.low %vm6691_vm13, %vm6690_vm14  ;;  %v10843_v43 = vadd.f32 %v27447_v61, %v8713_v32 }
 0x608   : > { %v18609_v38 = vpack.c.bf16 %v10851_v10, %v10848_v39  ;;  %20669 = vmatmul.mubr.msk.bf16.gmra.mrb[188].mxu1 %vm16527_vm15, %v22390_v52  ;;  %v5170_v33 = vpop.permute.xlu1 %5169  ;;  %v27456_v39 = vld [vmem:[#allocation94_spill] sm:$0xff] }
 0x609   : > { %v18604_v48 = vpack.c.bf16 %v10843_v43, %v10840_v15  ;;  %vm6693_vm1 = vcmp.eq.s32.totalorder %v22942_v37, %v5170_v33  ;;  %v5166_v35 = vpop.permute.xlu0 %5165  ;;  %v27458_v43 = vld [vmem:[#allocation96_spill] sm:$0xff] }
 0x60a   : > { %19721 = vst [vmem:[%s24974_s8 + $0x148] sm:$0xff] %v18609_v38   ;;  %vm6692_vm0 = vcmp.eq.s32.totalorder %v22942_v37, %v5166_v35  ;;  %5410 = vbcast.lane.b32.xlu1 %v27438_v4, 344  ;;  %5406 = vbcast.lane.b32.xlu0 %v27438_v4, 336  ;;  %v27459_v35 = vld [vmem:[#allocation97_spill] sm:$0xff] }
 0x60b   : > { %19720 = vst [vmem:[%s24974_s8 + $0x140] sm:$0xff] %v18604_v48   ;;  %vm16529_vm2 = vmpackc.low %vm6693_vm1, %vm6692_vm0  ;;  %v20566_v53 = vpop.f32.mrb[84].mxu1 }
 0x60c   : > { %v10864_v8 = vadd.f32 %v27448_v20, %v20566_v53  ;;  %v8726_v11 = vpop.f32.mrb[85].mxu1  ;;  %20672 = vmatprep.mubr.msk.bf16.mxu1 %vm16529_vm2, %v22390_v52  ;;  %v5178_v13 = vpop.permute.xlu1 %5177 }
 0x60d   : > { %v10856_v19 = vadd.f32 %v27449_v25, %v8726_v11  ;;  %vm6695_vm3 = vcmp.eq.s32.totalorder %v22942_v37, %v5178_v13  ;;  %v20567_v36 = vpop.f32.mrb[86].mxu1  ;;  %v5174_v62 = vpop.permute.xlu0 %5173 }
 0x60e   : > { %v10867_v30 = vadd.f32 %v27450_v31, %v20567_v36  ;;  %vm6694_vm5 = vcmp.eq.s32.totalorder %v22942_v37, %v5174_v62  ;;  %v8729_v3 = vpop.f32.mrb[87].mxu1  ;;  %5418 = vbcast.lane.b32.xlu1 %v27438_v4, 360  ;;  %5414 = vbcast.lane.b32.xlu0 %v27438_v4, 352  ;;  %v27461_v31 = vld [vmem:[#allocation99_spill] sm:$0xff] }
 0x60f   : > { %vm16531_vm8 = vmpackc.low %vm6695_vm3, %vm6694_vm5  ;;  %v10859_v12 = vadd.f32 %v27451_v42, %v8729_v3 }
 0x610   : > { %v18619_v41 = vpack.c.bf16 %v10867_v30, %v10864_v8  ;;  %20673 = vmatmul.mubr.msk.bf16.gmra.mrb[192].mxu1 %vm16531_vm8, %v22390_v52  ;;  %v5186_v57 = vpop.permute.xlu1 %5185  ;;  %v27460_v8 = vld [vmem:[#allocation98_spill] sm:$0xff] }
 0x611   : > { %v18614_v54 = vpack.c.bf16 %v10859_v12, %v10856_v19  ;;  %vm6697_vm9 = vcmp.eq.s32.totalorder %v22942_v37, %v5186_v57  ;;  %v5182_v44 = vpop.permute.xlu0 %5181  ;;  %v27462_v12 = vld [vmem:[#allocation100_spill] sm:$0xff] }
 0x612   : > { %19723 = vst [vmem:[%s24974_s8 + $0x158] sm:$0xff] %v18619_v41   ;;  %vm6696_vm7 = vcmp.eq.s32.totalorder %v22942_v37, %v5182_v44  ;;  %5426 = vbcast.lane.b32.xlu1 %v27438_v4, 376  ;;  %5422 = vbcast.lane.b32.xlu0 %v27438_v4, 368  ;;  %v27463_v44 = vld [vmem:[#allocation101_spill] sm:$0xff] }
 0x613   : > { %19722 = vst [vmem:[%s24974_s8 + $0x150] sm:$0xff] %v18614_v54   ;;  %vm16533_vm10 = vmpackc.low %vm6697_vm9, %vm6696_vm7  ;;  %v20570_v0 = vpop.f32.mrb[88].mxu1 }
 0x614   : > { %v10880_v1 = vadd.f32 %v27453_v24, %v20570_v0  ;;  %v8742_v46 = vpop.f32.mrb[89].mxu1  ;;  %20676 = vmatprep.mubr.msk.bf16.mxu1 %vm16533_vm10, %v22390_v52  ;;  %v5194_v55 = vpop.permute.xlu1 %5193 }
 0x615   : > { %v10872_v63 = vadd.f32 %v27454_v45, %v8742_v46  ;;  %vm6699_vm12 = vcmp.eq.s32.totalorder %v22942_v37, %v5194_v55  ;;  %v20571_v5 = vpop.f32.mrb[90].mxu1  ;;  %v5190_v51 = vpop.permute.xlu0 %5189 }
 0x616   : > { %v10883_v56 = vadd.f32 %v27455_v18, %v20571_v5  ;;  %vm6698_vm4 = vcmp.eq.s32.totalorder %v22942_v37, %v5190_v51  ;;  %v8745_v4 = vpop.f32.mrb[91].mxu1  ;;  %5437 = vbcast.lane.b32.xlu1 %v25319_v22, 264  ;;  %5433 = vbcast.lane.b32.xlu0 %v25319_v22, 256  ;;  %v27465_v18 = vld [vmem:[#allocation103_spill] sm:$0xff] }
 0x617   : > { %vm16535_vm6 = vmpackc.low %vm6699_vm12, %vm6698_vm4  ;;  %v10875_v40 = vadd.f32 %v27456_v39, %v8745_v4 }
 0x618   : > { %v18629_v26 = vpack.c.bf16 %v10883_v56, %v10880_v1  ;;  %20677 = vmatmul.mubr.msk.bf16.gmra.mrb[196].mxu1 %vm16535_vm6, %v22390_v52  ;;  %v5202_v34 = vpop.permute.xlu1 %5201  ;;  %v27464_v1 = vld [vmem:[#allocation102_spill] sm:$0xff] }
 0x619   : > { %v18624_v15 = vpack.c.bf16 %v10875_v40, %v10872_v63  ;;  %vm6701_vm11 = vcmp.eq.s32.totalorder %v22942_v37, %v5202_v34  ;;  %v5198_v21 = vpop.permute.xlu0 %5197  ;;  %v27466_v40 = vld [vmem:[#allocation104_spill] sm:$0xff] }
 0x61a   : > { %19725 = vst [vmem:[%s24974_s8 + $0x168] sm:$0xff] %v18629_v26   ;;  %vm6700_vm13 = vcmp.eq.s32.totalorder %v22942_v37, %v5198_v21  ;;  %5445 = vbcast.lane.b32.xlu1 %v25319_v22, 280  ;;  %5441 = vbcast.lane.b32.xlu0 %v25319_v22, 272  ;;  %v27467_v21 = vld [vmem:[#allocation105_spill] sm:$0xff] }
 0x61b   : > { %19724 = vst [vmem:[%s24974_s8 + $0x160] sm:$0xff] %v18624_v15   ;;  %vm16537_vm14 = vmpackc.low %vm6701_vm11, %vm6700_vm13  ;;  %v20574_v14 = vpop.f32.mrb[92].mxu1 }
 0x61c   : > { %v10896_v10 = vadd.f32 %v27457_v49, %v20574_v14  ;;  %v8758_v32 = vpop.f32.mrb[93].mxu1  ;;  %20680 = vmatprep.mubr.msk.bf16.mxu1 %vm16537_vm14, %v22390_v52  ;;  %v5210_v61 = vpop.permute.xlu1 %5209 }
 0x61d   : > { %v10888_v38 = vadd.f32 %v27458_v43, %v8758_v32  ;;  %vm6703_vm15 = vcmp.eq.s32.totalorder %v22942_v37, %v5210_v61  ;;  %v20575_v33 = vpop.f32.mrb[94].mxu1  ;;  %v5206_v48 = vpop.permute.xlu0 %5205 }
 0x61e   : > { %v10899_v53 = vadd.f32 %v27459_v35, %v20575_v33  ;;  %vm6702_vm1 = vcmp.eq.s32.totalorder %v22942_v37, %v5206_v48  ;;  %v8761_v20 = vpop.f32.mrb[95].mxu1  ;;  %5453 = vbcast.lane.b32.xlu1 %v25319_v22, 296  ;;  %5449 = vbcast.lane.b32.xlu0 %v25319_v22, 288  ;;  %v25387_v35 = vrot.slane %v27452_v2, %v22654_v17 }
 0x61f   : > { %vm16539_vm0 = vmpackc.low %vm6703_vm15, %vm6702_vm1  ;;  %v10891_v11 = vadd.f32 %v27460_v8, %v8761_v20 }
 0x620   : > { %v18639_v13 = vpack.c.bf16 %v10899_v53, %v10896_v10  ;;  %20681 = vmatmul.mubr.msk.bf16.gmra.mrb[200].mxu1 %vm16539_vm0, %v22390_v52  ;;  %v5218_v25 = vpop.permute.xlu1 %5217  ;;  %v27468_v10 = vld [vmem:[#allocation106_spill] sm:$0xff]  ;;  %v27469_v53 = vld [vmem:[#allocation107_spill] sm:$0xff] }
 0x621   : > { %v18634_v19 = vpack.c.bf16 %v10891_v11, %v10888_v38  ;;  %vm6705_vm2 = vcmp.eq.s32.totalorder %v22942_v37, %v5218_v25  ;;  %v5214_v36 = vpop.permute.xlu0 %5213 }
 0x622   : > { %19727 = vst [vmem:[%s24974_s8 + $0x178] sm:$0xff] %v18639_v13   ;;  %vm6704_vm3 = vcmp.eq.s32.totalorder %v22942_v37, %v5214_v36  ;;  %5461 = vbcast.lane.b32.xlu1 %v25319_v22, 312  ;;  %5457 = vbcast.lane.b32.xlu0 %v25319_v22, 304  ;;  %v27470_v13 = vld [vmem:[#allocation108_spill] sm:$0xff] }
 0x623   : > { %19726 = vst [vmem:[%s24974_s8 + $0x170] sm:$0xff] %v18634_v19   ;;  %vm16541_vm5 = vmpackc.low %vm6705_vm2, %vm6704_vm3  ;;  %v20578_v62 = vpop.f32.mrb[96].mxu1 }
 0x624   : > { %v10912_v30 = vadd.f32 %v27461_v31, %v20578_v62  ;;  %v8774_v3 = vpop.f32.mrb[97].mxu1  ;;  %20684 = vmatprep.mubr.msk.bf16.mxu1 %vm16541_vm5, %v22390_v52  ;;  %v5226_v42 = vpop.permute.xlu1 %5225  ;;  %v27471_v62 = vld [vmem:[#allocation109_spill] sm:$0xff] }
 0x625   : > { %v10904_v41 = vadd.f32 %v27462_v12, %v8774_v3  ;;  %vm6707_vm8 = vcmp.eq.s32.totalorder %v22942_v37, %v5226_v42  ;;  %v20579_v57 = vpop.f32.mrb[98].mxu1  ;;  %v5222_v54 = vpop.permute.xlu0 %5221 }
 0x626   : > { %v10915_v0 = vadd.f32 %v27463_v44, %v20579_v57  ;;  %vm6706_vm9 = vcmp.eq.s32.totalorder %v22942_v37, %v5222_v54  ;;  %v8777_v24 = vpop.f32.mrb[99].mxu1  ;;  %5469 = vbcast.lane.b32.xlu1 %v25319_v22, 328  ;;  %5465 = vbcast.lane.b32.xlu0 %v25319_v22, 320  ;;  %v27473_v44 = vld [vmem:[#allocation111_spill] sm:$0xff] }
 0x627   : > { %vm16543_vm7 = vmpackc.low %vm6707_vm8, %vm6706_vm9  ;;  %v10907_v46 = vadd.f32 %v27464_v1, %v8777_v24 }
 0x628   : > { %v18649_v55 = vpack.c.bf16 %v10915_v0, %v10912_v30  ;;  %20685 = vmatmul.mubr.msk.bf16.gmra.mrb[204].mxu1 %vm16543_vm7, %v22390_v52  ;;  %v5237_v45 = vpop.permute.xlu1 %5236  ;;  %v27472_v30 = vld [vmem:[#allocation110_spill] sm:$0xff] }
 0x629   : > { %v18644_v63 = vpack.c.bf16 %v10907_v46, %v10904_v41  ;;  %vm6709_vm10 = vcmp.eq.s32.totalorder %v22942_v37, %v5237_v45  ;;  %v5233_v5 = vpop.permute.xlu0 %5232  ;;  %v27474_v46 = vld [vmem:[#allocation112_spill] sm:$0xff] }
 0x62a   : > { %19729 = vst [vmem:[%s24974_s8 + $0x188] sm:$0xff] %v18649_v55   ;;  %vm6708_vm12 = vcmp.eq.s32.totalorder %v22942_v37, %v5233_v5  ;;  %5477 = vbcast.lane.b32.xlu1 %v25319_v22, 344  ;;  %5473 = vbcast.lane.b32.xlu0 %v25319_v22, 336  ;;  %v27475_v5 = vld [vmem:[#allocation113_spill] sm:$0xff] }
 0x62b   : > { %19728 = vst [vmem:[%s24974_s8 + $0x180] sm:$0xff] %v18644_v63   ;;  %vm16545_vm4 = vmpackc.low %vm6709_vm10, %vm6708_vm12  ;;  %v20582_v51 = vpop.f32.mrb[100].mxu1 }
 0x62c   : > { %v10928_v56 = vadd.f32 %v27465_v18, %v20582_v51  ;;  %v8790_v4 = vpop.f32.mrb[101].mxu1  ;;  %20688 = vmatprep.mubr.msk.bf16.mxu1 %vm16545_vm4, %v22390_v52  ;;  %v5245_v39 = vpop.permute.xlu1 %5244 }
 0x62d   : > { %v10920_v26 = vadd.f32 %v27466_v40, %v8790_v4  ;;  %vm6711_vm6 = vcmp.eq.s32.totalorder %v22942_v37, %v5245_v39  ;;  %v20583_v34 = vpop.f32.mrb[102].mxu1  ;;  %v5241_v15 = vpop.permute.xlu0 %5240 }
 0x62e   : > { %v10931_v14 = vadd.f32 %v27467_v21, %v20583_v34  ;;  %vm6710_vm11 = vcmp.eq.s32.totalorder %v22942_v37, %v5241_v15  ;;  %v8793_v49 = vpop.f32.mrb[103].mxu1  ;;  %5485 = vbcast.lane.b32.xlu1 %v25319_v22, 360  ;;  %5481 = vbcast.lane.b32.xlu0 %v25319_v22, 352  ;;  %v27477_v21 = vld [vmem:[#allocation115_spill] sm:$0xff] }
 0x62f   : > { %vm16547_vm13 = vmpackc.low %vm6711_vm6, %vm6710_vm11  ;;  %v10923_v32 = vadd.f32 %v27468_v10, %v8793_v49 }
 0x630   : > { %v18659_v61 = vpack.c.bf16 %v10931_v14, %v10928_v56  ;;  %20689 = vmatmul.mubr.msk.bf16.gmra.mrb[208].mxu1 %vm16547_vm13, %v22390_v52  ;;  %v5253_v43 = vpop.permute.xlu1 %5252  ;;  %v27476_v56 = vld [vmem:[#allocation114_spill] sm:$0xff] }
 0x631   : > { %v18654_v38 = vpack.c.bf16 %v10923_v32, %v10920_v26  ;;  %vm6713_vm14 = vcmp.eq.s32.totalorder %v22942_v37, %v5253_v43  ;;  %v5249_v33 = vpop.permute.xlu0 %5248  ;;  %v27478_v32 = vld [vmem:[#allocation116_spill] sm:$0xff] }
 0x632   : > { %19731 = vst [vmem:[%s24974_s8 + $0x198] sm:$0xff] %v18659_v61   ;;  %vm6712_vm15 = vcmp.eq.s32.totalorder %v22942_v37, %v5249_v33  ;;  %5493 = vbcast.lane.b32.xlu1 %v25319_v22, 376  ;;  %5489 = vbcast.lane.b32.xlu0 %v25319_v22, 368  ;;  %v27479_v33 = vld [vmem:[#allocation117_spill] sm:$0xff] }
 0x633   : > { %19730 = vst [vmem:[%s24974_s8 + $0x190] sm:$0xff] %v18654_v38   ;;  %vm16549_vm1 = vmpackc.low %vm6713_vm14, %vm6712_vm15  ;;  %v20586_v48 = vpop.f32.mrb[104].mxu1 }
 0x634   : > { %v10944_v20 = vadd.f32 %v27469_v53, %v20586_v48  ;;  %v8806_v8 = vpop.f32.mrb[105].mxu1  ;;  %20692 = vmatprep.mubr.msk.bf16.mxu1 %vm16549_vm1, %v22390_v52  ;;  %v5261_v11 = vpop.permute.xlu1 %5260 }
 0x635   : > { %v10936_v25 = vadd.f32 %v27470_v13, %v8806_v8  ;;  %vm6715_vm0 = vcmp.eq.s32.totalorder %v22942_v37, %v5261_v11  ;;  %v20587_v19 = vpop.f32.mrb[106].mxu1  ;;  %v5257_v36 = vpop.permute.xlu0 %5256 }
 0x636   : > { %v10947_v31 = vadd.f32 %v27471_v62, %v20587_v19  ;;  %vm6714_vm2 = vcmp.eq.s32.totalorder %v22942_v37, %v5257_v36  ;;  %v8809_v22 = vpop.f32.mrb[107].mxu1  ;;  %5504 = vbcast.lane.b32.xlu1 %v25387_v35, 264  ;;  %5500 = vbcast.lane.b32.xlu0 %v25387_v35, 256  ;;  %v27481_v62 = vld [vmem:[#allocation119_spill] sm:$0xff] }
 0x637   : > { %vm16551_vm3 = vmpackc.low %vm6715_vm0, %vm6714_vm2  ;;  %v10939_v3 = vadd.f32 %v27472_v30, %v8809_v22 }
 0x638   : > { %v18669_v42 = vpack.c.bf16 %v10947_v31, %v10944_v20  ;;  %20693 = vmatmul.mubr.msk.bf16.gmra.mrb[212].mxu1 %vm16551_vm3, %v22390_v52  ;;  %v5269_v12 = vpop.permute.xlu1 %5268  ;;  %v27480_v20 = vld [vmem:[#allocation118_spill] sm:$0xff] }
 0x639   : > { %v18664_v41 = vpack.c.bf16 %v10939_v3, %v10936_v25  ;;  %vm6717_vm5 = vcmp.eq.s32.totalorder %v22942_v37, %v5269_v12  ;;  %v5265_v57 = vpop.permute.xlu0 %5264  ;;  %v27482_v3 = vld [vmem:[#allocation120_spill] sm:$0xff] }
 0x63a   : > { %19733 = vst [vmem:[%s24974_s8 + $0x1a8] sm:$0xff] %v18669_v42   ;;  %vm6716_vm8 = vcmp.eq.s32.totalorder %v22942_v37, %v5265_v57  ;;  %5512 = vbcast.lane.b32.xlu1 %v25387_v35, 280  ;;  %5508 = vbcast.lane.b32.xlu0 %v25387_v35, 272  ;;  %v27483_v57 = vld [vmem:[#allocation121_spill] sm:$0xff] }
 0x63b   : > { %19732 = vst [vmem:[%s24974_s8 + $0x1a0] sm:$0xff] %v18664_v41   ;;  %vm16553_vm9 = vmpackc.low %vm6717_vm5, %vm6716_vm8  ;;  %v20590_v54 = vpop.f32.mrb[108].mxu1 }
 0x63c   : > { %v10960_v0 = vadd.f32 %v27473_v44, %v20590_v54  ;;  %v8822_v24 = vpop.f32.mrb[109].mxu1  ;;  %20696 = vmatprep.mubr.msk.bf16.mxu1 %vm16553_vm9, %v22390_v52  ;;  %v5277_v1 = vpop.permute.xlu1 %5276 }
 0x63d   : > { %v10952_v55 = vadd.f32 %v27474_v46, %v8822_v24  ;;  %vm6719_vm7 = vcmp.eq.s32.totalorder %v22942_v37, %v5277_v1  ;;  %v20591_v45 = vpop.f32.mrb[110].mxu1  ;;  %v5273_v63 = vpop.permute.xlu0 %5272 }
 0x63e   : > { %v10963_v51 = vadd.f32 %v27475_v5, %v20591_v45  ;;  %vm6718_vm10 = vcmp.eq.s32.totalorder %v22942_v37, %v5273_v63  ;;  %v8825_v18 = vpop.f32.mrb[111].mxu1  ;;  %5520 = vbcast.lane.b32.xlu1 %v25387_v35, 296  ;;  %5516 = vbcast.lane.b32.xlu0 %v25387_v35, 288  ;;  %v25455_v5 = vrot.slane %v27452_v2, %v22666_v29 }
 0x63f   : > { %vm16555_vm12 = vmpackc.low %vm6719_vm7, %vm6718_vm10  ;;  %v10955_v4 = vadd.f32 %v27476_v56, %v8825_v18 }
 0x640   : > { %v18679_v39 = vpack.c.bf16 %v10963_v51, %v10960_v0  ;;  %20697 = vmatmul.mubr.msk.bf16.gmra.mrb[216].mxu1 %vm16555_vm12, %v22390_v52  ;;  %v5285_v40 = vpop.permute.xlu1 %5284  ;;  %v27484_v0 = vld [vmem:[#allocation122_spill] sm:$0xff] }
 0x641   : > { %v18674_v26 = vpack.c.bf16 %v10955_v4, %v10952_v55  ;;  %vm6721_vm4 = vcmp.eq.s32.totalorder %v22942_v37, %v5285_v40  ;;  %v5281_v34 = vpop.permute.xlu0 %5280 }
 0x642   : > { %19735 = vst [vmem:[%s24974_s8 + $0x1b8] sm:$0xff] %v18679_v39   ;;  %vm6720_vm6 = vcmp.eq.s32.totalorder %v22942_v37, %v5281_v34  ;;  %5528 = vbcast.lane.b32.xlu1 %v25387_v35, 312  ;;  %5524 = vbcast.lane.b32.xlu0 %v25387_v35, 304 }
 0x643   : > { %19734 = vst [vmem:[%s24974_s8 + $0x1b0] sm:$0xff] %v18674_v26   ;;  %vm16557_vm11 = vmpackc.low %vm6721_vm4, %vm6720_vm6  ;;  %v20594_v15 = vpop.f32.mrb[112].mxu1  ;;  %v27485_v26 = vld [vmem:[#allocation123_spill] sm:$0xff] }
 0x644   : > { %v10976_v14 = vadd.f32 %v27477_v21, %v20594_v15  ;;  %v8838_v49 = vpop.f32.mrb[113].mxu1  ;;  %20700 = vmatprep.mubr.msk.bf16.mxu1 %vm16557_vm11, %v22390_v52  ;;  %v5293_v10 = vpop.permute.xlu1 %5292 }
 0x645   : > { %v10968_v61 = vadd.f32 %v27478_v32, %v8838_v49  ;;  %vm6723_vm13 = vcmp.eq.s32.totalorder %v22942_v37, %v5293_v10  ;;  %v20595_v43 = vpop.f32.mrb[114].mxu1  ;;  %v5289_v38 = vpop.permute.xlu0 %5288  ;;  %v27487_v10 = vld [vmem:[#allocation125_spill] sm:$0xff] }
 0x646   : > { %v10979_v48 = vadd.f32 %v27479_v33, %v20595_v43  ;;  %vm6722_vm14 = vcmp.eq.s32.totalorder %v22942_v37, %v5289_v38  ;;  %v8841_v53 = vpop.f32.mrb[115].mxu1  ;;  %5536 = vbcast.lane.b32.xlu1 %v25387_v35, 328  ;;  %5532 = vbcast.lane.b32.xlu0 %v25387_v35, 320  ;;  %v27488_v38 = vld [vmem:[#allocation126_spill] sm:$0xff] }
 0x647   : > { %vm16559_vm15 = vmpackc.low %vm6723_vm13, %vm6722_vm14  ;;  %v10971_v8 = vadd.f32 %v27480_v20, %v8841_v53  ;;  %v27489_v20 = vld [vmem:[#allocation127_spill] sm:$0xff] }
 0x648   : > { %v18689_v11 = vpack.c.bf16 %v10979_v48, %v10976_v14  ;;  %20701 = vmatmul.mubr.msk.bf16.gmra.mrb[220].mxu1 %vm16559_vm15, %v22390_v52  ;;  %v5304_v13 = vpop.permute.xlu1 %5303 }
 0x649   : > { %v18684_v25 = vpack.c.bf16 %v10971_v8, %v10968_v61  ;;  %vm6725_vm1 = vcmp.eq.s32.totalorder %v22942_v37, %v5304_v13  ;;  %v5300_v19 = vpop.permute.xlu0 %5299  ;;  %v27490_v13 = vld [vmem:[#allocation128_spill] sm:$0xff] }
 0x64a   : > { %19737 = vst [vmem:[%s24974_s8 + $0x1c8] sm:$0xff] %v18689_v11   ;;  %vm6724_vm0 = vcmp.eq.s32.totalorder %v22942_v37, %v5300_v19  ;;  %5544 = vbcast.lane.b32.xlu1 %v25387_v35, 344  ;;  %5540 = vbcast.lane.b32.xlu0 %v25387_v35, 336 }
 0x64b   : > { %19736 = vst [vmem:[%s24974_s8 + $0x1c0] sm:$0xff] %v18684_v25   ;;  %vm16561_vm2 = vmpackc.low %vm6725_vm1, %vm6724_vm0  ;;  %v20598_v36 = vpop.f32.mrb[116].mxu1 }
 0x64c   : > { %v10992_v31 = vadd.f32 %v27481_v62, %v20598_v36  ;;  %v8854_v22 = vpop.f32.mrb[117].mxu1  ;;  %20704 = vmatprep.mubr.msk.bf16.mxu1 %vm16561_vm2, %v22390_v52  ;;  %v5312_v30 = vpop.permute.xlu1 %5311 }
 0x64d   : > { %v10984_v42 = vadd.f32 %v27482_v3, %v8854_v22  ;;  %vm6727_vm3 = vcmp.eq.s32.totalorder %v22942_v37, %v5312_v30  ;;  %v20599_v12 = vpop.f32.mrb[118].mxu1  ;;  %v5308_v41 = vpop.permute.xlu0 %5307  ;;  %v27491_v30 = vld [vmem:[#allocation129_spill] sm:$0xff] }
 0x64e   : > { %v10995_v54 = vadd.f32 %v27483_v57, %v20599_v12  ;;  %vm6726_vm5 = vcmp.eq.s32.totalorder %v22942_v37, %v5308_v41  ;;  %v8857_v44 = vpop.f32.mrb[119].mxu1  ;;  %5552 = vbcast.lane.b32.xlu1 %v25387_v35, 360  ;;  %5548 = vbcast.lane.b32.xlu0 %v25387_v35, 352  ;;  %v27492_v41 = vld [vmem:[#allocation130_spill] sm:$0xff] }
 0x64f   : > { %vm16563_vm8 = vmpackc.low %vm6727_vm3, %vm6726_vm5  ;;  %v10987_v24 = vadd.f32 %v27484_v0, %v8857_v44  ;;  %v27493_v0 = vld [vmem:[#allocation131_spill] sm:$0xff] }
 0x650   : > { %v18699_v1 = vpack.c.bf16 %v10995_v54, %v10992_v31  ;;  %20705 = vmatmul.mubr.msk.bf16.gmra.mrb[224].mxu1 %vm16563_vm8, %v22390_v52  ;;  %v5320_v46 = vpop.permute.xlu1 %5319 }
 0x651   : > { %v18694_v55 = vpack.c.bf16 %v10987_v24, %v10984_v42  ;;  %vm6729_vm9 = vcmp.eq.s32.totalorder %v22942_v37, %v5320_v46  ;;  %v5316_v45 = vpop.permute.xlu0 %5315  ;;  %v27494_v46 = vld [vmem:[#allocation132_spill] sm:$0xff] }
 0x652   : > { %19739 = vst [vmem:[%s24974_s8 + $0x1d8] sm:$0xff] %v18699_v1   ;;  %vm6728_vm7 = vcmp.eq.s32.totalorder %v22942_v37, %v5316_v45  ;;  %5560 = vbcast.lane.b32.xlu1 %v25387_v35, 376  ;;  %5556 = vbcast.lane.b32.xlu0 %v25387_v35, 368 }
 0x653   : > { %19738 = vst [vmem:[%s24974_s8 + $0x1d0] sm:$0xff] %v18694_v55   ;;  %vm16565_vm10 = vmpackc.low %vm6729_vm9, %vm6728_vm7  ;;  %v20602_v63 = vpop.f32.mrb[120].mxu1 }
 0x654   : > { %v11008_v51 = vadd.f32 %v23779_v9, %v20602_v63  ;;  %v8870_v18 = vpop.f32.mrb[121].mxu1  ;;  %20708 = vmatprep.mubr.msk.bf16.mxu1 %vm16565_vm10, %v22390_v52  ;;  %v5328_v56 = vpop.permute.xlu1 %5327  ;;  %v27486_v9 = vld [vmem:[#allocation124_spill] sm:$0xff] }
 0x655   : > { %v11000_v4 = vadd.f32 %v23786_v6, %v8870_v18  ;;  %vm6731_vm12 = vcmp.eq.s32.totalorder %v22942_v37, %v5328_v56  ;;  %v20603_v39 = vpop.f32.mrb[122].mxu1  ;;  %v5324_v40 = vpop.permute.xlu0 %5323 }
 0x656   : > { %v11011_v34 = vadd.f32 %v27485_v26, %v20603_v39  ;;  %vm6730_vm4 = vcmp.eq.s32.totalorder %v22942_v37, %v5324_v40  ;;  %v8873_v2 = vpop.f32.mrb[123].mxu1  ;;  %5571 = vbcast.lane.b32.xlu1 %v25455_v5, 264  ;;  %5567 = vbcast.lane.b32.xlu0 %v25455_v5, 256 }
 0x657   : > { %vm16567_vm6 = vmpackc.low %vm6731_vm12, %vm6730_vm4  ;;  %v11003_v35 = vadd.f32 %v27486_v9, %v8873_v2 }
 0x658   : > { %v18709_v15 = vpack.c.bf16 %v11011_v34, %v11008_v51  ;;  %20709 = vmatmul.mubr.msk.bf16.gmra.mrb[228].mxu1 %vm16567_vm6, %v22390_v52  ;;  %v5336_v6 = vpop.permute.xlu1 %5335  ;;  %v27496_v34 = vld [vmem:[#allocation134_spill] sm:$0xff] }
 0x659   : > { %v18704_v21 = vpack.c.bf16 %v11003_v35, %v11000_v4  ;;  %vm6733_vm11 = vcmp.eq.s32.totalorder %v22942_v37, %v5336_v6  ;;  %v5332_v14 = vpop.permute.xlu0 %5331  ;;  %v27495_v4 = vld [vmem:[#allocation133_spill] sm:$0xff] }
 0x65a   : > { %19741 = vst [vmem:[%s24974_s8 + $0x1e8] sm:$0xff] %v18709_v15   ;;  %vm6732_vm13 = vcmp.eq.s32.totalorder %v22942_v37, %v5332_v14  ;;  %5579 = vbcast.lane.b32.xlu1 %v25455_v5, 280  ;;  %5575 = vbcast.lane.b32.xlu0 %v25455_v5, 272  ;;  %v27497_v15 = vld [vmem:[#allocation135_spill] sm:$0xff]  ;;  %v27498_v14 = vld [vmem:[#allocation136_spill] sm:$0xff] }
 0x65b   : > { %19740 = vst [vmem:[%s24974_s8 + $0x1e0] sm:$0xff] %v18704_v21   ;;  %vm16569_vm14 = vmpackc.low %vm6733_vm11, %vm6732_vm13  ;;  %v20606_v49 = vpop.f32.mrb[124].mxu1 }
 0x65c   : > { %v11024_v32 = vadd.f32 %v27487_v10, %v20606_v49  ;;  %v8886_v61 = vpop.f32.mrb[125].mxu1  ;;  %20712 = vmatprep.mubr.msk.bf16.mxu1 %vm16569_vm14, %v22390_v52  ;;  %v5344_v43 = vpop.permute.xlu1 %5343 }
 0x65d   : > { %v11016_v33 = vadd.f32 %v27488_v38, %v8886_v61  ;;  %vm6735_vm15 = vcmp.eq.s32.totalorder %v22942_v37, %v5344_v43  ;;  %v20607_v48 = vpop.f32.mrb[126].mxu1  ;;  %v5340_v53 = vpop.permute.xlu0 %5339 }
 0x65e   : > { %v11027_v8 = vadd.f32 %v27489_v20, %v20607_v48  ;;  %vm6734_vm1 = vcmp.eq.s32.totalorder %v22942_v37, %v5340_v53  ;;  %v8889_v11 = vpop.f32.mrb[127].mxu1  ;;  %5587 = vbcast.lane.b32.xlu1 %v25455_v5, 296  ;;  %5583 = vbcast.lane.b32.xlu0 %v25455_v5, 288  ;;  %v27499_v20 = vld [vmem:[#allocation137_spill] sm:$0xff] }
 0x65f   : > { %vm16571_vm0 = vmpackc.low %vm6735_vm15, %vm6734_vm1  ;;  %v11019_v25 = vadd.f32 %v27490_v13, %v8889_v11 }
 0x660   : > { %v18719_v19 = vpack.c.bf16 %v11027_v8, %v11024_v32  ;;  %20713 = vmatmul.mubr.msk.bf16.gmra.mrb[232].mxu1 %vm16571_vm0, %v22390_v52  ;;  %v5352_v36 = vpop.permute.xlu1 %5351 }
 0x661   : > { %v18714_v62 = vpack.c.bf16 %v11019_v25, %v11016_v33  ;;  %vm6737_vm2 = vcmp.eq.s32.totalorder %v22942_v37, %v5352_v36  ;;  %v5348_v31 = vpop.permute.xlu0 %5347  ;;  %v27500_v25 = vld [vmem:[#allocation138_spill] sm:$0xff] }
 0x662   : > { %19743 = vst [vmem:[%s24974_s8 + $0x1f8] sm:$0xff] %v18719_v19   ;;  %vm6736_vm3 = vcmp.eq.s32.totalorder %v22942_v37, %v5348_v31  ;;  %5595 = vbcast.lane.b32.xlu1 %v25455_v5, 312  ;;  %5591 = vbcast.lane.b32.xlu0 %v25455_v5, 304 }
 0x663   : > { %19742 = vst [vmem:[%s24974_s8 + $0x1f0] sm:$0xff] %v18714_v62   ;;  %vm16573_vm5 = vmpackc.low %vm6737_vm2, %vm6736_vm3  ;;  %v20610_v22 = vpop.f32.mrb[128].mxu1 }
 0x664   : > { %v11040_v3 = vadd.f32 %v27491_v30, %v20610_v22  ;;  %v8902_v42 = vpop.f32.mrb[129].mxu1  ;;  %20716 = vmatprep.mubr.msk.bf16.mxu1 %vm16573_vm5, %v22390_v52  ;;  %v5360_v12 = vpop.permute.xlu1 %5359 }
 0x665   : > { %v11032_v57 = vadd.f32 %v27492_v41, %v8902_v42  ;;  %vm6739_vm8 = vcmp.eq.s32.totalorder %v22942_v37, %v5360_v12  ;;  %v20611_v54 = vpop.f32.mrb[130].mxu1  ;;  %v5356_v44 = vpop.permute.xlu0 %5355  ;;  %v27503_v12 = vld [vmem:[#allocation140_spill] sm:$0xff] }
 0x666   : > { %v11043_v24 = vadd.f32 %v27493_v0, %v20611_v54  ;;  %vm6738_vm9 = vcmp.eq.s32.totalorder %v22942_v37, %v5356_v44  ;;  %v8905_v1 = vpop.f32.mrb[131].mxu1  ;;  %5603 = vbcast.lane.b32.xlu1 %v25455_v5, 328  ;;  %5599 = vbcast.lane.b32.xlu0 %v25455_v5, 320  ;;  %v27504_v44 = vld [vmem:[#allocation141_spill] sm:$0xff] }
 0x667   : > { %vm16575_vm7 = vmpackc.low %vm6739_vm8, %vm6738_vm9  ;;  %v11035_v55 = vadd.f32 %v27494_v46, %v8905_v1  ;;  %v27505_v46 = vld [vmem:[#allocation142_spill] sm:$0xff] }
 0x668   : > { %v18729_v45 = vpack.c.bf16 %v11043_v24, %v11040_v3  ;;  %20717 = vmatmul.mubr.msk.bf16.gmra.mrb[236].mxu1 %vm16575_vm7, %v22390_v52  ;;  %v5371_v63 = vpop.permute.xlu1 %5370 }
 0x669   : > { %v18724_v51 = vpack.c.bf16 %v11035_v55, %v11032_v57  ;;  %vm6741_vm10 = vcmp.eq.s32.totalorder %v22942_v37, %v5371_v63  ;;  %v5367_v18 = vpop.permute.xlu0 %5366  ;;  %v27506_v63 = vld [vmem:[#allocation143_spill] sm:$0xff] }
 0x66a   : > { %19745 = vst [vmem:[%s24974_s8 + $0x208] sm:$0xff] %v18729_v45   ;;  %vm6740_vm12 = vcmp.eq.s32.totalorder %v22942_v37, %v5367_v18  ;;  %5611 = vbcast.lane.b32.xlu1 %v25455_v5, 344  ;;  %5607 = vbcast.lane.b32.xlu0 %v25455_v5, 336 }
 0x66b   : > { %19744 = vst [vmem:[%s24974_s8 + $0x200] sm:$0xff] %v18724_v51   ;;  %vm16577_vm4 = vmpackc.low %vm6741_vm10, %vm6740_vm12  ;;  %v20614_v56 = vpop.f32.mrb[132].mxu1 }
 0x66c   : > { %v11056_v39 = vadd.f32 %v27495_v4, %v20614_v56  ;;  %v8918_v40 = vpop.f32.mrb[133].mxu1  ;;  %20720 = vmatprep.mubr.msk.bf16.mxu1 %vm16577_vm4, %v22390_v52  ;;  %v5379_v26 = vpop.permute.xlu1 %5378 }
 0x66d   : > { %v11048_v2 = vadd.f32 %v27496_v34, %v8918_v40  ;;  %vm6743_vm6 = vcmp.eq.s32.totalorder %v22942_v37, %v5379_v26  ;;  %v20615_v9 = vpop.f32.mrb[134].mxu1  ;;  %v5375_v35 = vpop.permute.xlu0 %5374  ;;  %v27507_v26 = vld [vmem:[#allocation144_spill] sm:$0xff] }
 0x66e   : > { %v11059_v6 = vadd.f32 %v27497_v15, %v20615_v9  ;;  %vm6742_vm11 = vcmp.eq.s32.totalorder %v22942_v37, %v5375_v35  ;;  %v8921_v21 = vpop.f32.mrb[135].mxu1  ;;  %5619 = vbcast.lane.b32.xlu1 %v25455_v5, 360  ;;  %5615 = vbcast.lane.b32.xlu0 %v25455_v5, 352  ;;  %v27508_v35 = vld [vmem:[#allocation145_spill] sm:$0xff] }
 0x66f   : > { %vm16579_vm13 = vmpackc.low %vm6743_vm6, %vm6742_vm11  ;;  %v11051_v49 = vadd.f32 %v27498_v14, %v8921_v21  ;;  %v27509_v14 = vld [vmem:[#allocation146_spill] sm:$0xff] }
 0x670   : > { %v18739_v10 = vpack.c.bf16 %v11059_v6, %v11056_v39  ;;  %20721 = vmatmul.mubr.msk.bf16.gmra.mrb[240].mxu1 %vm16579_vm13, %v22390_v52  ;;  %v5387_v32 = vpop.permute.xlu1 %5386 }
 0x671   : > { %v18734_v61 = vpack.c.bf16 %v11051_v49, %v11048_v2  ;;  %vm6745_vm14 = vcmp.eq.s32.totalorder %v22942_v37, %v5387_v32  ;;  %v5383_v43 = vpop.permute.xlu0 %5382  ;;  %v27510_v32 = vld [vmem:[#allocation147_spill] sm:$0xff] }
 0x672   : > { %19747 = vst [vmem:[%s24974_s8 + $0x218] sm:$0xff] %v18739_v10   ;;  %vm6744_vm15 = vcmp.eq.s32.totalorder %v22942_v37, %v5383_v43  ;;  %5627 = vbcast.lane.b32.xlu1 %v25455_v5, 376  ;;  %5623 = vbcast.lane.b32.xlu0 %v25455_v5, 368  ;;  %v27501_v5 = vld [vmem:[#allocation28_spill] sm:$0xff] }
 0x673   : > { %19746 = vst [vmem:[%s24974_s8 + $0x210] sm:$0xff] %v18734_v61   ;;  %vm16581_vm1 = vmpackc.low %vm6745_vm14, %vm6744_vm15  ;;  %v20618_v38 = vpop.f32.mrb[136].mxu1 }
 0x674   : > { %v11072_v33 = vadd.f32 %v23855_v58, %v20618_v38  ;;  %v8934_v48 = vpop.f32.mrb[137].mxu1  ;;  %20724 = vmatprep.mubr.msk.bf16.mxu1 %vm16581_vm1, %v22390_v52  ;;  %v5395_v53 = vpop.permute.xlu1 %5394  ;;  %v27502_v58 = vld [vmem:[#allocation139_spill] sm:$0xff] }
 0x675   : > { %v11064_v8 = vadd.f32 %v27499_v20, %v8934_v48  ;;  %vm6747_vm0 = vcmp.eq.s32.totalorder %v22942_v37, %v5395_v53  ;;  %v20619_v11 = vpop.f32.mrb[138].mxu1  ;;  %v5391_v13 = vpop.permute.xlu0 %5390  ;;  %v27511_v20 = vld [vmem:[#allocation148_spill] sm:$0xff] }
 0x676   : > { %v11075_v19 = vadd.f32 %v27500_v25, %v20619_v11  ;;  %vm6746_vm2 = vcmp.eq.s32.totalorder %v22942_v37, %v5391_v13  ;;  %v8937_v36 = vpop.f32.mrb[139].mxu1  ;;  %5638 = vbcast.lane.b32.xlu1 %v27501_v5, 264  ;;  %5634 = vbcast.lane.b32.xlu0 %v27501_v5, 256  ;;  %v27512_v25 = vld [vmem:[#allocation149_spill] sm:$0xff] }
 0x677   : > { %vm16583_vm3 = vmpackc.low %vm6747_vm0, %vm6746_vm2  ;;  %v11067_v62 = vadd.f32 %v27502_v58, %v8937_v36 }
 0x678   : > { %v18749_v31 = vpack.c.bf16 %v11075_v19, %v11072_v33  ;;  %20725 = vmatmul.mubr.msk.bf16.gmra.mrb[244].mxu1 %vm16583_vm3, %v22390_v52  ;;  %v5403_v22 = vpop.permute.xlu1 %5402 }
 0x679   : > { %v18744_v30 = vpack.c.bf16 %v11067_v62, %v11064_v8  ;;  %vm6749_vm5 = vcmp.eq.s32.totalorder %v22942_v37, %v5403_v22  ;;  %v5399_v3 = vpop.permute.xlu0 %5398  ;;  %v27513_v62 = vld [vmem:[#allocation150_spill] sm:$0xff] }
 0x67a   : > { %19749 = vst [vmem:[%s24974_s8 + $0x228] sm:$0xff] %v18749_v31   ;;  %vm6748_vm8 = vcmp.eq.s32.totalorder %v22942_v37, %v5399_v3  ;;  %5646 = vbcast.lane.b32.xlu1 %v27501_v5, 280  ;;  %5642 = vbcast.lane.b32.xlu0 %v27501_v5, 272 }
 0x67b   : > { %19748 = vst [vmem:[%s24974_s8 + $0x220] sm:$0xff] %v18744_v30   ;;  %vm16585_vm9 = vmpackc.low %vm6749_vm5, %vm6748_vm8  ;;  %v20622_v42 = vpop.f32.mrb[140].mxu1  ;;  %v27514_v30 = vld [vmem:[#allocation151_spill] sm:$0xff] }
 0x67c   : > { %v11088_v41 = vadd.f32 %v27503_v12, %v20622_v42  ;;  %v8950_v57 = vpop.f32.mrb[141].mxu1  ;;  %20728 = vmatprep.mubr.msk.bf16.mxu1 %vm16585_vm9, %v22390_v52  ;;  %v5411_v54 = vpop.permute.xlu1 %5410 }
 0x67d   : > { %v11080_v0 = vadd.f32 %v27504_v44, %v8950_v57  ;;  %vm6751_vm7 = vcmp.eq.s32.totalorder %v22942_v37, %v5411_v54  ;;  %v20623_v24 = vpop.f32.mrb[142].mxu1  ;;  %v5407_v1 = vpop.permute.xlu0 %5406 }
 0x67e   : > { %v11091_v55 = vadd.f32 %v27505_v46, %v20623_v24  ;;  %vm6750_vm10 = vcmp.eq.s32.totalorder %v22942_v37, %v5407_v1  ;;  %v8953_v45 = vpop.f32.mrb[143].mxu1  ;;  %5654 = vbcast.lane.b32.xlu1 %v27501_v5, 296  ;;  %5650 = vbcast.lane.b32.xlu0 %v27501_v5, 288  ;;  %v27515_v1 = vld [vmem:[#allocation152_spill] sm:$0xff] }
 0x67f   : > { %vm16587_vm12 = vmpackc.low %vm6751_vm7, %vm6750_vm10  ;;  %v11083_v51 = vadd.f32 %v27506_v63, %v8953_v45  ;;  %v27516_v63 = vld [vmem:[#allocation153_spill] sm:$0xff] }
 0x680   : > { %v18759_v18 = vpack.c.bf16 %v11091_v55, %v11088_v41  ;;  %20729 = vmatmul.mubr.msk.bf16.gmra.mrb[248].mxu1 %vm16587_vm12, %v22390_v52  ;;  %v5419_v56 = vpop.permute.xlu1 %5418 }
 0x681   : > { %v18754_v4 = vpack.c.bf16 %v11083_v51, %v11080_v0  ;;  %vm6753_vm4 = vcmp.eq.s32.totalorder %v22942_v37, %v5419_v56  ;;  %v5415_v39 = vpop.permute.xlu0 %5414 }
 0x682   : > { %19751 = vst [vmem:[%s24974_s8 + $0x238] sm:$0xff] %v18759_v18   ;;  %vm6752_vm6 = vcmp.eq.s32.totalorder %v22942_v37, %v5415_v39  ;;  %5662 = vbcast.lane.b32.xlu1 %v27501_v5, 312  ;;  %5658 = vbcast.lane.b32.xlu0 %v27501_v5, 304 }
 0x683   : > { %19750 = vst [vmem:[%s24974_s8 + $0x230] sm:$0xff] %v18754_v4   ;;  %vm16589_vm11 = vmpackc.low %vm6753_vm4, %vm6752_vm6  ;;  %v20626_v40 = vpop.f32.mrb[144].mxu1 }
 0x684   : > { %v11104_v34 = vadd.f32 %v27507_v26, %v20626_v40  ;;  %v8966_v2 = vpop.f32.mrb[145].mxu1  ;;  %20732 = vmatprep.mubr.msk.bf16.mxu1 %vm16589_vm11, %v22390_v52  ;;  %v5427_v9 = vpop.permute.xlu1 %5426 }
 0x685   : > { %v11096_v15 = vadd.f32 %v27508_v35, %v8966_v2  ;;  %vm6755_vm13 = vcmp.eq.s32.totalorder %v22942_v37, %v5427_v9  ;;  %v20627_v6 = vpop.f32.mrb[146].mxu1  ;;  %v5423_v21 = vpop.permute.xlu0 %5422  ;;  %v27519_v2 = vld [vmem:[#allocation155_spill] sm:$0xff] }
 0x686   : > { %v11107_v49 = vadd.f32 %v27509_v14, %v20627_v6  ;;  %vm6754_vm14 = vcmp.eq.s32.totalorder %v22942_v37, %v5423_v21  ;;  %v8969_v10 = vpop.f32.mrb[147].mxu1  ;;  %5670 = vbcast.lane.b32.xlu1 %v27501_v5, 328  ;;  %5666 = vbcast.lane.b32.xlu0 %v27501_v5, 320  ;;  %v27520_v6 = vld [vmem:[#allocation156_spill] sm:$0xff] }
 0x687   : > { %vm16591_vm15 = vmpackc.low %vm6755_vm13, %vm6754_vm14  ;;  %v11099_v61 = vadd.f32 %v27510_v32, %v8969_v10  ;;  %v27521_v10 = vld [vmem:[#allocation157_spill] sm:$0xff] }
 0x688   : > { %v18769_v43 = vpack.c.bf16 %v11107_v49, %v11104_v34  ;;  %20733 = vmatmul.mubr.msk.bf16.gmra.mrb[252].mxu1 %vm16591_vm15, %v22390_v52  ;;  %v5438_v38 = vpop.permute.xlu1 %5437 }
 0x689   : > { %v18764_v33 = vpack.c.bf16 %v11099_v61, %v11096_v15  ;;  %vm6757_vm1 = vcmp.eq.s32.totalorder %v22942_v37, %v5438_v38  ;;  %v5434_v48 = vpop.permute.xlu0 %5433 }
 0x68a   : > { %19753 = vst [vmem:[%s24974_s8 + $0x248] sm:$0xff] %v18769_v43   ;;  %vm6756_vm0 = vcmp.eq.s32.totalorder %v22942_v37, %v5434_v48  ;;  %5678 = vbcast.lane.b32.xlu1 %v27501_v5, 344  ;;  %5674 = vbcast.lane.b32.xlu0 %v27501_v5, 336  ;;  %v27522_v43 = vld [vmem:[#allocation158_spill] sm:$0xff] }
 0x68b   : > { %19752 = vst [vmem:[%s24974_s8 + $0x240] sm:$0xff] %v18764_v33   ;;  %vm16593_vm2 = vmpackc.low %vm6757_vm1, %vm6756_vm0  ;;  %v20630_v53 = vpop.f32.mrb[148].mxu1 }
 0x68c   : > { %v11120_v8 = vadd.f32 %v27511_v20, %v20630_v53  ;;  %v8982_v11 = vpop.f32.mrb[149].mxu1  ;;  %20736 = vmatprep.mubr.msk.bf16.mxu1 %vm16593_vm2, %v22390_v52  ;;  %v5446_v13 = vpop.permute.xlu1 %5445 }
 0x68d   : > { %v11112_v19 = vadd.f32 %v27512_v25, %v8982_v11  ;;  %vm6759_vm3 = vcmp.eq.s32.totalorder %v22942_v37, %v5446_v13  ;;  %v20631_v36 = vpop.f32.mrb[150].mxu1  ;;  %v5442_v58 = vpop.permute.xlu0 %5441  ;;  %v27523_v11 = vld [vmem:[#allocation159_spill] sm:$0xff] }
 0x68e   : > { %v11123_v31 = vadd.f32 %v27513_v62, %v20631_v36  ;;  %vm6758_vm5 = vcmp.eq.s32.totalorder %v22942_v37, %v5442_v58  ;;  %v8985_v22 = vpop.f32.mrb[151].mxu1  ;;  %5686 = vbcast.lane.b32.xlu1 %v27501_v5, 360  ;;  %5682 = vbcast.lane.b32.xlu0 %v27501_v5, 352  ;;  %v27524_v36 = vld [vmem:[#allocation160_spill] sm:$0xff] }
 0x68f   : > { %vm16595_vm8 = vmpackc.low %vm6759_vm3, %vm6758_vm5  ;;  %v11115_v3 = vadd.f32 %v27514_v30, %v8985_v22  ;;  %v27525_v22 = vld [vmem:[#allocation161_spill] sm:$0xff] }
 0x690   : > { %v18779_v42 = vpack.c.bf16 %v11123_v31, %v11120_v8  ;;  %20737 = vmatmul.mubr.msk.bf16.gmra.mrb[148].mxu1 %vm16595_vm8, %v22390_v52  ;;  %v5454_v12 = vpop.permute.xlu1 %5453 }
 0x691   : > { %v18774_v41 = vpack.c.bf16 %v11115_v3, %v11112_v19  ;;  %vm6761_vm9 = vcmp.eq.s32.totalorder %v22942_v37, %v5454_v12  ;;  %v5450_v57 = vpop.permute.xlu0 %5449 }
 0x692   : > { %19755 = vst [vmem:[%s24974_s8 + $0x258] sm:$0xff] %v18779_v42   ;;  %vm6760_vm7 = vcmp.eq.s32.totalorder %v22942_v37, %v5450_v57  ;;  %5694 = vbcast.lane.b32.xlu1 %v27501_v5, 376  ;;  %5690 = vbcast.lane.b32.xlu0 %v27501_v5, 368  ;;  %v27517_v5 = vld [vmem:[#allocation29_spill] sm:$0xff]  ;;  %v27526_v42 = vld [vmem:[#allocation162_spill] sm:$0xff] }
 0x693   : > { %19754 = vst [vmem:[%s24974_s8 + $0x250] sm:$0xff] %v18774_v41   ;;  %vm16597_vm10 = vmpackc.low %vm6761_vm9, %vm6760_vm7  ;;  %v20634_v54 = vpop.f32.mrb[152].mxu1 }
 0x694   : > { %v11136_v44 = vadd.f32 %v23927_v7, %v20634_v54  ;;  %v8998_v0 = vpop.f32.mrb[153].mxu1  ;;  %20740 = vmatprep.mubr.msk.bf16.mxu1 %vm16597_vm10, %v22390_v52  ;;  %v5462_v24 = vpop.permute.xlu1 %5461  ;;  %v27518_v7 = vld [vmem:[#allocation154_spill] sm:$0xff] }
 0x695   : > { %v11128_v46 = vadd.f32 %v27515_v1, %v8998_v0  ;;  %vm6763_vm12 = vcmp.eq.s32.totalorder %v22942_v37, %v5462_v24  ;;  %v20635_v55 = vpop.f32.mrb[154].mxu1  ;;  %v5458_v45 = vpop.permute.xlu0 %5457  ;;  %v27527_v24 = vld [vmem:[#allocation163_spill] sm:$0xff] }
 0x696   : > { %v11139_v51 = vadd.f32 %v27516_v63, %v20635_v55  ;;  %vm6762_vm4 = vcmp.eq.s32.totalorder %v22942_v37, %v5458_v45  ;;  %v9001_v18 = vpop.f32.mrb[155].mxu1  ;;  %5705 = vbcast.lane.b32.xlu1 %v27517_v5, 264  ;;  %5701 = vbcast.lane.b32.xlu0 %v27517_v5, 256  ;;  %v27528_v45 = vld [vmem:[#allocation164_spill] sm:$0xff] }
 0x697   : > { %vm16599_vm6 = vmpackc.low %vm6763_vm12, %vm6762_vm4  ;;  %v11131_v56 = vadd.f32 %v27518_v7, %v9001_v18  ;;  %v27529_v7 = vld [vmem:[#allocation165_spill] sm:$0xff] }
 0x698   : > { %v18789_v4 = vpack.c.bf16 %v11139_v51, %v11136_v44  ;;  %20741 = vmatmul.mubr.msk.bf16.gmra.mrb[152].mxu1 %vm16599_vm6, %v22390_v52  ;;  %v5470_v39 = vpop.permute.xlu1 %5469 }
 0x699   : > { %v18784_v40 = vpack.c.bf16 %v11131_v56, %v11128_v46  ;;  %vm6765_vm11 = vcmp.eq.s32.totalorder %v22942_v37, %v5470_v39  ;;  %v5466_v26 = vpop.permute.xlu0 %5465  ;;  %v27530_v39 = vld [vmem:[#allocation166_spill] sm:$0xff] }
 0x69a   : > { %19757 = vst [vmem:[%s24974_s8 + $0x268] sm:$0xff] %v18789_v4   ;;  %vm6764_vm13 = vcmp.eq.s32.totalorder %v22942_v37, %v5466_v26  ;;  %5713 = vbcast.lane.b32.xlu1 %v27517_v5, 280  ;;  %5709 = vbcast.lane.b32.xlu0 %v27517_v5, 272 }
 0x69b   : > { %19756 = vst [vmem:[%s24974_s8 + $0x260] sm:$0xff] %v18784_v40   ;;  %vm16601_vm14 = vmpackc.low %vm6765_vm11, %vm6764_vm13  ;;  %v20638_v34 = vpop.f32.mrb[156].mxu1 }
 0x69c   : > { %v11152_v9 = vadd.f32 %v27519_v2, %v20638_v34  ;;  %v9014_v35 = vpop.f32.mrb[157].mxu1  ;;  %20744 = vmatprep.mubr.msk.bf16.mxu1 %vm16601_vm14, %v22390_v52  ;;  %v5478_v15 = vpop.permute.xlu1 %5477 }
 0x69d   : > { %v11144_v21 = vadd.f32 %v27520_v6, %v9014_v35  ;;  %vm6767_vm15 = vcmp.eq.s32.totalorder %v22942_v37, %v5478_v15  ;;  %v20639_v14 = vpop.f32.mrb[158].mxu1  ;;  %v5474_v49 = vpop.permute.xlu0 %5473  ;;  %v27531_v15 = vld [vmem:[#allocation167_spill] sm:$0xff] }
 0x69e   : > { %v11155_v32 = vadd.f32 %v27521_v10, %v20639_v14  ;;  %vm6766_vm1 = vcmp.eq.s32.totalorder %v22942_v37, %v5474_v49  ;;  %v9017_v61 = vpop.f32.mrb[159].mxu1  ;;  %5721 = vbcast.lane.b32.xlu1 %v27517_v5, 296  ;;  %5717 = vbcast.lane.b32.xlu0 %v27517_v5, 288  ;;  %v27532_v49 = vld [vmem:[#allocation168_spill] sm:$0xff] }
 0x69f   : > { %vm16603_vm0 = vmpackc.low %vm6767_vm15, %vm6766_vm1  ;;  %v11147_v38 = vadd.f32 %v27522_v43, %v9017_v61  ;;  %v27533_v43 = vld [vmem:[#allocation169_spill] sm:$0xff] }
 0x6a0   : > { %v18799_v33 = vpack.c.bf16 %v11155_v32, %v11152_v9  ;;  %20745 = vmatmul.mubr.msk.bf16.gmra.mrb[156].mxu1 %vm16603_vm0, %v22390_v52  ;;  %v5486_v48 = vpop.permute.xlu1 %5485 }
 0x6a1   : > { %v18794_v53 = vpack.c.bf16 %v11147_v38, %v11144_v21  ;;  %vm6769_vm2 = vcmp.eq.s32.totalorder %v22942_v37, %v5486_v48  ;;  %v5482_v20 = vpop.permute.xlu0 %5481  ;;  %v27535_v48 = vld [vmem:[#allocation170_spill] sm:$0xff] }
 0x6a2   : > { %19759 = vst [vmem:[%s24974_s8 + $0x278] sm:$0xff] %v18799_v33   ;;  %vm6768_vm3 = vcmp.eq.s32.totalorder %v22942_v37, %v5482_v20  ;;  %5729 = vbcast.lane.b32.xlu1 %v27517_v5, 312  ;;  %5725 = vbcast.lane.b32.xlu0 %v27517_v5, 304 }
 0x6a3   : > { %19758 = vst [vmem:[%s24974_s8 + $0x270] sm:$0xff] %v18794_v53   ;;  %vm16605_vm5 = vmpackc.low %vm6769_vm2, %vm6768_vm3  ;;  %v20642_v8 = vpop.f32.mrb[160].mxu1 }
 0x6a4   : > { %v11168_v13 = vadd.f32 %v27523_v11, %v20642_v8  ;;  %v9030_v25 = vpop.f32.mrb[161].mxu1  ;;  %20748 = vmatprep.mubr.msk.bf16.mxu1 %vm16605_vm5, %v22390_v52  ;;  %v5494_v19 = vpop.permute.xlu1 %5493 }
 0x6a5   : > { %v11160_v58 = vadd.f32 %v27524_v36, %v9030_v25  ;;  %vm6771_vm8 = vcmp.eq.s32.totalorder %v22942_v37, %v5494_v19  ;;  %v20643_v62 = vpop.f32.mrb[162].mxu1  ;;  %v5490_v31 = vpop.permute.xlu0 %5489  ;;  %v27536_v19 = vld [vmem:[#allocation171_spill] sm:$0xff] }
 0x6a6   : > { %v11171_v30 = vadd.f32 %v27525_v22, %v20643_v62  ;;  %vm6770_vm9 = vcmp.eq.s32.totalorder %v22942_v37, %v5490_v31  ;;  %v9033_v3 = vpop.f32.mrb[163].mxu1  ;;  %5737 = vbcast.lane.b32.xlu1 %v27517_v5, 328  ;;  %5733 = vbcast.lane.b32.xlu0 %v27517_v5, 320  ;;  %v27537_v31 = vld [vmem:[#allocation172_spill] sm:$0xff] }
 0x6a7   : > { %vm16607_vm7 = vmpackc.low %vm6771_vm8, %vm6770_vm9  ;;  %v11163_v12 = vadd.f32 %v27526_v42, %v9033_v3  ;;  %v27538_v42 = vld [vmem:[#allocation173_spill] sm:$0xff] }
 0x6a8   : > { %v18809_v41 = vpack.c.bf16 %v11171_v30, %v11168_v13  ;;  %20749 = vmatmul.mubr.msk.bf16.gmra.mrb[160].mxu1 %vm16607_vm7, %v22390_v52  ;;  %v5505_v57 = vpop.permute.xlu1 %5504 }
 0x6a9   : > { %v18804_v54 = vpack.c.bf16 %v11163_v12, %v11160_v58  ;;  %vm6773_vm10 = vcmp.eq.s32.totalorder %v22942_v37, %v5505_v57  ;;  %v5501_v44 = vpop.permute.xlu0 %5500  ;;  %v27539_v57 = vld [vmem:[#allocation174_spill] sm:$0xff] }
 0x6aa   : > { %19761 = vst [vmem:[%s24974_s8 + $0x288] sm:$0xff] %v18809_v41   ;;  %vm6772_vm12 = vcmp.eq.s32.totalorder %v22942_v37, %v5501_v44  ;;  %5745 = vbcast.lane.b32.xlu1 %v27517_v5, 344  ;;  %5741 = vbcast.lane.b32.xlu0 %v27517_v5, 336 }
 0x6ab   : > { %19760 = vst [vmem:[%s24974_s8 + $0x280] sm:$0xff] %v18804_v54   ;;  %vm16609_vm4 = vmpackc.low %vm6773_vm10, %vm6772_vm12  ;;  %v20646_v0 = vpop.f32.mrb[164].mxu1 }
 0x6ac   : > { %v11184_v1 = vadd.f32 %v27527_v24, %v20646_v0  ;;  %v9046_v46 = vpop.f32.mrb[165].mxu1  ;;  %20752 = vmatprep.mubr.msk.bf16.mxu1 %vm16609_vm4, %v22390_v52  ;;  %v5513_v55 = vpop.permute.xlu1 %5512 }
 0x6ad   : > { %v11176_v63 = vadd.f32 %v27528_v45, %v9046_v46  ;;  %vm6775_vm6 = vcmp.eq.s32.totalorder %v22942_v37, %v5513_v55  ;;  %v20647_v51 = vpop.f32.mrb[166].mxu1  ;;  %v5509_v18 = vpop.permute.xlu0 %5508  ;;  %v27540_v55 = vld [vmem:[#allocation175_spill] sm:$0xff] }
 0x6ae   : > { %v11187_v56 = vadd.f32 %v27529_v7, %v20647_v51  ;;  %vm6774_vm11 = vcmp.eq.s32.totalorder %v22942_v37, %v5509_v18  ;;  %v9049_v4 = vpop.f32.mrb[167].mxu1  ;;  %5753 = vbcast.lane.b32.xlu1 %v27517_v5, 360  ;;  %5749 = vbcast.lane.b32.xlu0 %v27517_v5, 352  ;;  %v27541_v18 = vld [vmem:[#allocation176_spill] sm:$0xff] }
 0x6af   : > { %vm16611_vm13 = vmpackc.low %vm6775_vm6, %vm6774_vm11  ;;  %v11179_v40 = vadd.f32 %v27530_v39, %v9049_v4  ;;  %v27542_v39 = vld [vmem:[#allocation177_spill] sm:$0xff] }
 0x6b0   : > { %v18819_v26 = vpack.c.bf16 %v11187_v56, %v11184_v1  ;;  %20753 = vmatmul.mubr.msk.bf16.gmra.mrb[164].mxu1 %vm16611_vm13, %v22390_v52  ;;  %v5521_v34 = vpop.permute.xlu1 %5520 }
 0x6b1   : > { %v18814_v2 = vpack.c.bf16 %v11179_v40, %v11176_v63  ;;  %vm6777_vm14 = vcmp.eq.s32.totalorder %v22942_v37, %v5521_v34  ;;  %v5517_v9 = vpop.permute.xlu0 %5516  ;;  %v27543_v34 = vld [vmem:[#allocation178_spill] sm:$0xff] }
 0x6b2   : > { %19763 = vst [vmem:[%s24974_s8 + $0x298] sm:$0xff] %v18819_v26   ;;  %vm6776_vm15 = vcmp.eq.s32.totalorder %v22942_v37, %v5517_v9  ;;  %5761 = vbcast.lane.b32.xlu1 %v27517_v5, 376  ;;  %5757 = vbcast.lane.b32.xlu0 %v27517_v5, 368  ;;  %v27534_v5 = vld [vmem:[#allocation30_spill] sm:$0xff] }
 0x6b3   : > { %19762 = vst [vmem:[%s24974_s8 + $0x290] sm:$0xff] %v18814_v2   ;;  %vm16613_vm1 = vmpackc.low %vm6777_vm14, %vm6776_vm15  ;;  %v20650_v35 = vpop.f32.mrb[168].mxu1 }
 0x6b4   : > { %v11200_v6 = vadd.f32 %v27531_v15, %v20650_v35  ;;  %v9062_v21 = vpop.f32.mrb[169].mxu1  ;;  %20756 = vmatprep.mubr.msk.bf16.mxu1 %vm16613_vm1, %v22390_v52  ;;  %v5529_v14 = vpop.permute.xlu1 %5528 }
 0x6b5   : > { %v11192_v10 = vadd.f32 %v27532_v49, %v9062_v21  ;;  %vm6779_vm0 = vcmp.eq.s32.totalorder %v22942_v37, %v5529_v14  ;;  %v20651_v32 = vpop.f32.mrb[170].mxu1  ;;  %v5525_v61 = vpop.permute.xlu0 %5524  ;;  %v27544_v14 = vld [vmem:[#allocation179_spill] sm:$0xff] }
 0x6b6   : > { %v11203_v38 = vadd.f32 %v27533_v43, %v20651_v32  ;;  %vm6778_vm2 = vcmp.eq.s32.totalorder %v22942_v37, %v5525_v61  ;;  %v9065_v33 = vpop.f32.mrb[171].mxu1  ;;  %5772 = vbcast.lane.b32.xlu1 %v27534_v5, 264  ;;  %5768 = vbcast.lane.b32.xlu0 %v27534_v5, 256  ;;  %v27545_v61 = vld [vmem:[#allocation180_spill] sm:$0xff] }
 0x6b7   : > { %vm16615_vm3 = vmpackc.low %vm6779_vm0, %vm6778_vm2  ;;  %v11195_v53 = vadd.f32 %v27535_v48, %v9065_v33  ;;  %v27546_v48 = vld [vmem:[#allocation181_spill] sm:$0xff] }
 0x6b8   : > { %v18829_v20 = vpack.c.bf16 %v11203_v38, %v11200_v6  ;;  %20757 = vmatmul.mubr.msk.bf16.gmra.mrb[168].mxu1 %vm16615_vm3, %v22390_v52  ;;  %v5537_v8 = vpop.permute.xlu1 %5536 }
 0x6b9   : > { %v18824_v11 = vpack.c.bf16 %v11195_v53, %v11192_v10  ;;  %vm6781_vm5 = vcmp.eq.s32.totalorder %v22942_v37, %v5537_v8  ;;  %v5533_v13 = vpop.permute.xlu0 %5532  ;;  %v27547_v8 = vld [vmem:[#allocation182_spill] sm:$0xff] }
 0x6ba   : > { %19765 = vst [vmem:[%s24974_s8 + $0x2a8] sm:$0xff] %v18829_v20   ;;  %vm6780_vm8 = vcmp.eq.s32.totalorder %v22942_v37, %v5533_v13  ;;  %5780 = vbcast.lane.b32.xlu1 %v27534_v5, 280  ;;  %5776 = vbcast.lane.b32.xlu0 %v27534_v5, 272 }
 0x6bb   : > { %19764 = vst [vmem:[%s24974_s8 + $0x2a0] sm:$0xff] %v18824_v11   ;;  %vm16617_vm9 = vmpackc.low %vm6781_vm5, %vm6780_vm8  ;;  %v20654_v25 = vpop.f32.mrb[172].mxu1 }
 0x6bc   : > { %v11216_v36 = vadd.f32 %v27536_v19, %v20654_v25  ;;  %v9078_v58 = vpop.f32.mrb[173].mxu1  ;;  %20760 = vmatprep.mubr.msk.bf16.mxu1 %vm16617_vm9, %v22390_v52  ;;  %v5545_v62 = vpop.permute.xlu1 %5544 }
 0x6bd   : > { %v11208_v22 = vadd.f32 %v27537_v31, %v9078_v58  ;;  %vm6783_vm7 = vcmp.eq.s32.totalorder %v22942_v37, %v5545_v62  ;;  %v20655_v30 = vpop.f32.mrb[174].mxu1  ;;  %v5541_v3 = vpop.permute.xlu0 %5540  ;;  %v27548_v62 = vld [vmem:[#allocation183_spill] sm:$0xff] }
 0x6be   : > { %v11219_v12 = vadd.f32 %v27538_v42, %v20655_v30  ;;  %vm6782_vm10 = vcmp.eq.s32.totalorder %v22942_v37, %v5541_v3  ;;  %v9081_v41 = vpop.f32.mrb[175].mxu1  ;;  %5788 = vbcast.lane.b32.xlu1 %v27534_v5, 296  ;;  %5784 = vbcast.lane.b32.xlu0 %v27534_v5, 288  ;;  %v27549_v3 = vld [vmem:[#allocation184_spill] sm:$0xff] }
 0x6bf   : > { %vm16619_vm12 = vmpackc.low %vm6783_vm7, %vm6782_vm10  ;;  %v11211_v54 = vadd.f32 %v27539_v57, %v9081_v41  ;;  %v27550_v57 = vld [vmem:[#allocation185_spill] sm:$0xff] }
 0x6c0   : > { %v18839_v44 = vpack.c.bf16 %v11219_v12, %v11216_v36  ;;  %20761 = vmatmul.mubr.msk.bf16.gmra.mrb[172].mxu1 %vm16619_vm12, %v22390_v52  ;;  %v5553_v0 = vpop.permute.xlu1 %5552 }
 0x6c1   : > { %v18834_v24 = vpack.c.bf16 %v11211_v54, %v11208_v22  ;;  %vm6785_vm4 = vcmp.eq.s32.totalorder %v22942_v37, %v5553_v0  ;;  %v5549_v1 = vpop.permute.xlu0 %5548  ;;  %v27552_v0 = vld [vmem:[#allocation186_spill] sm:$0xff] }
 0x6c2   : > { %19767 = vst [vmem:[%s24974_s8 + $0x2b8] sm:$0xff] %v18839_v44   ;;  %vm6784_vm6 = vcmp.eq.s32.totalorder %v22942_v37, %v5549_v1  ;;  %5796 = vbcast.lane.b32.xlu1 %v27534_v5, 312  ;;  %5792 = vbcast.lane.b32.xlu0 %v27534_v5, 304 }
 0x6c3   : > { %19766 = vst [vmem:[%s24974_s8 + $0x2b0] sm:$0xff] %v18834_v24   ;;  %vm16621_vm11 = vmpackc.low %vm6785_vm4, %vm6784_vm6  ;;  %v20658_v46 = vpop.f32.mrb[176].mxu1 }
 0x6c4   : > { %v11232_v45 = vadd.f32 %v27540_v55, %v20658_v46  ;;  %v9094_v63 = vpop.f32.mrb[177].mxu1  ;;  %20764 = vmatprep.mubr.msk.bf16.mxu1 %vm16621_vm11, %v22390_v52  ;;  %v5561_v51 = vpop.permute.xlu1 %5560 }
 0x6c5   : > { %v11224_v7 = vadd.f32 %v27541_v18, %v9094_v63  ;;  %vm6787_vm13 = vcmp.eq.s32.totalorder %v22942_v37, %v5561_v51  ;;  %v20659_v56 = vpop.f32.mrb[178].mxu1  ;;  %v5557_v4 = vpop.permute.xlu0 %5556  ;;  %v27553_v51 = vld [vmem:[#allocation187_spill] sm:$0xff] }
 0x6c6   : > { %v11235_v40 = vadd.f32 %v27542_v39, %v20659_v56  ;;  %vm6786_vm14 = vcmp.eq.s32.totalorder %v22942_v37, %v5557_v4  ;;  %v9097_v26 = vpop.f32.mrb[179].mxu1  ;;  %5804 = vbcast.lane.b32.xlu1 %v27534_v5, 328  ;;  %5800 = vbcast.lane.b32.xlu0 %v27534_v5, 320  ;;  %v27554_v4 = vld [vmem:[#allocation188_spill] sm:$0xff] }
 0x6c7   : > { %vm16623_vm15 = vmpackc.low %vm6787_vm13, %vm6786_vm14  ;;  %v11227_v2 = vadd.f32 %v27543_v34, %v9097_v26  ;;  %v27555_v34 = vld [vmem:[#allocation189_spill] sm:$0xff] }
 0x6c8   : > { %v18849_v9 = vpack.c.bf16 %v11235_v40, %v11232_v45  ;;  %20765 = vmatmul.mubr.msk.bf16.gmra.mrb[176].mxu1 %vm16623_vm15, %v22390_v52  ;;  %v5572_v35 = vpop.permute.xlu1 %5571 }
 0x6c9   : > { %v18844_v15 = vpack.c.bf16 %v11227_v2, %v11224_v7  ;;  %vm6789_vm1 = vcmp.eq.s32.totalorder %v22942_v37, %v5572_v35  ;;  %v5568_v6 = vpop.permute.xlu0 %5567  ;;  %v27556_v35 = vld [vmem:[#allocation190_spill] sm:$0xff] }
 0x6ca   : > { %19769 = vst [vmem:[%s24974_s8 + $0x2c8] sm:$0xff] %v18849_v9   ;;  %vm6788_vm0 = vcmp.eq.s32.totalorder %v22942_v37, %v5568_v6  ;;  %5812 = vbcast.lane.b32.xlu1 %v27534_v5, 344  ;;  %5808 = vbcast.lane.b32.xlu0 %v27534_v5, 336 }
 0x6cb   : > { %19768 = vst [vmem:[%s24974_s8 + $0x2c0] sm:$0xff] %v18844_v15   ;;  %vm16625_vm2 = vmpackc.low %vm6789_vm1, %vm6788_vm0  ;;  %v20662_v21 = vpop.f32.mrb[180].mxu1 }
 0x6cc   : > { %v11248_v49 = vadd.f32 %v27544_v14, %v20662_v21  ;;  %v9110_v10 = vpop.f32.mrb[181].mxu1  ;;  %20768 = vmatprep.mubr.msk.bf16.mxu1 %vm16625_vm2, %v22390_v52  ;;  %v5580_v32 = vpop.permute.xlu1 %5579 }
 0x6cd   : > { %v11240_v43 = vadd.f32 %v27545_v61, %v9110_v10  ;;  %vm6791_vm3 = vcmp.eq.s32.totalorder %v22942_v37, %v5580_v32  ;;  %v20663_v38 = vpop.f32.mrb[182].mxu1  ;;  %v5576_v33 = vpop.permute.xlu0 %5575  ;;  %v27557_v32 = vld [vmem:[#allocation191_spill] sm:$0xff] }
 0x6ce   : > { %v11251_v53 = vadd.f32 %v27546_v48, %v20663_v38  ;;  %vm6790_vm5 = vcmp.eq.s32.totalorder %v22942_v37, %v5576_v33  ;;  %v9113_v20 = vpop.f32.mrb[183].mxu1  ;;  %5820 = vbcast.lane.b32.xlu1 %v27534_v5, 360  ;;  %5816 = vbcast.lane.b32.xlu0 %v27534_v5, 352  ;;  %v27558_v33 = vld [vmem:[#allocation192_spill] sm:$0xff] }
 0x6cf   : > { %vm16627_vm8 = vmpackc.low %vm6791_vm3, %vm6790_vm5  ;;  %v11243_v11 = vadd.f32 %v27547_v8, %v9113_v20  ;;  %v27559_v8 = vld [vmem:[#allocation193_spill] sm:$0xff] }
 0x6d0   : > { %v18859_v13 = vpack.c.bf16 %v11251_v53, %v11248_v49  ;;  %20769 = vmatmul.mubr.msk.bf16.gmra.mrb[180].mxu1 %vm16627_vm8, %v22390_v52  ;;  %v5588_v25 = vpop.permute.xlu1 %5587 }
 0x6d1   : > { %v18854_v19 = vpack.c.bf16 %v11243_v11, %v11240_v43  ;;  %vm6793_vm9 = vcmp.eq.s32.totalorder %v22942_v37, %v5588_v25  ;;  %v5584_v36 = vpop.permute.xlu0 %5583  ;;  %v27560_v25 = vld [vmem:[#allocation194_spill] sm:$0xff] }
 0x6d2   : > { %19771 = vst [vmem:[%s24974_s8 + $0x2d8] sm:$0xff] %v18859_v13   ;;  %vm6792_vm7 = vcmp.eq.s32.totalorder %v22942_v37, %v5584_v36  ;;  %5828 = vbcast.lane.b32.xlu1 %v27534_v5, 376  ;;  %5824 = vbcast.lane.b32.xlu0 %v27534_v5, 368  ;;  %v27551_v5 = vld [vmem:[#allocation31_spill] sm:$0xff] }
 0x6d3   : > { %19770 = vst [vmem:[%s24974_s8 + $0x2d0] sm:$0xff] %v18854_v19   ;;  %vm16629_vm10 = vmpackc.low %vm6793_vm9, %vm6792_vm7  ;;  %v20666_v58 = vpop.f32.mrb[184].mxu1 }
 0x6d4   : > { %v11264_v31 = vadd.f32 %v27548_v62, %v20666_v58  ;;  %v9126_v22 = vpop.f32.mrb[185].mxu1  ;;  %20772 = vmatprep.mubr.msk.bf16.mxu1 %vm16629_vm10, %v22390_v52  ;;  %v5596_v30 = vpop.permute.xlu1 %5595 }
 0x6d5   : > { %v11256_v42 = vadd.f32 %v27549_v3, %v9126_v22  ;;  %vm6795_vm12 = vcmp.eq.s32.totalorder %v22942_v37, %v5596_v30  ;;  %v20667_v12 = vpop.f32.mrb[186].mxu1  ;;  %v5592_v41 = vpop.permute.xlu0 %5591  ;;  %v27561_v30 = vld [vmem:[#allocation195_spill] sm:$0xff] }
 0x6d6   : > { %v11267_v54 = vadd.f32 %v27550_v57, %v20667_v12  ;;  %vm6794_vm4 = vcmp.eq.s32.totalorder %v22942_v37, %v5592_v41  ;;  %v9129_v44 = vpop.f32.mrb[187].mxu1  ;;  %5839 = vbcast.lane.b32.xlu1 %v27551_v5, 264  ;;  %5835 = vbcast.lane.b32.xlu0 %v27551_v5, 256  ;;  %v27562_v41 = vld [vmem:[#allocation196_spill] sm:$0xff] }
 0x6d7   : > { %vm16631_vm6 = vmpackc.low %vm6795_vm12, %vm6794_vm4  ;;  %v11259_v24 = vadd.f32 %v27552_v0, %v9129_v44  ;;  %v27563_v0 = vld [vmem:[#allocation197_spill] sm:$0xff] }
 0x6d8   : > { %v18869_v1 = vpack.c.bf16 %v11267_v54, %v11264_v31  ;;  %20773 = vmatmul.mubr.msk.bf16.gmra.mrb[184].mxu1 %vm16631_vm6, %v22390_v52  ;;  %v5604_v46 = vpop.permute.xlu1 %5603 }
 0x6d9   : > { %v18864_v55 = vpack.c.bf16 %v11259_v24, %v11256_v42  ;;  %vm6797_vm11 = vcmp.eq.s32.totalorder %v22942_v37, %v5604_v46  ;;  %v5600_v45 = vpop.permute.xlu0 %5599  ;;  %v27564_v46 = vld [vmem:[#allocation198_spill] sm:$0xff] }
 0x6da   : > { %19773 = vst [vmem:[%s24974_s8 + $0x2e8] sm:$0xff] %v18869_v1   ;;  %vm6796_vm13 = vcmp.eq.s32.totalorder %v22942_v37, %v5600_v45  ;;  %5847 = vbcast.lane.b32.xlu1 %v27551_v5, 280  ;;  %5843 = vbcast.lane.b32.xlu0 %v27551_v5, 272 }
 0x6db   : > { %19772 = vst [vmem:[%s24974_s8 + $0x2e0] sm:$0xff] %v18864_v55   ;;  %vm16633_vm14 = vmpackc.low %vm6797_vm11, %vm6796_vm13  ;;  %v20670_v63 = vpop.f32.mrb[188].mxu1 }
 0x6dc   : > { %v11280_v18 = vadd.f32 %v27553_v51, %v20670_v63  ;;  %v9142_v7 = vpop.f32.mrb[189].mxu1  ;;  %20776 = vmatprep.mubr.msk.bf16.mxu1 %vm16633_vm14, %v22390_v52  ;;  %v5612_v56 = vpop.permute.xlu1 %5611 }
 0x6dd   : > { %v11272_v39 = vadd.f32 %v27554_v4, %v9142_v7  ;;  %vm6799_vm15 = vcmp.eq.s32.totalorder %v22942_v37, %v5612_v56  ;;  %v20671_v40 = vpop.f32.mrb[190].mxu1  ;;  %v5608_v26 = vpop.permute.xlu0 %5607 }
 0x6de   : > { %v11283_v2 = vadd.f32 %v27555_v34, %v20671_v40  ;;  %vm6798_vm1 = vcmp.eq.s32.totalorder %v22942_v37, %v5608_v26  ;;  %v9145_v9 = vpop.f32.mrb[191].mxu1  ;;  %5855 = vbcast.lane.b32.xlu1 %v27551_v5, 296  ;;  %5851 = vbcast.lane.b32.xlu0 %v27551_v5, 288  ;;  %v27565_v40 = vld [vmem:[#allocation199_spill] sm:$0xff] }
 0x6df   : > { %vm16635_vm0 = vmpackc.low %vm6799_vm15, %vm6798_vm1  ;;  %v11275_v15 = vadd.f32 %v27556_v35, %v9145_v9  ;;  %v27566_v9 = vld [vmem:[#allocation200_spill] sm:$0xff] }
 0x6e0   : > { %v18879_v6 = vpack.c.bf16 %v11283_v2, %v11280_v18  ;;  %20777 = vmatmul.mubr.msk.bf16.gmra.mrb[188].mxu1 %vm16635_vm0, %v22390_v52  ;;  %v5620_v21 = vpop.permute.xlu1 %5619 }
 0x6e1   : > { %v18874_v14 = vpack.c.bf16 %v11275_v15, %v11272_v39  ;;  %vm6801_vm2 = vcmp.eq.s32.totalorder %v22942_v37, %v5620_v21  ;;  %v5616_v49 = vpop.permute.xlu0 %5615 }
 0x6e2   : > { %19775 = vst [vmem:[%s24974_s8 + $0x2f8] sm:$0xff] %v18879_v6   ;;  %vm6800_vm3 = vcmp.eq.s32.totalorder %v22942_v37, %v5616_v49  ;;  %5863 = vbcast.lane.b32.xlu1 %v27551_v5, 312  ;;  %5859 = vbcast.lane.b32.xlu0 %v27551_v5, 304 }
 0x6e3   : > { %19774 = vst [vmem:[%s24974_s8 + $0x2f0] sm:$0xff] %v18874_v14   ;;  %vm16637_vm5 = vmpackc.low %vm6801_vm2, %vm6800_vm3  ;;  %v20674_v10 = vpop.f32.mrb[192].mxu1 }
 0x6e4   : > { %v11296_v61 = vadd.f32 %v27557_v32, %v20674_v10  ;;  %v9158_v43 = vpop.f32.mrb[193].mxu1  ;;  %20780 = vmatprep.mubr.msk.bf16.mxu1 %vm16637_vm5, %v22390_v52  ;;  %v5628_v38 = vpop.permute.xlu1 %5627 }
 0x6e5   : > { %v11288_v48 = vadd.f32 %v27558_v33, %v9158_v43  ;;  %vm6803_vm8 = vcmp.eq.s32.totalorder %v22942_v37, %v5628_v38  ;;  %v20675_v53 = vpop.f32.mrb[194].mxu1  ;;  %v5624_v20 = vpop.permute.xlu0 %5623  ;;  %v27569_v33 = vld [vmem:[#allocation202_spill] sm:$0xff] }
 0x6e6   : > { %v11299_v11 = vadd.f32 %v27559_v8, %v20675_v53  ;;  %vm6802_vm9 = vcmp.eq.s32.totalorder %v22942_v37, %v5624_v20  ;;  %v9161_v13 = vpop.f32.mrb[195].mxu1  ;;  %5871 = vbcast.lane.b32.xlu1 %v27551_v5, 328  ;;  %5867 = vbcast.lane.b32.xlu0 %v27551_v5, 320  ;;  %v27570_v8 = vld [vmem:[#allocation203_spill] sm:$0xff] }
 0x6e7   : > { %vm16639_vm7 = vmpackc.low %vm6803_vm8, %vm6802_vm9  ;;  %v11291_v19 = vadd.f32 %v27560_v25, %v9161_v13 }
 0x6e8   : > { %v18889_v36 = vpack.c.bf16 %v11299_v11, %v11296_v61  ;;  %20781 = vmatmul.mubr.msk.bf16.gmra.mrb[192].mxu1 %vm16639_vm7, %v22390_v52  ;;  %v5639_v58 = vpop.permute.xlu1 %5638 }
 0x6e9   : > { %v18884_v62 = vpack.c.bf16 %v11291_v19, %v11288_v48  ;;  %vm6805_vm10 = vcmp.eq.s32.totalorder %v22942_v37, %v5639_v58  ;;  %v5635_v31 = vpop.permute.xlu0 %5634 }
 0x6ea   : > { %19777 = vst [vmem:[%s24974_s8 + $0x308] sm:$0xff] %v18889_v36   ;;  %vm6804_vm12 = vcmp.eq.s32.totalorder %v22942_v37, %v5635_v31  ;;  %5879 = vbcast.lane.b32.xlu1 %v27551_v5, 344  ;;  %5875 = vbcast.lane.b32.xlu0 %v27551_v5, 336 }
 0x6eb   : > { %19776 = vst [vmem:[%s24974_s8 + $0x300] sm:$0xff] %v18884_v62   ;;  %vm16641_vm4 = vmpackc.low %vm6805_vm10, %vm6804_vm12  ;;  %v20678_v22 = vpop.f32.mrb[196].mxu1 }
 0x6ec   : > { %v11312_v3 = vadd.f32 %v27561_v30, %v20678_v22  ;;  %v9174_v42 = vpop.f32.mrb[197].mxu1  ;;  %20784 = vmatprep.mubr.msk.bf16.mxu1 %vm16641_vm4, %v22390_v52  ;;  %v5647_v12 = vpop.permute.xlu1 %5646  ;;  %v27572_v22 = vld [vmem:[#allocation205_spill] sm:$0xff] }
 0x6ed   : > { %v11304_v57 = vadd.f32 %v27562_v41, %v9174_v42  ;;  %vm6807_vm6 = vcmp.eq.s32.totalorder %v22942_v37, %v5647_v12  ;;  %v20679_v54 = vpop.f32.mrb[198].mxu1  ;;  %v5643_v44 = vpop.permute.xlu0 %5642  ;;  %v27573_v12 = vld [vmem:[#allocation206_spill] sm:$0xff] }
 0x6ee   : > { %v11315_v24 = vadd.f32 %v27563_v0, %v20679_v54  ;;  %vm6806_vm11 = vcmp.eq.s32.totalorder %v22942_v37, %v5643_v44  ;;  %v9177_v1 = vpop.f32.mrb[199].mxu1  ;;  %5887 = vbcast.lane.b32.xlu1 %v27551_v5, 360  ;;  %5883 = vbcast.lane.b32.xlu0 %v27551_v5, 352  ;;  %v27574_v44 = vld [vmem:[#allocation207_spill] sm:$0xff] }
 0x6ef   : > { %vm16643_vm13 = vmpackc.low %vm6807_vm6, %vm6806_vm11  ;;  %v11307_v55 = vadd.f32 %v27564_v46, %v9177_v1  ;;  %v27575_v1 = vld [vmem:[#allocation23_spill] sm:$0xff]  ;;  %v27576_v46 = vld [vmem:[#allocation208_spill] sm:$0xff] }
 0x6f0   : > { %v18899_v45 = vpack.c.bf16 %v11315_v24, %v11312_v3  ;;  %20785 = vmatmul.mubr.msk.bf16.gmra.mrb[196].mxu1 %vm16643_vm13, %v22390_v52  ;;  %v5655_v63 = vpop.permute.xlu1 %5654 }
 0x6f1   : > { %v18894_v51 = vpack.c.bf16 %v11307_v55, %v11304_v57  ;;  %vm6809_vm14 = vcmp.eq.s32.totalorder %v22942_v37, %v5655_v63  ;;  %v5651_v18 = vpop.permute.xlu0 %5650 }
 0x6f2   : > { %19779 = vst [vmem:[%s24974_s8 + $0x318] sm:$0xff] %v18899_v45   ;;  %vm6808_vm15 = vcmp.eq.s32.totalorder %v22942_v37, %v5651_v18  ;;  %5895 = vbcast.lane.b32.xlu1 %v27551_v5, 376  ;;  %5891 = vbcast.lane.b32.xlu0 %v27551_v5, 368  ;;  %v27567_v5 = vld [vmem:[#allocation32_spill] sm:$0xff] }
 0x6f3   : > { %19778 = vst [vmem:[%s24974_s8 + $0x310] sm:$0xff] %v18894_v51   ;;  %vm16645_vm1 = vmpackc.low %vm6809_vm14, %vm6808_vm15  ;;  %v20682_v7 = vpop.f32.mrb[200].mxu1 }
 0x6f4   : > { %v11328_v56 = vadd.f32 %v24143_v27, %v20682_v7  ;;  %v9190_v4 = vpop.f32.mrb[201].mxu1  ;;  %20788 = vmatprep.mubr.msk.bf16.mxu1 %vm16645_vm1, %v22390_v52  ;;  %v5663_v39 = vpop.permute.xlu1 %5662  ;;  %v27568_v27 = vld [vmem:[#allocation201_spill] sm:$0xff] }
 0x6f5   : > { %v11320_v26 = vadd.f32 %v27565_v40, %v9190_v4  ;;  %vm6811_vm0 = vcmp.eq.s32.totalorder %v22942_v37, %v5663_v39  ;;  %v20683_v34 = vpop.f32.mrb[202].mxu1  ;;  %v5659_v2 = vpop.permute.xlu0 %5658 }
 0x6f6   : > { %v11331_v35 = vadd.f32 %v27566_v9, %v20683_v34  ;;  %vm6810_vm2 = vcmp.eq.s32.totalorder %v22942_v37, %v5659_v2  ;;  %v9193_v15 = vpop.f32.mrb[203].mxu1  ;;  %5906 = vbcast.lane.b32.xlu1 %v27567_v5, 264  ;;  %5902 = vbcast.lane.b32.xlu0 %v27567_v5, 256 }
 0x6f7   : > { %vm16647_vm3 = vmpackc.low %vm6811_vm0, %vm6810_vm2  ;;  %v11323_v6 = vadd.f32 %v27568_v27, %v9193_v15 }
 0x6f8   : > { %v18909_v21 = vpack.c.bf16 %v11331_v35, %v11328_v56  ;;  %20789 = vmatmul.mubr.msk.bf16.gmra.mrb[200].mxu1 %vm16647_vm3, %v22390_v52  ;;  %v5671_v14 = vpop.permute.xlu1 %5670  ;;  %v27577_v56 = vld [vmem:[#allocation209_spill] sm:$0xff]  ;;  %v27579_v35 = vld [vmem:[#allocation211_spill] sm:$0xff] }
 0x6f9   : > { %v18904_v49 = vpack.c.bf16 %v11323_v6, %v11320_v26  ;;  %vm6813_vm5 = vcmp.eq.s32.totalorder %v22942_v37, %v5671_v14  ;;  %v5667_v10 = vpop.permute.xlu0 %5666  ;;  %v27578_v26 = vld [vmem:[#allocation210_spill] sm:$0xff]  ;;  %v27580_v6 = vld [vmem:[#allocation212_spill] sm:$0xff] }
 0x6fa   : > { %19781 = vst [vmem:[%s24974_s8 + $0x328] sm:$0xff] %v18909_v21   ;;  %vm6812_vm8 = vcmp.eq.s32.totalorder %v22942_v37, %v5667_v10  ;;  %5914 = vbcast.lane.b32.xlu1 %v27567_v5, 280  ;;  %5910 = vbcast.lane.b32.xlu0 %v27567_v5, 272 }
 0x6fb   : > { %19780 = vst [vmem:[%s24974_s8 + $0x320] sm:$0xff] %v18904_v49   ;;  %vm16649_vm9 = vmpackc.low %vm6813_vm5, %vm6812_vm8  ;;  %v20686_v32 = vpop.f32.mrb[204].mxu1 }
 0x6fc   : > { %v11344_v61 = vadd.f32 %v24161_v60, %v20686_v32  ;;  %v9206_v43 = vpop.f32.mrb[205].mxu1  ;;  %20792 = vmatprep.mubr.msk.bf16.mxu1 %vm16649_vm9, %v22390_v52  ;;  %v5679_v38 = vpop.permute.xlu1 %5678  ;;  %v27571_v60 = vld [vmem:[#allocation204_spill] sm:$0xff] }
 0x6fd   : > { %v11336_v48 = vadd.f32 %v27569_v33, %v9206_v43  ;;  %vm6815_vm7 = vcmp.eq.s32.totalorder %v22942_v37, %v5679_v38  ;;  %v20687_v53 = vpop.f32.mrb[206].mxu1  ;;  %v5675_v20 = vpop.permute.xlu0 %5674  ;;  %v27581_v43 = vld [vmem:[#allocation213_spill] sm:$0xff] }
 0x6fe   : > { %v11347_v11 = vadd.f32 %v27570_v8, %v20687_v53  ;;  %vm6814_vm10 = vcmp.eq.s32.totalorder %v22942_v37, %v5675_v20  ;;  %v9209_v13 = vpop.f32.mrb[207].mxu1  ;;  %5922 = vbcast.lane.b32.xlu1 %v27567_v5, 296  ;;  %5918 = vbcast.lane.b32.xlu0 %v27567_v5, 288  ;;  %v27582_v53 = vld [vmem:[#allocation214_spill] sm:$0xff] }
 0x6ff   : > { %vm16651_vm12 = vmpackc.low %vm6815_vm7, %vm6814_vm10  ;;  %v11339_v25 = vadd.f32 %v27571_v60, %v9209_v13  ;;  %v27583_v13 = vld [vmem:[#allocation215_spill] sm:$0xff] }
 0x700   : > { %v18919_v19 = vpack.c.bf16 %v11347_v11, %v11344_v61  ;;  %20793 = vmatmul.mubr.msk.bf16.gmra.mrb[204].mxu1 %vm16651_vm12, %v22390_v52  ;;  %v5687_v36 = vpop.permute.xlu1 %5686 }
 0x701   : > { %v18914_v58 = vpack.c.bf16 %v11339_v25, %v11336_v48  ;;  %vm6817_vm4 = vcmp.eq.s32.totalorder %v22942_v37, %v5687_v36  ;;  %v5683_v62 = vpop.permute.xlu0 %5682 }
 0x702   : > { %19783 = vst [vmem:[%s24974_s8 + $0x338] sm:$0xff] %v18919_v19   ;;  %vm6816_vm6 = vcmp.eq.s32.totalorder %v22942_v37, %v5683_v62  ;;  %5930 = vbcast.lane.b32.xlu1 %v27567_v5, 312  ;;  %5926 = vbcast.lane.b32.xlu0 %v27567_v5, 304  ;;  %v27584_v19 = vld [vmem:[#allocation216_spill] sm:$0xff] }
 0x703   : > { %19782 = vst [vmem:[%s24974_s8 + $0x330] sm:$0xff] %v18914_v58   ;;  %vm16653_vm11 = vmpackc.low %vm6817_vm4, %vm6816_vm6  ;;  %v20690_v31 = vpop.f32.mrb[208].mxu1 }
 0x704   : > { %v11360_v30 = vadd.f32 %v27572_v22, %v20690_v31  ;;  %v9222_v3 = vpop.f32.mrb[209].mxu1  ;;  %20796 = vmatprep.mubr.msk.bf16.mxu1 %vm16653_vm11, %v22390_v52  ;;  %v5695_v42 = vpop.permute.xlu1 %5694 }
 0x705   : > { %v11352_v41 = vadd.f32 %v27573_v12, %v9222_v3  ;;  %vm6819_vm13 = vcmp.eq.s32.totalorder %v22942_v37, %v5695_v42  ;;  %v20691_v57 = vpop.f32.mrb[210].mxu1  ;;  %v5691_v54 = vpop.permute.xlu0 %5690  ;;  %v27585_v3 = vld [vmem:[#allocation217_spill] sm:$0xff] }
 0x706   : > { %v11363_v0 = vadd.f32 %v27574_v44, %v20691_v57  ;;  %vm6818_vm14 = vcmp.eq.s32.totalorder %v22942_v37, %v5691_v54  ;;  %v9225_v24 = vpop.f32.mrb[211].mxu1  ;;  %1986 = vbcast.lane.b32.xlu1 %v27575_v1, 328  ;;  %1982 = vbcast.lane.b32.xlu0 %v27575_v1, 320  ;;  %v27586_v57 = vld [vmem:[#allocation218_spill] sm:$0xff] }
 0x707   : > { %vm16655_vm15 = vmpackc.low %vm6819_vm13, %vm6818_vm14  ;;  %v11355_v55 = vadd.f32 %v27576_v46, %v9225_v24  ;;  %v27587_v24 = vld [vmem:[#allocation219_spill] sm:$0xff] }
 0x708   : > { %v18929_v45 = vpack.c.bf16 %v11363_v0, %v11360_v30  ;;  %20797 = vmatmul.mubr.msk.bf16.gmra.mrb[208].mxu1 %vm16655_vm15, %v22390_v52  ;;  %v5706_v63 = vpop.permute.xlu1 %5705 }
 0x709   : > { %v18924_v51 = vpack.c.bf16 %v11355_v55, %v11352_v41  ;;  %vm6821_vm1 = vcmp.eq.s32.totalorder %v22942_v37, %v5706_v63  ;;  %v5702_v18 = vpop.permute.xlu0 %5701 }
 0x70a   : > { %19785 = vst [vmem:[%s24974_s8 + $0x348] sm:$0xff] %v18929_v45   ;;  %vm6820_vm0 = vcmp.eq.s32.totalorder %v22942_v37, %v5702_v18  ;;  %5938 = vbcast.lane.b32.xlu1 %v27567_v5, 328  ;;  %5934 = vbcast.lane.b32.xlu0 %v27567_v5, 320  ;;  %v27588_v45 = vld [vmem:[#allocation220_spill] sm:$0xff] }
 0x70b   : > { %19784 = vst [vmem:[%s24974_s8 + $0x340] sm:$0xff] %v18924_v51   ;;  %vm16657_vm2 = vmpackc.low %vm6821_vm1, %vm6820_vm0  ;;  %v20694_v7 = vpop.f32.mrb[212].mxu1 }
 0x70c   : > { %v11376_v4 = vadd.f32 %v27577_v56, %v20694_v7  ;;  %v9238_v39 = vpop.f32.mrb[213].mxu1  ;;  %20800 = vmatprep.mubr.msk.bf16.mxu1 %vm16657_vm2, %v22390_v52  ;;  %v5714_v40 = vpop.permute.xlu1 %5713 }
 0x70d   : > { %v11368_v34 = vadd.f32 %v27578_v26, %v9238_v39  ;;  %vm6823_vm3 = vcmp.eq.s32.totalorder %v22942_v37, %v5714_v40  ;;  %v20695_v2 = vpop.f32.mrb[214].mxu1  ;;  %v5710_v9 = vpop.permute.xlu0 %5709  ;;  %v27590_v40 = vld [vmem:[#allocation221_spill] sm:$0xff] }
 0x70e   : > { %v11379_v15 = vadd.f32 %v27579_v35, %v20695_v2  ;;  %vm6822_vm5 = vcmp.eq.s32.totalorder %v22942_v37, %v5710_v9  ;;  %v9241_v27 = vpop.f32.mrb[215].mxu1  ;;  %1994 = vbcast.lane.b32.xlu1 %v27575_v1, 344  ;;  %1990 = vbcast.lane.b32.xlu0 %v27575_v1, 336  ;;  %v27591_v9 = vld [vmem:[#allocation222_spill] sm:$0xff] }
 0x70f   : > { %vm16659_vm8 = vmpackc.low %vm6823_vm3, %vm6822_vm5  ;;  %v11371_v21 = vadd.f32 %v27580_v6, %v9241_v27  ;;  %v27592_v6 = vld [vmem:[#allocation223_spill] sm:$0xff] }
 0x710   : > { %v18939_v14 = vpack.c.bf16 %v11379_v15, %v11376_v4  ;;  %20801 = vmatmul.mubr.msk.bf16.gmra.mrb[212].mxu1 %vm16659_vm8, %v22390_v52  ;;  %v5722_v49 = vpop.permute.xlu1 %5721 }
 0x711   : > { %v18934_v10 = vpack.c.bf16 %v11371_v21, %v11368_v34  ;;  %vm6825_vm9 = vcmp.eq.s32.totalorder %v22942_v37, %v5722_v49  ;;  %v5718_v32 = vpop.permute.xlu0 %5717 }
 0x712   : > { %19787 = vst [vmem:[%s24974_s8 + $0x358] sm:$0xff] %v18939_v14   ;;  %vm6824_vm7 = vcmp.eq.s32.totalorder %v22942_v37, %v5718_v32  ;;  %5946 = vbcast.lane.b32.xlu1 %v27567_v5, 344  ;;  %5942 = vbcast.lane.b32.xlu0 %v27567_v5, 336  ;;  %v27593_v14 = vld [vmem:[#allocation224_spill] sm:$0xff] }
 0x713   : > { %19786 = vst [vmem:[%s24974_s8 + $0x350] sm:$0xff] %v18934_v10   ;;  %vm16661_vm10 = vmpackc.low %vm6825_vm9, %vm6824_vm7  ;;  %v20698_v61 = vpop.f32.mrb[216].mxu1  ;;  %v27594_v10 = vld [vmem:[#allocation33_spill] sm:$0xff] }
 0x714   : > { %v11392_v38 = vadd.f32 %v27581_v43, %v20698_v61  ;;  %v9254_v33 = vpop.f32.mrb[217].mxu1  ;;  %20804 = vmatprep.mubr.msk.bf16.mxu1 %vm16661_vm10, %v22390_v52  ;;  %v5730_v48 = vpop.permute.xlu1 %5729  ;;  %v25888_v32 = vrot.slane %v27594_v10, %v22652_v16 }
 0x715   : > { %v11384_v20 = vadd.f32 %v27582_v53, %v9254_v33  ;;  %vm6827_vm12 = vcmp.eq.s32.totalorder %v22942_v37, %v5730_v48  ;;  %v20699_v8 = vpop.f32.mrb[218].mxu1  ;;  %v5726_v11 = vpop.permute.xlu0 %5725 }
 0x716   : > { %v11395_v60 = vadd.f32 %v27583_v13, %v20699_v8  ;;  %vm6826_vm4 = vcmp.eq.s32.totalorder %v22942_v37, %v5726_v11  ;;  %v9257_v25 = vpop.f32.mrb[219].mxu1  ;;  %2002 = vbcast.lane.b32.xlu1 %v27575_v1, 360  ;;  %1998 = vbcast.lane.b32.xlu0 %v27575_v1, 352  ;;  %v27596_v11 = vld [vmem:[#allocation226_spill] sm:$0xff] }
 0x717   : > { %vm16663_vm6 = vmpackc.low %vm6827_vm12, %vm6826_vm4  ;;  %v11387_v36 = vadd.f32 %v27584_v19, %v9257_v25  ;;  %v27597_v19 = vld [vmem:[#allocation227_spill] sm:$0xff] }
 0x718   : > { %v18949_v58 = vpack.c.bf16 %v11395_v60, %v11392_v38  ;;  %20805 = vmatmul.mubr.msk.bf16.gmra.mrb[216].mxu1 %vm16663_vm6, %v22390_v52  ;;  %v5738_v62 = vpop.permute.xlu1 %5737 }
 0x719   : > { %v18944_v31 = vpack.c.bf16 %v11387_v36, %v11384_v20  ;;  %vm6829_vm11 = vcmp.eq.s32.totalorder %v22942_v37, %v5738_v62  ;;  %v5734_v22 = vpop.permute.xlu0 %5733  ;;  %v27598_v62 = vld [vmem:[#allocation228_spill] sm:$0xff] }
 0x71a   : > { %19789 = vst [vmem:[%s24974_s8 + $0x368] sm:$0xff] %v18949_v58   ;;  %vm6828_vm13 = vcmp.eq.s32.totalorder %v22942_v37, %v5734_v22  ;;  %5954 = vbcast.lane.b32.xlu1 %v27567_v5, 360  ;;  %5950 = vbcast.lane.b32.xlu0 %v27567_v5, 352 }
 0x71b   : > { %19788 = vst [vmem:[%s24974_s8 + $0x360] sm:$0xff] %v18944_v31   ;;  %vm16665_vm14 = vmpackc.low %vm6829_vm11, %vm6828_vm13  ;;  %v20702_v30 = vpop.f32.mrb[220].mxu1 }
 0x71c   : > { %v11408_v42 = vadd.f32 %v27585_v3, %v20702_v30  ;;  %v9270_v12 = vpop.f32.mrb[221].mxu1  ;;  %20808 = vmatprep.mubr.msk.bf16.mxu1 %vm16665_vm14, %v22390_v52  ;;  %v5746_v41 = vpop.permute.xlu1 %5745 }
 0x71d   : > { %v11400_v54 = vadd.f32 %v27586_v57, %v9270_v12  ;;  %vm6831_vm15 = vcmp.eq.s32.totalorder %v22942_v37, %v5746_v41  ;;  %v20703_v44 = vpop.f32.mrb[222].mxu1  ;;  %v5742_v0 = vpop.permute.xlu0 %5741  ;;  %v27599_v41 = vld [vmem:[#allocation229_spill] sm:$0xff] }
 0x71e   : > { %v11411_v46 = vadd.f32 %v27587_v24, %v20703_v44  ;;  %vm6830_vm1 = vcmp.eq.s32.totalorder %v22942_v37, %v5742_v0  ;;  %v9273_v55 = vpop.f32.mrb[223].mxu1  ;;  %2010 = vbcast.lane.b32.xlu1 %v27575_v1, 376  ;;  %2006 = vbcast.lane.b32.xlu0 %v27575_v1, 368  ;;  %v27589_v1 = vld [vmem:[#allocation17_spill] sm:$0xff]  ;;  %v27600_v0 = vld [vmem:[#allocation230_spill] sm:$0xff] }
 0x71f   : > { %vm16667_vm0 = vmpackc.low %vm6831_vm15, %vm6830_vm1  ;;  %v11403_v63 = vadd.f32 %v27588_v45, %v9273_v55  ;;  %v25875_v39 = vrot.slane %v27589_v1, %v22652_v16  ;;  %v27595_v16 = vld [vmem:[#allocation225_spill] sm:$0xff]  ;;  %v27601_v45 = vld [vmem:[#allocation231_spill] sm:$0xff] }
 0x720   : > { %v18959_v51 = vpack.c.bf16 %v11411_v46, %v11408_v42  ;;  %20809 = vmatmul.mubr.msk.bf16.gmra.mrb[220].mxu1 %vm16667_vm0, %v22390_v52  ;;  %v5754_v18 = vpop.permute.xlu1 %5753 }
 0x721   : > { %v18954_v7 = vpack.c.bf16 %v11403_v63, %v11400_v54  ;;  %vm6833_vm2 = vcmp.eq.s32.totalorder %v22942_v37, %v5754_v18  ;;  %v5750_v56 = vpop.permute.xlu0 %5749  ;;  %v27602_v18 = vld [vmem:[#allocation232_spill] sm:$0xff] }
 0x722   : > { %19791 = vst [vmem:[%s24974_s8 + $0x378] sm:$0xff] %v18959_v51   ;;  %vm6832_vm3 = vcmp.eq.s32.totalorder %v22942_v37, %v5750_v56  ;;  %5962 = vbcast.lane.b32.xlu1 %v27567_v5, 376  ;;  %5958 = vbcast.lane.b32.xlu0 %v27567_v5, 368 }
 0x723   : > { %19790 = vst [vmem:[%s24974_s8 + $0x370] sm:$0xff] %v18954_v7   ;;  %vm16669_vm5 = vmpackc.low %vm6833_vm2, %vm6832_vm3  ;;  %v20706_v4 = vpop.f32.mrb[224].mxu1 }
 0x724   : > { %v11424_v26 = vadd.f32 %v27590_v40, %v20706_v4  ;;  %v9286_v34 = vpop.f32.mrb[225].mxu1  ;;  %20812 = vmatprep.mubr.msk.bf16.mxu1 %vm16669_vm5, %v22390_v52  ;;  %v5762_v2 = vpop.permute.xlu1 %5761 }
 0x725   : > { %v11416_v35 = vadd.f32 %v27591_v9, %v9286_v34  ;;  %vm6835_vm8 = vcmp.eq.s32.totalorder %v22942_v37, %v5762_v2  ;;  %v20707_v15 = vpop.f32.mrb[226].mxu1  ;;  %v5758_v27 = vpop.permute.xlu0 %5757  ;;  %v27603_v2 = vld [vmem:[#allocation233_spill] sm:$0xff] }
 0x726   : > { %v11427_v21 = vadd.f32 %v27592_v6, %v20707_v15  ;;  %vm6834_vm9 = vcmp.eq.s32.totalorder %v22942_v37, %v5758_v27  ;;  %v9289_v5 = vpop.f32.mrb[227].mxu1  ;;  %2021 = vbcast.lane.b32.xlu1 %v25875_v39, 264  ;;  %2017 = vbcast.lane.b32.xlu0 %v25875_v39, 256  ;;  %v27604_v27 = vld [vmem:[#allocation234_spill] sm:$0xff] }
 0x727   : > { %vm16671_vm7 = vmpackc.low %vm6835_vm8, %vm6834_vm9  ;;  %v11419_v49 = vadd.f32 %v27593_v14, %v9289_v5  ;;  %v27605_v14 = vld [vmem:[#allocation235_spill] sm:$0xff] }
 0x728   : > { %v18969_v61 = vpack.c.bf16 %v11427_v21, %v11424_v26  ;;  %20813 = vmatmul.mubr.msk.bf16.gmra.mrb[224].mxu1 %vm16671_vm7, %v22390_v52  ;;  %v5773_v43 = vpop.permute.xlu1 %5772 }
 0x729   : > { %v18964_v38 = vpack.c.bf16 %v11419_v49, %v11416_v35  ;;  %vm6837_vm10 = vcmp.eq.s32.totalorder %v22942_v37, %v5773_v43  ;;  %v5769_v33 = vpop.permute.xlu0 %5768  ;;  %v27606_v43 = vld [vmem:[#allocation236_spill] sm:$0xff] }
 0x72a   : > { %19793 = vst [vmem:[%s24974_s8 + $0x388] sm:$0xff] %v18969_v61   ;;  %vm6836_vm12 = vcmp.eq.s32.totalorder %v22942_v37, %v5769_v33  ;;  %5973 = vbcast.lane.b32.xlu1 %v25888_v32, 264  ;;  %5969 = vbcast.lane.b32.xlu0 %v25888_v32, 256 }
 0x72b   : > { %19792 = vst [vmem:[%s24974_s8 + $0x380] sm:$0xff] %v18964_v38   ;;  %vm16673_vm4 = vmpackc.low %vm6837_vm10, %vm6836_vm12  ;;  %v20710_v48 = vpop.f32.mrb[228].mxu1 }
 0x72c   : > { %v11440_v53 = vadd.f32 %v27595_v16, %v20710_v48  ;;  %v9302_v20 = vpop.f32.mrb[229].mxu1  ;;  %20816 = vmatprep.mubr.msk.bf16.mxu1 %vm16673_vm4, %v22390_v52  ;;  %v5781_v8 = vpop.permute.xlu1 %5780 }
 0x72d   : > { %v11432_v13 = vadd.f32 %v27596_v11, %v9302_v20  ;;  %vm6839_vm6 = vcmp.eq.s32.totalorder %v22942_v37, %v5781_v8  ;;  %v20711_v60 = vpop.f32.mrb[230].mxu1  ;;  %v5777_v25 = vpop.permute.xlu0 %5776 }
 0x72e   : > { %v11443_v36 = vadd.f32 %v27597_v19, %v20711_v60  ;;  %vm6838_vm11 = vcmp.eq.s32.totalorder %v22942_v37, %v5777_v25  ;;  %v9305_v58 = vpop.f32.mrb[231].mxu1  ;;  %2029 = vbcast.lane.b32.xlu1 %v25875_v39, 280  ;;  %2025 = vbcast.lane.b32.xlu0 %v25875_v39, 272 }
 0x72f   : > { %vm16675_vm13 = vmpackc.low %vm6839_vm6, %vm6838_vm11  ;;  %v11435_v31 = vadd.f32 %v27598_v62, %v9305_v58 }
 0x730   : > { %v18979_v22 = vpack.c.bf16 %v11443_v36, %v11440_v53  ;;  %20817 = vmatmul.mubr.msk.bf16.gmra.mrb[228].mxu1 %vm16675_vm13, %v22390_v52  ;;  %v5789_v30 = vpop.permute.xlu1 %5788  ;;  %v27607_v36 = vld [vmem:[#allocation237_spill] sm:$0xff] }
 0x731   : > { %v18974_v3 = vpack.c.bf16 %v11435_v31, %v11432_v13  ;;  %vm6841_vm14 = vcmp.eq.s32.totalorder %v22942_v37, %v5789_v30  ;;  %v5785_v42 = vpop.permute.xlu0 %5784 }
 0x732   : > { %19795 = vst [vmem:[%s24974_s8 + $0x398] sm:$0xff] %v18979_v22   ;;  %vm6840_vm15 = vcmp.eq.s32.totalorder %v22942_v37, %v5785_v42  ;;  %5981 = vbcast.lane.b32.xlu1 %v25888_v32, 280  ;;  %5977 = vbcast.lane.b32.xlu0 %v25888_v32, 272 }
 0x733   : > { %19794 = vst [vmem:[%s24974_s8 + $0x390] sm:$0xff] %v18974_v3   ;;  %vm16677_vm1 = vmpackc.low %vm6841_vm14, %vm6840_vm15  ;;  %v20714_v12 = vpop.f32.mrb[232].mxu1 }
 0x734   : > { %v11456_v57 = vadd.f32 %v27599_v41, %v20714_v12  ;;  %v9318_v54 = vpop.f32.mrb[233].mxu1  ;;  %20820 = vmatprep.mubr.msk.bf16.mxu1 %vm16677_vm1, %v22390_v52  ;;  %v5797_v44 = vpop.permute.xlu1 %5796  ;;  %v27609_v12 = vld [vmem:[#allocation239_spill] sm:$0xff] }
 0x735   : > { %v11448_v24 = vadd.f32 %v27600_v0, %v9318_v54  ;;  %vm6843_vm0 = vcmp.eq.s32.totalorder %v22942_v37, %v5797_v44  ;;  %v20715_v46 = vpop.f32.mrb[234].mxu1  ;;  %v5793_v55 = vpop.permute.xlu0 %5792  ;;  %v27610_v44 = vld [vmem:[#allocation240_spill] sm:$0xff] }
 0x736   : > { %v11459_v63 = vadd.f32 %v27601_v45, %v20715_v46  ;;  %vm6842_vm2 = vcmp.eq.s32.totalorder %v22942_v37, %v5793_v55  ;;  %v9321_v51 = vpop.f32.mrb[235].mxu1  ;;  %2037 = vbcast.lane.b32.xlu1 %v25875_v39, 296  ;;  %2033 = vbcast.lane.b32.xlu0 %v25875_v39, 288  ;;  %v27611_v55 = vld [vmem:[#allocation241_spill] sm:$0xff] }
 0x737   : > { %vm16679_vm3 = vmpackc.low %vm6843_vm0, %vm6842_vm2  ;;  %v11451_v7 = vadd.f32 %v27602_v18, %v9321_v51  ;;  %v27612_v51 = vld [vmem:[#allocation242_spill] sm:$0xff] }
 0x738   : > { %v18989_v56 = vpack.c.bf16 %v11459_v63, %v11456_v57  ;;  %20821 = vmatmul.mubr.msk.bf16.gmra.mrb[232].mxu1 %vm16679_vm3, %v22390_v52  ;;  %v5805_v4 = vpop.permute.xlu1 %5804 }
 0x739   : > { %v18984_v40 = vpack.c.bf16 %v11451_v7, %v11448_v24  ;;  %vm6845_vm5 = vcmp.eq.s32.totalorder %v22942_v37, %v5805_v4  ;;  %v5801_v26 = vpop.permute.xlu0 %5800 }
 0x73a   : > { %19797 = vst [vmem:[%s24974_s8 + $0x3a8] sm:$0xff] %v18989_v56   ;;  %vm6844_vm8 = vcmp.eq.s32.totalorder %v22942_v37, %v5801_v26  ;;  %5989 = vbcast.lane.b32.xlu1 %v25888_v32, 296  ;;  %5985 = vbcast.lane.b32.xlu0 %v25888_v32, 288 }
 0x73b   : > { %19796 = vst [vmem:[%s24974_s8 + $0x3a0] sm:$0xff] %v18984_v40   ;;  %vm16681_vm9 = vmpackc.low %vm6845_vm5, %vm6844_vm8  ;;  %v20718_v34 = vpop.f32.mrb[236].mxu1 }
 0x73c   : > { %v11472_v9 = vadd.f32 %v27603_v2, %v20718_v34  ;;  %v9334_v35 = vpop.f32.mrb[237].mxu1  ;;  %20824 = vmatprep.mubr.msk.bf16.mxu1 %vm16681_vm9, %v22390_v52  ;;  %v5813_v15 = vpop.permute.xlu1 %5812  ;;  %v27613_v34 = vld [vmem:[#allocation243_spill] sm:$0xff] }
 0x73d   : > { %v11464_v6 = vadd.f32 %v27604_v27, %v9334_v35  ;;  %vm6847_vm7 = vcmp.eq.s32.totalorder %v22942_v37, %v5813_v15  ;;  %v20719_v21 = vpop.f32.mrb[238].mxu1  ;;  %v5809_v5 = vpop.permute.xlu0 %5808  ;;  %v27614_v15 = vld [vmem:[#allocation244_spill] sm:$0xff] }
 0x73e   : > { %v11475_v49 = vadd.f32 %v27605_v14, %v20719_v21  ;;  %vm6846_vm10 = vcmp.eq.s32.totalorder %v22942_v37, %v5809_v5  ;;  %v9337_v61 = vpop.f32.mrb[239].mxu1  ;;  %2045 = vbcast.lane.b32.xlu1 %v25875_v39, 312  ;;  %2041 = vbcast.lane.b32.xlu0 %v25875_v39, 304  ;;  %v27615_v5 = vld [vmem:[#allocation245_spill] sm:$0xff] }
 0x73f   : > { %vm16683_vm12 = vmpackc.low %vm6847_vm7, %vm6846_vm10  ;;  %v11467_v38 = vadd.f32 %v27606_v43, %v9337_v61  ;;  %v27616_v61 = vld [vmem:[#allocation246_spill] sm:$0xff] }
 0x740   : > { %v18999_v33 = vpack.c.bf16 %v11475_v49, %v11472_v9  ;;  %20825 = vmatmul.mubr.msk.bf16.gmra.mrb[236].mxu1 %vm16683_vm12, %v22390_v52  ;;  %v5821_v48 = vpop.permute.xlu1 %5820 }
 0x741   : > { %v18994_v16 = vpack.c.bf16 %v11467_v38, %v11464_v6  ;;  %vm6849_vm4 = vcmp.eq.s32.totalorder %v22942_v37, %v5821_v48  ;;  %v5817_v53 = vpop.permute.xlu0 %5816 }
 0x742   : > { %19799 = vst [vmem:[%s24974_s8 + $0x3b8] sm:$0xff] %v18999_v33   ;;  %vm6848_vm6 = vcmp.eq.s32.totalorder %v22942_v37, %v5817_v53  ;;  %5997 = vbcast.lane.b32.xlu1 %v25888_v32, 312  ;;  %5993 = vbcast.lane.b32.xlu0 %v25888_v32, 304 }
 0x743   : > { %19798 = vst [vmem:[%s24974_s8 + $0x3b0] sm:$0xff] %v18994_v16   ;;  %vm16685_vm11 = vmpackc.low %vm6849_vm4, %vm6848_vm6  ;;  %v20722_v20 = vpop.f32.mrb[240].mxu1 }
 0x744   : > { %v11488_v8 = vadd.f32 %v24331_v28, %v20722_v20  ;;  %v9350_v11 = vpop.f32.mrb[241].mxu1  ;;  %20828 = vmatprep.mubr.msk.bf16.mxu1 %vm16685_vm11, %v22390_v52  ;;  %v5829_v13 = vpop.permute.xlu1 %5828  ;;  %v27608_v28 = vld [vmem:[#allocation238_spill] sm:$0xff]  ;;  %v27617_v20 = vld [vmem:[#allocation247_spill] sm:$0xff] }
 0x745   : > { %v11480_v60 = vadd.f32 %v24338_v59, %v9350_v11  ;;  %vm6851_vm13 = vcmp.eq.s32.totalorder %v22942_v37, %v5829_v13  ;;  %v20723_v25 = vpop.f32.mrb[242].mxu1  ;;  %v5825_v19 = vpop.permute.xlu0 %5824 }
 0x746   : > { %v11491_v58 = vadd.f32 %v27607_v36, %v20723_v25  ;;  %vm6850_vm14 = vcmp.eq.s32.totalorder %v22942_v37, %v5825_v19  ;;  %v9353_v62 = vpop.f32.mrb[243].mxu1  ;;  %2053 = vbcast.lane.b32.xlu1 %v25875_v39, 328  ;;  %2049 = vbcast.lane.b32.xlu0 %v25875_v39, 320 }
 0x747   : > { %vm16687_vm15 = vmpackc.low %vm6851_vm13, %vm6850_vm14  ;;  %v11483_v31 = vadd.f32 %v27608_v28, %v9353_v62 }
 0x748   : > { %v19009_v22 = vpack.c.bf16 %v11491_v58, %v11488_v8  ;;  %20829 = vmatmul.mubr.msk.bf16.gmra.mrb[240].mxu1 %vm16687_vm15, %v22390_v52  ;;  %v5840_v59 = vpop.permute.xlu1 %5839  ;;  %v27619_v58 = vld [vmem:[#allocation249_spill] sm:$0xff] }
 0x749   : > { %v19004_v30 = vpack.c.bf16 %v11483_v31, %v11480_v60  ;;  %vm6853_vm1 = vcmp.eq.s32.totalorder %v22942_v37, %v5840_v59  ;;  %v5836_v3 = vpop.permute.xlu0 %5835  ;;  %v27618_v60 = vld [vmem:[#allocation248_spill] sm:$0xff]  ;;  %v27620_v31 = vld [vmem:[#allocation250_spill] sm:$0xff] }
 0x74a   : > { %19801 = vst [vmem:[%s24974_s8 + $0x3c8] sm:$0xff] %v19009_v22   ;;  %vm6852_vm0 = vcmp.eq.s32.totalorder %v22942_v37, %v5836_v3  ;;  %6005 = vbcast.lane.b32.xlu1 %v25888_v32, 328  ;;  %6001 = vbcast.lane.b32.xlu0 %v25888_v32, 320 }
 0x74b   : > { %19800 = vst [vmem:[%s24974_s8 + $0x3c0] sm:$0xff] %v19004_v30   ;;  %vm16689_vm2 = vmpackc.low %vm6853_vm1, %vm6852_vm0  ;;  %v20726_v42 = vpop.f32.mrb[244].mxu1 }
 0x74c   : > { %v11504_v41 = vadd.f32 %v27609_v12, %v20726_v42  ;;  %v9366_v57 = vpop.f32.mrb[245].mxu1  ;;  %20832 = vmatprep.mubr.msk.bf16.mxu1 %vm16689_vm2, %v22390_v52  ;;  %v5848_v54 = vpop.permute.xlu1 %5847 }
 0x74d   : > { %v11496_v0 = vadd.f32 %v27610_v44, %v9366_v57  ;;  %vm6855_vm3 = vcmp.eq.s32.totalorder %v22942_v37, %v5848_v54  ;;  %v20727_v24 = vpop.f32.mrb[246].mxu1  ;;  %v5844_v46 = vpop.permute.xlu0 %5843 }
 0x74e   : > { %v11507_v45 = vadd.f32 %v27611_v55, %v20727_v24  ;;  %vm6854_vm5 = vcmp.eq.s32.totalorder %v22942_v37, %v5844_v46  ;;  %v9369_v63 = vpop.f32.mrb[247].mxu1  ;;  %2061 = vbcast.lane.b32.xlu1 %v25875_v39, 344  ;;  %2057 = vbcast.lane.b32.xlu0 %v25875_v39, 336 }
 0x74f   : > { %vm16691_vm8 = vmpackc.low %vm6855_vm3, %vm6854_vm5  ;;  %v11499_v18 = vadd.f32 %v27612_v51, %v9369_v63  ;;  %v27624_v51 = vld [vmem:[#allocation254_spill] sm:$0xff] }
 0x750   : > { %v19019_v7 = vpack.c.bf16 %v11507_v45, %v11504_v41  ;;  %20833 = vmatmul.mubr.msk.bf16.gmra.mrb[244].mxu1 %vm16691_vm8, %v22390_v52  ;;  %v5856_v56 = vpop.permute.xlu1 %5855  ;;  %v27621_v41 = vld [vmem:[#allocation251_spill] sm:$0xff]  ;;  %v27623_v45 = vld [vmem:[#allocation253_spill] sm:$0xff] }
 0x751   : > { %v19014_v4 = vpack.c.bf16 %v11499_v18, %v11496_v0  ;;  %vm6857_vm9 = vcmp.eq.s32.totalorder %v22942_v37, %v5856_v56  ;;  %v5852_v40 = vpop.permute.xlu0 %5851  ;;  %v27622_v0 = vld [vmem:[#allocation252_spill] sm:$0xff] }
 0x752   : > { %19803 = vst [vmem:[%s24974_s8 + $0x3d8] sm:$0xff] %v19019_v7   ;;  %vm6856_vm7 = vcmp.eq.s32.totalorder %v22942_v37, %v5852_v40  ;;  %6013 = vbcast.lane.b32.xlu1 %v25888_v32, 344  ;;  %6009 = vbcast.lane.b32.xlu0 %v25888_v32, 336  ;;  %v26024_v7 = vrot.slane %v27594_v10, %v22654_v17 }
 0x753   : > { %19802 = vst [vmem:[%s24974_s8 + $0x3d0] sm:$0xff] %v19014_v4   ;;  %vm16693_vm10 = vmpackc.low %vm6857_vm9, %vm6856_vm7  ;;  %v20730_v26 = vpop.f32.mrb[248].mxu1 }
 0x754   : > { %v11520_v2 = vadd.f32 %v27613_v34, %v20730_v26  ;;  %v9382_v9 = vpop.f32.mrb[249].mxu1  ;;  %20836 = vmatprep.mubr.msk.bf16.mxu1 %vm16693_vm10, %v22390_v52  ;;  %v5864_v35 = vpop.permute.xlu1 %5863 }
 0x755   : > { %v11512_v27 = vadd.f32 %v27614_v15, %v9382_v9  ;;  %vm6859_vm12 = vcmp.eq.s32.totalorder %v22942_v37, %v5864_v35  ;;  %v20731_v6 = vpop.f32.mrb[250].mxu1  ;;  %v5860_v21 = vpop.permute.xlu0 %5859  ;;  %v27626_v15 = vld [vmem:[#allocation256_spill] sm:$0xff] }
 0x756   : > { %v11523_v14 = vadd.f32 %v27615_v5, %v20731_v6  ;;  %vm6858_vm4 = vcmp.eq.s32.totalorder %v22942_v37, %v5860_v21  ;;  %v9385_v49 = vpop.f32.mrb[251].mxu1  ;;  %2069 = vbcast.lane.b32.xlu1 %v25875_v39, 360  ;;  %2065 = vbcast.lane.b32.xlu0 %v25875_v39, 352  ;;  %v27627_v5 = vld [vmem:[#allocation257_spill] sm:$0xff] }
 0x757   : > { %vm16695_vm6 = vmpackc.low %vm6859_vm12, %vm6858_vm4  ;;  %v11515_v43 = vadd.f32 %v27616_v61, %v9385_v49  ;;  %v27628_v61 = vld [vmem:[#allocation258_spill] sm:$0xff] }
 0x758   : > { %v19029_v38 = vpack.c.bf16 %v11523_v14, %v11520_v2  ;;  %20837 = vmatmul.mubr.msk.bf16.gmra.mrb[248].mxu1 %vm16695_vm6, %v22390_v52  ;;  %v5872_v33 = vpop.permute.xlu1 %5871 }
 0x759   : > { %v19024_v48 = vpack.c.bf16 %v11515_v43, %v11512_v27  ;;  %vm6861_vm11 = vcmp.eq.s32.totalorder %v22942_v37, %v5872_v33  ;;  %v5868_v16 = vpop.permute.xlu0 %5867 }
 0x75a   : > { %19805 = vst [vmem:[%s24974_s8 + $0x3e8] sm:$0xff] %v19029_v38   ;;  %vm6860_vm13 = vcmp.eq.s32.totalorder %v22942_v37, %v5868_v16  ;;  %6021 = vbcast.lane.b32.xlu1 %v25888_v32, 360  ;;  %6017 = vbcast.lane.b32.xlu0 %v25888_v32, 352 }
 0x75b   : > { %19804 = vst [vmem:[%s24974_s8 + $0x3e0] sm:$0xff] %v19024_v48   ;;  %vm16697_vm14 = vmpackc.low %vm6861_vm11, %vm6860_vm13  ;;  %v20734_v53 = vpop.f32.mrb[252].mxu1 }
 0x75c   : > { %v11536_v8 = vadd.f32 %v27617_v20, %v20734_v53  ;;  %v9398_v11 = vpop.f32.mrb[253].mxu1  ;;  %20840 = vmatprep.mubr.msk.bf16.mxu1 %vm16697_vm14, %v22390_v52  ;;  %v5880_v13 = vpop.permute.xlu1 %5879  ;;  %v27629_v20 = vld [vmem:[#allocation259_spill] sm:$0xff] }
 0x75d   : > { %v11528_v25 = vadd.f32 %v27618_v60, %v9398_v11  ;;  %vm6863_vm15 = vcmp.eq.s32.totalorder %v22942_v37, %v5880_v13  ;;  %v20735_v19 = vpop.f32.mrb[254].mxu1  ;;  %v5876_v36 = vpop.permute.xlu0 %5875  ;;  %v27630_v60 = vld [vmem:[#allocation260_spill] sm:$0xff] }
 0x75e   : > { %v11539_v62 = vadd.f32 %v27619_v58, %v20735_v19  ;;  %vm6862_vm1 = vcmp.eq.s32.totalorder %v22942_v37, %v5876_v36  ;;  %v9401_v28 = vpop.f32.mrb[255].mxu1  ;;  %2077 = vbcast.lane.b32.xlu1 %v25875_v39, 376  ;;  %2073 = vbcast.lane.b32.xlu0 %v25875_v39, 368  ;;  %v26011_v39 = vrot.slane %v27589_v1, %v22654_v17  ;;  %v27625_v17 = vld [vmem:[#allocation255_spill] sm:$0xff]  ;;  %v27631_v58 = vld [vmem:[#allocation261_spill] sm:$0xff] }
 0x75f   : > { %vm16699_vm0 = vmpackc.low %vm6863_vm15, %vm6862_vm1  ;;  %v11531_v22 = vadd.f32 %v27620_v31, %v9401_v28  ;;  %v27632_v31 = vld [vmem:[#allocation262_spill] sm:$0xff] }
 0x760   : > { %v19039_v59 = vpack.c.bf16 %v11539_v62, %v11536_v8  ;;  %20841 = vmatmul.mubr.msk.bf16.gmra.mrb[252].mxu1 %vm16699_vm0, %v22390_v52  ;;  %v5888_v30 = vpop.permute.xlu1 %5887 }
 0x761   : > { %v19034_v3 = vpack.c.bf16 %v11531_v22, %v11528_v25  ;;  %vm6865_vm2 = vcmp.eq.s32.totalorder %v22942_v37, %v5888_v30  ;;  %v5884_v42 = vpop.permute.xlu0 %5883 }
 0x762   : > { %19807 = vst [vmem:[%s24974_s8 + $0x3f8] sm:$0xff] %v19039_v59   ;;  %vm6864_vm3 = vcmp.eq.s32.totalorder %v22942_v37, %v5884_v42  ;;  %6029 = vbcast.lane.b32.xlu1 %v25888_v32, 376  ;;  %6025 = vbcast.lane.b32.xlu0 %v25888_v32, 368 }
 0x763   : > { %19806 = vst [vmem:[%s24974_s8 + $0x3f0] sm:$0xff] %v19034_v3   ;;  %vm16701_vm5 = vmpackc.low %vm6865_vm2, %vm6864_vm3  ;;  %v20738_v12 = vpop.f32.mrb[148].mxu1 }
 0x764   : > { %v11552_v57 = vadd.f32 %v27621_v41, %v20738_v12  ;;  %v9414_v54 = vpop.f32.mrb[149].mxu1  ;;  %20844 = vmatprep.mubr.msk.bf16.mxu1 %vm16701_vm5, %v22390_v52  ;;  %v5896_v44 = vpop.permute.xlu1 %5895 }
 0x765   : > { %v11544_v24 = vadd.f32 %v27622_v0, %v9414_v54  ;;  %vm6867_vm8 = vcmp.eq.s32.totalorder %v22942_v37, %v5896_v44  ;;  %v20739_v46 = vpop.f32.mrb[150].mxu1  ;;  %v5892_v55 = vpop.permute.xlu0 %5891  ;;  %v27633_v44 = vld [vmem:[#allocation263_spill] sm:$0xff] }
 0x766   : > { %v11555_v63 = vadd.f32 %v27623_v45, %v20739_v46  ;;  %vm6866_vm9 = vcmp.eq.s32.totalorder %v22942_v37, %v5892_v55  ;;  %v9417_v32 = vpop.f32.mrb[151].mxu1  ;;  %2088 = vbcast.lane.b32.xlu1 %v26011_v39, 264  ;;  %2084 = vbcast.lane.b32.xlu0 %v26011_v39, 256  ;;  %v27634_v55 = vld [vmem:[#allocation264_spill] sm:$0xff] }
 0x767   : > { %vm16703_vm7 = vmpackc.low %vm6867_vm8, %vm6866_vm9  ;;  %v11547_v18 = vadd.f32 %v27624_v51, %v9417_v32 }
 0x768   : > { %v19049_v56 = vpack.c.bf16 %v11555_v63, %v11552_v57  ;;  %20845 = vmatmul.mubr.msk.bf16.gmra.mrb[148].mxu1 %vm16703_vm7, %v22390_v52  ;;  %v5907_v4 = vpop.permute.xlu1 %5906 }
 0x769   : > { %v19044_v40 = vpack.c.bf16 %v11547_v18, %v11544_v24  ;;  %vm6869_vm10 = vcmp.eq.s32.totalorder %v22942_v37, %v5907_v4  ;;  %v5903_v26 = vpop.permute.xlu0 %5902 }
 0x76a   : > { %19809 = vst [vmem:[%s24974_s8 + $0x408] sm:$0xff] %v19049_v56   ;;  %vm6868_vm12 = vcmp.eq.s32.totalorder %v22942_v37, %v5903_v26  ;;  %6040 = vbcast.lane.b32.xlu1 %v26024_v7, 264  ;;  %6036 = vbcast.lane.b32.xlu0 %v26024_v7, 256 }
 0x76b   : > { %19808 = vst [vmem:[%s24974_s8 + $0x400] sm:$0xff] %v19044_v40   ;;  %vm16705_vm4 = vmpackc.low %vm6869_vm10, %vm6868_vm12  ;;  %v20742_v34 = vpop.f32.mrb[152].mxu1 }
 0x76c   : > { %v11568_v2 = vadd.f32 %v27625_v17, %v20742_v34  ;;  %v9430_v9 = vpop.f32.mrb[153].mxu1  ;;  %20848 = vmatprep.mubr.msk.bf16.mxu1 %vm16705_vm4, %v22390_v52  ;;  %v5915_v35 = vpop.permute.xlu1 %5914 }
 0x76d   : > { %v11560_v27 = vadd.f32 %v27626_v15, %v9430_v9  ;;  %vm6871_vm6 = vcmp.eq.s32.totalorder %v22942_v37, %v5915_v35  ;;  %v20743_v6 = vpop.f32.mrb[154].mxu1  ;;  %v5911_v21 = vpop.permute.xlu0 %5910 }
 0x76e   : > { %v11571_v14 = vadd.f32 %v27627_v5, %v20743_v6  ;;  %vm6870_vm11 = vcmp.eq.s32.totalorder %v22942_v37, %v5911_v21  ;;  %v9433_v49 = vpop.f32.mrb[155].mxu1  ;;  %2096 = vbcast.lane.b32.xlu1 %v26011_v39, 280  ;;  %2092 = vbcast.lane.b32.xlu0 %v26011_v39, 272 }
 0x76f   : > { %vm16707_vm13 = vmpackc.low %vm6871_vm6, %vm6870_vm11  ;;  %v11563_v43 = vadd.f32 %v27628_v61, %v9433_v49 }
 0x770   : > { %v19059_v38 = vpack.c.bf16 %v11571_v14, %v11568_v2  ;;  %20849 = vmatmul.mubr.msk.bf16.gmra.mrb[152].mxu1 %vm16707_vm13, %v22390_v52  ;;  %v5923_v33 = vpop.permute.xlu1 %5922  ;;  %v27636_v2 = vld [vmem:[#allocation266_spill] sm:$0xff] }
 0x771   : > { %v19054_v48 = vpack.c.bf16 %v11563_v43, %v11560_v27  ;;  %vm6873_vm14 = vcmp.eq.s32.totalorder %v22942_v37, %v5923_v33  ;;  %v5919_v16 = vpop.permute.xlu0 %5918  ;;  %v27637_v27 = vld [vmem:[#allocation267_spill] sm:$0xff]  ;;  %v27639_v33 = vld [vmem:[#allocation269_spill] sm:$0xff] }
 0x772   : > { %19811 = vst [vmem:[%s24974_s8 + $0x418] sm:$0xff] %v19059_v38   ;;  %vm6872_vm15 = vcmp.eq.s32.totalorder %v22942_v37, %v5919_v16  ;;  %6048 = vbcast.lane.b32.xlu1 %v26024_v7, 280  ;;  %6044 = vbcast.lane.b32.xlu0 %v26024_v7, 272 }
 0x773   : > { %19810 = vst [vmem:[%s24974_s8 + $0x410] sm:$0xff] %v19054_v48   ;;  %vm16709_vm1 = vmpackc.low %vm6873_vm14, %vm6872_vm15  ;;  %v20746_v53 = vpop.f32.mrb[156].mxu1 }
 0x774   : > { %v11584_v8 = vadd.f32 %v27629_v20, %v20746_v53  ;;  %v9446_v11 = vpop.f32.mrb[157].mxu1  ;;  %20852 = vmatprep.mubr.msk.bf16.mxu1 %vm16709_vm1, %v22390_v52  ;;  %v5931_v13 = vpop.permute.xlu1 %5930  ;;  %v27640_v20 = vld [vmem:[#allocation270_spill] sm:$0xff] }
 0x775   : > { %v11576_v25 = vadd.f32 %v27630_v60, %v9446_v11  ;;  %vm6875_vm0 = vcmp.eq.s32.totalorder %v22942_v37, %v5931_v13  ;;  %v20747_v19 = vpop.f32.mrb[158].mxu1  ;;  %v5927_v36 = vpop.permute.xlu0 %5926  ;;  %v27641_v60 = vld [vmem:[#allocation271_spill] sm:$0xff] }
 0x776   : > { %v11587_v62 = vadd.f32 %v27631_v58, %v20747_v19  ;;  %vm6874_vm2 = vcmp.eq.s32.totalorder %v22942_v37, %v5927_v36  ;;  %v9449_v28 = vpop.f32.mrb[159].mxu1  ;;  %2104 = vbcast.lane.b32.xlu1 %v26011_v39, 296  ;;  %2100 = vbcast.lane.b32.xlu0 %v26011_v39, 288  ;;  %v27642_v36 = vld [vmem:[#allocation272_spill] sm:$0xff] }
 0x777   : > { %vm16711_vm3 = vmpackc.low %vm6875_vm0, %vm6874_vm2  ;;  %v11579_v22 = vadd.f32 %v27632_v31, %v9449_v28 }
 0x778   : > { %v19069_v59 = vpack.c.bf16 %v11587_v62, %v11584_v8  ;;  %20853 = vmatmul.mubr.msk.bf16.gmra.mrb[156].mxu1 %vm16711_vm3, %v22390_v52  ;;  %v1987_v30 = vpop.permute.xlu1 %1986 }
 0x779   : > { %v19064_v3 = vpack.c.bf16 %v11579_v22, %v11576_v25  ;;  %vm2925_vm5 = vcmp.eq.s32.totalorder %v22942_v37, %v1987_v30  ;;  %v1983_v42 = vpop.permute.xlu0 %1982  ;;  %v27643_v30 = vld [vmem:[#allocation273_spill] sm:$0xff] }
 0x77a   : > { %19813 = vst [vmem:[%s24974_s8 + $0x428] sm:$0xff] %v19069_v59   ;;  %vm2924_vm8 = vcmp.eq.s32.totalorder %v22942_v37, %v1983_v42  ;;  %6056 = vbcast.lane.b32.xlu1 %v26024_v7, 296  ;;  %6052 = vbcast.lane.b32.xlu0 %v26024_v7, 288 }
 0x77b   : > { %19812 = vst [vmem:[%s24974_s8 + $0x420] sm:$0xff] %v19064_v3   ;;  %vm17233_vm9 = vmpackc.low %vm2925_vm5, %vm2924_vm8  ;;  %v20750_v12 = vpop.f32.mrb[160].mxu1 }
 0x77c   : > { %v11600_v41 = vadd.f32 %v24461_v47, %v20750_v12  ;;  %v9462_v57 = vpop.f32.mrb[161].mxu1  ;;  %21384 = vmatprep.mubr.msk.bf16.mxu0 %vm17233_vm9, %v22390_v52  ;;  %v5939_v54 = vpop.permute.xlu1 %5938  ;;  %v27635_v47 = vld [vmem:[#allocation265_spill] sm:$0xff] }
 0x77d   : > { %v11592_v0 = vadd.f32 %v27633_v44, %v9462_v57  ;;  %vm6877_vm7 = vcmp.eq.s32.totalorder %v22942_v37, %v5939_v54  ;;  %v20751_v24 = vpop.f32.mrb[162].mxu1  ;;  %v5935_v46 = vpop.permute.xlu0 %5934 }
 0x77e   : > { %v11603_v45 = vadd.f32 %v27634_v55, %v20751_v24  ;;  %vm6876_vm10 = vcmp.eq.s32.totalorder %v22942_v37, %v5935_v46  ;;  %v9465_v63 = vpop.f32.mrb[163].mxu1  ;;  %2112 = vbcast.lane.b32.xlu1 %v26011_v39, 312  ;;  %2108 = vbcast.lane.b32.xlu0 %v26011_v39, 304  ;;  %v27646_v55 = vld [vmem:[#allocation276_spill] sm:$0xff] }
 0x77f   : > { %vm16713_vm12 = vmpackc.low %vm6877_vm7, %vm6876_vm10  ;;  %v11595_v32 = vadd.f32 %v27635_v47, %v9465_v63 }
 0x780   : > { %v19079_v51 = vpack.c.bf16 %v11603_v45, %v11600_v41  ;;  %20856 = vmatprep.mubr.msk.bf16.mxu1 %vm16713_vm12, %v22390_v52  ;;  %v1995_v18 = vpop.permute.xlu1 %1994  ;;  %v27644_v41 = vld [vmem:[#allocation274_spill] sm:$0xff] }
 0x781   : > { %v19074_v56 = vpack.c.bf16 %v11595_v32, %v11592_v0  ;;  %vm2927_vm4 = vcmp.eq.s32.totalorder %v22942_v37, %v1995_v18  ;;  %v1991_v4 = vpop.permute.xlu0 %1990  ;;  %v27645_v0 = vld [vmem:[#allocation275_spill] sm:$0xff] }
 0x782   : > { %19815 = vst [vmem:[%s24974_s8 + $0x438] sm:$0xff] %v19079_v51   ;;  %vm2926_vm6 = vcmp.eq.s32.totalorder %v22942_v37, %v1991_v4  ;;  %6064 = vbcast.lane.b32.xlu1 %v26024_v7, 312  ;;  %6060 = vbcast.lane.b32.xlu0 %v26024_v7, 304 }
 0x783   : > { %19814 = vst [vmem:[%s24974_s8 + $0x430] sm:$0xff] %v19074_v56   ;;  %vm17235_vm11 = vmpackc.low %vm2927_vm4, %vm2926_vm6  ;;  %v20754_v40 = vpop.f32.mrb[164].mxu1  ;;  %v27647_v56 = vld [vmem:[#allocation277_spill] sm:$0xff] }
 0x784   : > { %v11616_v26 = vadd.f32 %v24479_v50, %v20754_v40  ;;  %v9478_v34 = vpop.f32.mrb[165].mxu1  ;;  %21385 = vmatmul.mubr.msk.bf16.gmra.mrb[120].mxu0 %vm17235_vm11, %v22390_v52  ;;  %v5947_v17 = vpop.permute.xlu1 %5946  ;;  %v27638_v50 = vld [vmem:[#allocation268_spill] sm:$0xff] }
 0x785   : > { %v11608_v9 = vadd.f32 %v27636_v2, %v9478_v34  ;;  %vm6879_vm13 = vcmp.eq.s32.totalorder %v22942_v37, %v5947_v17  ;;  %v20755_v35 = vpop.f32.mrb[166].mxu1  ;;  %v5943_v15 = vpop.permute.xlu0 %5942  ;;  %v27648_v34 = vld [vmem:[#allocation278_spill] sm:$0xff] }
 0x786   : > { %v11619_v6 = vadd.f32 %v27637_v27, %v20755_v35  ;;  %vm6878_vm14 = vcmp.eq.s32.totalorder %v22942_v37, %v5943_v15  ;;  %v9481_v21 = vpop.f32.mrb[167].mxu1  ;;  %2120 = vbcast.lane.b32.xlu1 %v26011_v39, 328  ;;  %2116 = vbcast.lane.b32.xlu0 %v26011_v39, 320  ;;  %v27649_v35 = vld [vmem:[#allocation279_spill] sm:$0xff] }
 0x787   : > { %vm16715_vm15 = vmpackc.low %vm6879_vm13, %vm6878_vm14  ;;  %v11611_v5 = vadd.f32 %v27638_v50, %v9481_v21 }
 0x788   : > { %v19089_v14 = vpack.c.bf16 %v11619_v6, %v11616_v26  ;;  %20857 = vmatmul.mubr.msk.bf16.gmra.mrb[160].mxu1 %vm16715_vm15, %v22390_v52  ;;  %v2003_v49 = vpop.permute.xlu1 %2002  ;;  %v27650_v6 = vld [vmem:[#allocation280_spill] sm:$0xff] }
 0x789   : > { %v19084_v61 = vpack.c.bf16 %v11611_v5, %v11608_v9  ;;  %vm2929_vm1 = vcmp.eq.s32.totalorder %v22942_v37, %v2003_v49  ;;  %v1999_v43 = vpop.permute.xlu0 %1998 }
 0x78a   : > { %19817 = vst [vmem:[%s24974_s8 + $0x448] sm:$0xff] %v19089_v14   ;;  %vm2928_vm0 = vcmp.eq.s32.totalorder %v22942_v37, %v1999_v43  ;;  %6072 = vbcast.lane.b32.xlu1 %v26024_v7, 328  ;;  %6068 = vbcast.lane.b32.xlu0 %v26024_v7, 320 }
 0x78b   : > { %19816 = vst [vmem:[%s24974_s8 + $0x440] sm:$0xff] %v19084_v61   ;;  %vm17237_vm2 = vmpackc.low %vm2929_vm1, %vm2928_vm0  ;;  %v20758_v38 = vpop.f32.mrb[168].mxu1 }
 0x78c   : > { %v11632_v48 = vadd.f32 %v27639_v33, %v20758_v38  ;;  %v9494_v16 = vpop.f32.mrb[169].mxu1  ;;  %21388 = vmatprep.mubr.msk.bf16.mxu0 %vm17237_vm2, %v22390_v52  ;;  %v5955_v53 = vpop.permute.xlu1 %5954 }
 0x78d   : > { %v11624_v8 = vadd.f32 %v27640_v20, %v9494_v16  ;;  %vm6881_vm3 = vcmp.eq.s32.totalorder %v22942_v37, %v5955_v53  ;;  %v20759_v11 = vpop.f32.mrb[170].mxu1  ;;  %v5951_v13 = vpop.permute.xlu0 %5950 }
 0x78e   : > { %v11635_v25 = vadd.f32 %v27641_v60, %v20759_v11  ;;  %vm6880_vm5 = vcmp.eq.s32.totalorder %v22942_v37, %v5951_v13  ;;  %v9497_v19 = vpop.f32.mrb[171].mxu1  ;;  %2128 = vbcast.lane.b32.xlu1 %v26011_v39, 344  ;;  %2124 = vbcast.lane.b32.xlu0 %v26011_v39, 336  ;;  %v26160_v13 = vrot.slane %v27594_v10, %v22666_v29 }
 0x78f   : > { %vm16717_vm8 = vmpackc.low %vm6881_vm3, %vm6880_vm5  ;;  %v11627_v58 = vadd.f32 %v27642_v36, %v9497_v19 }
 0x790   : > { %v19099_v62 = vpack.c.bf16 %v11635_v25, %v11632_v48  ;;  %20860 = vmatprep.mubr.msk.bf16.mxu1 %vm16717_vm8, %v22390_v52  ;;  %v2011_v28 = vpop.permute.xlu1 %2010  ;;  %v27651_v48 = vld [vmem:[#allocation281_spill] sm:$0xff] }
 0x791   : > { %v19094_v31 = vpack.c.bf16 %v11627_v58, %v11624_v8  ;;  %vm2931_vm9 = vcmp.eq.s32.totalorder %v22942_v37, %v2011_v28  ;;  %v2007_v22 = vpop.permute.xlu0 %2006  ;;  %v27652_v8 = vld [vmem:[#allocation282_spill] sm:$0xff] }
 0x792   : > { %19819 = vst [vmem:[%s24974_s8 + $0x458] sm:$0xff] %v19099_v62   ;;  %vm2930_vm7 = vcmp.eq.s32.totalorder %v22942_v37, %v2007_v22  ;;  %6080 = vbcast.lane.b32.xlu1 %v26024_v7, 344  ;;  %6076 = vbcast.lane.b32.xlu0 %v26024_v7, 336 }
 0x793   : > { %19818 = vst [vmem:[%s24974_s8 + $0x450] sm:$0xff] %v19094_v31   ;;  %vm17239_vm10 = vmpackc.low %vm2931_vm9, %vm2930_vm7  ;;  %v20762_v59 = vpop.f32.mrb[172].mxu1  ;;  %v27655_v31 = vld [vmem:[#allocation285_spill] sm:$0xff] }
 0x794   : > { %v11648_v3 = vadd.f32 %v27643_v30, %v20762_v59  ;;  %v9510_v42 = vpop.f32.mrb[173].mxu1  ;;  %21389 = vmatmul.mubr.msk.bf16.gmra.mrb[124].mxu0 %vm17239_vm10, %v22390_v52  ;;  %v5963_v12 = vpop.permute.xlu1 %5962 }
 0x795   : > { %v11640_v57 = vadd.f32 %v27644_v41, %v9510_v42  ;;  %vm6883_vm12 = vcmp.eq.s32.totalorder %v22942_v37, %v5963_v12  ;;  %v20763_v54 = vpop.f32.mrb[174].mxu1  ;;  %v5959_v44 = vpop.permute.xlu0 %5958  ;;  %v27657_v41 = vld [vmem:[#allocation287_spill] sm:$0xff] }
 0x796   : > { %v11651_v24 = vadd.f32 %v27645_v0, %v20763_v54  ;;  %vm6882_vm4 = vcmp.eq.s32.totalorder %v22942_v37, %v5959_v44  ;;  %v9513_v46 = vpop.f32.mrb[175].mxu1  ;;  %2136 = vbcast.lane.b32.xlu1 %v26011_v39, 360  ;;  %2132 = vbcast.lane.b32.xlu0 %v26011_v39, 352 }
 0x797   : > { %vm16719_vm6 = vmpackc.low %vm6883_vm12, %vm6882_vm4  ;;  %v11643_v45 = vadd.f32 %v27646_v55, %v9513_v46  ;;  %v27658_v55 = vld [vmem:[#allocation288_spill] sm:$0xff] }
 0x798   : > { %v19109_v63 = vpack.c.bf16 %v11651_v24, %v11648_v3  ;;  %20861 = vmatmul.mubr.msk.bf16.gmra.mrb[164].mxu1 %vm16719_vm6, %v22390_v52  ;;  %v2022_v47 = vpop.permute.xlu1 %2021  ;;  %v27656_v3 = vld [vmem:[#allocation286_spill] sm:$0xff] }
 0x799   : > { %v19104_v32 = vpack.c.bf16 %v11643_v45, %v11640_v57  ;;  %vm2933_vm11 = vcmp.eq.s32.totalorder %v22942_v37, %v2022_v47  ;;  %v2018_v51 = vpop.permute.xlu0 %2017 }
 0x79a   : > { %19821 = vst [vmem:[%s24974_s8 + $0x468] sm:$0xff] %v19109_v63   ;;  %vm2932_vm13 = vcmp.eq.s32.totalorder %v22942_v37, %v2018_v51  ;;  %6088 = vbcast.lane.b32.xlu1 %v26024_v7, 360  ;;  %6084 = vbcast.lane.b32.xlu0 %v26024_v7, 352 }
 0x79b   : > { %19820 = vst [vmem:[%s24974_s8 + $0x460] sm:$0xff] %v19104_v32   ;;  %vm17241_vm14 = vmpackc.low %vm2933_vm11, %vm2932_vm13  ;;  %v20766_v18 = vpop.f32.mrb[176].mxu1  ;;  %v27659_v32 = vld [vmem:[#allocation289_spill] sm:$0xff] }
 0x79c   : > { %v11664_v4 = vadd.f32 %v27647_v56, %v20766_v18  ;;  %v9526_v40 = vpop.f32.mrb[177].mxu1  ;;  %21392 = vmatprep.mubr.msk.bf16.mxu0 %vm17241_vm14, %v22390_v52  ;;  %v5974_v26 = vpop.permute.xlu1 %5973 }
 0x79d   : > { %v11656_v17 = vadd.f32 %v27648_v34, %v9526_v40  ;;  %vm6885_vm15 = vcmp.eq.s32.totalorder %v22942_v37, %v5974_v26  ;;  %v20767_v2 = vpop.f32.mrb[178].mxu1  ;;  %v5970_v9 = vpop.permute.xlu0 %5969  ;;  %v27661_v34 = vld [vmem:[#allocation291_spill] sm:$0xff] }
 0x79e   : > { %v11667_v15 = vadd.f32 %v27649_v35, %v20767_v2  ;;  %vm6884_vm1 = vcmp.eq.s32.totalorder %v22942_v37, %v5970_v9  ;;  %v9529_v27 = vpop.f32.mrb[179].mxu1  ;;  %2144 = vbcast.lane.b32.xlu1 %v26011_v39, 376  ;;  %2140 = vbcast.lane.b32.xlu0 %v26011_v39, 368  ;;  %v26147_v39 = vrot.slane %v27589_v1, %v22666_v29  ;;  %v27654_v29 = vld [vmem:[#allocation284_spill] sm:$0xff] }
 0x79f   : > { %vm16721_vm0 = vmpackc.low %vm6885_vm15, %vm6884_vm1  ;;  %v11659_v21 = vadd.f32 %v27650_v6, %v9529_v27  ;;  %v27662_v6 = vld [vmem:[#allocation292_spill] sm:$0xff] }
 0x7a0   : > { %v19119_v50 = vpack.c.bf16 %v11667_v15, %v11664_v4  ;;  %20864 = vmatprep.mubr.msk.bf16.mxu1 %vm16721_vm0, %v22390_v52  ;;  %v2030_v5 = vpop.permute.xlu1 %2029  ;;  %v27660_v4 = vld [vmem:[#allocation290_spill] sm:$0xff] }
 0x7a1   : > { %v19114_v14 = vpack.c.bf16 %v11659_v21, %v11656_v17  ;;  %vm2935_vm2 = vcmp.eq.s32.totalorder %v22942_v37, %v2030_v5  ;;  %v2026_v49 = vpop.permute.xlu0 %2025 }
 0x7a2   : > { %19823 = vst [vmem:[%s24974_s8 + $0x478] sm:$0xff] %v19119_v50   ;;  %vm2934_vm3 = vcmp.eq.s32.totalorder %v22942_v37, %v2026_v49  ;;  %6096 = vbcast.lane.b32.xlu1 %v26024_v7, 376  ;;  %6092 = vbcast.lane.b32.xlu0 %v26024_v7, 368 }
 0x7a3   : > { %19822 = vst [vmem:[%s24974_s8 + $0x470] sm:$0xff] %v19114_v14   ;;  %vm17243_vm5 = vmpackc.low %vm2935_vm2, %vm2934_vm3  ;;  %v20770_v61 = vpop.f32.mrb[180].mxu1  ;;  %v27663_v14 = vld [vmem:[#allocation293_spill] sm:$0xff] }
 0x7a4   : > { %v11680_v43 = vadd.f32 %v24551_v23, %v20770_v61  ;;  %v9542_v38 = vpop.f32.mrb[181].mxu1  ;;  %21393 = vmatmul.mubr.msk.bf16.gmra.mrb[128].mxu0 %vm17243_vm5, %v22390_v52  ;;  %v5982_v33 = vpop.permute.xlu1 %5981  ;;  %v27653_v23 = vld [vmem:[#allocation283_spill] sm:$0xff] }
 0x7a5   : > { %v11672_v16 = vadd.f32 %v27651_v48, %v9542_v38  ;;  %vm6887_vm8 = vcmp.eq.s32.totalorder %v22942_v37, %v5982_v33  ;;  %v20771_v53 = vpop.f32.mrb[182].mxu1  ;;  %v5978_v20 = vpop.permute.xlu0 %5977  ;;  %v27664_v38 = vld [vmem:[#allocation294_spill] sm:$0xff] }
 0x7a6   : > { %v11683_v11 = vadd.f32 %v27652_v8, %v20771_v53  ;;  %vm6886_vm9 = vcmp.eq.s32.totalorder %v22942_v37, %v5978_v20  ;;  %v9545_v1 = vpop.f32.mrb[183].mxu1  ;;  %2155 = vbcast.lane.b32.xlu1 %v26147_v39, 264  ;;  %2151 = vbcast.lane.b32.xlu0 %v26147_v39, 256 }
 0x7a7   : > { %vm16723_vm7 = vmpackc.low %vm6887_vm8, %vm6886_vm9  ;;  %v11675_v7 = vadd.f32 %v27653_v23, %v9545_v1 }
 0x7a8   : > { %v19129_v60 = vpack.c.bf16 %v11683_v11, %v11680_v43  ;;  %20865 = vmatmul.mubr.msk.bf16.gmra.mrb[168].mxu1 %vm16723_vm7, %v22390_v52  ;;  %v2038_v25 = vpop.permute.xlu1 %2037 }
 0x7a9   : > { %v19124_v19 = vpack.c.bf16 %v11675_v7, %v11672_v16  ;;  %vm2937_vm10 = vcmp.eq.s32.totalorder %v22942_v37, %v2038_v25  ;;  %v2034_v36 = vpop.permute.xlu0 %2033  ;;  %v27665_v16 = vld [vmem:[#allocation295_spill] sm:$0xff]  ;;  %v27666_v7 = vld [vmem:[#allocation296_spill] sm:$0xff] }
 0x7aa   : > { %19825 = vst [vmem:[%s24974_s8 + $0x488] sm:$0xff] %v19129_v60   ;;  %vm2936_vm12 = vcmp.eq.s32.totalorder %v22942_v37, %v2034_v36  ;;  %6107 = vbcast.lane.b32.xlu1 %v26160_v13, 264  ;;  %6103 = vbcast.lane.b32.xlu0 %v26160_v13, 256  ;;  %v27667_v36 = vld [vmem:[#allocation297_spill] sm:$0xff] }
 0x7ab   : > { %19824 = vst [vmem:[%s24974_s8 + $0x480] sm:$0xff] %v19124_v19   ;;  %vm17245_vm4 = vmpackc.low %vm2937_vm10, %vm2936_vm12  ;;  %v20774_v58 = vpop.f32.mrb[184].mxu1 }
 0x7ac   : > { %v11696_v10 = vadd.f32 %v27654_v29, %v20774_v58  ;;  %v9558_v62 = vpop.f32.mrb[185].mxu1  ;;  %21396 = vmatprep.mubr.msk.bf16.mxu0 %vm17245_vm4, %v22390_v52  ;;  %v5990_v28 = vpop.permute.xlu1 %5989 }
 0x7ad   : > { %v11688_v22 = vadd.f32 %v27655_v31, %v9558_v62  ;;  %vm6889_vm6 = vcmp.eq.s32.totalorder %v22942_v37, %v5990_v28  ;;  %v20775_v59 = vpop.f32.mrb[186].mxu1  ;;  %v5986_v30 = vpop.permute.xlu0 %5985  ;;  %v27668_v62 = vld [vmem:[#allocation298_spill] sm:$0xff] }
 0x7ae   : > { %v11699_v42 = vadd.f32 %v27656_v3, %v20775_v59  ;;  %vm6888_vm11 = vcmp.eq.s32.totalorder %v22942_v37, %v5986_v30  ;;  %v9561_v12 = vpop.f32.mrb[187].mxu1  ;;  %2163 = vbcast.lane.b32.xlu1 %v26147_v39, 280  ;;  %2159 = vbcast.lane.b32.xlu0 %v26147_v39, 272 }
 0x7af   : > { %vm16725_vm13 = vmpackc.low %vm6889_vm6, %vm6888_vm11  ;;  %v11691_v57 = vadd.f32 %v27657_v41, %v9561_v12 }
 0x7b0   : > { %v19139_v54 = vpack.c.bf16 %v11699_v42, %v11696_v10  ;;  %20868 = vmatprep.mubr.msk.bf16.mxu1 %vm16725_vm13, %v22390_v52  ;;  %v2046_v44 = vpop.permute.xlu1 %2045 }
 0x7b1   : > { %v19134_v0 = vpack.c.bf16 %v11691_v57, %v11688_v22  ;;  %vm2939_vm14 = vcmp.eq.s32.totalorder %v22942_v37, %v2046_v44  ;;  %v2042_v24 = vpop.permute.xlu0 %2041  ;;  %v27669_v22 = vld [vmem:[#allocation299_spill] sm:$0xff]  ;;  %v27670_v57 = vld [vmem:[#allocation300_spill] sm:$0xff] }
 0x7b2   : > { %19827 = vst [vmem:[%s24974_s8 + $0x498] sm:$0xff] %v19139_v54   ;;  %vm2938_vm15 = vcmp.eq.s32.totalorder %v22942_v37, %v2042_v24  ;;  %6115 = vbcast.lane.b32.xlu1 %v26160_v13, 280  ;;  %6111 = vbcast.lane.b32.xlu0 %v26160_v13, 272  ;;  %v27671_v24 = vld [vmem:[#allocation301_spill] sm:$0xff] }
 0x7b3   : > { %19826 = vst [vmem:[%s24974_s8 + $0x490] sm:$0xff] %v19134_v0   ;;  %vm17247_vm1 = vmpackc.low %vm2939_vm14, %vm2938_vm15  ;;  %v20778_v46 = vpop.f32.mrb[188].mxu1 }
 0x7b4   : > { %v11712_v45 = vadd.f32 %v27658_v55, %v20778_v46  ;;  %v9574_v63 = vpop.f32.mrb[189].mxu1  ;;  %21397 = vmatmul.mubr.msk.bf16.gmra.mrb[132].mxu0 %vm17247_vm1, %v22390_v52  ;;  %v5998_v47 = vpop.permute.xlu1 %5997 }
 0x7b5   : > { %v11704_v51 = vadd.f32 %v27659_v32, %v9574_v63  ;;  %vm6891_vm0 = vcmp.eq.s32.totalorder %v22942_v37, %v5998_v47  ;;  %v20779_v18 = vpop.f32.mrb[190].mxu1  ;;  %v5994_v56 = vpop.permute.xlu0 %5993  ;;  %v27672_v63 = vld [vmem:[#allocation302_spill] sm:$0xff] }
 0x7b6   : > { %v11715_v40 = vadd.f32 %v27660_v4, %v20779_v18  ;;  %vm6890_vm2 = vcmp.eq.s32.totalorder %v22942_v37, %v5994_v56  ;;  %v9577_v26 = vpop.f32.mrb[191].mxu1  ;;  %2171 = vbcast.lane.b32.xlu1 %v26147_v39, 296  ;;  %2167 = vbcast.lane.b32.xlu0 %v26147_v39, 288 }
 0x7b7   : > { %vm16727_vm3 = vmpackc.low %vm6891_vm0, %vm6890_vm2  ;;  %v11707_v17 = vadd.f32 %v27661_v34, %v9577_v26 }
 0x7b8   : > { %v19149_v2 = vpack.c.bf16 %v11715_v40, %v11712_v45  ;;  %20869 = vmatmul.mubr.msk.bf16.gmra.mrb[172].mxu1 %vm16727_vm3, %v22390_v52  ;;  %v2054_v9 = vpop.permute.xlu1 %2053 }
 0x7b9   : > { %v19144_v35 = vpack.c.bf16 %v11707_v17, %v11704_v51  ;;  %vm2941_vm5 = vcmp.eq.s32.totalorder %v22942_v37, %v2054_v9  ;;  %v2050_v15 = vpop.permute.xlu0 %2049  ;;  %v27673_v51 = vld [vmem:[#allocation303_spill] sm:$0xff]  ;;  %v27674_v17 = vld [vmem:[#allocation304_spill] sm:$0xff] }
 0x7ba   : > { %19829 = vst [vmem:[%s24974_s8 + $0x4a8] sm:$0xff] %v19149_v2   ;;  %vm2940_vm8 = vcmp.eq.s32.totalorder %v22942_v37, %v2050_v15  ;;  %6123 = vbcast.lane.b32.xlu1 %v26160_v13, 296  ;;  %6119 = vbcast.lane.b32.xlu0 %v26160_v13, 288  ;;  %v27675_v15 = vld [vmem:[#allocation305_spill] sm:$0xff] }
 0x7bb   : > { %19828 = vst [vmem:[%s24974_s8 + $0x4a0] sm:$0xff] %v19144_v35   ;;  %vm17249_vm9 = vmpackc.low %vm2941_vm5, %vm2940_vm8  ;;  %v20782_v27 = vpop.f32.mrb[192].mxu1 }
 0x7bc   : > { %v11728_v21 = vadd.f32 %v27662_v6, %v20782_v27  ;;  %v9590_v50 = vpop.f32.mrb[193].mxu1  ;;  %21400 = vmatprep.mubr.msk.bf16.mxu0 %vm17249_vm9, %v22390_v52  ;;  %v6006_v5 = vpop.permute.xlu1 %6005 }
 0x7bd   : > { %v11720_v49 = vadd.f32 %v27663_v14, %v9590_v50  ;;  %vm6893_vm7 = vcmp.eq.s32.totalorder %v22942_v37, %v6006_v5  ;;  %v20783_v61 = vpop.f32.mrb[194].mxu1  ;;  %v6002_v43 = vpop.permute.xlu0 %6001  ;;  %v27676_v50 = vld [vmem:[#allocation306_spill] sm:$0xff] }
 0x7be   : > { %v11731_v33 = vadd.f32 %v27664_v38, %v20783_v61  ;;  %vm6892_vm10 = vcmp.eq.s32.totalorder %v22942_v37, %v6002_v43  ;;  %v9593_v48 = vpop.f32.mrb[195].mxu1  ;;  %2179 = vbcast.lane.b32.xlu1 %v26147_v39, 312  ;;  %2175 = vbcast.lane.b32.xlu0 %v26147_v39, 304 }
 0x7bf   : > { %vm16729_vm12 = vmpackc.low %vm6893_vm7, %vm6892_vm10  ;;  %v11723_v53 = vadd.f32 %v27665_v16, %v9593_v48 }
 0x7c0   : > { %v19159_v20 = vpack.c.bf16 %v11731_v33, %v11728_v21  ;;  %20872 = vmatprep.mubr.msk.bf16.mxu1 %vm16729_vm12, %v22390_v52  ;;  %v2062_v8 = vpop.permute.xlu1 %2061 }
 0x7c1   : > { %v19154_v11 = vpack.c.bf16 %v11723_v53, %v11720_v49  ;;  %vm2943_vm4 = vcmp.eq.s32.totalorder %v22942_v37, %v2062_v8  ;;  %v2058_v1 = vpop.permute.xlu0 %2057  ;;  %v27677_v49 = vld [vmem:[#allocation307_spill] sm:$0xff]  ;;  %v27678_v53 = vld [vmem:[#allocation308_spill] sm:$0xff] }
 0x7c2   : > { %19831 = vst [vmem:[%s24974_s8 + $0x4b8] sm:$0xff] %v19159_v20   ;;  %vm2942_vm6 = vcmp.eq.s32.totalorder %v22942_v37, %v2058_v1  ;;  %6131 = vbcast.lane.b32.xlu1 %v26160_v13, 312  ;;  %6127 = vbcast.lane.b32.xlu0 %v26160_v13, 304  ;;  %v27679_v1 = vld [vmem:[#allocation309_spill] sm:$0xff] }
 0x7c3   : > { %19830 = vst [vmem:[%s24974_s8 + $0x4b0] sm:$0xff] %v19154_v11   ;;  %vm17251_vm11 = vmpackc.low %vm2943_vm4, %vm2942_vm6  ;;  %v20786_v23 = vpop.f32.mrb[196].mxu1 }
 0x7c4   : > { %v11744_v60 = vadd.f32 %v27666_v7, %v20786_v23  ;;  %v9606_v25 = vpop.f32.mrb[197].mxu1  ;;  %21401 = vmatmul.mubr.msk.bf16.gmra.mrb[136].mxu0 %vm17251_vm11, %v22390_v52  ;;  %v6014_v19 = vpop.permute.xlu1 %6013 }
 0x7c5   : > { %v11736_v58 = vadd.f32 %v27667_v36, %v9606_v25  ;;  %vm6895_vm13 = vcmp.eq.s32.totalorder %v22942_v37, %v6014_v19  ;;  %v20787_v29 = vpop.f32.mrb[198].mxu1  ;;  %v6010_v10 = vpop.permute.xlu0 %6009  ;;  %v27680_v25 = vld [vmem:[#allocation310_spill] sm:$0xff] }
 0x7c6   : > { %v11747_v28 = vadd.f32 %v27668_v62, %v20787_v29  ;;  %vm6894_vm14 = vcmp.eq.s32.totalorder %v22942_v37, %v6010_v10  ;;  %v9609_v31 = vpop.f32.mrb[199].mxu1  ;;  %2187 = vbcast.lane.b32.xlu1 %v26147_v39, 328  ;;  %2183 = vbcast.lane.b32.xlu0 %v26147_v39, 320 }
 0x7c7   : > { %vm16731_vm15 = vmpackc.low %vm6895_vm13, %vm6894_vm14  ;;  %v11739_v59 = vadd.f32 %v27669_v22, %v9609_v31 }
 0x7c8   : > { %v19169_v30 = vpack.c.bf16 %v11747_v28, %v11744_v60  ;;  %20873 = vmatmul.mubr.msk.bf16.gmra.mrb[176].mxu1 %vm16731_vm15, %v22390_v52  ;;  %v2070_v3 = vpop.permute.xlu1 %2069 }
 0x7c9   : > { %v19164_v42 = vpack.c.bf16 %v11739_v59, %v11736_v58  ;;  %vm2945_vm1 = vcmp.eq.s32.totalorder %v22942_v37, %v2070_v3  ;;  %v2066_v12 = vpop.permute.xlu0 %2065  ;;  %v27681_v58 = vld [vmem:[#allocation311_spill] sm:$0xff]  ;;  %v27682_v59 = vld [vmem:[#allocation312_spill] sm:$0xff] }
 0x7ca   : > { %19833 = vst [vmem:[%s24974_s8 + $0x4c8] sm:$0xff] %v19169_v30   ;;  %vm2944_vm0 = vcmp.eq.s32.totalorder %v22942_v37, %v2066_v12  ;;  %6139 = vbcast.lane.b32.xlu1 %v26160_v13, 328  ;;  %6135 = vbcast.lane.b32.xlu0 %v26160_v13, 320 }
 0x7cb   : > { %19832 = vst [vmem:[%s24974_s8 + $0x4c0] sm:$0xff] %v19164_v42   ;;  %vm17253_vm2 = vmpackc.low %vm2945_vm1, %vm2944_vm0  ;;  %v20790_v41 = vpop.f32.mrb[200].mxu1  ;;  %v27683_v42 = vld [vmem:[#allocation313_spill] sm:$0xff] }
 0x7cc   : > { %v11760_v54 = vadd.f32 %v27670_v57, %v20790_v41  ;;  %v9622_v44 = vpop.f32.mrb[201].mxu1  ;;  %21404 = vmatprep.mubr.msk.bf16.mxu0 %vm17253_vm2, %v22390_v52  ;;  %v6022_v0 = vpop.permute.xlu1 %6021 }
 0x7cd   : > { %v11752_v46 = vadd.f32 %v27671_v24, %v9622_v44  ;;  %vm6897_vm3 = vcmp.eq.s32.totalorder %v22942_v37, %v6022_v0  ;;  %v20791_v55 = vpop.f32.mrb[202].mxu1  ;;  %v6018_v45 = vpop.permute.xlu0 %6017  ;;  %v27686_v24 = vld [vmem:[#allocation315_spill] sm:$0xff] }
 0x7ce   : > { %v11763_v47 = vadd.f32 %v27672_v63, %v20791_v55  ;;  %vm6896_vm5 = vcmp.eq.s32.totalorder %v22942_v37, %v6018_v45  ;;  %v9625_v32 = vpop.f32.mrb[203].mxu1  ;;  %2195 = vbcast.lane.b32.xlu1 %v26147_v39, 344  ;;  %2191 = vbcast.lane.b32.xlu0 %v26147_v39, 336 }
 0x7cf   : > { %vm16733_vm8 = vmpackc.low %vm6897_vm3, %vm6896_vm5  ;;  %v11755_v18 = vadd.f32 %v27673_v51, %v9625_v32  ;;  %v27687_v32 = vld [vmem:[#allocation34_spill] sm:$0xff] }
 0x7d0   : > { %v19179_v56 = vpack.c.bf16 %v11763_v47, %v11760_v54  ;;  %20876 = vmatprep.mubr.msk.bf16.mxu1 %vm16733_vm8, %v22390_v52  ;;  %v2078_v4 = vpop.permute.xlu1 %2077  ;;  %v27684_v54 = vld [vmem:[#allocation314_spill] sm:$0xff] }
 0x7d1   : > { %v19174_v40 = vpack.c.bf16 %v11755_v18, %v11752_v46  ;;  %vm2947_vm9 = vcmp.eq.s32.totalorder %v22942_v37, %v2078_v4  ;;  %v2074_v26 = vpop.permute.xlu0 %2073  ;;  %v27688_v18 = vld [vmem:[#allocation316_spill] sm:$0xff] }
 0x7d2   : > { %19835 = vst [vmem:[%s24974_s8 + $0x4d8] sm:$0xff] %v19179_v56   ;;  %vm2946_vm7 = vcmp.eq.s32.totalorder %v22942_v37, %v2074_v26  ;;  %6147 = vbcast.lane.b32.xlu1 %v26160_v13, 344  ;;  %6143 = vbcast.lane.b32.xlu0 %v26160_v13, 336  ;;  %v27689_v26 = vld [vmem:[#allocation317_spill] sm:$0xff] }
 0x7d3   : > { %19834 = vst [vmem:[%s24974_s8 + $0x4d0] sm:$0xff] %v19174_v40   ;;  %vm17255_vm10 = vmpackc.low %vm2947_vm9, %vm2946_vm7  ;;  %v20794_v34 = vpop.f32.mrb[204].mxu1 }
 0x7d4   : > { %v11776_v2 = vadd.f32 %v27674_v17, %v20794_v34  ;;  %v9638_v9 = vpop.f32.mrb[205].mxu1  ;;  %21405 = vmatmul.mubr.msk.bf16.gmra.mrb[140].mxu0 %vm17255_vm10, %v22390_v52  ;;  %v6030_v35 = vpop.permute.xlu1 %6029 }
 0x7d5   : > { %v11768_v27 = vadd.f32 %v27675_v15, %v9638_v9  ;;  %vm6899_vm12 = vcmp.eq.s32.totalorder %v22942_v37, %v6030_v35  ;;  %v20795_v6 = vpop.f32.mrb[206].mxu1  ;;  %v6026_v21 = vpop.permute.xlu0 %6025  ;;  %v27690_v9 = vld [vmem:[#allocation318_spill] sm:$0xff] }
 0x7d6   : > { %v11779_v5 = vadd.f32 %v27676_v50, %v20795_v6  ;;  %vm6898_vm4 = vcmp.eq.s32.totalorder %v22942_v37, %v6026_v21  ;;  %v9641_v14 = vpop.f32.mrb[207].mxu1  ;;  %2203 = vbcast.lane.b32.xlu1 %v26147_v39, 360  ;;  %2199 = vbcast.lane.b32.xlu0 %v26147_v39, 352 }
 0x7d7   : > { %vm16735_vm6 = vmpackc.low %vm6899_vm12, %vm6898_vm4  ;;  %v11771_v61 = vadd.f32 %v27677_v49, %v9641_v14 }
 0x7d8   : > { %v19189_v43 = vpack.c.bf16 %v11779_v5, %v11776_v2  ;;  %20877 = vmatmul.mubr.msk.bf16.gmra.mrb[180].mxu1 %vm16735_vm6, %v22390_v52  ;;  %v2089_v38 = vpop.permute.xlu1 %2088 }
 0x7d9   : > { %v19184_v33 = vpack.c.bf16 %v11771_v61, %v11768_v27  ;;  %vm2949_vm11 = vcmp.eq.s32.totalorder %v22942_v37, %v2089_v38  ;;  %v2085_v48 = vpop.permute.xlu0 %2084  ;;  %v27691_v27 = vld [vmem:[#allocation319_spill] sm:$0xff]  ;;  %v27692_v61 = vld [vmem:[#allocation320_spill] sm:$0xff] }
 0x7da   : > { %19837 = vst [vmem:[%s24974_s8 + $0x4e8] sm:$0xff] %v19189_v43   ;;  %vm2948_vm13 = vcmp.eq.s32.totalorder %v22942_v37, %v2085_v48  ;;  %6155 = vbcast.lane.b32.xlu1 %v26160_v13, 360  ;;  %6151 = vbcast.lane.b32.xlu0 %v26160_v13, 352  ;;  %v27693_v48 = vld [vmem:[#allocation321_spill] sm:$0xff] }
 0x7db   : > { %19836 = vst [vmem:[%s24974_s8 + $0x4e0] sm:$0xff] %v19184_v33   ;;  %vm17257_vm14 = vmpackc.low %vm2949_vm11, %vm2948_vm13  ;;  %v20798_v16 = vpop.f32.mrb[208].mxu1 }
 0x7dc   : > { %v11792_v20 = vadd.f32 %v27678_v53, %v20798_v16  ;;  %v9654_v8 = vpop.f32.mrb[209].mxu1  ;;  %21408 = vmatprep.mubr.msk.bf16.mxu0 %vm17257_vm14, %v22390_v52  ;;  %v6041_v11 = vpop.permute.xlu1 %6040 }
 0x7dd   : > { %v11784_v23 = vadd.f32 %v27679_v1, %v9654_v8  ;;  %vm6901_vm15 = vcmp.eq.s32.totalorder %v22942_v37, %v6041_v11  ;;  %v20799_v7 = vpop.f32.mrb[210].mxu1  ;;  %v6037_v60 = vpop.permute.xlu0 %6036  ;;  %v27694_v8 = vld [vmem:[#allocation322_spill] sm:$0xff] }
 0x7de   : > { %v11795_v19 = vadd.f32 %v27680_v25, %v20799_v7  ;;  %vm6900_vm1 = vcmp.eq.s32.totalorder %v22942_v37, %v6037_v60  ;;  %v9657_v36 = vpop.f32.mrb[211].mxu1  ;;  %2211 = vbcast.lane.b32.xlu1 %v26147_v39, 376  ;;  %2207 = vbcast.lane.b32.xlu0 %v26147_v39, 368 }
 0x7df   : > { %vm16737_vm0 = vmpackc.low %vm6901_vm15, %vm6900_vm1  ;;  %v11787_v29 = vadd.f32 %v27681_v58, %v9657_v36 }
 0x7e0   : > { %v19199_v10 = vpack.c.bf16 %v11795_v19, %v11792_v20  ;;  %20880 = vmatprep.mubr.msk.bf16.mxu1 %vm16737_vm0, %v22390_v52  ;;  %v2097_v62 = vpop.permute.xlu1 %2096 }
 0x7e1   : > { %v19194_v28 = vpack.c.bf16 %v11787_v29, %v11784_v23  ;;  %vm2951_vm2 = vcmp.eq.s32.totalorder %v22942_v37, %v2097_v62  ;;  %v2093_v31 = vpop.permute.xlu0 %2092  ;;  %v27695_v23 = vld [vmem:[#allocation323_spill] sm:$0xff]  ;;  %v27696_v29 = vld [vmem:[#allocation324_spill] sm:$0xff] }
 0x7e2   : > { %19839 = vst [vmem:[%s24974_s8 + $0x4f8] sm:$0xff] %v19199_v10   ;;  %vm2950_vm3 = vcmp.eq.s32.totalorder %v22942_v37, %v2093_v31  ;;  %6163 = vbcast.lane.b32.xlu1 %v26160_v13, 376  ;;  %6159 = vbcast.lane.b32.xlu0 %v26160_v13, 368  ;;  %v27685_v13 = vld [vmem:[#allocation18_spill] sm:$0xff]  ;;  %v27697_v31 = vld [vmem:[#allocation325_spill] sm:$0xff] }
 0x7e3   : > { %19838 = vst [vmem:[%s24974_s8 + $0x4f0] sm:$0xff] %v19194_v28   ;;  %vm17259_vm5 = vmpackc.low %vm2951_vm2, %vm2950_vm3  ;;  %v20802_v22 = vpop.f32.mrb[212].mxu1 }
 0x7e4   : > { %v11808_v39 = vadd.f32 %v27682_v59, %v20802_v22  ;;  %v9670_v30 = vpop.f32.mrb[213].mxu1  ;;  %21409 = vmatmul.mubr.msk.bf16.gmra.mrb[144].mxu0 %vm17259_vm5, %v22390_v52  ;;  %v6049_v3 = vpop.permute.xlu1 %6048 }
 0x7e5   : > { %v11800_v12 = vadd.f32 %v27683_v42, %v9670_v30  ;;  %vm6903_vm8 = vcmp.eq.s32.totalorder %v22942_v37, %v6049_v3  ;;  %v20803_v41 = vpop.f32.mrb[214].mxu1  ;;  %v6045_v57 = vpop.permute.xlu0 %6044  ;;  %v27698_v30 = vld [vmem:[#allocation326_spill] sm:$0xff] }
 0x7e6   : > { %v11811_v44 = vadd.f32 %v27684_v54, %v20803_v41  ;;  %vm6902_vm9 = vcmp.eq.s32.totalorder %v22942_v37, %v6045_v57  ;;  %v9673_v0 = vpop.f32.mrb[215].mxu1  ;;  %2222 = vbcast.lane.b32.xlu1 %v27685_v13, 264  ;;  %2218 = vbcast.lane.b32.xlu0 %v27685_v13, 256 }
 0x7e7   : > { %vm16739_vm7 = vmpackc.low %vm6903_vm8, %vm6902_vm9  ;;  %v11803_v46 = vadd.f32 %v27686_v24, %v9673_v0 }
 0x7e8   : > { %v19209_v55 = vpack.c.bf16 %v11811_v44, %v11808_v39  ;;  %20881 = vmatmul.mubr.msk.bf16.gmra.mrb[184].mxu1 %vm16739_vm7, %v22390_v52  ;;  %v2105_v45 = vpop.permute.xlu1 %2104 }
 0x7e9   : > { %v19204_v63 = vpack.c.bf16 %v11803_v46, %v11800_v12  ;;  %vm2953_vm10 = vcmp.eq.s32.totalorder %v22942_v37, %v2105_v45  ;;  %v2101_v47 = vpop.permute.xlu0 %2100  ;;  %v27699_v12 = vld [vmem:[#allocation327_spill] sm:$0xff]  ;;  %v27700_v46 = vld [vmem:[#allocation328_spill] sm:$0xff] }
 0x7ea   : > { %19841 = vst [vmem:[%s24974_s8 + $0x508] sm:$0xff] %v19209_v55   ;;  %vm2952_vm12 = vcmp.eq.s32.totalorder %v22942_v37, %v2101_v47  ;;  %6174 = vbcast.lane.b32.xlu1 %v27687_v32, 264  ;;  %6170 = vbcast.lane.b32.xlu0 %v27687_v32, 256  ;;  %v27701_v47 = vld [vmem:[#allocation329_spill] sm:$0xff] }
 0x7eb   : > { %19840 = vst [vmem:[%s24974_s8 + $0x500] sm:$0xff] %v19204_v63   ;;  %vm17261_vm4 = vmpackc.low %vm2953_vm10, %vm2952_vm12  ;;  %v20806_v51 = vpop.f32.mrb[216].mxu1 }
 0x7ec   : > { %v11824_v56 = vadd.f32 %v27688_v18, %v20806_v51  ;;  %v9686_v4 = vpop.f32.mrb[217].mxu1  ;;  %21412 = vmatprep.mubr.msk.bf16.mxu0 %vm17261_vm4, %v22390_v52  ;;  %v6057_v40 = vpop.permute.xlu1 %6056 }
 0x7ed   : > { %v11816_v34 = vadd.f32 %v27689_v26, %v9686_v4  ;;  %vm6905_vm6 = vcmp.eq.s32.totalorder %v22942_v37, %v6057_v40  ;;  %v20807_v17 = vpop.f32.mrb[218].mxu1  ;;  %v6053_v2 = vpop.permute.xlu0 %6052  ;;  %v27702_v4 = vld [vmem:[#allocation330_spill] sm:$0xff] }
 0x7ee   : > { %v11827_v35 = vadd.f32 %v27690_v9, %v20807_v17  ;;  %vm6904_vm11 = vcmp.eq.s32.totalorder %v22942_v37, %v6053_v2  ;;  %v9689_v15 = vpop.f32.mrb[219].mxu1  ;;  %2230 = vbcast.lane.b32.xlu1 %v27685_v13, 280  ;;  %2226 = vbcast.lane.b32.xlu0 %v27685_v13, 272 }
 0x7ef   : > { %vm16741_vm13 = vmpackc.low %vm6905_vm6, %vm6904_vm11  ;;  %v11819_v6 = vadd.f32 %v27691_v27, %v9689_v15 }
 0x7f0   : > { %v19219_v21 = vpack.c.bf16 %v11827_v35, %v11824_v56  ;;  %20884 = vmatprep.mubr.msk.bf16.mxu1 %vm16741_vm13, %v22390_v52  ;;  %v2113_v50 = vpop.permute.xlu1 %2112 }
 0x7f1   : > { %v19214_v5 = vpack.c.bf16 %v11819_v6, %v11816_v34  ;;  %vm2955_vm14 = vcmp.eq.s32.totalorder %v22942_v37, %v2113_v50  ;;  %v2109_v14 = vpop.permute.xlu0 %2108  ;;  %v27703_v34 = vld [vmem:[#allocation331_spill] sm:$0xff]  ;;  %v27704_v6 = vld [vmem:[#allocation332_spill] sm:$0xff] }
 0x7f2   : > { %19843 = vst [vmem:[%s24974_s8 + $0x518] sm:$0xff] %v19219_v21   ;;  %vm2954_vm15 = vcmp.eq.s32.totalorder %v22942_v37, %v2109_v14  ;;  %6182 = vbcast.lane.b32.xlu1 %v27687_v32, 280  ;;  %6178 = vbcast.lane.b32.xlu0 %v27687_v32, 272  ;;  %v27705_v14 = vld [vmem:[#allocation333_spill] sm:$0xff] }
 0x7f3   : > { %19842 = vst [vmem:[%s24974_s8 + $0x510] sm:$0xff] %v19214_v5   ;;  %vm17263_vm1 = vmpackc.low %vm2955_vm14, %vm2954_vm15  ;;  %v20810_v49 = vpop.f32.mrb[220].mxu1 }
 0x7f4   : > { %v11840_v43 = vadd.f32 %v27692_v61, %v20810_v49  ;;  %v9702_v38 = vpop.f32.mrb[221].mxu1  ;;  %21413 = vmatmul.mubr.msk.bf16.gmra.mrb[148].mxu0 %vm17263_vm1, %v22390_v52  ;;  %v6065_v33 = vpop.permute.xlu1 %6064 }
 0x7f5   : > { %v11832_v16 = vadd.f32 %v27693_v48, %v9702_v38  ;;  %vm6907_vm0 = vcmp.eq.s32.totalorder %v22942_v37, %v6065_v33  ;;  %v20811_v53 = vpop.f32.mrb[222].mxu1  ;;  %v6061_v20 = vpop.permute.xlu0 %6060  ;;  %v27706_v38 = vld [vmem:[#allocation334_spill] sm:$0xff] }
 0x7f6   : > { %v11843_v11 = vadd.f32 %v27694_v8, %v20811_v53  ;;  %vm6906_vm2 = vcmp.eq.s32.totalorder %v22942_v37, %v6061_v20  ;;  %v9705_v1 = vpop.f32.mrb[223].mxu1  ;;  %2238 = vbcast.lane.b32.xlu1 %v27685_v13, 296  ;;  %2234 = vbcast.lane.b32.xlu0 %v27685_v13, 288 }
 0x7f7   : > { %vm16743_vm3 = vmpackc.low %vm6907_vm0, %vm6906_vm2  ;;  %v11835_v7 = vadd.f32 %v27695_v23, %v9705_v1 }
 0x7f8   : > { %v19229_v60 = vpack.c.bf16 %v11843_v11, %v11840_v43  ;;  %20885 = vmatmul.mubr.msk.bf16.gmra.mrb[188].mxu1 %vm16743_vm3, %v22390_v52  ;;  %v2121_v25 = vpop.permute.xlu1 %2120 }
 0x7f9   : > { %v19224_v19 = vpack.c.bf16 %v11835_v7, %v11832_v16  ;;  %vm2957_vm5 = vcmp.eq.s32.totalorder %v22942_v37, %v2121_v25  ;;  %v2117_v36 = vpop.permute.xlu0 %2116  ;;  %v27707_v16 = vld [vmem:[#allocation335_spill] sm:$0xff]  ;;  %v27708_v7 = vld [vmem:[#allocation336_spill] sm:$0xff] }
 0x7fa   : > { %19845 = vst [vmem:[%s24974_s8 + $0x528] sm:$0xff] %v19229_v60   ;;  %vm2956_vm8 = vcmp.eq.s32.totalorder %v22942_v37, %v2117_v36  ;;  %6190 = vbcast.lane.b32.xlu1 %v27687_v32, 296  ;;  %6186 = vbcast.lane.b32.xlu0 %v27687_v32, 288  ;;  %v27709_v36 = vld [vmem:[#allocation337_spill] sm:$0xff] }
 0x7fb   : > { %19844 = vst [vmem:[%s24974_s8 + $0x520] sm:$0xff] %v19224_v19   ;;  %vm17265_vm9 = vmpackc.low %vm2957_vm5, %vm2956_vm8  ;;  %v20814_v58 = vpop.f32.mrb[224].mxu1 }
 0x7fc   : > { %v11856_v10 = vadd.f32 %v27696_v29, %v20814_v58  ;;  %v9718_v62 = vpop.f32.mrb[225].mxu1  ;;  %21416 = vmatprep.mubr.msk.bf16.mxu0 %vm17265_vm9, %v22390_v52  ;;  %v6073_v28 = vpop.permute.xlu1 %6072 }
 0x7fd   : > { %v11848_v22 = vadd.f32 %v27697_v31, %v9718_v62  ;;  %vm6909_vm7 = vcmp.eq.s32.totalorder %v22942_v37, %v6073_v28  ;;  %v20815_v59 = vpop.f32.mrb[226].mxu1  ;;  %v6069_v39 = vpop.permute.xlu0 %6068  ;;  %v27710_v62 = vld [vmem:[#allocation338_spill] sm:$0xff] }
 0x7fe   : > { %v11859_v3 = vadd.f32 %v27698_v30, %v20815_v59  ;;  %vm6908_vm10 = vcmp.eq.s32.totalorder %v22942_v37, %v6069_v39  ;;  %v9721_v42 = vpop.f32.mrb[227].mxu1  ;;  %2246 = vbcast.lane.b32.xlu1 %v27685_v13, 312  ;;  %2242 = vbcast.lane.b32.xlu0 %v27685_v13, 304 }
 0x7ff   : > { %vm16745_vm12 = vmpackc.low %vm6909_vm7, %vm6908_vm10  ;;  %v11851_v41 = vadd.f32 %v27699_v12, %v9721_v42 }
 0x800   : > { %v19239_v57 = vpack.c.bf16 %v11859_v3, %v11856_v10  ;;  %20888 = vmatprep.mubr.msk.bf16.mxu1 %vm16745_vm12, %v22390_v52  ;;  %v2129_v54 = vpop.permute.xlu1 %2128 }
 0x801   : > { %v19234_v44 = vpack.c.bf16 %v11851_v41, %v11848_v22  ;;  %vm2959_vm4 = vcmp.eq.s32.totalorder %v22942_v37, %v2129_v54  ;;  %v2125_v0 = vpop.permute.xlu0 %2124  ;;  %v27711_v22 = vld [vmem:[#allocation339_spill] sm:$0xff]  ;;  %v27712_v41 = vld [vmem:[#allocation340_spill] sm:$0xff] }
 0x802   : > { %19847 = vst [vmem:[%s24974_s8 + $0x538] sm:$0xff] %v19239_v57   ;;  %vm2958_vm6 = vcmp.eq.s32.totalorder %v22942_v37, %v2125_v0  ;;  %6198 = vbcast.lane.b32.xlu1 %v27687_v32, 312  ;;  %6194 = vbcast.lane.b32.xlu0 %v27687_v32, 304  ;;  %v27713_v0 = vld [vmem:[#allocation341_spill] sm:$0xff] }
 0x803   : > { %19846 = vst [vmem:[%s24974_s8 + $0x530] sm:$0xff] %v19234_v44   ;;  %vm17267_vm11 = vmpackc.low %vm2959_vm4, %vm2958_vm6  ;;  %v20818_v24 = vpop.f32.mrb[228].mxu1 }
 0x804   : > { %v11872_v55 = vadd.f32 %v27700_v46, %v20818_v24  ;;  %v9734_v45 = vpop.f32.mrb[229].mxu1  ;;  %21417 = vmatmul.mubr.msk.bf16.gmra.mrb[152].mxu0 %vm17267_vm11, %v22390_v52  ;;  %v6081_v63 = vpop.permute.xlu1 %6080 }
 0x805   : > { %v11864_v51 = vadd.f32 %v27701_v47, %v9734_v45  ;;  %vm6911_vm13 = vcmp.eq.s32.totalorder %v22942_v37, %v6081_v63  ;;  %v20819_v18 = vpop.f32.mrb[230].mxu1  ;;  %v6077_v56 = vpop.permute.xlu0 %6076  ;;  %v27714_v45 = vld [vmem:[#allocation342_spill] sm:$0xff] }
 0x806   : > { %v11875_v40 = vadd.f32 %v27702_v4, %v20819_v18  ;;  %vm6910_vm14 = vcmp.eq.s32.totalorder %v22942_v37, %v6077_v56  ;;  %v9737_v26 = vpop.f32.mrb[231].mxu1  ;;  %2254 = vbcast.lane.b32.xlu1 %v27685_v13, 328  ;;  %2250 = vbcast.lane.b32.xlu0 %v27685_v13, 320 }
 0x807   : > { %vm16747_vm15 = vmpackc.low %vm6911_vm13, %vm6910_vm14  ;;  %v11867_v17 = vadd.f32 %v27703_v34, %v9737_v26 }
 0x808   : > { %v19249_v2 = vpack.c.bf16 %v11875_v40, %v11872_v55  ;;  %20889 = vmatmul.mubr.msk.bf16.gmra.mrb[192].mxu1 %vm16747_vm15, %v22390_v52  ;;  %v2137_v9 = vpop.permute.xlu1 %2136 }
 0x809   : > { %v19244_v35 = vpack.c.bf16 %v11867_v17, %v11864_v51  ;;  %vm2961_vm1 = vcmp.eq.s32.totalorder %v22942_v37, %v2137_v9  ;;  %v2133_v15 = vpop.permute.xlu0 %2132  ;;  %v27715_v51 = vld [vmem:[#allocation343_spill] sm:$0xff]  ;;  %v27716_v17 = vld [vmem:[#allocation344_spill] sm:$0xff] }
 0x80a   : > { %19849 = vst [vmem:[%s24974_s8 + $0x548] sm:$0xff] %v19249_v2   ;;  %vm2960_vm0 = vcmp.eq.s32.totalorder %v22942_v37, %v2133_v15  ;;  %6206 = vbcast.lane.b32.xlu1 %v27687_v32, 328  ;;  %6202 = vbcast.lane.b32.xlu0 %v27687_v32, 320 }
 0x80b   : > { %19848 = vst [vmem:[%s24974_s8 + $0x540] sm:$0xff] %v19244_v35   ;;  %vm17269_vm2 = vmpackc.low %vm2961_vm1, %vm2960_vm0  ;;  %v20822_v27 = vpop.f32.mrb[232].mxu1  ;;  %v27717_v35 = vld [vmem:[#allocation345_spill] sm:$0xff] }
 0x80c   : > { %v11888_v21 = vadd.f32 %v27704_v6, %v20822_v27  ;;  %v9750_v50 = vpop.f32.mrb[233].mxu1  ;;  %21420 = vmatprep.mubr.msk.bf16.mxu0 %vm17269_vm2, %v22390_v52  ;;  %v6089_v5 = vpop.permute.xlu1 %6088 }
 0x80d   : > { %v11880_v49 = vadd.f32 %v27705_v14, %v9750_v50  ;;  %vm6913_vm3 = vcmp.eq.s32.totalorder %v22942_v37, %v6089_v5  ;;  %v20823_v61 = vpop.f32.mrb[234].mxu1  ;;  %v6085_v43 = vpop.permute.xlu0 %6084  ;;  %v27720_v14 = vld [vmem:[#allocation347_spill] sm:$0xff] }
 0x80e   : > { %v11891_v33 = vadd.f32 %v27706_v38, %v20823_v61  ;;  %vm6912_vm5 = vcmp.eq.s32.totalorder %v22942_v37, %v6085_v43  ;;  %v9753_v48 = vpop.f32.mrb[235].mxu1  ;;  %2262 = vbcast.lane.b32.xlu1 %v27685_v13, 344  ;;  %2258 = vbcast.lane.b32.xlu0 %v27685_v13, 336 }
 0x80f   : > { %vm16749_vm8 = vmpackc.low %vm6913_vm3, %vm6912_vm5  ;;  %v11883_v53 = vadd.f32 %v27707_v16, %v9753_v48  ;;  %v27721_v48 = vld [vmem:[#allocation35_spill] sm:$0xff] }
 0x810   : > { %v19259_v20 = vpack.c.bf16 %v11891_v33, %v11888_v21  ;;  %20892 = vmatprep.mubr.msk.bf16.mxu1 %vm16749_vm8, %v22390_v52  ;;  %v2145_v8 = vpop.permute.xlu1 %2144  ;;  %v27718_v21 = vld [vmem:[#allocation346_spill] sm:$0xff] }
 0x811   : > { %v19254_v11 = vpack.c.bf16 %v11883_v53, %v11880_v49  ;;  %vm2963_vm9 = vcmp.eq.s32.totalorder %v22942_v37, %v2145_v8  ;;  %v2141_v1 = vpop.permute.xlu0 %2140  ;;  %v27722_v53 = vld [vmem:[#allocation348_spill] sm:$0xff] }
 0x812   : > { %19851 = vst [vmem:[%s24974_s8 + $0x558] sm:$0xff] %v19259_v20   ;;  %vm2962_vm7 = vcmp.eq.s32.totalorder %v22942_v37, %v2141_v1  ;;  %6214 = vbcast.lane.b32.xlu1 %v27687_v32, 344  ;;  %6210 = vbcast.lane.b32.xlu0 %v27687_v32, 336  ;;  %v27723_v1 = vld [vmem:[#allocation349_spill] sm:$0xff] }
 0x813   : > { %19850 = vst [vmem:[%s24974_s8 + $0x550] sm:$0xff] %v19254_v11   ;;  %vm17271_vm10 = vmpackc.low %vm2963_vm9, %vm2962_vm7  ;;  %v20826_v23 = vpop.f32.mrb[236].mxu1 }
 0x814   : > { %v11904_v60 = vadd.f32 %v27708_v7, %v20826_v23  ;;  %v9766_v25 = vpop.f32.mrb[237].mxu1  ;;  %21421 = vmatmul.mubr.msk.bf16.gmra.mrb[156].mxu0 %vm17271_vm10, %v22390_v52  ;;  %v6097_v19 = vpop.permute.xlu1 %6096 }
 0x815   : > { %v11896_v58 = vadd.f32 %v27709_v36, %v9766_v25  ;;  %vm6915_vm12 = vcmp.eq.s32.totalorder %v22942_v37, %v6097_v19  ;;  %v20827_v29 = vpop.f32.mrb[238].mxu1  ;;  %v6093_v10 = vpop.permute.xlu0 %6092  ;;  %v27724_v25 = vld [vmem:[#allocation350_spill] sm:$0xff] }
 0x816   : > { %v11907_v28 = vadd.f32 %v27710_v62, %v20827_v29  ;;  %vm6914_vm4 = vcmp.eq.s32.totalorder %v22942_v37, %v6093_v10  ;;  %v9769_v31 = vpop.f32.mrb[239].mxu1  ;;  %2270 = vbcast.lane.b32.xlu1 %v27685_v13, 360  ;;  %2266 = vbcast.lane.b32.xlu0 %v27685_v13, 352 }
 0x817   : > { %vm16751_vm6 = vmpackc.low %vm6915_vm12, %vm6914_vm4  ;;  %v11899_v59 = vadd.f32 %v27711_v22, %v9769_v31 }
 0x818   : > { %v19269_v39 = vpack.c.bf16 %v11907_v28, %v11904_v60  ;;  %20893 = vmatmul.mubr.msk.bf16.gmra.mrb[196].mxu1 %vm16751_vm6, %v22390_v52  ;;  %v2156_v30 = vpop.permute.xlu1 %2155 }
 0x819   : > { %v19264_v3 = vpack.c.bf16 %v11899_v59, %v11896_v58  ;;  %vm2965_vm11 = vcmp.eq.s32.totalorder %v22942_v37, %v2156_v30  ;;  %v2152_v42 = vpop.permute.xlu0 %2151  ;;  %v27725_v58 = vld [vmem:[#allocation351_spill] sm:$0xff]  ;;  %v27726_v59 = vld [vmem:[#allocation352_spill] sm:$0xff] }
 0x81a   : > { %19853 = vst [vmem:[%s24974_s8 + $0x568] sm:$0xff] %v19269_v39   ;;  %vm2964_vm13 = vcmp.eq.s32.totalorder %v22942_v37, %v2152_v42  ;;  %6222 = vbcast.lane.b32.xlu1 %v27687_v32, 360  ;;  %6218 = vbcast.lane.b32.xlu0 %v27687_v32, 352  ;;  %v27727_v42 = vld [vmem:[#allocation353_spill] sm:$0xff] }
 0x81b   : > { %19852 = vst [vmem:[%s24974_s8 + $0x560] sm:$0xff] %v19264_v3   ;;  %vm17273_vm14 = vmpackc.low %vm2965_vm11, %vm2964_vm13  ;;  %v20830_v12 = vpop.f32.mrb[240].mxu1 }
 0x81c   : > { %v11920_v57 = vadd.f32 %v27712_v41, %v20830_v12  ;;  %v9782_v54 = vpop.f32.mrb[241].mxu1  ;;  %21424 = vmatprep.mubr.msk.bf16.mxu0 %vm17273_vm14, %v22390_v52  ;;  %v6108_v44 = vpop.permute.xlu1 %6107 }
 0x81d   : > { %v11912_v24 = vadd.f32 %v27713_v0, %v9782_v54  ;;  %vm6917_vm15 = vcmp.eq.s32.totalorder %v22942_v37, %v6108_v44  ;;  %v20831_v46 = vpop.f32.mrb[242].mxu1  ;;  %v6104_v55 = vpop.permute.xlu0 %6103  ;;  %v27728_v54 = vld [vmem:[#allocation354_spill] sm:$0xff] }
 0x81e   : > { %v11923_v63 = vadd.f32 %v27714_v45, %v20831_v46  ;;  %vm6916_vm1 = vcmp.eq.s32.totalorder %v22942_v37, %v6104_v55  ;;  %v9785_v47 = vpop.f32.mrb[243].mxu1  ;;  %2278 = vbcast.lane.b32.xlu1 %v27685_v13, 376  ;;  %2274 = vbcast.lane.b32.xlu0 %v27685_v13, 368 }
 0x81f   : > { %vm16753_vm0 = vmpackc.low %vm6917_vm15, %vm6916_vm1  ;;  %v11915_v18 = vadd.f32 %v27715_v51, %v9785_v47 }
 0x820   : > { %v19279_v56 = vpack.c.bf16 %v11923_v63, %v11920_v57  ;;  %20896 = vmatprep.mubr.msk.bf16.mxu1 %vm16753_vm0, %v22390_v52  ;;  %v2164_v4 = vpop.permute.xlu1 %2163 }
 0x821   : > { %v19274_v40 = vpack.c.bf16 %v11915_v18, %v11912_v24  ;;  %vm2967_vm2 = vcmp.eq.s32.totalorder %v22942_v37, %v2164_v4  ;;  %v2160_v26 = vpop.permute.xlu0 %2159  ;;  %v27729_v24 = vld [vmem:[#allocation355_spill] sm:$0xff]  ;;  %v27730_v18 = vld [vmem:[#allocation356_spill] sm:$0xff] }
 0x822   : > { %19855 = vst [vmem:[%s24974_s8 + $0x578] sm:$0xff] %v19279_v56   ;;  %vm2966_vm3 = vcmp.eq.s32.totalorder %v22942_v37, %v2160_v26  ;;  %6230 = vbcast.lane.b32.xlu1 %v27687_v32, 376  ;;  %6226 = vbcast.lane.b32.xlu0 %v27687_v32, 368  ;;  %v27719_v32 = vld [vmem:[#allocation19_spill] sm:$0xff]  ;;  %v27731_v26 = vld [vmem:[#allocation357_spill] sm:$0xff] }
 0x823   : > { %19854 = vst [vmem:[%s24974_s8 + $0x570] sm:$0xff] %v19274_v40   ;;  %vm17275_vm5 = vmpackc.low %vm2967_vm2, %vm2966_vm3  ;;  %v20834_v34 = vpop.f32.mrb[244].mxu1 }
 0x824   : > { %v11936_v13 = vadd.f32 %v27716_v17, %v20834_v34  ;;  %v9798_v2 = vpop.f32.mrb[245].mxu1  ;;  %21425 = vmatmul.mubr.msk.bf16.gmra.mrb[160].mxu0 %vm17275_vm5, %v22390_v52  ;;  %v6116_v9 = vpop.permute.xlu1 %6115 }
 0x825   : > { %v11928_v15 = vadd.f32 %v27717_v35, %v9798_v2  ;;  %vm6919_vm8 = vcmp.eq.s32.totalorder %v22942_v37, %v6116_v9  ;;  %v20835_v27 = vpop.f32.mrb[246].mxu1  ;;  %v6112_v6 = vpop.permute.xlu0 %6111  ;;  %v27732_v2 = vld [vmem:[#allocation358_spill] sm:$0xff] }
 0x826   : > { %v11939_v50 = vadd.f32 %v27718_v21, %v20835_v27  ;;  %vm6918_vm9 = vcmp.eq.s32.totalorder %v22942_v37, %v6112_v6  ;;  %v9801_v5 = vpop.f32.mrb[247].mxu1  ;;  %2289 = vbcast.lane.b32.xlu1 %v27719_v32, 264  ;;  %2285 = vbcast.lane.b32.xlu0 %v27719_v32, 256 }
 0x827   : > { %vm16755_vm7 = vmpackc.low %vm6919_vm8, %vm6918_vm9  ;;  %v11931_v49 = vadd.f32 %v27720_v14, %v9801_v5 }
 0x828   : > { %v19289_v61 = vpack.c.bf16 %v11939_v50, %v11936_v13  ;;  %20897 = vmatmul.mubr.msk.bf16.gmra.mrb[200].mxu1 %vm16755_vm7, %v22390_v52  ;;  %v2172_v43 = vpop.permute.xlu1 %2171 }
 0x829   : > { %v19284_v38 = vpack.c.bf16 %v11931_v49, %v11928_v15  ;;  %vm2969_vm10 = vcmp.eq.s32.totalorder %v22942_v37, %v2172_v43  ;;  %v2168_v33 = vpop.permute.xlu0 %2167  ;;  %v27733_v15 = vld [vmem:[#allocation359_spill] sm:$0xff]  ;;  %v27734_v49 = vld [vmem:[#allocation360_spill] sm:$0xff] }
 0x82a   : > { %19857 = vst [vmem:[%s24974_s8 + $0x588] sm:$0xff] %v19289_v61   ;;  %vm2968_vm12 = vcmp.eq.s32.totalorder %v22942_v37, %v2168_v33  ;;  %6241 = vbcast.lane.b32.xlu1 %v27721_v48, 264  ;;  %6237 = vbcast.lane.b32.xlu0 %v27721_v48, 256  ;;  %v27735_v33 = vld [vmem:[#allocation361_spill] sm:$0xff] }
 0x82b   : > { %19856 = vst [vmem:[%s24974_s8 + $0x580] sm:$0xff] %v19284_v38   ;;  %vm17277_vm4 = vmpackc.low %vm2969_vm10, %vm2968_vm12  ;;  %v20838_v16 = vpop.f32.mrb[248].mxu1 }
 0x82c   : > { %v11952_v20 = vadd.f32 %v27722_v53, %v20838_v16  ;;  %v9814_v8 = vpop.f32.mrb[249].mxu1  ;;  %21428 = vmatprep.mubr.msk.bf16.mxu0 %vm17277_vm4, %v22390_v52  ;;  %v6124_v11 = vpop.permute.xlu1 %6123 }
 0x82d   : > { %v11944_v23 = vadd.f32 %v27723_v1, %v9814_v8  ;;  %vm6921_vm6 = vcmp.eq.s32.totalorder %v22942_v37, %v6124_v11  ;;  %v20839_v7 = vpop.f32.mrb[250].mxu1  ;;  %v6120_v60 = vpop.permute.xlu0 %6119  ;;  %v27736_v8 = vld [vmem:[#allocation362_spill] sm:$0xff] }
 0x82e   : > { %v11955_v19 = vadd.f32 %v27724_v25, %v20839_v7  ;;  %vm6920_vm11 = vcmp.eq.s32.totalorder %v22942_v37, %v6120_v60  ;;  %v9817_v36 = vpop.f32.mrb[251].mxu1  ;;  %2297 = vbcast.lane.b32.xlu1 %v27719_v32, 280  ;;  %2293 = vbcast.lane.b32.xlu0 %v27719_v32, 272 }
 0x82f   : > { %vm16757_vm13 = vmpackc.low %vm6921_vm6, %vm6920_vm11  ;;  %v11947_v29 = vadd.f32 %v27725_v58, %v9817_v36 }
 0x830   : > { %v19299_v10 = vpack.c.bf16 %v11955_v19, %v11952_v20  ;;  %20900 = vmatprep.mubr.msk.bf16.mxu1 %vm16757_vm13, %v22390_v52  ;;  %v2180_v62 = vpop.permute.xlu1 %2179 }
 0x831   : > { %v19294_v28 = vpack.c.bf16 %v11947_v29, %v11944_v23  ;;  %vm2971_vm14 = vcmp.eq.s32.totalorder %v22942_v37, %v2180_v62  ;;  %v2176_v31 = vpop.permute.xlu0 %2175  ;;  %v27737_v23 = vld [vmem:[#allocation363_spill] sm:$0xff]  ;;  %v27738_v29 = vld [vmem:[#allocation364_spill] sm:$0xff] }
 0x832   : > { %19859 = vst [vmem:[%s24974_s8 + $0x598] sm:$0xff] %v19299_v10   ;;  %vm2970_vm15 = vcmp.eq.s32.totalorder %v22942_v37, %v2176_v31  ;;  %6249 = vbcast.lane.b32.xlu1 %v27721_v48, 280  ;;  %6245 = vbcast.lane.b32.xlu0 %v27721_v48, 272  ;;  %v27739_v31 = vld [vmem:[#allocation365_spill] sm:$0xff] }
 0x833   : > { %19858 = vst [vmem:[%s24974_s8 + $0x590] sm:$0xff] %v19294_v28   ;;  %vm17279_vm1 = vmpackc.low %vm2971_vm14, %vm2970_vm15  ;;  %v20842_v22 = vpop.f32.mrb[252].mxu1 }
 0x834   : > { %v11968_v39 = vadd.f32 %v27726_v59, %v20842_v22  ;;  %v9830_v30 = vpop.f32.mrb[253].mxu1  ;;  %21429 = vmatmul.mubr.msk.bf16.gmra.mrb[164].mxu0 %vm17279_vm1, %v22390_v52  ;;  %v6132_v3 = vpop.permute.xlu1 %6131 }
 0x835   : > { %v11960_v12 = vadd.f32 %v27727_v42, %v9830_v30  ;;  %vm6923_vm0 = vcmp.eq.s32.totalorder %v22942_v37, %v6132_v3  ;;  %v20843_v41 = vpop.f32.mrb[254].mxu1  ;;  %v6128_v57 = vpop.permute.xlu0 %6127  ;;  %v27740_v30 = vld [vmem:[#allocation366_spill] sm:$0xff] }
 0x836   : > { %v11971_v44 = vadd.f32 %v27728_v54, %v20843_v41  ;;  %vm6922_vm2 = vcmp.eq.s32.totalorder %v22942_v37, %v6128_v57  ;;  %v9833_v0 = vpop.f32.mrb[255].mxu1  ;;  %2305 = vbcast.lane.b32.xlu1 %v27719_v32, 296  ;;  %2301 = vbcast.lane.b32.xlu0 %v27719_v32, 288 }
 0x837   : > { %vm16759_vm3 = vmpackc.low %vm6923_vm0, %vm6922_vm2  ;;  %v11963_v46 = vadd.f32 %v27729_v24, %v9833_v0 }
 0x838   : > { %v19309_v55 = vpack.c.bf16 %v11971_v44, %v11968_v39  ;;  %20901 = vmatmul.mubr.msk.bf16.gmra.mrb[204].mxu1 %vm16759_vm3, %v22390_v52  ;;  %v2188_v45 = vpop.permute.xlu1 %2187 }
 0x839   : > { %v19304_v63 = vpack.c.bf16 %v11963_v46, %v11960_v12  ;;  %vm2973_vm5 = vcmp.eq.s32.totalorder %v22942_v37, %v2188_v45  ;;  %v2184_v47 = vpop.permute.xlu0 %2183  ;;  %v27741_v12 = vld [vmem:[#allocation367_spill] sm:$0xff] }
 0x83a   : > { %19861 = vst [vmem:[%s24974_s8 + $0x5a8] sm:$0xff] %v19309_v55   ;;  %vm2972_vm8 = vcmp.eq.s32.totalorder %v22942_v37, %v2184_v47  ;;  %6257 = vbcast.lane.b32.xlu1 %v27721_v48, 296  ;;  %6253 = vbcast.lane.b32.xlu0 %v27721_v48, 288 }
 0x83b   : > { %19860 = vst [vmem:[%s24974_s8 + $0x5a0] sm:$0xff] %v19304_v63   ;;  %vm17281_vm9 = vmpackc.low %vm2973_vm5, %vm2972_vm8  ;;  %v20846_v51 = vpop.f32.mrb[148].mxu1 }
 0x83c   : > { %v11984_v56 = vadd.f32 %v27730_v18, %v20846_v51  ;;  %v9846_v4 = vpop.f32.mrb[149].mxu1  ;;  %21432 = vmatprep.mubr.msk.bf16.mxu0 %vm17281_vm9, %v22390_v52  ;;  %v6140_v40 = vpop.permute.xlu1 %6139 }
 0x83d   : > { %v11976_v34 = vadd.f32 %v27731_v26, %v9846_v4  ;;  %vm6925_vm7 = vcmp.eq.s32.totalorder %v22942_v37, %v6140_v40  ;;  %v20847_v17 = vpop.f32.mrb[150].mxu1  ;;  %v6136_v13 = vpop.permute.xlu0 %6135 }
 0x83e   : > { %v11987_v9 = vadd.f32 %v27732_v2, %v20847_v17  ;;  %vm6924_vm10 = vcmp.eq.s32.totalorder %v22942_v37, %v6136_v13  ;;  %v9849_v35 = vpop.f32.mrb[151].mxu1  ;;  %2313 = vbcast.lane.b32.xlu1 %v27719_v32, 312  ;;  %2309 = vbcast.lane.b32.xlu0 %v27719_v32, 304 }
 0x83f   : > { %vm16761_vm12 = vmpackc.low %vm6925_vm7, %vm6924_vm10  ;;  %v11979_v27 = vadd.f32 %v27733_v15, %v9849_v35 }
 0x840   : > { %v19319_v6 = vpack.c.bf16 %v11987_v9, %v11984_v56  ;;  %20904 = vmatprep.mubr.msk.bf16.mxu1 %vm16761_vm12, %v22390_v52  ;;  %v2196_v21 = vpop.permute.xlu1 %2195 }
 0x841   : > { %v19314_v50 = vpack.c.bf16 %v11979_v27, %v11976_v34  ;;  %vm2975_vm4 = vcmp.eq.s32.totalorder %v22942_v37, %v2196_v21  ;;  %v2192_v5 = vpop.permute.xlu0 %2191 }
 0x842   : > { %19863 = vst [vmem:[%s24974_s8 + $0x5b8] sm:$0xff] %v19319_v6   ;;  %vm2974_vm6 = vcmp.eq.s32.totalorder %v22942_v37, %v2192_v5  ;;  %6265 = vbcast.lane.b32.xlu1 %v27721_v48, 312  ;;  %6261 = vbcast.lane.b32.xlu0 %v27721_v48, 304  ;;  %v27742_v5 = vld [vmem:[#allocation20_spill] sm:$0xff] }
 0x843   : > { %19862 = vst [vmem:[%s24974_s8 + $0x5b0] sm:$0xff] %v19314_v50   ;;  %vm17283_vm11 = vmpackc.low %vm2975_vm4, %vm2974_vm6  ;;  %v20850_v14 = vpop.f32.mrb[152].mxu1 }
 0x844   : > { %v12000_v61 = vadd.f32 %v27734_v49, %v20850_v14  ;;  %v9862_v43 = vpop.f32.mrb[153].mxu1  ;;  %21433 = vmatmul.mubr.msk.bf16.gmra.mrb[168].mxu0 %vm17283_vm11, %v22390_v52  ;;  %v6148_v38 = vpop.permute.xlu1 %6147 }
 0x845   : > { %v11992_v16 = vadd.f32 %v27735_v33, %v9862_v43  ;;  %vm6927_vm13 = vcmp.eq.s32.totalorder %v22942_v37, %v6148_v38  ;;  %v20851_v53 = vpop.f32.mrb[154].mxu1  ;;  %v6144_v20 = vpop.permute.xlu0 %6143  ;;  %v27743_v33 = vld [vmem:[#allocation36_spill] sm:$0xff] }
 0x846   : > { %v12003_v11 = vadd.f32 %v27736_v8, %v20851_v53  ;;  %vm6926_vm14 = vcmp.eq.s32.totalorder %v22942_v37, %v6144_v20  ;;  %v9865_v1 = vpop.f32.mrb[155].mxu1  ;;  %2321 = vbcast.lane.b32.xlu1 %v27719_v32, 328  ;;  %2317 = vbcast.lane.b32.xlu0 %v27719_v32, 320 }
 0x847   : > { %vm16763_vm15 = vmpackc.low %vm6927_vm13, %vm6926_vm14  ;;  %v11995_v7 = vadd.f32 %v27737_v23, %v9865_v1 }
 0x848   : > { %v19329_v60 = vpack.c.bf16 %v12003_v11, %v12000_v61  ;;  %20905 = vmatmul.mubr.msk.bf16.gmra.mrb[208].mxu1 %vm16763_vm15, %v22390_v52  ;;  %v2204_v25 = vpop.permute.xlu1 %2203 }
 0x849   : > { %v19324_v19 = vpack.c.bf16 %v11995_v7, %v11992_v16  ;;  %vm2977_vm1 = vcmp.eq.s32.totalorder %v22942_v37, %v2204_v25  ;;  %v2200_v36 = vpop.permute.xlu0 %2199 }
 0x84a   : > { %19865 = vst [vmem:[%s24974_s8 + $0x5c8] sm:$0xff] %v19329_v60   ;;  %vm2976_vm0 = vcmp.eq.s32.totalorder %v22942_v37, %v2200_v36  ;;  %6273 = vbcast.lane.b32.xlu1 %v27721_v48, 328  ;;  %6269 = vbcast.lane.b32.xlu0 %v27721_v48, 320 }
 0x84b   : > { %19864 = vst [vmem:[%s24974_s8 + $0x5c0] sm:$0xff] %v19324_v19   ;;  %vm17285_vm2 = vmpackc.low %vm2977_vm1, %vm2976_vm0  ;;  %v20854_v58 = vpop.f32.mrb[156].mxu1 }
 0x84c   : > { %v12016_v10 = vadd.f32 %v27738_v29, %v20854_v58  ;;  %v9878_v62 = vpop.f32.mrb[157].mxu1  ;;  %21436 = vmatprep.mubr.msk.bf16.mxu0 %vm17285_vm2, %v22390_v52  ;;  %v6156_v28 = vpop.permute.xlu1 %6155 }
 0x84d   : > { %v12008_v22 = vadd.f32 %v27739_v31, %v9878_v62  ;;  %vm6929_vm3 = vcmp.eq.s32.totalorder %v22942_v37, %v6156_v28  ;;  %v20855_v59 = vpop.f32.mrb[158].mxu1  ;;  %v6152_v39 = vpop.permute.xlu0 %6151 }
 0x84e   : > { %v12019_v3 = vadd.f32 %v27740_v30, %v20855_v59  ;;  %vm6928_vm5 = vcmp.eq.s32.totalorder %v22942_v37, %v6152_v39  ;;  %v9881_v42 = vpop.f32.mrb[159].mxu1  ;;  %2329 = vbcast.lane.b32.xlu1 %v27719_v32, 344  ;;  %2325 = vbcast.lane.b32.xlu0 %v27719_v32, 336 }
 0x84f   : > { %vm16765_vm8 = vmpackc.low %vm6929_vm3, %vm6928_vm5  ;;  %v12011_v41 = vadd.f32 %v27741_v12, %v9881_v42 }
 0x850   : > { %v19339_v57 = vpack.c.bf16 %v12019_v3, %v12016_v10  ;;  %20908 = vmatprep.mubr.msk.bf16.mxu1 %vm16765_vm8, %v22390_v52  ;;  %v2212_v54 = vpop.permute.xlu1 %2211 }
 0x851   : > { %v19334_v44 = vpack.c.bf16 %v12011_v41, %v12008_v22  ;;  %vm2979_vm9 = vcmp.eq.s32.totalorder %v22942_v37, %v2212_v54  ;;  %v2208_v0 = vpop.permute.xlu0 %2207 }
 0x852   : > { %19867 = vst [vmem:[%s24974_s8 + $0x5d8] sm:$0xff] %v19339_v57   ;;  %vm2978_vm7 = vcmp.eq.s32.totalorder %v22942_v37, %v2208_v0  ;;  %6281 = vbcast.lane.b32.xlu1 %v27721_v48, 344  ;;  %6277 = vbcast.lane.b32.xlu0 %v27721_v48, 336 }
 0x853   : > { %19866 = vst [vmem:[%s24974_s8 + $0x5d0] sm:$0xff] %v19334_v44   ;;  %vm17287_vm10 = vmpackc.low %vm2979_vm9, %vm2978_vm7 }
 0x854   : > { %21437 = vmatmul.mubr.msk.bf16.gmra.mrb[172].mxu0 %vm17287_vm10, %v22390_v52  ;;  %v6164_v24 = vpop.permute.xlu1 %6163 }
 0x855   : > { %vm6931_vm12 = vcmp.eq.s32.totalorder %v22942_v37, %v6164_v24  ;;  %v6160_v46 = vpop.permute.xlu0 %6159 }
 0x856   : > { %vm6930_vm4 = vcmp.eq.s32.totalorder %v22942_v37, %v6160_v46  ;;  %2337 = vbcast.lane.b32.xlu1 %v27719_v32, 360  ;;  %2333 = vbcast.lane.b32.xlu0 %v27719_v32, 352 }
 0x857   : > { %vm16767_vm6 = vmpackc.low %vm6931_vm12, %vm6930_vm4  ;;  %v21386_v55 = vpop.f32.mrb[120].mxu0 }
 0x858   : > { %20909 = vmatmul.mubr.msk.bf16.gmra.mrb[212].mxu1 %vm16767_vm6, %v22390_v52  ;;  %v12023_v45 = vpop.f32.mrb[121].mxu0  ;;  %v2223_v63 = vpop.permute.xlu1 %2222 }
 0x859   : > { %vm2981_vm11 = vcmp.eq.s32.totalorder %v22942_v37, %v2223_v63  ;;  %v21387_v47 = vpop.f32.mrb[122].mxu0  ;;  %v2219_v51 = vpop.permute.xlu0 %2218 }
 0x85a   : > { %vm2980_vm13 = vcmp.eq.s32.totalorder %v22942_v37, %v2219_v51  ;;  %v12026_v18 = vpop.f32.mrb[123].mxu0  ;;  %6289 = vbcast.lane.b32.xlu1 %v27721_v48, 360  ;;  %6285 = vbcast.lane.b32.xlu0 %v27721_v48, 352 }
 0x85b   : > { %vm17289_vm14 = vmpackc.low %vm2981_vm11, %vm2980_vm13  ;;  %v20858_v56 = vpop.f32.mrb[160].mxu1 }
 0x85c   : > { %v12032_v4 = vadd.f32 %v21386_v55, %v20858_v56  ;;  %v9894_v40 = vpop.f32.mrb[161].mxu1  ;;  %21440 = vmatprep.mubr.msk.bf16.mxu0 %vm17289_vm14, %v22390_v52  ;;  %v6175_v26 = vpop.permute.xlu1 %6174 }
 0x85d   : > { %v12024_v34 = vadd.f32 %v12023_v45, %v9894_v40  ;;  %vm6933_vm15 = vcmp.eq.s32.totalorder %v22942_v37, %v6175_v26  ;;  %v20859_v17 = vpop.f32.mrb[162].mxu1  ;;  %v6171_v13 = vpop.permute.xlu0 %6170 }
 0x85e   : > { %v12035_v2 = vadd.f32 %v21387_v47, %v20859_v17  ;;  %vm6932_vm1 = vcmp.eq.s32.totalorder %v22942_v37, %v6171_v13  ;;  %v9897_v9 = vpop.f32.mrb[163].mxu1  ;;  %2345 = vbcast.lane.b32.xlu1 %v27719_v32, 376  ;;  %2341 = vbcast.lane.b32.xlu0 %v27719_v32, 368 }
 0x85f   : > { %vm16769_vm0 = vmpackc.low %vm6933_vm15, %vm6932_vm1  ;;  %v12027_v35 = vadd.f32 %v12026_v18, %v9897_v9 }
 0x860   : > { %v19349_v15 = vpack.c.bf16 %v12035_v2, %v12032_v4  ;;  %20912 = vmatprep.mubr.msk.bf16.mxu1 %vm16769_vm0, %v22390_v52  ;;  %v2231_v27 = vpop.permute.xlu1 %2230 }
 0x861   : > { %v19344_v6 = vpack.c.bf16 %v12027_v35, %v12024_v34  ;;  %vm2983_vm2 = vcmp.eq.s32.totalorder %v22942_v37, %v2231_v27  ;;  %v2227_v21 = vpop.permute.xlu0 %2226 }
 0x862   : > { %19869 = vst [vmem:[%s24974_s8 + $0x5e8] sm:$0xff] %v19349_v15   ;;  %vm2982_vm3 = vcmp.eq.s32.totalorder %v22942_v37, %v2227_v21  ;;  %6297 = vbcast.lane.b32.xlu1 %v27721_v48, 376  ;;  %6293 = vbcast.lane.b32.xlu0 %v27721_v48, 368 }
 0x863   : > { %19868 = vst [vmem:[%s24974_s8 + $0x5e0] sm:$0xff] %v19344_v6   ;;  %vm17291_vm5 = vmpackc.low %vm2983_vm2, %vm2982_vm3 }
 0x864   : > { %21441 = vmatmul.mubr.msk.bf16.gmra.mrb[176].mxu0 %vm17291_vm5, %v22390_v52  ;;  %v6183_v32 = vpop.permute.xlu1 %6182 }
 0x865   : > { %vm6935_vm8 = vcmp.eq.s32.totalorder %v22942_v37, %v6183_v32  ;;  %v6179_v50 = vpop.permute.xlu0 %6178 }
 0x866   : > { %vm6934_vm9 = vcmp.eq.s32.totalorder %v22942_v37, %v6179_v50  ;;  %2356 = vbcast.lane.b32.xlu1 %v27742_v5, 264  ;;  %2352 = vbcast.lane.b32.xlu0 %v27742_v5, 256 }
 0x867   : > { %vm16771_vm7 = vmpackc.low %vm6935_vm8, %vm6934_vm9  ;;  %v21390_v14 = vpop.f32.mrb[124].mxu0 }
 0x868   : > { %20913 = vmatmul.mubr.msk.bf16.gmra.mrb[216].mxu1 %vm16771_vm7, %v22390_v52  ;;  %v12039_v49 = vpop.f32.mrb[125].mxu0  ;;  %v2239_v61 = vpop.permute.xlu1 %2238 }
 0x869   : > { %vm2985_vm10 = vcmp.eq.s32.totalorder %v22942_v37, %v2239_v61  ;;  %v21391_v48 = vpop.f32.mrb[126].mxu0  ;;  %v2235_v43 = vpop.permute.xlu0 %2234 }
 0x86a   : > { %vm2984_vm12 = vcmp.eq.s32.totalorder %v22942_v37, %v2235_v43  ;;  %v12042_v38 = vpop.f32.mrb[127].mxu0  ;;  %6308 = vbcast.lane.b32.xlu1 %v27743_v33, 264  ;;  %6304 = vbcast.lane.b32.xlu0 %v27743_v33, 256 }
 0x86b   : > { %vm17293_vm4 = vmpackc.low %vm2985_vm10, %vm2984_vm12  ;;  %v20862_v16 = vpop.f32.mrb[164].mxu1 }
 0x86c   : > { %v12048_v53 = vadd.f32 %v21390_v14, %v20862_v16  ;;  %v9910_v20 = vpop.f32.mrb[165].mxu1  ;;  %21444 = vmatprep.mubr.msk.bf16.mxu0 %vm17293_vm4, %v22390_v52  ;;  %v6191_v8 = vpop.permute.xlu1 %6190 }
 0x86d   : > { %v12040_v11 = vadd.f32 %v12039_v49, %v9910_v20  ;;  %vm6937_vm6 = vcmp.eq.s32.totalorder %v22942_v37, %v6191_v8  ;;  %v20863_v1 = vpop.f32.mrb[166].mxu1  ;;  %v6187_v23 = vpop.permute.xlu0 %6186 }
 0x86e   : > { %v12051_v7 = vadd.f32 %v21391_v48, %v20863_v1  ;;  %vm6936_vm11 = vcmp.eq.s32.totalorder %v22942_v37, %v6187_v23  ;;  %v9913_v60 = vpop.f32.mrb[167].mxu1  ;;  %2364 = vbcast.lane.b32.xlu1 %v27742_v5, 280  ;;  %2360 = vbcast.lane.b32.xlu0 %v27742_v5, 272 }
 0x86f   : > { %vm16773_vm13 = vmpackc.low %vm6937_vm6, %vm6936_vm11  ;;  %v12043_v25 = vadd.f32 %v12042_v38, %v9913_v60 }
 0x870   : > { %v19359_v19 = vpack.c.bf16 %v12051_v7, %v12048_v53  ;;  %20916 = vmatprep.mubr.msk.bf16.mxu1 %vm16773_vm13, %v22390_v52  ;;  %v2247_v36 = vpop.permute.xlu1 %2246 }
 0x871   : > { %v19354_v58 = vpack.c.bf16 %v12043_v25, %v12040_v11  ;;  %vm2987_vm14 = vcmp.eq.s32.totalorder %v22942_v37, %v2247_v36  ;;  %v2243_v29 = vpop.permute.xlu0 %2242 }
 0x872   : > { %19871 = vst [vmem:[%s24974_s8 + $0x5f8] sm:$0xff] %v19359_v19   ;;  %vm2986_vm15 = vcmp.eq.s32.totalorder %v22942_v37, %v2243_v29  ;;  %6316 = vbcast.lane.b32.xlu1 %v27743_v33, 280  ;;  %6312 = vbcast.lane.b32.xlu0 %v27743_v33, 272 }
 0x873   : > { %19870 = vst [vmem:[%s24974_s8 + $0x5f0] sm:$0xff] %v19354_v58   ;;  %vm17295_vm1 = vmpackc.low %vm2987_vm14, %vm2986_vm15 }
 0x874   : > { %21445 = vmatmul.mubr.msk.bf16.gmra.mrb[180].mxu0 %vm17295_vm1, %v22390_v52  ;;  %v6199_v10 = vpop.permute.xlu1 %6198 }
 0x875   : > { %vm6939_vm0 = vcmp.eq.s32.totalorder %v22942_v37, %v6199_v10  ;;  %v6195_v62 = vpop.permute.xlu0 %6194 }
 0x876   : > { %vm6938_vm2 = vcmp.eq.s32.totalorder %v22942_v37, %v6195_v62  ;;  %2372 = vbcast.lane.b32.xlu1 %v27742_v5, 296  ;;  %2368 = vbcast.lane.b32.xlu0 %v27742_v5, 288 }
 0x877   : > { %vm16775_vm3 = vmpackc.low %vm6939_vm0, %vm6938_vm2  ;;  %v21394_v28 = vpop.f32.mrb[128].mxu0 }
 0x878   : > { %20917 = vmatmul.mubr.msk.bf16.gmra.mrb[220].mxu1 %vm16775_vm3, %v22390_v52  ;;  %v12055_v31 = vpop.f32.mrb[129].mxu0  ;;  %v2255_v22 = vpop.permute.xlu1 %2254 }
 0x879   : > { %vm2989_vm5 = vcmp.eq.s32.totalorder %v22942_v37, %v2255_v22  ;;  %v21395_v59 = vpop.f32.mrb[130].mxu0  ;;  %v2251_v39 = vpop.permute.xlu0 %2250 }
 0x87a   : > { %vm2988_vm8 = vcmp.eq.s32.totalorder %v22942_v37, %v2251_v39  ;;  %v12058_v30 = vpop.f32.mrb[131].mxu0  ;;  %6324 = vbcast.lane.b32.xlu1 %v27743_v33, 296  ;;  %6320 = vbcast.lane.b32.xlu0 %v27743_v33, 288 }
 0x87b   : > { %vm17297_vm9 = vmpackc.low %vm2989_vm5, %vm2988_vm8  ;;  %v20866_v3 = vpop.f32.mrb[168].mxu1 }
 0x87c   : > { %v12064_v42 = vadd.f32 %v21394_v28, %v20866_v3  ;;  %v9926_v12 = vpop.f32.mrb[169].mxu1  ;;  %21448 = vmatprep.mubr.msk.bf16.mxu0 %vm17297_vm9, %v22390_v52  ;;  %v6207_v41 = vpop.permute.xlu1 %6206 }
 0x87d   : > { %v12056_v57 = vadd.f32 %v12055_v31, %v9926_v12  ;;  %vm6941_vm7 = vcmp.eq.s32.totalorder %v22942_v37, %v6207_v41  ;;  %v20867_v54 = vpop.f32.mrb[170].mxu1  ;;  %v6203_v44 = vpop.permute.xlu0 %6202 }
 0x87e   : > { %v12067_v0 = vadd.f32 %v21395_v59, %v20867_v54  ;;  %vm6940_vm10 = vcmp.eq.s32.totalorder %v22942_v37, %v6203_v44  ;;  %v9929_v24 = vpop.f32.mrb[171].mxu1  ;;  %2380 = vbcast.lane.b32.xlu1 %v27742_v5, 312  ;;  %2376 = vbcast.lane.b32.xlu0 %v27742_v5, 304  ;;  %v27745_v54 = vld [vmem:[#allocation37_spill] sm:$0xff] }
 0x87f   : > { %vm16777_vm12 = vmpackc.low %vm6941_vm7, %vm6940_vm10  ;;  %v12059_v46 = vadd.f32 %v12058_v30, %v9929_v24  ;;  %v27744_v30 = vld [vmem:[#allocation21_spill] sm:$0xff] }
 0x880   : > { %v19369_v55 = vpack.c.bf16 %v12067_v0, %v12064_v42  ;;  %20920 = vmatprep.mubr.msk.bf16.mxu1 %vm16777_vm12, %v22390_v52  ;;  %v2263_v45 = vpop.permute.xlu1 %2262 }
 0x881   : > { %v19364_v63 = vpack.c.bf16 %v12059_v46, %v12056_v57  ;;  %vm2991_vm4 = vcmp.eq.s32.totalorder %v22942_v37, %v2263_v45  ;;  %v2259_v47 = vpop.permute.xlu0 %2258 }
 0x882   : > { %19873 = vst [vmem:[%s24974_s8 + $0x608] sm:$0xff] %v19369_v55   ;;  %vm2990_vm6 = vcmp.eq.s32.totalorder %v22942_v37, %v2259_v47  ;;  %6332 = vbcast.lane.b32.xlu1 %v27743_v33, 312  ;;  %6328 = vbcast.lane.b32.xlu0 %v27743_v33, 304 }
 0x883   : > { %19872 = vst [vmem:[%s24974_s8 + $0x600] sm:$0xff] %v19364_v63   ;;  %vm17299_vm11 = vmpackc.low %vm2991_vm4, %vm2990_vm6 }
 0x884   : > { %21449 = vmatmul.mubr.msk.bf16.gmra.mrb[184].mxu0 %vm17299_vm11, %v22390_v52  ;;  %v6215_v51 = vpop.permute.xlu1 %6214 }
 0x885   : > { %vm6943_vm13 = vcmp.eq.s32.totalorder %v22942_v37, %v6215_v51  ;;  %v6211_v18 = vpop.permute.xlu0 %6210 }
 0x886   : > { %vm6942_vm14 = vcmp.eq.s32.totalorder %v22942_v37, %v6211_v18  ;;  %2388 = vbcast.lane.b32.xlu1 %v27742_v5, 328  ;;  %2384 = vbcast.lane.b32.xlu0 %v27742_v5, 320 }
 0x887   : > { %vm16779_vm15 = vmpackc.low %vm6943_vm13, %vm6942_vm14  ;;  %v21398_v56 = vpop.f32.mrb[132].mxu0 }
 0x888   : > { %20921 = vmatmul.mubr.msk.bf16.gmra.mrb[224].mxu1 %vm16779_vm15, %v22390_v52  ;;  %v12071_v4 = vpop.f32.mrb[133].mxu0  ;;  %v2271_v40 = vpop.permute.xlu1 %2270 }
 0x889   : > { %vm2993_vm1 = vcmp.eq.s32.totalorder %v22942_v37, %v2271_v40  ;;  %v21399_v26 = vpop.f32.mrb[134].mxu0  ;;  %v2267_v34 = vpop.permute.xlu0 %2266 }
 0x88a   : > { %vm2992_vm0 = vcmp.eq.s32.totalorder %v22942_v37, %v2267_v34  ;;  %v12074_v17 = vpop.f32.mrb[135].mxu0  ;;  %6340 = vbcast.lane.b32.xlu1 %v27743_v33, 328  ;;  %6336 = vbcast.lane.b32.xlu0 %v27743_v33, 320 }
 0x88b   : > { %vm17301_vm2 = vmpackc.low %vm2993_vm1, %vm2992_vm0  ;;  %v20870_v13 = vpop.f32.mrb[172].mxu1 }
 0x88c   : > { %v12080_v2 = vadd.f32 %v21398_v56, %v20870_v13  ;;  %v9942_v9 = vpop.f32.mrb[173].mxu1  ;;  %21452 = vmatprep.mubr.msk.bf16.mxu0 %vm17301_vm2, %v22390_v52  ;;  %v6223_v35 = vpop.permute.xlu1 %6222 }
 0x88d   : > { %v12072_v15 = vadd.f32 %v12071_v4, %v9942_v9  ;;  %vm6945_vm3 = vcmp.eq.s32.totalorder %v22942_v37, %v6223_v35  ;;  %v20871_v27 = vpop.f32.mrb[174].mxu1  ;;  %v6219_v6 = vpop.permute.xlu0 %6218 }
 0x88e   : > { %v12083_v21 = vadd.f32 %v21399_v26, %v20871_v27  ;;  %vm6944_vm5 = vcmp.eq.s32.totalorder %v22942_v37, %v6219_v6  ;;  %v9945_v32 = vpop.f32.mrb[175].mxu1  ;;  %2396 = vbcast.lane.b32.xlu1 %v27742_v5, 344  ;;  %2392 = vbcast.lane.b32.xlu0 %v27742_v5, 336 }
 0x88f   : > { %vm16781_vm8 = vmpackc.low %vm6945_vm3, %vm6944_vm5  ;;  %v12075_v50 = vadd.f32 %v12074_v17, %v9945_v32 }
 0x890   : > { %v19379_v14 = vpack.c.bf16 %v12083_v21, %v12080_v2  ;;  %20924 = vmatprep.mubr.msk.bf16.mxu1 %vm16781_vm8, %v22390_v52  ;;  %v2279_v49 = vpop.permute.xlu1 %2278 }
 0x891   : > { %v19374_v61 = vpack.c.bf16 %v12075_v50, %v12072_v15  ;;  %vm2995_vm9 = vcmp.eq.s32.totalorder %v22942_v37, %v2279_v49  ;;  %v2275_v48 = vpop.permute.xlu0 %2274 }
 0x892   : > { %19875 = vst [vmem:[%s24974_s8 + $0x618] sm:$0xff] %v19379_v14   ;;  %vm2994_vm7 = vcmp.eq.s32.totalorder %v22942_v37, %v2275_v48  ;;  %6348 = vbcast.lane.b32.xlu1 %v27743_v33, 344  ;;  %6344 = vbcast.lane.b32.xlu0 %v27743_v33, 336 }
 0x893   : > { %19874 = vst [vmem:[%s24974_s8 + $0x610] sm:$0xff] %v19374_v61   ;;  %vm17303_vm10 = vmpackc.low %vm2995_vm9, %vm2994_vm7 }
 0x894   : > { %21453 = vmatmul.mubr.msk.bf16.gmra.mrb[188].mxu0 %vm17303_vm10, %v22390_v52  ;;  %v6231_v43 = vpop.permute.xlu1 %6230 }
 0x895   : > { %vm6947_vm12 = vcmp.eq.s32.totalorder %v22942_v37, %v6231_v43  ;;  %v6227_v38 = vpop.permute.xlu0 %6226 }
 0x896   : > { %vm6946_vm4 = vcmp.eq.s32.totalorder %v22942_v37, %v6227_v38  ;;  %2404 = vbcast.lane.b32.xlu1 %v27742_v5, 360  ;;  %2400 = vbcast.lane.b32.xlu0 %v27742_v5, 352 }
 0x897   : > { %vm16783_vm6 = vmpackc.low %vm6947_vm12, %vm6946_vm4  ;;  %v21402_v16 = vpop.f32.mrb[136].mxu0 }
 0x898   : > { %20925 = vmatmul.mubr.msk.bf16.gmra.mrb[228].mxu1 %vm16783_vm6, %v22390_v52  ;;  %v12087_v53 = vpop.f32.mrb[137].mxu0  ;;  %v2290_v20 = vpop.permute.xlu1 %2289 }
 0x899   : > { %vm2997_vm11 = vcmp.eq.s32.totalorder %v22942_v37, %v2290_v20  ;;  %v21403_v8 = vpop.f32.mrb[138].mxu0  ;;  %v2286_v11 = vpop.permute.xlu0 %2285 }
 0x89a   : > { %vm2996_vm13 = vcmp.eq.s32.totalorder %v22942_v37, %v2286_v11  ;;  %v12090_v1 = vpop.f32.mrb[139].mxu0  ;;  %6356 = vbcast.lane.b32.xlu1 %v27743_v33, 360  ;;  %6352 = vbcast.lane.b32.xlu0 %v27743_v33, 352 }
 0x89b   : > { %vm17305_vm14 = vmpackc.low %vm2997_vm11, %vm2996_vm13  ;;  %v20874_v23 = vpop.f32.mrb[176].mxu1 }
 0x89c   : > { %v12096_v7 = vadd.f32 %v21402_v16, %v20874_v23  ;;  %v9958_v60 = vpop.f32.mrb[177].mxu1  ;;  %21456 = vmatprep.mubr.msk.bf16.mxu0 %vm17305_vm14, %v22390_v52  ;;  %v6242_v25 = vpop.permute.xlu1 %6241 }
 0x89d   : > { %v12088_v19 = vadd.f32 %v12087_v53, %v9958_v60  ;;  %vm6949_vm15 = vcmp.eq.s32.totalorder %v22942_v37, %v6242_v25  ;;  %v20875_v36 = vpop.f32.mrb[178].mxu1  ;;  %v6238_v58 = vpop.permute.xlu0 %6237 }
 0x89e   : > { %v12099_v29 = vadd.f32 %v21403_v8, %v20875_v36  ;;  %vm6948_vm1 = vcmp.eq.s32.totalorder %v22942_v37, %v6238_v58  ;;  %v9961_v10 = vpop.f32.mrb[179].mxu1  ;;  %2412 = vbcast.lane.b32.xlu1 %v27742_v5, 376  ;;  %2408 = vbcast.lane.b32.xlu0 %v27742_v5, 368 }
 0x89f   : > { %vm16785_vm0 = vmpackc.low %vm6949_vm15, %vm6948_vm1  ;;  %v12091_v62 = vadd.f32 %v12090_v1, %v9961_v10 }
 0x8a0   : > { %v19389_v28 = vpack.c.bf16 %v12099_v29, %v12096_v7  ;;  %20928 = vmatprep.mubr.msk.bf16.mxu1 %vm16785_vm0, %v22390_v52  ;;  %v2298_v31 = vpop.permute.xlu1 %2297 }
 0x8a1   : > { %v19384_v22 = vpack.c.bf16 %v12091_v62, %v12088_v19  ;;  %vm2999_vm2 = vcmp.eq.s32.totalorder %v22942_v37, %v2298_v31  ;;  %v2294_v59 = vpop.permute.xlu0 %2293 }
 0x8a2   : > { %19877 = vst [vmem:[%s24974_s8 + $0x628] sm:$0xff] %v19389_v28   ;;  %vm2998_vm3 = vcmp.eq.s32.totalorder %v22942_v37, %v2294_v59  ;;  %6364 = vbcast.lane.b32.xlu1 %v27743_v33, 376  ;;  %6360 = vbcast.lane.b32.xlu0 %v27743_v33, 368 }
 0x8a3   : > { %19876 = vst [vmem:[%s24974_s8 + $0x620] sm:$0xff] %v19384_v22   ;;  %vm17307_vm5 = vmpackc.low %vm2999_vm2, %vm2998_vm3 }
 0x8a4   : > { %21457 = vmatmul.mubr.msk.bf16.gmra.mrb[192].mxu0 %vm17307_vm5, %v22390_v52  ;;  %v6250_v5 = vpop.permute.xlu1 %6249 }
 0x8a5   : > { %vm6951_vm8 = vcmp.eq.s32.totalorder %v22942_v37, %v6250_v5  ;;  %v6246_v39 = vpop.permute.xlu0 %6245 }
 0x8a6   : > { %vm6950_vm9 = vcmp.eq.s32.totalorder %v22942_v37, %v6246_v39  ;;  %2423 = vbcast.lane.b32.xlu1 %v27744_v30, 264  ;;  %2419 = vbcast.lane.b32.xlu0 %v27744_v30, 256 }
 0x8a7   : > { %vm16787_vm7 = vmpackc.low %vm6951_vm8, %vm6950_vm9  ;;  %v21406_v3 = vpop.f32.mrb[140].mxu0 }
 0x8a8   : > { %20929 = vmatmul.mubr.msk.bf16.gmra.mrb[232].mxu1 %vm16787_vm7, %v22390_v52  ;;  %v12103_v42 = vpop.f32.mrb[141].mxu0  ;;  %v2306_v12 = vpop.permute.xlu1 %2305 }
 0x8a9   : > { %vm3001_vm10 = vcmp.eq.s32.totalorder %v22942_v37, %v2306_v12  ;;  %v21407_v33 = vpop.f32.mrb[142].mxu0  ;;  %v2302_v41 = vpop.permute.xlu0 %2301 }
 0x8aa   : > { %vm3000_vm12 = vcmp.eq.s32.totalorder %v22942_v37, %v2302_v41  ;;  %v12106_v57 = vpop.f32.mrb[143].mxu0  ;;  %6375 = vbcast.lane.b32.xlu1 %v27745_v54, 264  ;;  %6371 = vbcast.lane.b32.xlu0 %v27745_v54, 256 }
 0x8ab   : > { %vm17309_vm4 = vmpackc.low %vm3001_vm10, %vm3000_vm12  ;;  %v20878_v44 = vpop.f32.mrb[180].mxu1 }
 0x8ac   : > { %v12112_v0 = vadd.f32 %v21406_v3, %v20878_v44  ;;  %v9974_v24 = vpop.f32.mrb[181].mxu1  ;;  %21460 = vmatprep.mubr.msk.bf16.mxu0 %vm17309_vm4, %v22390_v52  ;;  %v6258_v46 = vpop.permute.xlu1 %6257 }
 0x8ad   : > { %v12104_v55 = vadd.f32 %v12103_v42, %v9974_v24  ;;  %vm6953_vm6 = vcmp.eq.s32.totalorder %v22942_v37, %v6258_v46  ;;  %v20879_v45 = vpop.f32.mrb[182].mxu1  ;;  %v6254_v63 = vpop.permute.xlu0 %6253 }
 0x8ae   : > { %v12115_v47 = vadd.f32 %v21407_v33, %v20879_v45  ;;  %vm6952_vm11 = vcmp.eq.s32.totalorder %v22942_v37, %v6254_v63  ;;  %v9977_v51 = vpop.f32.mrb[183].mxu1  ;;  %2431 = vbcast.lane.b32.xlu1 %v27744_v30, 280  ;;  %2427 = vbcast.lane.b32.xlu0 %v27744_v30, 272 }
 0x8af   : > { %vm16789_vm13 = vmpackc.low %vm6953_vm6, %vm6952_vm11  ;;  %v12107_v18 = vadd.f32 %v12106_v57, %v9977_v51 }
 0x8b0   : > { %v19399_v56 = vpack.c.bf16 %v12115_v47, %v12112_v0  ;;  %20932 = vmatprep.mubr.msk.bf16.mxu1 %vm16789_vm13, %v22390_v52  ;;  %v2314_v4 = vpop.permute.xlu1 %2313 }
 0x8b1   : > { %v19394_v40 = vpack.c.bf16 %v12107_v18, %v12104_v55  ;;  %vm3003_vm14 = vcmp.eq.s32.totalorder %v22942_v37, %v2314_v4  ;;  %v2310_v26 = vpop.permute.xlu0 %2309 }
 0x8b2   : > { %19879 = vst [vmem:[%s24974_s8 + $0x638] sm:$0xff] %v19399_v56   ;;  %vm3002_vm15 = vcmp.eq.s32.totalorder %v22942_v37, %v2310_v26  ;;  %6383 = vbcast.lane.b32.xlu1 %v27745_v54, 280  ;;  %6379 = vbcast.lane.b32.xlu0 %v27745_v54, 272 }
 0x8b3   : > { %19878 = vst [vmem:[%s24974_s8 + $0x630] sm:$0xff] %v19394_v40   ;;  %vm17311_vm1 = vmpackc.low %vm3003_vm14, %vm3002_vm15 }
 0x8b4   : > { %21461 = vmatmul.mubr.msk.bf16.gmra.mrb[196].mxu0 %vm17311_vm1, %v22390_v52  ;;  %v6266_v34 = vpop.permute.xlu1 %6265 }
 0x8b5   : > { %vm6955_vm0 = vcmp.eq.s32.totalorder %v22942_v37, %v6266_v34  ;;  %v6262_v17 = vpop.permute.xlu0 %6261 }
 0x8b6   : > { %vm6954_vm2 = vcmp.eq.s32.totalorder %v22942_v37, %v6262_v17  ;;  %2439 = vbcast.lane.b32.xlu1 %v27744_v30, 296  ;;  %2435 = vbcast.lane.b32.xlu0 %v27744_v30, 288 }
 0x8b7   : > { %vm16791_vm3 = vmpackc.low %vm6955_vm0, %vm6954_vm2  ;;  %v21410_v13 = vpop.f32.mrb[144].mxu0 }
 0x8b8   : > { %20933 = vmatmul.mubr.msk.bf16.gmra.mrb[236].mxu1 %vm16791_vm3, %v22390_v52  ;;  %v12119_v2 = vpop.f32.mrb[145].mxu0  ;;  %v2322_v9 = vpop.permute.xlu1 %2321 }
 0x8b9   : > { %vm3005_vm5 = vcmp.eq.s32.totalorder %v22942_v37, %v2322_v9  ;;  %v21411_v35 = vpop.f32.mrb[146].mxu0  ;;  %v2318_v15 = vpop.permute.xlu0 %2317 }
 0x8ba   : > { %vm3004_vm8 = vcmp.eq.s32.totalorder %v22942_v37, %v2318_v15  ;;  %v12122_v27 = vpop.f32.mrb[147].mxu0  ;;  %6391 = vbcast.lane.b32.xlu1 %v27745_v54, 296  ;;  %6387 = vbcast.lane.b32.xlu0 %v27745_v54, 288 }
 0x8bb   : > { %vm17313_vm9 = vmpackc.low %vm3005_vm5, %vm3004_vm8  ;;  %v20882_v6 = vpop.f32.mrb[184].mxu1 }
 0x8bc   : > { %v12128_v21 = vadd.f32 %v21410_v13, %v20882_v6  ;;  %v9990_v32 = vpop.f32.mrb[185].mxu1  ;;  %21464 = vmatprep.mubr.msk.bf16.mxu0 %vm17313_vm9, %v22390_v52  ;;  %v6274_v50 = vpop.permute.xlu1 %6273 }
 0x8bd   : > { %v12120_v14 = vadd.f32 %v12119_v2, %v9990_v32  ;;  %vm6957_vm7 = vcmp.eq.s32.totalorder %v22942_v37, %v6274_v50  ;;  %v20883_v49 = vpop.f32.mrb[186].mxu1  ;;  %v6270_v61 = vpop.permute.xlu0 %6269 }
 0x8be   : > { %v12131_v48 = vadd.f32 %v21411_v35, %v20883_v49  ;;  %vm6956_vm10 = vcmp.eq.s32.totalorder %v22942_v37, %v6270_v61  ;;  %v9993_v43 = vpop.f32.mrb[187].mxu1  ;;  %2447 = vbcast.lane.b32.xlu1 %v27744_v30, 312  ;;  %2443 = vbcast.lane.b32.xlu0 %v27744_v30, 304  ;;  %v27747_v49 = vld [vmem:[#allocation38_spill] sm:$0xff] }
 0x8bf   : > { %vm16793_vm12 = vmpackc.low %vm6957_vm7, %vm6956_vm10  ;;  %v12123_v38 = vadd.f32 %v12122_v27, %v9993_v43  ;;  %v27746_v27 = vld [vmem:[#allocation22_spill] sm:$0xff] }
 0x8c0   : > { %v19409_v16 = vpack.c.bf16 %v12131_v48, %v12128_v21  ;;  %20936 = vmatprep.mubr.msk.bf16.mxu1 %vm16793_vm12, %v22390_v52  ;;  %v2330_v53 = vpop.permute.xlu1 %2329 }
 0x8c1   : > { %v19404_v20 = vpack.c.bf16 %v12123_v38, %v12120_v14  ;;  %vm3007_vm4 = vcmp.eq.s32.totalorder %v22942_v37, %v2330_v53  ;;  %v2326_v8 = vpop.permute.xlu0 %2325 }
 0x8c2   : > { %19881 = vst [vmem:[%s24974_s8 + $0x648] sm:$0xff] %v19409_v16   ;;  %vm3006_vm6 = vcmp.eq.s32.totalorder %v22942_v37, %v2326_v8  ;;  %6399 = vbcast.lane.b32.xlu1 %v27745_v54, 312  ;;  %6395 = vbcast.lane.b32.xlu0 %v27745_v54, 304 }
 0x8c3   : > { %19880 = vst [vmem:[%s24974_s8 + $0x640] sm:$0xff] %v19404_v20   ;;  %vm17315_vm11 = vmpackc.low %vm3007_vm4, %vm3006_vm6 }
 0x8c4   : > { %21465 = vmatmul.mubr.msk.bf16.gmra.mrb[200].mxu0 %vm17315_vm11, %v22390_v52  ;;  %v6282_v11 = vpop.permute.xlu1 %6281 }
 0x8c5   : > { %vm6959_vm13 = vcmp.eq.s32.totalorder %v22942_v37, %v6282_v11  ;;  %v6278_v1 = vpop.permute.xlu0 %6277 }
 0x8c6   : > { %vm6958_vm14 = vcmp.eq.s32.totalorder %v22942_v37, %v6278_v1  ;;  %2455 = vbcast.lane.b32.xlu1 %v27744_v30, 328  ;;  %2451 = vbcast.lane.b32.xlu0 %v27744_v30, 320 }
 0x8c7   : > { %vm16795_vm15 = vmpackc.low %vm6959_vm13, %vm6958_vm14  ;;  %v21414_v23 = vpop.f32.mrb[148].mxu0 }
 0x8c8   : > { %20937 = vmatmul.mubr.msk.bf16.gmra.mrb[240].mxu1 %vm16795_vm15, %v22390_v52  ;;  %v12135_v7 = vpop.f32.mrb[149].mxu0  ;;  %v2338_v60 = vpop.permute.xlu1 %2337 }
 0x8c9   : > { %vm3009_vm1 = vcmp.eq.s32.totalorder %v22942_v37, %v2338_v60  ;;  %v21415_v25 = vpop.f32.mrb[150].mxu0  ;;  %v2334_v19 = vpop.permute.xlu0 %2333 }
 0x8ca   : > { %vm3008_vm0 = vcmp.eq.s32.totalorder %v22942_v37, %v2334_v19  ;;  %v12138_v36 = vpop.f32.mrb[151].mxu0  ;;  %6407 = vbcast.lane.b32.xlu1 %v27745_v54, 328  ;;  %6403 = vbcast.lane.b32.xlu0 %v27745_v54, 320 }
 0x8cb   : > { %vm17317_vm2 = vmpackc.low %vm3009_vm1, %vm3008_vm0  ;;  %v20886_v58 = vpop.f32.mrb[188].mxu1 }
 0x8cc   : > { %v12144_v29 = vadd.f32 %v21414_v23, %v20886_v58  ;;  %v10006_v10 = vpop.f32.mrb[189].mxu1  ;;  %21468 = vmatprep.mubr.msk.bf16.mxu0 %vm17317_vm2, %v22390_v52  ;;  %v6290_v62 = vpop.permute.xlu1 %6289 }
 0x8cd   : > { %v12136_v28 = vadd.f32 %v12135_v7, %v10006_v10  ;;  %vm6961_vm3 = vcmp.eq.s32.totalorder %v22942_v37, %v6290_v62  ;;  %v20887_v31 = vpop.f32.mrb[190].mxu1  ;;  %v6286_v22 = vpop.permute.xlu0 %6285 }
 0x8ce   : > { %v12147_v59 = vadd.f32 %v21415_v25, %v20887_v31  ;;  %vm6960_vm5 = vcmp.eq.s32.totalorder %v22942_v37, %v6286_v22  ;;  %v10009_v5 = vpop.f32.mrb[191].mxu1  ;;  %2463 = vbcast.lane.b32.xlu1 %v27744_v30, 344  ;;  %2459 = vbcast.lane.b32.xlu0 %v27744_v30, 336 }
 0x8cf   : > { %vm16797_vm8 = vmpackc.low %vm6961_vm3, %vm6960_vm5  ;;  %v12139_v39 = vadd.f32 %v12138_v36, %v10009_v5 }
 0x8d0   : > { %v19419_v3 = vpack.c.bf16 %v12147_v59, %v12144_v29  ;;  %20940 = vmatprep.mubr.msk.bf16.mxu1 %vm16797_vm8, %v22390_v52  ;;  %v2346_v42 = vpop.permute.xlu1 %2345 }
 0x8d1   : > { %v19414_v12 = vpack.c.bf16 %v12139_v39, %v12136_v28  ;;  %vm3011_vm9 = vcmp.eq.s32.totalorder %v22942_v37, %v2346_v42  ;;  %v2342_v33 = vpop.permute.xlu0 %2341 }
 0x8d2   : > { %19883 = vst [vmem:[%s24974_s8 + $0x658] sm:$0xff] %v19419_v3   ;;  %vm3010_vm7 = vcmp.eq.s32.totalorder %v22942_v37, %v2342_v33  ;;  %6415 = vbcast.lane.b32.xlu1 %v27745_v54, 344  ;;  %6411 = vbcast.lane.b32.xlu0 %v27745_v54, 336 }
 0x8d3   : > { %19882 = vst [vmem:[%s24974_s8 + $0x650] sm:$0xff] %v19414_v12   ;;  %vm17319_vm10 = vmpackc.low %vm3011_vm9, %vm3010_vm7 }
 0x8d4   : > { %21469 = vmatmul.mubr.msk.bf16.gmra.mrb[204].mxu0 %vm17319_vm10, %v22390_v52  ;;  %v6298_v41 = vpop.permute.xlu1 %6297 }
 0x8d5   : > { %vm6963_vm12 = vcmp.eq.s32.totalorder %v22942_v37, %v6298_v41  ;;  %v6294_v57 = vpop.permute.xlu0 %6293 }
 0x8d6   : > { %vm6962_vm4 = vcmp.eq.s32.totalorder %v22942_v37, %v6294_v57  ;;  %2471 = vbcast.lane.b32.xlu1 %v27744_v30, 360  ;;  %2467 = vbcast.lane.b32.xlu0 %v27744_v30, 352 }
 0x8d7   : > { %vm16799_vm6 = vmpackc.low %vm6963_vm12, %vm6962_vm4  ;;  %v21418_v44 = vpop.f32.mrb[152].mxu0 }
 0x8d8   : > { %20941 = vmatmul.mubr.msk.bf16.gmra.mrb[244].mxu1 %vm16799_vm6, %v22390_v52  ;;  %v12151_v0 = vpop.f32.mrb[153].mxu0  ;;  %v2357_v24 = vpop.permute.xlu1 %2356 }
 0x8d9   : > { %vm3013_vm11 = vcmp.eq.s32.totalorder %v22942_v37, %v2357_v24  ;;  %v21419_v46 = vpop.f32.mrb[154].mxu0  ;;  %v2353_v55 = vpop.permute.xlu0 %2352 }
 0x8da   : > { %vm3012_vm13 = vcmp.eq.s32.totalorder %v22942_v37, %v2353_v55  ;;  %v12154_v45 = vpop.f32.mrb[155].mxu0  ;;  %6423 = vbcast.lane.b32.xlu1 %v27745_v54, 360  ;;  %6419 = vbcast.lane.b32.xlu0 %v27745_v54, 352 }
 0x8db   : > { %vm17321_vm14 = vmpackc.low %vm3013_vm11, %vm3012_vm13  ;;  %v20890_v63 = vpop.f32.mrb[192].mxu1 }
 0x8dc   : > { %v12160_v47 = vadd.f32 %v21418_v44, %v20890_v63  ;;  %v10022_v51 = vpop.f32.mrb[193].mxu1  ;;  %21472 = vmatprep.mubr.msk.bf16.mxu0 %vm17321_vm14, %v22390_v52  ;;  %v6309_v18 = vpop.permute.xlu1 %6308 }
 0x8dd   : > { %v12152_v56 = vadd.f32 %v12151_v0, %v10022_v51  ;;  %vm6965_vm15 = vcmp.eq.s32.totalorder %v22942_v37, %v6309_v18  ;;  %v20891_v4 = vpop.f32.mrb[194].mxu1  ;;  %v6305_v40 = vpop.permute.xlu0 %6304 }
 0x8de   : > { %v12163_v26 = vadd.f32 %v21419_v46, %v20891_v4  ;;  %vm6964_vm1 = vcmp.eq.s32.totalorder %v22942_v37, %v6305_v40  ;;  %v10025_v34 = vpop.f32.mrb[195].mxu1  ;;  %2479 = vbcast.lane.b32.xlu1 %v27744_v30, 376  ;;  %2475 = vbcast.lane.b32.xlu0 %v27744_v30, 368 }
 0x8df   : > { %vm16801_vm0 = vmpackc.low %vm6965_vm15, %vm6964_vm1  ;;  %v12155_v17 = vadd.f32 %v12154_v45, %v10025_v34 }
 0x8e0   : > { %v19429_v13 = vpack.c.bf16 %v12163_v26, %v12160_v47  ;;  %20944 = vmatprep.mubr.msk.bf16.mxu1 %vm16801_vm0, %v22390_v52  ;;  %v2365_v2 = vpop.permute.xlu1 %2364 }
 0x8e1   : > { %v19424_v9 = vpack.c.bf16 %v12155_v17, %v12152_v56  ;;  %vm3015_vm2 = vcmp.eq.s32.totalorder %v22942_v37, %v2365_v2  ;;  %v2361_v35 = vpop.permute.xlu0 %2360 }
 0x8e2   : > { %19885 = vst [vmem:[%s24974_s8 + $0x668] sm:$0xff] %v19429_v13   ;;  %vm3014_vm3 = vcmp.eq.s32.totalorder %v22942_v37, %v2361_v35  ;;  %6431 = vbcast.lane.b32.xlu1 %v27745_v54, 376  ;;  %6427 = vbcast.lane.b32.xlu0 %v27745_v54, 368 }
 0x8e3   : > { %19884 = vst [vmem:[%s24974_s8 + $0x660] sm:$0xff] %v19424_v9   ;;  %vm17323_vm5 = vmpackc.low %vm3015_vm2, %vm3014_vm3 }
 0x8e4   : > { %21473 = vmatmul.mubr.msk.bf16.gmra.mrb[208].mxu0 %vm17323_vm5, %v22390_v52  ;;  %v6317_v30 = vpop.permute.xlu1 %6316 }
 0x8e5   : > { %vm6967_vm8 = vcmp.eq.s32.totalorder %v22942_v37, %v6317_v30  ;;  %v6313_v15 = vpop.permute.xlu0 %6312 }
 0x8e6   : > { %vm6966_vm9 = vcmp.eq.s32.totalorder %v22942_v37, %v6313_v15  ;;  %2490 = vbcast.lane.b32.xlu1 %v27746_v27, 264  ;;  %2486 = vbcast.lane.b32.xlu0 %v27746_v27, 256 }
 0x8e7   : > { %vm16803_vm7 = vmpackc.low %vm6967_vm8, %vm6966_vm9  ;;  %v21422_v6 = vpop.f32.mrb[156].mxu0 }
 0x8e8   : > { %20945 = vmatmul.mubr.msk.bf16.gmra.mrb[248].mxu1 %vm16803_vm7, %v22390_v52  ;;  %v12167_v21 = vpop.f32.mrb[157].mxu0  ;;  %v2373_v32 = vpop.permute.xlu1 %2372 }
 0x8e9   : > { %vm3017_vm10 = vcmp.eq.s32.totalorder %v22942_v37, %v2373_v32  ;;  %v21423_v54 = vpop.f32.mrb[158].mxu0  ;;  %v2369_v50 = vpop.permute.xlu0 %2368 }
 0x8ea   : > { %vm3016_vm12 = vcmp.eq.s32.totalorder %v22942_v37, %v2369_v50  ;;  %v12170_v14 = vpop.f32.mrb[159].mxu0  ;;  %6442 = vbcast.lane.b32.xlu1 %v27747_v49, 264  ;;  %6438 = vbcast.lane.b32.xlu0 %v27747_v49, 256 }
 0x8eb   : > { %vm17325_vm4 = vmpackc.low %vm3017_vm10, %vm3016_vm12  ;;  %v20894_v61 = vpop.f32.mrb[196].mxu1 }
 0x8ec   : > { %v12176_v48 = vadd.f32 %v21422_v6, %v20894_v61  ;;  %v10038_v43 = vpop.f32.mrb[197].mxu1  ;;  %21476 = vmatprep.mubr.msk.bf16.mxu0 %vm17325_vm4, %v22390_v52  ;;  %v6325_v38 = vpop.permute.xlu1 %6324 }
 0x8ed   : > { %v12168_v16 = vadd.f32 %v12167_v21, %v10038_v43  ;;  %vm6969_vm6 = vcmp.eq.s32.totalorder %v22942_v37, %v6325_v38  ;;  %v20895_v53 = vpop.f32.mrb[198].mxu1  ;;  %v6321_v20 = vpop.permute.xlu0 %6320 }
 0x8ee   : > { %v12179_v8 = vadd.f32 %v21423_v54, %v20895_v53  ;;  %vm6968_vm11 = vcmp.eq.s32.totalorder %v22942_v37, %v6321_v20  ;;  %v10041_v11 = vpop.f32.mrb[199].mxu1  ;;  %2498 = vbcast.lane.b32.xlu1 %v27746_v27, 280  ;;  %2494 = vbcast.lane.b32.xlu0 %v27746_v27, 272 }
 0x8ef   : > { %vm16805_vm13 = vmpackc.low %vm6969_vm6, %vm6968_vm11  ;;  %v12171_v1 = vadd.f32 %v12170_v14, %v10041_v11 }
 0x8f0   : > { %v19439_v23 = vpack.c.bf16 %v12179_v8, %v12176_v48  ;;  %20948 = vmatprep.mubr.msk.bf16.mxu1 %vm16805_vm13, %v22390_v52  ;;  %v2381_v7 = vpop.permute.xlu1 %2380 }
 0x8f1   : > { %v19434_v60 = vpack.c.bf16 %v12171_v1, %v12168_v16  ;;  %vm3019_vm14 = vcmp.eq.s32.totalorder %v22942_v37, %v2381_v7  ;;  %v2377_v25 = vpop.permute.xlu0 %2376 }
 0x8f2   : > { %19887 = vst [vmem:[%s24974_s8 + $0x678] sm:$0xff] %v19439_v23   ;;  %vm3018_vm15 = vcmp.eq.s32.totalorder %v22942_v37, %v2377_v25  ;;  %6450 = vbcast.lane.b32.xlu1 %v27747_v49, 280  ;;  %6446 = vbcast.lane.b32.xlu0 %v27747_v49, 272 }
 0x8f3   : > { %19886 = vst [vmem:[%s24974_s8 + $0x670] sm:$0xff] %v19434_v60   ;;  %vm17327_vm1 = vmpackc.low %vm3019_vm14, %vm3018_vm15 }
 0x8f4   : > { %21477 = vmatmul.mubr.msk.bf16.gmra.mrb[212].mxu0 %vm17327_vm1, %v22390_v52  ;;  %v6333_v19 = vpop.permute.xlu1 %6332 }
 0x8f5   : > { %vm6971_vm0 = vcmp.eq.s32.totalorder %v22942_v37, %v6333_v19  ;;  %v6329_v36 = vpop.permute.xlu0 %6328 }
 0x8f6   : > { %vm6970_vm2 = vcmp.eq.s32.totalorder %v22942_v37, %v6329_v36  ;;  %2506 = vbcast.lane.b32.xlu1 %v27746_v27, 296  ;;  %2502 = vbcast.lane.b32.xlu0 %v27746_v27, 288 }
 0x8f7   : > { %vm16807_vm3 = vmpackc.low %vm6971_vm0, %vm6970_vm2  ;;  %v21426_v58 = vpop.f32.mrb[160].mxu0 }
 0x8f8   : > { %20949 = vmatmul.mubr.msk.bf16.gmra.mrb[252].mxu1 %vm16807_vm3, %v22390_v52  ;;  %v12183_v29 = vpop.f32.mrb[161].mxu0  ;;  %v2389_v10 = vpop.permute.xlu1 %2388 }
 0x8f9   : > { %vm3021_vm5 = vcmp.eq.s32.totalorder %v22942_v37, %v2389_v10  ;;  %v21427_v62 = vpop.f32.mrb[162].mxu0  ;;  %v2385_v28 = vpop.permute.xlu0 %2384 }
 0x8fa   : > { %vm3020_vm8 = vcmp.eq.s32.totalorder %v22942_v37, %v2385_v28  ;;  %v12186_v31 = vpop.f32.mrb[163].mxu0  ;;  %6458 = vbcast.lane.b32.xlu1 %v27747_v49, 296  ;;  %6454 = vbcast.lane.b32.xlu0 %v27747_v49, 288 }
 0x8fb   : > { %vm17329_vm9 = vmpackc.low %vm3021_vm5, %vm3020_vm8  ;;  %v20898_v22 = vpop.f32.mrb[200].mxu1 }
 0x8fc   : > { %v12192_v59 = vadd.f32 %v21426_v58, %v20898_v22  ;;  %v10054_v5 = vpop.f32.mrb[201].mxu1  ;;  %21480 = vmatprep.mubr.msk.bf16.mxu0 %vm17329_vm9, %v22390_v52  ;;  %v6341_v39 = vpop.permute.xlu1 %6340 }
 0x8fd   : > { %v12184_v3 = vadd.f32 %v12183_v29, %v10054_v5  ;;  %vm6973_vm7 = vcmp.eq.s32.totalorder %v22942_v37, %v6341_v39  ;;  %v20899_v42 = vpop.f32.mrb[202].mxu1  ;;  %v6337_v12 = vpop.permute.xlu0 %6336 }
 0x8fe   : > { %v12195_v33 = vadd.f32 %v21427_v62, %v20899_v42  ;;  %vm6972_vm10 = vcmp.eq.s32.totalorder %v22942_v37, %v6337_v12  ;;  %v10057_v41 = vpop.f32.mrb[203].mxu1  ;;  %2514 = vbcast.lane.b32.xlu1 %v27746_v27, 312  ;;  %2510 = vbcast.lane.b32.xlu0 %v27746_v27, 304 }
 0x8ff   : > { %vm16809_vm12 = vmpackc.low %vm6973_vm7, %vm6972_vm10  ;;  %v12187_v57 = vadd.f32 %v12186_v31, %v10057_v41 }
 0x900   : > { %v19449_v44 = vpack.c.bf16 %v12195_v33, %v12192_v59  ;;  %20952 = vmatprep.mubr.msk.bf16.mxu1 %vm16809_vm12, %v22390_v52  ;;  %v2397_v0 = vpop.permute.xlu1 %2396 }
 0x901   : > { %v19444_v24 = vpack.c.bf16 %v12187_v57, %v12184_v3  ;;  %vm3023_vm4 = vcmp.eq.s32.totalorder %v22942_v37, %v2397_v0  ;;  %v2393_v46 = vpop.permute.xlu0 %2392 }
 0x902   : > { %19889 = vst [vmem:[%s24974_s8 + $0x688] sm:$0xff] %v19449_v44   ;;  %vm3022_vm6 = vcmp.eq.s32.totalorder %v22942_v37, %v2393_v46  ;;  %6466 = vbcast.lane.b32.xlu1 %v27747_v49, 312  ;;  %6462 = vbcast.lane.b32.xlu0 %v27747_v49, 304 }
 0x903   : > { %19888 = vst [vmem:[%s24974_s8 + $0x680] sm:$0xff] %v19444_v24   ;;  %vm17331_vm11 = vmpackc.low %vm3023_vm4, %vm3022_vm6 }
 0x904   : > { %21481 = vmatmul.mubr.msk.bf16.gmra.mrb[216].mxu0 %vm17331_vm11, %v22390_v52  ;;  %v6349_v55 = vpop.permute.xlu1 %6348 }
 0x905   : > { %vm6975_vm13 = vcmp.eq.s32.totalorder %v22942_v37, %v6349_v55  ;;  %v6345_v45 = vpop.permute.xlu0 %6344 }
 0x906   : > { %vm6974_vm14 = vcmp.eq.s32.totalorder %v22942_v37, %v6345_v45  ;;  %2522 = vbcast.lane.b32.xlu1 %v27746_v27, 328  ;;  %2518 = vbcast.lane.b32.xlu0 %v27746_v27, 320 }
 0x907   : > { %vm16811_vm15 = vmpackc.low %vm6975_vm13, %vm6974_vm14  ;;  %v21430_v63 = vpop.f32.mrb[164].mxu0 }
 0x908   : > { %20953 = vmatmul.mubr.msk.bf16.gmra.mrb[148].mxu1 %vm16811_vm15, %v22390_v52  ;;  %v12199_v47 = vpop.f32.mrb[165].mxu0  ;;  %v2405_v51 = vpop.permute.xlu1 %2404 }
 0x909   : > { %vm3025_vm1 = vcmp.eq.s32.totalorder %v22942_v37, %v2405_v51  ;;  %v21431_v18 = vpop.f32.mrb[166].mxu0  ;;  %v2401_v56 = vpop.permute.xlu0 %2400 }
 0x90a   : > { %vm3024_vm0 = vcmp.eq.s32.totalorder %v22942_v37, %v2401_v56  ;;  %v12202_v4 = vpop.f32.mrb[167].mxu0  ;;  %6474 = vbcast.lane.b32.xlu1 %v27747_v49, 328  ;;  %6470 = vbcast.lane.b32.xlu0 %v27747_v49, 320 }
 0x90b   : > { %vm17333_vm2 = vmpackc.low %vm3025_vm1, %vm3024_vm0  ;;  %v20902_v40 = vpop.f32.mrb[204].mxu1 }
 0x90c   : > { %v12208_v26 = vadd.f32 %v21430_v63, %v20902_v40  ;;  %v10070_v34 = vpop.f32.mrb[205].mxu1  ;;  %21484 = vmatprep.mubr.msk.bf16.mxu0 %vm17333_vm2, %v22390_v52  ;;  %v6357_v17 = vpop.permute.xlu1 %6356 }
 0x90d   : > { %v12200_v13 = vadd.f32 %v12199_v47, %v10070_v34  ;;  %vm6977_vm3 = vcmp.eq.s32.totalorder %v22942_v37, %v6357_v17  ;;  %v20903_v2 = vpop.f32.mrb[206].mxu1  ;;  %v6353_v9 = vpop.permute.xlu0 %6352 }
 0x90e   : > { %v12211_v35 = vadd.f32 %v21431_v18, %v20903_v2  ;;  %vm6976_vm5 = vcmp.eq.s32.totalorder %v22942_v37, %v6353_v9  ;;  %v10073_v30 = vpop.f32.mrb[207].mxu1  ;;  %2530 = vbcast.lane.b32.xlu1 %v27746_v27, 344  ;;  %2526 = vbcast.lane.b32.xlu0 %v27746_v27, 336 }
 0x90f   : > { %vm16813_vm8 = vmpackc.low %vm6977_vm3, %vm6976_vm5  ;;  %v12203_v15 = vadd.f32 %v12202_v4, %v10073_v30 }
 0x910   : > { %v19459_v6 = vpack.c.bf16 %v12211_v35, %v12208_v26  ;;  %20956 = vmatprep.mubr.msk.bf16.mxu1 %vm16813_vm8, %v22390_v52  ;;  %v2413_v21 = vpop.permute.xlu1 %2412 }
 0x911   : > { %v19454_v32 = vpack.c.bf16 %v12203_v15, %v12200_v13  ;;  %vm3027_vm9 = vcmp.eq.s32.totalorder %v22942_v37, %v2413_v21  ;;  %v2409_v54 = vpop.permute.xlu0 %2408 }
 0x912   : > { %19891 = vst [vmem:[%s24974_s8 + $0x698] sm:$0xff] %v19459_v6   ;;  %vm3026_vm7 = vcmp.eq.s32.totalorder %v22942_v37, %v2409_v54  ;;  %6482 = vbcast.lane.b32.xlu1 %v27747_v49, 344  ;;  %6478 = vbcast.lane.b32.xlu0 %v27747_v49, 336 }
 0x913   : > { %19890 = vst [vmem:[%s24974_s8 + $0x690] sm:$0xff] %v19454_v32   ;;  %vm17335_vm10 = vmpackc.low %vm3027_vm9, %vm3026_vm7 }
 0x914   : > { %21485 = vmatmul.mubr.msk.bf16.gmra.mrb[220].mxu0 %vm17335_vm10, %v22390_v52  ;;  %v6365_v50 = vpop.permute.xlu1 %6364 }
 0x915   : > { %vm6979_vm12 = vcmp.eq.s32.totalorder %v22942_v37, %v6365_v50  ;;  %v6361_v14 = vpop.permute.xlu0 %6360 }
 0x916   : > { %vm6978_vm4 = vcmp.eq.s32.totalorder %v22942_v37, %v6361_v14  ;;  %2538 = vbcast.lane.b32.xlu1 %v27746_v27, 360  ;;  %2534 = vbcast.lane.b32.xlu0 %v27746_v27, 352 }
 0x917   : > { %vm16815_vm6 = vmpackc.low %vm6979_vm12, %vm6978_vm4  ;;  %v21434_v61 = vpop.f32.mrb[168].mxu0 }
 0x918   : > { %20957 = vmatmul.mubr.msk.bf16.gmra.mrb[152].mxu1 %vm16815_vm6, %v22390_v52  ;;  %v12215_v48 = vpop.f32.mrb[169].mxu0  ;;  %v2424_v43 = vpop.permute.xlu1 %2423 }
 0x919   : > { %vm3029_vm11 = vcmp.eq.s32.totalorder %v22942_v37, %v2424_v43  ;;  %v21435_v38 = vpop.f32.mrb[170].mxu0  ;;  %v2420_v16 = vpop.permute.xlu0 %2419 }
 0x91a   : > { %vm3028_vm13 = vcmp.eq.s32.totalorder %v22942_v37, %v2420_v16  ;;  %v12218_v53 = vpop.f32.mrb[171].mxu0  ;;  %6490 = vbcast.lane.b32.xlu1 %v27747_v49, 360  ;;  %6486 = vbcast.lane.b32.xlu0 %v27747_v49, 352 }
 0x91b   : > { %vm17337_vm14 = vmpackc.low %vm3029_vm11, %vm3028_vm13  ;;  %v20906_v20 = vpop.f32.mrb[208].mxu1 }
 0x91c   : > { %v12224_v8 = vadd.f32 %v21434_v61, %v20906_v20  ;;  %v10086_v11 = vpop.f32.mrb[209].mxu1  ;;  %21488 = vmatprep.mubr.msk.bf16.mxu0 %vm17337_vm14, %v22390_v52  ;;  %v6376_v1 = vpop.permute.xlu1 %6375 }
 0x91d   : > { %v12216_v23 = vadd.f32 %v12215_v48, %v10086_v11  ;;  %vm6981_vm15 = vcmp.eq.s32.totalorder %v22942_v37, %v6376_v1  ;;  %v20907_v7 = vpop.f32.mrb[210].mxu1  ;;  %v6372_v60 = vpop.permute.xlu0 %6371 }
 0x91e   : > { %v12227_v25 = vadd.f32 %v21435_v38, %v20907_v7  ;;  %vm6980_vm1 = vcmp.eq.s32.totalorder %v22942_v37, %v6372_v60  ;;  %v10089_v19 = vpop.f32.mrb[211].mxu1  ;;  %2546 = vbcast.lane.b32.xlu1 %v27746_v27, 376  ;;  %2542 = vbcast.lane.b32.xlu0 %v27746_v27, 368 }
 0x91f   : > { %vm16817_vm0 = vmpackc.low %vm6981_vm15, %vm6980_vm1  ;;  %v12219_v36 = vadd.f32 %v12218_v53, %v10089_v19 }
 0x920   : > { %v19469_v58 = vpack.c.bf16 %v12227_v25, %v12224_v8  ;;  %20960 = vmatprep.mubr.msk.bf16.mxu1 %vm16817_vm0, %v22390_v52  ;;  %v2432_v29 = vpop.permute.xlu1 %2431 }
 0x921   : > { %v19464_v10 = vpack.c.bf16 %v12219_v36, %v12216_v23  ;;  %vm3031_vm2 = vcmp.eq.s32.totalorder %v22942_v37, %v2432_v29  ;;  %v2428_v62 = vpop.permute.xlu0 %2427 }
 0x922   : > { %19893 = vst [vmem:[%s24974_s8 + $0x6a8] sm:$0xff] %v19469_v58   ;;  %vm3030_vm3 = vcmp.eq.s32.totalorder %v22942_v37, %v2428_v62  ;;  %6498 = vbcast.lane.b32.xlu1 %v27747_v49, 376  ;;  %6494 = vbcast.lane.b32.xlu0 %v27747_v49, 368 }
 0x923   : > { %19892 = vst [vmem:[%s24974_s8 + $0x6a0] sm:$0xff] %v19464_v10   ;;  %vm17339_vm5 = vmpackc.low %vm3031_vm2, %vm3030_vm3 }
 0x924   : > { %21489 = vmatmul.mubr.msk.bf16.gmra.mrb[224].mxu0 %vm17339_vm5, %v22390_v52  ;;  %v6384_v27 = vpop.permute.xlu1 %6383 }
 0x925   : > { %vm6983_vm8 = vcmp.eq.s32.totalorder %v22942_v37, %v6384_v27  ;;  %v6380_v28 = vpop.permute.xlu0 %6379 }
 0x926   : > { %vm6982_vm9 = vcmp.eq.s32.totalorder %v22942_v37, %v6380_v28 }
 0x927   : > { %vm16819_vm7 = vmpackc.low %vm6983_vm8, %vm6982_vm9  ;;  %v21438_v31 = vpop.f32.mrb[172].mxu0 }
 0x928   : > { %20961 = vmatmul.mubr.msk.bf16.gmra.mrb[156].mxu1 %vm16819_vm7, %v22390_v52  ;;  %v12231_v22 = vpop.f32.mrb[173].mxu0  ;;  %v2440_v59 = vpop.permute.xlu1 %2439 }
 0x929   : > { %vm3033_vm10 = vcmp.eq.s32.totalorder %v22942_v37, %v2440_v59  ;;  %v21439_v5 = vpop.f32.mrb[174].mxu0  ;;  %v2436_v39 = vpop.permute.xlu0 %2435 }
 0x92a   : > { %vm3032_vm12 = vcmp.eq.s32.totalorder %v22942_v37, %v2436_v39  ;;  %v12234_v49 = vpop.f32.mrb[175].mxu0 }
 0x92b   : > { %vm17341_vm4 = vmpackc.low %vm3033_vm10, %vm3032_vm12  ;;  %v20910_v3 = vpop.f32.mrb[212].mxu1 }
 0x92c   : > { %v12240_v42 = vadd.f32 %v21438_v31, %v20910_v3  ;;  %v10102_v12 = vpop.f32.mrb[213].mxu1  ;;  %21492 = vmatprep.mubr.msk.bf16.mxu0 %vm17341_vm4, %v22390_v52  ;;  %v6392_v33 = vpop.permute.xlu1 %6391 }
 0x92d   : > { %v12232_v41 = vadd.f32 %v12231_v22, %v10102_v12  ;;  %vm6985_vm6 = vcmp.eq.s32.totalorder %v22942_v37, %v6392_v33  ;;  %v20911_v57 = vpop.f32.mrb[214].mxu1  ;;  %v6388_v44 = vpop.permute.xlu0 %6387 }
 0x92e   : > { %v12243_v0 = vadd.f32 %v21439_v5, %v20911_v57  ;;  %vm6984_vm11 = vcmp.eq.s32.totalorder %v22942_v37, %v6388_v44  ;;  %v10105_v24 = vpop.f32.mrb[215].mxu1 }
 0x92f   : > { %vm16821_vm13 = vmpackc.low %vm6985_vm6, %vm6984_vm11  ;;  %v12235_v46 = vadd.f32 %v12234_v49, %v10105_v24 }
 0x930   : > { %v19479_v55 = vpack.c.bf16 %v12243_v0, %v12240_v42  ;;  %20964 = vmatprep.mubr.msk.bf16.mxu1 %vm16821_vm13, %v22390_v52  ;;  %v2448_v45 = vpop.permute.xlu1 %2447 }
 0x931   : > { %v19474_v63 = vpack.c.bf16 %v12235_v46, %v12232_v41  ;;  %vm3035_vm14 = vcmp.eq.s32.totalorder %v22942_v37, %v2448_v45  ;;  %v2444_v47 = vpop.permute.xlu0 %2443 }
 0x932   : > { %19895 = vst [vmem:[%s24974_s8 + $0x6b8] sm:$0xff] %v19479_v55   ;;  %vm3034_vm15 = vcmp.eq.s32.totalorder %v22942_v37, %v2444_v47 }
 0x933   : > { %19894 = vst [vmem:[%s24974_s8 + $0x6b0] sm:$0xff] %v19474_v63   ;;  %vm17343_vm1 = vmpackc.low %vm3035_vm14, %vm3034_vm15 }
 0x934   : > { %21493 = vmatmul.mubr.msk.bf16.gmra.mrb[228].mxu0 %vm17343_vm1, %v22390_v52  ;;  %v6400_v51 = vpop.permute.xlu1 %6399 }
 0x935   : > { %vm6987_vm0 = vcmp.eq.s32.totalorder %v22942_v37, %v6400_v51  ;;  %v6396_v18 = vpop.permute.xlu0 %6395 }
 0x936   : > { %vm6986_vm2 = vcmp.eq.s32.totalorder %v22942_v37, %v6396_v18 }
 0x937   : > { %vm16823_vm3 = vmpackc.low %vm6987_vm0, %vm6986_vm2  ;;  %v21442_v56 = vpop.f32.mrb[176].mxu0 }
 0x938   : > { %20965 = vmatmul.mubr.msk.bf16.gmra.mrb[160].mxu1 %vm16823_vm3, %v22390_v52  ;;  %v12247_v4 = vpop.f32.mrb[177].mxu0  ;;  %v2456_v40 = vpop.permute.xlu1 %2455 }
 0x939   : > { %vm3037_vm5 = vcmp.eq.s32.totalorder %v22942_v37, %v2456_v40  ;;  %v21443_v26 = vpop.f32.mrb[178].mxu0  ;;  %v2452_v34 = vpop.permute.xlu0 %2451 }
 0x93a   : > { %vm3036_vm8 = vcmp.eq.s32.totalorder %v22942_v37, %v2452_v34  ;;  %v12250_v17 = vpop.f32.mrb[179].mxu0 }
 0x93b   : > { %vm17345_vm9 = vmpackc.low %vm3037_vm5, %vm3036_vm8  ;;  %v20914_v13 = vpop.f32.mrb[216].mxu1 }
 0x93c   : > { %v12256_v2 = vadd.f32 %v21442_v56, %v20914_v13  ;;  %v10118_v9 = vpop.f32.mrb[217].mxu1  ;;  %21496 = vmatprep.mubr.msk.bf16.mxu0 %vm17345_vm9, %v22390_v52  ;;  %v6408_v35 = vpop.permute.xlu1 %6407 }
 0x93d   : > { %v12248_v30 = vadd.f32 %v12247_v4, %v10118_v9  ;;  %vm6989_vm7 = vcmp.eq.s32.totalorder %v22942_v37, %v6408_v35  ;;  %v20915_v15 = vpop.f32.mrb[218].mxu1  ;;  %v6404_v6 = vpop.permute.xlu0 %6403 }
 0x93e   : > { %v12259_v21 = vadd.f32 %v21443_v26, %v20915_v15  ;;  %vm6988_vm10 = vcmp.eq.s32.totalorder %v22942_v37, %v6404_v6  ;;  %v10121_v32 = vpop.f32.mrb[219].mxu1 }
 0x93f   : > { %vm16825_vm12 = vmpackc.low %vm6989_vm7, %vm6988_vm10  ;;  %v12251_v54 = vadd.f32 %v12250_v17, %v10121_v32 }
 0x940   : > { %v19489_v50 = vpack.c.bf16 %v12259_v21, %v12256_v2  ;;  %20968 = vmatprep.mubr.msk.bf16.mxu1 %vm16825_vm12, %v22390_v52  ;;  %v2464_v14 = vpop.permute.xlu1 %2463 }
 0x941   : > { %v19484_v61 = vpack.c.bf16 %v12251_v54, %v12248_v30  ;;  %vm3039_vm4 = vcmp.eq.s32.totalorder %v22942_v37, %v2464_v14  ;;  %v2460_v48 = vpop.permute.xlu0 %2459 }
 0x942   : > { %19897 = vst [vmem:[%s24974_s8 + $0x6c8] sm:$0xff] %v19489_v50   ;;  %vm3038_vm6 = vcmp.eq.s32.totalorder %v22942_v37, %v2460_v48 }
 0x943   : > { %19896 = vst [vmem:[%s24974_s8 + $0x6c0] sm:$0xff] %v19484_v61   ;;  %vm17347_vm11 = vmpackc.low %vm3039_vm4, %vm3038_vm6 }
 0x944   : > { %21497 = vmatmul.mubr.msk.bf16.gmra.mrb[232].mxu0 %vm17347_vm11, %v22390_v52  ;;  %v6416_v43 = vpop.permute.xlu1 %6415 }
 0x945   : > { %vm6991_vm13 = vcmp.eq.s32.totalorder %v22942_v37, %v6416_v43  ;;  %v6412_v38 = vpop.permute.xlu0 %6411 }
 0x946   : > { %vm6990_vm14 = vcmp.eq.s32.totalorder %v22942_v37, %v6412_v38 }
 0x947   : > { %vm16827_vm15 = vmpackc.low %vm6991_vm13, %vm6990_vm14  ;;  %v21446_v16 = vpop.f32.mrb[180].mxu0 }
 0x948   : > { %20969 = vmatmul.mubr.msk.bf16.gmra.mrb[164].mxu1 %vm16827_vm15, %v22390_v52  ;;  %v12263_v53 = vpop.f32.mrb[181].mxu0  ;;  %v2472_v20 = vpop.permute.xlu1 %2471 }
 0x949   : > { %vm3041_vm1 = vcmp.eq.s32.totalorder %v22942_v37, %v2472_v20  ;;  %v21447_v8 = vpop.f32.mrb[182].mxu0  ;;  %v2468_v11 = vpop.permute.xlu0 %2467 }
 0x94a   : > { %vm3040_vm0 = vcmp.eq.s32.totalorder %v22942_v37, %v2468_v11  ;;  %v12266_v1 = vpop.f32.mrb[183].mxu0 }
 0x94b   : > { %vm17349_vm2 = vmpackc.low %vm3041_vm1, %vm3040_vm0  ;;  %v20918_v23 = vpop.f32.mrb[220].mxu1 }
 0x94c   : > { %v12272_v7 = vadd.f32 %v21446_v16, %v20918_v23  ;;  %v10134_v60 = vpop.f32.mrb[221].mxu1  ;;  %21500 = vmatprep.mubr.msk.bf16.mxu0 %vm17349_vm2, %v22390_v52  ;;  %v6424_v25 = vpop.permute.xlu1 %6423 }
 0x94d   : > { %v12264_v19 = vadd.f32 %v12263_v53, %v10134_v60  ;;  %vm6993_vm3 = vcmp.eq.s32.totalorder %v22942_v37, %v6424_v25  ;;  %v20919_v36 = vpop.f32.mrb[222].mxu1  ;;  %v6420_v58 = vpop.permute.xlu0 %6419 }
 0x94e   : > { %v12275_v29 = vadd.f32 %v21447_v8, %v20919_v36  ;;  %vm6992_vm5 = vcmp.eq.s32.totalorder %v22942_v37, %v6420_v58  ;;  %v10137_v10 = vpop.f32.mrb[223].mxu1 }
 0x94f   : > { %vm16829_vm8 = vmpackc.low %vm6993_vm3, %vm6992_vm5  ;;  %v12267_v62 = vadd.f32 %v12266_v1, %v10137_v10 }
 0x950   : > { %v19499_v27 = vpack.c.bf16 %v12275_v29, %v12272_v7  ;;  %20972 = vmatprep.mubr.msk.bf16.mxu1 %vm16829_vm8, %v22390_v52  ;;  %v2480_v28 = vpop.permute.xlu1 %2479 }
 0x951   : > { %v19494_v31 = vpack.c.bf16 %v12267_v62, %v12264_v19  ;;  %vm3043_vm9 = vcmp.eq.s32.totalorder %v22942_v37, %v2480_v28  ;;  %v2476_v22 = vpop.permute.xlu0 %2475 }
 0x952   : > { %19899 = vst [vmem:[%s24974_s8 + $0x6d8] sm:$0xff] %v19499_v27   ;;  %vm3042_vm7 = vcmp.eq.s32.totalorder %v22942_v37, %v2476_v22 }
 0x953   : > { %19898 = vst [vmem:[%s24974_s8 + $0x6d0] sm:$0xff] %v19494_v31   ;;  %vm17351_vm10 = vmpackc.low %vm3043_vm9, %vm3042_vm7 }
 0x954   : > { %21501 = vmatmul.mubr.msk.bf16.gmra.mrb[236].mxu0 %vm17351_vm10, %v22390_v52  ;;  %v6432_v59 = vpop.permute.xlu1 %6431 }
 0x955   : > { %vm6995_vm12 = vcmp.eq.s32.totalorder %v22942_v37, %v6432_v59  ;;  %v6428_v5 = vpop.permute.xlu0 %6427 }
 0x956   : > { %vm6994_vm4 = vcmp.eq.s32.totalorder %v22942_v37, %v6428_v5 }
 0x957   : > { %vm16831_vm6 = vmpackc.low %vm6995_vm12, %vm6994_vm4  ;;  %v21450_v39 = vpop.f32.mrb[184].mxu0 }
 0x958   : > { %20973 = vmatmul.mubr.msk.bf16.gmra.mrb[168].mxu1 %vm16831_vm6, %v22390_v52  ;;  %v12279_v49 = vpop.f32.mrb[185].mxu0  ;;  %v2491_v3 = vpop.permute.xlu1 %2490 }
 0x959   : > { %vm3045_vm11 = vcmp.eq.s32.totalorder %v22942_v37, %v2491_v3  ;;  %v21451_v42 = vpop.f32.mrb[186].mxu0  ;;  %v2487_v12 = vpop.permute.xlu0 %2486 }
 0x95a   : > { %vm3044_vm13 = vcmp.eq.s32.totalorder %v22942_v37, %v2487_v12  ;;  %v12282_v33 = vpop.f32.mrb[187].mxu0 }
 0x95b   : > { %vm17353_vm14 = vmpackc.low %vm3045_vm11, %vm3044_vm13  ;;  %v20922_v41 = vpop.f32.mrb[224].mxu1 }
 0x95c   : > { %v12288_v57 = vadd.f32 %v21450_v39, %v20922_v41  ;;  %v10150_v44 = vpop.f32.mrb[225].mxu1  ;;  %21504 = vmatprep.mubr.msk.bf16.mxu0 %vm17353_vm14, %v22390_v52  ;;  %v6443_v0 = vpop.permute.xlu1 %6442 }
 0x95d   : > { %v12280_v24 = vadd.f32 %v12279_v49, %v10150_v44  ;;  %vm6997_vm15 = vcmp.eq.s32.totalorder %v22942_v37, %v6443_v0  ;;  %v20923_v46 = vpop.f32.mrb[226].mxu1  ;;  %v6439_v55 = vpop.permute.xlu0 %6438 }
 0x95e   : > { %v12291_v45 = vadd.f32 %v21451_v42, %v20923_v46  ;;  %vm6996_vm1 = vcmp.eq.s32.totalorder %v22942_v37, %v6439_v55  ;;  %v10153_v63 = vpop.f32.mrb[227].mxu1 }
 0x95f   : > { %vm16833_vm0 = vmpackc.low %vm6997_vm15, %vm6996_vm1  ;;  %v12283_v47 = vadd.f32 %v12282_v33, %v10153_v63 }
 0x960   : > { %v19509_v51 = vpack.c.bf16 %v12291_v45, %v12288_v57  ;;  %20976 = vmatprep.mubr.msk.bf16.mxu1 %vm16833_vm0, %v22390_v52  ;;  %v2499_v18 = vpop.permute.xlu1 %2498 }
 0x961   : > { %v19504_v56 = vpack.c.bf16 %v12283_v47, %v12280_v24  ;;  %vm3047_vm2 = vcmp.eq.s32.totalorder %v22942_v37, %v2499_v18  ;;  %v2495_v4 = vpop.permute.xlu0 %2494 }
 0x962   : > { %19901 = vst [vmem:[%s24974_s8 + $0x6e8] sm:$0xff] %v19509_v51   ;;  %vm3046_vm3 = vcmp.eq.s32.totalorder %v22942_v37, %v2495_v4 }
 0x963   : > { %19900 = vst [vmem:[%s24974_s8 + $0x6e0] sm:$0xff] %v19504_v56   ;;  %vm17355_vm5 = vmpackc.low %vm3047_vm2, %vm3046_vm3 }
 0x964   : > { %21505 = vmatmul.mubr.msk.bf16.gmra.mrb[240].mxu0 %vm17355_vm5, %v22390_v52  ;;  %v6451_v40 = vpop.permute.xlu1 %6450 }
 0x965   : > { %vm6999_vm8 = vcmp.eq.s32.totalorder %v22942_v37, %v6451_v40  ;;  %v6447_v26 = vpop.permute.xlu0 %6446 }
 0x966   : > { %vm6998_vm9 = vcmp.eq.s32.totalorder %v22942_v37, %v6447_v26 }
 0x967   : > { %vm16835_vm7 = vmpackc.low %vm6999_vm8, %vm6998_vm9  ;;  %v21454_v34 = vpop.f32.mrb[188].mxu0 }
 0x968   : > { %20977 = vmatmul.mubr.msk.bf16.gmra.mrb[172].mxu1 %vm16835_vm7, %v22390_v52  ;;  %v12295_v17 = vpop.f32.mrb[189].mxu0  ;;  %v2507_v13 = vpop.permute.xlu1 %2506 }
 0x969   : > { %vm3049_vm10 = vcmp.eq.s32.totalorder %v22942_v37, %v2507_v13  ;;  %v21455_v2 = vpop.f32.mrb[190].mxu0  ;;  %v2503_v9 = vpop.permute.xlu0 %2502 }
 0x96a   : > { %vm3048_vm12 = vcmp.eq.s32.totalorder %v22942_v37, %v2503_v9  ;;  %v12298_v35 = vpop.f32.mrb[191].mxu0 }
 0x96b   : > { %vm17357_vm4 = vmpackc.low %vm3049_vm10, %vm3048_vm12  ;;  %v20926_v30 = vpop.f32.mrb[228].mxu1 }
 0x96c   : > { %v12304_v15 = vadd.f32 %v21454_v34, %v20926_v30  ;;  %v10166_v6 = vpop.f32.mrb[229].mxu1  ;;  %21508 = vmatprep.mubr.msk.bf16.mxu0 %vm17357_vm4, %v22390_v52  ;;  %v6459_v21 = vpop.permute.xlu1 %6458 }
 0x96d   : > { %v12296_v32 = vadd.f32 %v12295_v17, %v10166_v6  ;;  %vm7001_vm6 = vcmp.eq.s32.totalorder %v22942_v37, %v6459_v21  ;;  %v20927_v54 = vpop.f32.mrb[230].mxu1  ;;  %v6455_v50 = vpop.permute.xlu0 %6454 }
 0x96e   : > { %v12307_v14 = vadd.f32 %v21455_v2, %v20927_v54  ;;  %vm7000_vm11 = vcmp.eq.s32.totalorder %v22942_v37, %v6455_v50  ;;  %v10169_v61 = vpop.f32.mrb[231].mxu1 }
 0x96f   : > { %vm16837_vm13 = vmpackc.low %vm7001_vm6, %vm7000_vm11  ;;  %v12299_v48 = vadd.f32 %v12298_v35, %v10169_v61 }
 0x970   : > { %v19519_v43 = vpack.c.bf16 %v12307_v14, %v12304_v15  ;;  %20980 = vmatprep.mubr.msk.bf16.mxu1 %vm16837_vm13, %v22390_v52  ;;  %v2515_v38 = vpop.permute.xlu1 %2514 }
 0x971   : > { %v19514_v16 = vpack.c.bf16 %v12299_v48, %v12296_v32  ;;  %vm3051_vm14 = vcmp.eq.s32.totalorder %v22942_v37, %v2515_v38  ;;  %v2511_v53 = vpop.permute.xlu0 %2510 }
 0x972   : > { %19903 = vst [vmem:[%s24974_s8 + $0x6f8] sm:$0xff] %v19519_v43   ;;  %vm3050_vm15 = vcmp.eq.s32.totalorder %v22942_v37, %v2511_v53 }
 0x973   : > { %19902 = vst [vmem:[%s24974_s8 + $0x6f0] sm:$0xff] %v19514_v16   ;;  %vm17359_vm1 = vmpackc.low %vm3051_vm14, %vm3050_vm15 }
 0x974   : > { %21509 = vmatmul.mubr.msk.bf16.gmra.mrb[244].mxu0 %vm17359_vm1, %v22390_v52  ;;  %v6467_v20 = vpop.permute.xlu1 %6466 }
 0x975   : > { %vm7003_vm0 = vcmp.eq.s32.totalorder %v22942_v37, %v6467_v20  ;;  %v6463_v8 = vpop.permute.xlu0 %6462 }
 0x976   : > { %vm7002_vm2 = vcmp.eq.s32.totalorder %v22942_v37, %v6463_v8 }
 0x977   : > { %vm16839_vm3 = vmpackc.low %vm7003_vm0, %vm7002_vm2  ;;  %v21458_v11 = vpop.f32.mrb[192].mxu0 }
 0x978   : > { %20981 = vmatmul.mubr.msk.bf16.gmra.mrb[176].mxu1 %vm16839_vm3, %v22390_v52  ;;  %v12311_v1 = vpop.f32.mrb[193].mxu0  ;;  %v2523_v23 = vpop.permute.xlu1 %2522 }
 0x979   : > { %vm3053_vm5 = vcmp.eq.s32.totalorder %v22942_v37, %v2523_v23  ;;  %v21459_v7 = vpop.f32.mrb[194].mxu0  ;;  %v2519_v60 = vpop.permute.xlu0 %2518 }
 0x97a   : > { %vm3052_vm8 = vcmp.eq.s32.totalorder %v22942_v37, %v2519_v60  ;;  %v12314_v25 = vpop.f32.mrb[195].mxu0 }
 0x97b   : > { %vm17361_vm9 = vmpackc.low %vm3053_vm5, %vm3052_vm8  ;;  %v20930_v19 = vpop.f32.mrb[232].mxu1 }
 0x97c   : > { %v12320_v36 = vadd.f32 %v21458_v11, %v20930_v19  ;;  %v10182_v58 = vpop.f32.mrb[233].mxu1  ;;  %21512 = vmatprep.mubr.msk.bf16.mxu0 %vm17361_vm9, %v22390_v52  ;;  %v6475_v29 = vpop.permute.xlu1 %6474 }
 0x97d   : > { %v12312_v10 = vadd.f32 %v12311_v1, %v10182_v58  ;;  %vm7005_vm7 = vcmp.eq.s32.totalorder %v22942_v37, %v6475_v29  ;;  %v20931_v62 = vpop.f32.mrb[234].mxu1  ;;  %v6471_v27 = vpop.permute.xlu0 %6470 }
 0x97e   : > { %v12323_v28 = vadd.f32 %v21459_v7, %v20931_v62  ;;  %vm7004_vm10 = vcmp.eq.s32.totalorder %v22942_v37, %v6471_v27  ;;  %v10185_v31 = vpop.f32.mrb[235].mxu1 }
 0x97f   : > { %vm16841_vm12 = vmpackc.low %vm7005_vm7, %vm7004_vm10  ;;  %v12315_v22 = vadd.f32 %v12314_v25, %v10185_v31 }
 0x980   : > { %v19529_v59 = vpack.c.bf16 %v12323_v28, %v12320_v36  ;;  %20984 = vmatprep.mubr.msk.bf16.mxu1 %vm16841_vm12, %v22390_v52  ;;  %v2531_v5 = vpop.permute.xlu1 %2530 }
 0x981   : > { %v19524_v39 = vpack.c.bf16 %v12315_v22, %v12312_v10  ;;  %vm3055_vm4 = vcmp.eq.s32.totalorder %v22942_v37, %v2531_v5  ;;  %v2527_v49 = vpop.permute.xlu0 %2526 }
 0x982   : > { %19905 = vst [vmem:[%s24974_s8 + $0x708] sm:$0xff] %v19529_v59   ;;  %vm3054_vm6 = vcmp.eq.s32.totalorder %v22942_v37, %v2527_v49 }
 0x983   : > { %19904 = vst [vmem:[%s24974_s8 + $0x700] sm:$0xff] %v19524_v39   ;;  %vm17363_vm11 = vmpackc.low %vm3055_vm4, %vm3054_vm6 }
 0x984   : > { %21513 = vmatmul.mubr.msk.bf16.gmra.mrb[248].mxu0 %vm17363_vm11, %v22390_v52  ;;  %v6483_v3 = vpop.permute.xlu1 %6482 }
 0x985   : > { %vm7007_vm13 = vcmp.eq.s32.totalorder %v22942_v37, %v6483_v3  ;;  %v6479_v42 = vpop.permute.xlu0 %6478 }
 0x986   : > { %vm7006_vm14 = vcmp.eq.s32.totalorder %v22942_v37, %v6479_v42 }
 0x987   : > { %vm16843_vm15 = vmpackc.low %vm7007_vm13, %vm7006_vm14  ;;  %v21462_v12 = vpop.f32.mrb[196].mxu0 }
 0x988   : > { %20985 = vmatmul.mubr.msk.bf16.gmra.mrb[180].mxu1 %vm16843_vm15, %v22390_v52  ;;  %v12327_v33 = vpop.f32.mrb[197].mxu0  ;;  %v2539_v41 = vpop.permute.xlu1 %2538 }
 0x989   : > { %vm3057_vm1 = vcmp.eq.s32.totalorder %v22942_v37, %v2539_v41  ;;  %v21463_v57 = vpop.f32.mrb[198].mxu0  ;;  %v2535_v44 = vpop.permute.xlu0 %2534 }
 0x98a   : > { %vm3056_vm0 = vcmp.eq.s32.totalorder %v22942_v37, %v2535_v44  ;;  %v12330_v0 = vpop.f32.mrb[199].mxu0 }
 0x98b   : > { %vm17365_vm2 = vmpackc.low %vm3057_vm1, %vm3056_vm0  ;;  %v20934_v24 = vpop.f32.mrb[236].mxu1 }
 0x98c   : > { %v12336_v46 = vadd.f32 %v21462_v12, %v20934_v24  ;;  %v10198_v55 = vpop.f32.mrb[237].mxu1  ;;  %21516 = vmatprep.mubr.msk.bf16.mxu0 %vm17365_vm2, %v22390_v52  ;;  %v6491_v45 = vpop.permute.xlu1 %6490 }
 0x98d   : > { %v12328_v63 = vadd.f32 %v12327_v33, %v10198_v55  ;;  %vm7009_vm3 = vcmp.eq.s32.totalorder %v22942_v37, %v6491_v45  ;;  %v20935_v47 = vpop.f32.mrb[238].mxu1  ;;  %v6487_v51 = vpop.permute.xlu0 %6486 }
 0x98e   : > { %v12339_v18 = vadd.f32 %v21463_v57, %v20935_v47  ;;  %vm7008_vm5 = vcmp.eq.s32.totalorder %v22942_v37, %v6487_v51  ;;  %v10201_v56 = vpop.f32.mrb[239].mxu1 }
 0x98f   : > { %vm16845_vm8 = vmpackc.low %vm7009_vm3, %vm7008_vm5  ;;  %v12331_v4 = vadd.f32 %v12330_v0, %v10201_v56 }
 0x990   : > { %v19539_v40 = vpack.c.bf16 %v12339_v18, %v12336_v46  ;;  %20988 = vmatprep.mubr.msk.bf16.mxu1 %vm16845_vm8, %v22390_v52  ;;  %v2547_v26 = vpop.permute.xlu1 %2546 }
 0x991   : > { %v19534_v34 = vpack.c.bf16 %v12331_v4, %v12328_v63  ;;  %vm3059_vm9 = vcmp.eq.s32.totalorder %v22942_v37, %v2547_v26  ;;  %v2543_v17 = vpop.permute.xlu0 %2542 }
 0x992   : > { %19907 = vst [vmem:[%s24974_s8 + $0x718] sm:$0xff] %v19539_v40   ;;  %vm3058_vm7 = vcmp.eq.s32.totalorder %v22942_v37, %v2543_v17 }
 0x993   : > { %19906 = vst [vmem:[%s24974_s8 + $0x710] sm:$0xff] %v19534_v34   ;;  %vm17367_vm10 = vmpackc.low %vm3059_vm9, %vm3058_vm7 }
 0x994   : > { %21517 = vmatmul.mubr.msk.bf16.gmra.mrb[252].mxu0 %vm17367_vm10, %v22390_v52  ;;  %v6499_v13 = vpop.permute.xlu1 %6498 }
 0x995   : > { %vm7011_vm12 = vcmp.eq.s32.totalorder %v22942_v37, %v6499_v13  ;;  %v6495_v2 = vpop.permute.xlu0 %6494 }
 0x996   : > { %vm7010_vm4 = vcmp.eq.s32.totalorder %v22942_v37, %v6495_v2 }
 0x997   : > { %vm16847_vm6 = vmpackc.low %vm7011_vm12, %vm7010_vm4  ;;  %v21466_v9 = vpop.f32.mrb[200].mxu0 }
 0x998   : > { %20989 = vmatmul.mubr.msk.bf16.gmra.mrb[184].mxu1 %vm16847_vm6, %v22390_v52  ;;  %v12343_v35 = vpop.f32.mrb[201].mxu0 }
 0x999   : > { %v21467_v30 = vpop.f32.mrb[202].mxu0 }
 0x99a   : > { %v12346_v15 = vpop.f32.mrb[203].mxu0 }
 0x99b   : > { %v20938_v6 = vpop.f32.mrb[240].mxu1 }
 0x99c   : > { %v12352_v21 = vadd.f32 %v21466_v9, %v20938_v6  ;;  %v10214_v32 = vpop.f32.mrb[241].mxu1 }
 0x99d   : > { %v12344_v54 = vadd.f32 %v12343_v35, %v10214_v32  ;;  %v20939_v50 = vpop.f32.mrb[242].mxu1 }
 0x99e   : > { %v12355_v14 = vadd.f32 %v21467_v30, %v20939_v50  ;;  %v10217_v61 = vpop.f32.mrb[243].mxu1 }
 0x99f   : > { %v12347_v48 = vadd.f32 %v12346_v15, %v10217_v61 }
 0x9a0   : > { %v19549_v43 = vpack.c.bf16 %v12355_v14, %v12352_v21 }
 0x9a1   : > { %v19544_v38 = vpack.c.bf16 %v12347_v48, %v12344_v54 }
 0x9a2   : > { %19909 = vst [vmem:[%s24974_s8 + $0x728] sm:$0xff] %v19549_v43  }
 0x9a3   : > { %19908 = vst [vmem:[%s24974_s8 + $0x720] sm:$0xff] %v19544_v38  }
 0x9a7   : > { %v21470_v37 = vpop.f32.mrb[204].mxu0 }
 0x9a8   : > { %v12359_v16 = vpop.f32.mrb[205].mxu0 }
 0x9a9   : > { %v21471_v52 = vpop.f32.mrb[206].mxu0 }
 0x9aa   : > { %v12362_v53 = vpop.f32.mrb[207].mxu0 }
 0x9ab   : > { %v20942_v20 = vpop.f32.mrb[244].mxu1 }
 0x9ac   : > { %v12368_v8 = vadd.f32 %v21470_v37, %v20942_v20  ;;  %v10230_v11 = vpop.f32.mrb[245].mxu1 }
 0x9ad   : > { %v12360_v1 = vadd.f32 %v12359_v16, %v10230_v11  ;;  %v20943_v23 = vpop.f32.mrb[246].mxu1 }
 0x9ae   : > { %v12371_v7 = vadd.f32 %v21471_v52, %v20943_v23  ;;  %v10233_v60 = vpop.f32.mrb[247].mxu1 }
 0x9af   : > { %v12363_v25 = vadd.f32 %v12362_v53, %v10233_v60 }
 0x9b0   : > { %v19559_v19 = vpack.c.bf16 %v12371_v7, %v12368_v8 }
 0x9b1   : > { %v19554_v36 = vpack.c.bf16 %v12363_v25, %v12360_v1 }
 0x9b2   : > { %19911 = vst [vmem:[%s24974_s8 + $0x738] sm:$0xff] %v19559_v19  }
 0x9b3   : > { %19910 = vst [vmem:[%s24974_s8 + $0x730] sm:$0xff] %v19554_v36  }
 0x9b7   : > { %v21474_v58 = vpop.f32.mrb[208].mxu0 }
 0x9b8   : > { %v12375_v29 = vpop.f32.mrb[209].mxu0 }
 0x9b9   : > { %v21475_v10 = vpop.f32.mrb[210].mxu0 }
 0x9ba   : > { %v12378_v62 = vpop.f32.mrb[211].mxu0 }
 0x9bb   : > { %v20946_v27 = vpop.f32.mrb[248].mxu1 }
 0x9bc   : > { %v12384_v28 = vadd.f32 %v21474_v58, %v20946_v27  ;;  %v10246_v31 = vpop.f32.mrb[249].mxu1 }
 0x9bd   : > { %v12376_v22 = vadd.f32 %v12375_v29, %v10246_v31  ;;  %v20947_v59 = vpop.f32.mrb[250].mxu1 }
 0x9be   : > { %v12387_v5 = vadd.f32 %v21475_v10, %v20947_v59  ;;  %v10249_v39 = vpop.f32.mrb[251].mxu1 }
 0x9bf   : > { %v12379_v49 = vadd.f32 %v12378_v62, %v10249_v39 }
 0x9c0   : > { %v19569_v3 = vpack.c.bf16 %v12387_v5, %v12384_v28 }
 0x9c1   : > { %v19564_v42 = vpack.c.bf16 %v12379_v49, %v12376_v22 }
 0x9c2   : > { %19913 = vst [vmem:[%s24974_s8 + $0x748] sm:$0xff] %v19569_v3  }
 0x9c3   : > { %19912 = vst [vmem:[%s24974_s8 + $0x740] sm:$0xff] %v19564_v42  }
 0x9c7   : > { %v21478_v12 = vpop.f32.mrb[212].mxu0 }
 0x9c8   : > { %v12391_v33 = vpop.f32.mrb[213].mxu0 }
 0x9c9   : > { %v21479_v41 = vpop.f32.mrb[214].mxu0 }
 0x9ca   : > { %v12394_v57 = vpop.f32.mrb[215].mxu0 }
 0x9cb   : > { %v20950_v44 = vpop.f32.mrb[252].mxu1 }
 0x9cc   : > { %v12400_v0 = vadd.f32 %v21478_v12, %v20950_v44  ;;  %v10262_v24 = vpop.f32.mrb[253].mxu1 }
 0x9cd   : > { %v12392_v46 = vadd.f32 %v12391_v33, %v10262_v24  ;;  %v20951_v55 = vpop.f32.mrb[254].mxu1 }
 0x9ce   : > { %v12403_v45 = vadd.f32 %v21479_v41, %v20951_v55  ;;  %v10265_v63 = vpop.f32.mrb[255].mxu1 }
 0x9cf   : > { %v12395_v47 = vadd.f32 %v12394_v57, %v10265_v63 }
 0x9d0   : > { %v19579_v51 = vpack.c.bf16 %v12403_v45, %v12400_v0 }
 0x9d1   : > { %v19574_v18 = vpack.c.bf16 %v12395_v47, %v12392_v46 }
 0x9d2   : > { %19915 = vst [vmem:[%s24974_s8 + $0x758] sm:$0xff] %v19579_v51  }
 0x9d3   : > { %19914 = vst [vmem:[%s24974_s8 + $0x750] sm:$0xff] %v19574_v18  }
 0x9d7   : > { %v21482_v56 = vpop.f32.mrb[216].mxu0 }
 0x9d8   : > { %v12407_v4 = vpop.f32.mrb[217].mxu0 }
 0x9d9   : > { %v21483_v40 = vpop.f32.mrb[218].mxu0 }
 0x9da   : > { %v12410_v26 = vpop.f32.mrb[219].mxu0 }
 0x9db   : > { %v20954_v34 = vpop.f32.mrb[148].mxu1 }
 0x9dc   : > { %v12416_v17 = vadd.f32 %v21482_v56, %v20954_v34  ;;  %v10278_v13 = vpop.f32.mrb[149].mxu1 }
 0x9dd   : > { %v12408_v2 = vadd.f32 %v12407_v4, %v10278_v13  ;;  %v20955_v9 = vpop.f32.mrb[150].mxu1 }
 0x9de   : > { %v12419_v35 = vadd.f32 %v21483_v40, %v20955_v9  ;;  %v10281_v30 = vpop.f32.mrb[151].mxu1 }
 0x9df   : > { %v12411_v15 = vadd.f32 %v12410_v26, %v10281_v30 }
 0x9e0   : > { %v19589_v6 = vpack.c.bf16 %v12419_v35, %v12416_v17 }
 0x9e1   : > { %v19584_v21 = vpack.c.bf16 %v12411_v15, %v12408_v2 }
 0x9e2   : > { %19917 = vst [vmem:[%s24974_s8 + $0x768] sm:$0xff] %v19589_v6  }
 0x9e3   : > { %19916 = vst [vmem:[%s24974_s8 + $0x760] sm:$0xff] %v19584_v21  }
 0x9e7   : > { %v21486_v32 = vpop.f32.mrb[220].mxu0 }
 0x9e8   : > { %v12423_v54 = vpop.f32.mrb[221].mxu0 }
 0x9e9   : > { %v21487_v50 = vpop.f32.mrb[222].mxu0 }
 0x9ea   : > { %v12426_v14 = vpop.f32.mrb[223].mxu0 }
 0x9eb   : > { %v20958_v61 = vpop.f32.mrb[152].mxu1 }
 0x9ec   : > { %v12432_v48 = vadd.f32 %v21486_v32, %v20958_v61  ;;  %v10294_v43 = vpop.f32.mrb[153].mxu1 }
 0x9ed   : > { %v12424_v38 = vadd.f32 %v12423_v54, %v10294_v43  ;;  %v20959_v37 = vpop.f32.mrb[154].mxu1 }
 0x9ee   : > { %v12435_v16 = vadd.f32 %v21487_v50, %v20959_v37  ;;  %v10297_v52 = vpop.f32.mrb[155].mxu1 }
 0x9ef   : > { %v12427_v53 = vadd.f32 %v12426_v14, %v10297_v52 }
 0x9f0   : > { %v19599_v20 = vpack.c.bf16 %v12435_v16, %v12432_v48 }
 0x9f1   : > { %v19594_v8 = vpack.c.bf16 %v12427_v53, %v12424_v38 }
 0x9f2   : > { %19919 = vst [vmem:[%s24974_s8 + $0x778] sm:$0xff] %v19599_v20  }
 0x9f3   : > { %19918 = vst [vmem:[%s24974_s8 + $0x770] sm:$0xff] %v19594_v8  }
 0x9f7   : > { %v21490_v11 = vpop.f32.mrb[224].mxu0 }
 0x9f8   : > { %v12439_v1 = vpop.f32.mrb[225].mxu0 }
 0x9f9   : > { %v21491_v23 = vpop.f32.mrb[226].mxu0 }
 0x9fa   : > { %v12442_v7 = vpop.f32.mrb[227].mxu0 }
 0x9fb   : > { %v20962_v60 = vpop.f32.mrb[156].mxu1 }
 0x9fc   : > { %v12448_v25 = vadd.f32 %v21490_v11, %v20962_v60  ;;  %v10310_v19 = vpop.f32.mrb[157].mxu1 }
 0x9fd   : > { %v12440_v36 = vadd.f32 %v12439_v1, %v10310_v19  ;;  %v20963_v58 = vpop.f32.mrb[158].mxu1 }
 0x9fe   : > { %v12451_v29 = vadd.f32 %v21491_v23, %v20963_v58  ;;  %v10313_v10 = vpop.f32.mrb[159].mxu1 }
 0x9ff   : > { %v12443_v62 = vadd.f32 %v12442_v7, %v10313_v10 }
 0xa00   : > { %v19609_v27 = vpack.c.bf16 %v12451_v29, %v12448_v25 }
 0xa01   : > { %v19604_v28 = vpack.c.bf16 %v12443_v62, %v12440_v36 }
 0xa02   : > { %19921 = vst [vmem:[%s24974_s8 + $0x788] sm:$0xff] %v19609_v27  }
 0xa03   : > { %19920 = vst [vmem:[%s24974_s8 + $0x780] sm:$0xff] %v19604_v28  }
 0xa07   : > { %v21494_v31 = vpop.f32.mrb[228].mxu0 }
 0xa08   : > { %v12455_v22 = vpop.f32.mrb[229].mxu0 }
 0xa09   : > { %v21495_v59 = vpop.f32.mrb[230].mxu0 }
 0xa0a   : > { %v12458_v5 = vpop.f32.mrb[231].mxu0 }
 0xa0b   : > { %v20966_v39 = vpop.f32.mrb[160].mxu1 }
 0xa0c   : > { %v12464_v49 = vadd.f32 %v21494_v31, %v20966_v39  ;;  %v10326_v3 = vpop.f32.mrb[161].mxu1 }
 0xa0d   : > { %v12456_v42 = vadd.f32 %v12455_v22, %v10326_v3  ;;  %v20967_v12 = vpop.f32.mrb[162].mxu1 }
 0xa0e   : > { %v12467_v33 = vadd.f32 %v21495_v59, %v20967_v12  ;;  %v10329_v41 = vpop.f32.mrb[163].mxu1 }
 0xa0f   : > { %v12459_v57 = vadd.f32 %v12458_v5, %v10329_v41 }
 0xa10   : > { %v19619_v44 = vpack.c.bf16 %v12467_v33, %v12464_v49 }
 0xa11   : > { %v19614_v0 = vpack.c.bf16 %v12459_v57, %v12456_v42 }
 0xa12   : > { %19923 = vst [vmem:[%s24974_s8 + $0x798] sm:$0xff] %v19619_v44  }
 0xa13   : > { %19922 = vst [vmem:[%s24974_s8 + $0x790] sm:$0xff] %v19614_v0  }
 0xa17   : > { %v21498_v24 = vpop.f32.mrb[232].mxu0 }
 0xa18   : > { %v12471_v46 = vpop.f32.mrb[233].mxu0 }
 0xa19   : > { %v21499_v55 = vpop.f32.mrb[234].mxu0 }
 0xa1a   : > { %v12474_v45 = vpop.f32.mrb[235].mxu0 }
 0xa1b   : > { %v20970_v63 = vpop.f32.mrb[164].mxu1 }
 0xa1c   : > { %v12480_v47 = vadd.f32 %v21498_v24, %v20970_v63  ;;  %v10342_v51 = vpop.f32.mrb[165].mxu1 }
 0xa1d   : > { %v12472_v18 = vadd.f32 %v12471_v46, %v10342_v51  ;;  %v20971_v56 = vpop.f32.mrb[166].mxu1 }
 0xa1e   : > { %v12483_v4 = vadd.f32 %v21499_v55, %v20971_v56  ;;  %v10345_v40 = vpop.f32.mrb[167].mxu1 }
 0xa1f   : > { %v12475_v26 = vadd.f32 %v12474_v45, %v10345_v40 }
 0xa20   : > { %v19629_v34 = vpack.c.bf16 %v12483_v4, %v12480_v47 }
 0xa21   : > { %v19624_v17 = vpack.c.bf16 %v12475_v26, %v12472_v18 }
 0xa22   : > { %19925 = vst [vmem:[%s24974_s8 + $0x7a8] sm:$0xff] %v19629_v34  }
 0xa23   : > { %19924 = vst [vmem:[%s24974_s8 + $0x7a0] sm:$0xff] %v19624_v17  }
 0xa27   : > { %v21502_v13 = vpop.f32.mrb[236].mxu0 }
 0xa28   : > { %v12487_v2 = vpop.f32.mrb[237].mxu0 }
 0xa29   : > { %v21503_v9 = vpop.f32.mrb[238].mxu0 }
 0xa2a   : > { %v12490_v35 = vpop.f32.mrb[239].mxu0 }
 0xa2b   : > { %v20974_v30 = vpop.f32.mrb[168].mxu1 }
 0xa2c   : > { %v12496_v15 = vadd.f32 %v21502_v13, %v20974_v30  ;;  %v10358_v6 = vpop.f32.mrb[169].mxu1 }
 0xa2d   : > { %v12488_v21 = vadd.f32 %v12487_v2, %v10358_v6  ;;  %v20975_v32 = vpop.f32.mrb[170].mxu1 }
 0xa2e   : > { %v12499_v54 = vadd.f32 %v21503_v9, %v20975_v32  ;;  %v10361_v50 = vpop.f32.mrb[171].mxu1 }
 0xa2f   : > { %v12491_v14 = vadd.f32 %v12490_v35, %v10361_v50 }
 0xa30   : > { %v19639_v61 = vpack.c.bf16 %v12499_v54, %v12496_v15 }
 0xa31   : > { %v19634_v48 = vpack.c.bf16 %v12491_v14, %v12488_v21 }
 0xa32   : > { %19927 = vst [vmem:[%s24974_s8 + $0x7b8] sm:$0xff] %v19639_v61  }
 0xa33   : > { %19926 = vst [vmem:[%s24974_s8 + $0x7b0] sm:$0xff] %v19634_v48  }
 0xa37   : > { %v21506_v43 = vpop.f32.mrb[240].mxu0 }
 0xa38   : > { %v12503_v38 = vpop.f32.mrb[241].mxu0 }
 0xa39   : > { %v21507_v37 = vpop.f32.mrb[242].mxu0 }
 0xa3a   : > { %v12506_v16 = vpop.f32.mrb[243].mxu0 }
 0xa3b   : > { %v20978_v52 = vpop.f32.mrb[172].mxu1 }
 0xa3c   : > { %v12512_v53 = vadd.f32 %v21506_v43, %v20978_v52  ;;  %v10374_v20 = vpop.f32.mrb[173].mxu1 }
 0xa3d   : > { %v12504_v8 = vadd.f32 %v12503_v38, %v10374_v20  ;;  %v20979_v11 = vpop.f32.mrb[174].mxu1 }
 0xa3e   : > { %v12515_v1 = vadd.f32 %v21507_v37, %v20979_v11  ;;  %v10377_v23 = vpop.f32.mrb[175].mxu1 }
 0xa3f   : > { %v12507_v7 = vadd.f32 %v12506_v16, %v10377_v23 }
 0xa40   : > { %v19649_v60 = vpack.c.bf16 %v12515_v1, %v12512_v53 }
 0xa41   : > { %v19644_v25 = vpack.c.bf16 %v12507_v7, %v12504_v8 }
 0xa42   : > { %19929 = vst [vmem:[%s24974_s8 + $0x7c8] sm:$0xff] %v19649_v60  }
 0xa43   : > { %19928 = vst [vmem:[%s24974_s8 + $0x7c0] sm:$0xff] %v19644_v25  }
 0xa47   : > { %v21510_v19 = vpop.f32.mrb[244].mxu0 }
 0xa48   : > { %v12519_v36 = vpop.f32.mrb[245].mxu0 }
 0xa49   : > { %v21511_v58 = vpop.f32.mrb[246].mxu0 }
 0xa4a   : > { %v12522_v29 = vpop.f32.mrb[247].mxu0 }
 0xa4b   : > { %v20982_v10 = vpop.f32.mrb[176].mxu1 }
 0xa4c   : > { %v12528_v62 = vadd.f32 %v21510_v19, %v20982_v10  ;;  %v10390_v27 = vpop.f32.mrb[177].mxu1 }
 0xa4d   : > { %v12520_v28 = vadd.f32 %v12519_v36, %v10390_v27  ;;  %v20983_v31 = vpop.f32.mrb[178].mxu1 }
 0xa4e   : > { %v12531_v22 = vadd.f32 %v21511_v58, %v20983_v31  ;;  %v10393_v59 = vpop.f32.mrb[179].mxu1 }
 0xa4f   : > { %v12523_v5 = vadd.f32 %v12522_v29, %v10393_v59 }
 0xa50   : > { %v19659_v39 = vpack.c.bf16 %v12531_v22, %v12528_v62 }
 0xa51   : > { %v19654_v49 = vpack.c.bf16 %v12523_v5, %v12520_v28 }
 0xa52   : > { %19931 = vst [vmem:[%s24974_s8 + $0x7d8] sm:$0xff] %v19659_v39  }
 0xa53   : > { %19930 = vst [vmem:[%s24974_s8 + $0x7d0] sm:$0xff] %v19654_v49  }
 0xa57   : > { %v21514_v3 = vpop.f32.mrb[248].mxu0 }
 0xa58   : > { %v12535_v42 = vpop.f32.mrb[249].mxu0 }
 0xa59   : > { %v21515_v12 = vpop.f32.mrb[250].mxu0 }
 0xa5a   : > { %v12538_v33 = vpop.f32.mrb[251].mxu0 }
 0xa5b   : > { %v20986_v41 = vpop.f32.mrb[180].mxu1 }
 0xa5c   : > { %v12544_v57 = vadd.f32 %v21514_v3, %v20986_v41  ;;  %v10406_v44 = vpop.f32.mrb[181].mxu1 }
 0xa5d   : > { %v12536_v0 = vadd.f32 %v12535_v42, %v10406_v44  ;;  %v20987_v24 = vpop.f32.mrb[182].mxu1 }
 0xa5e   : > { %v12547_v46 = vadd.f32 %v21515_v12, %v20987_v24  ;;  %v10409_v55 = vpop.f32.mrb[183].mxu1 }
 0xa5f   : > { %v12539_v45 = vadd.f32 %v12538_v33, %v10409_v55 }
 0xa60   : > { %v19669_v63 = vpack.c.bf16 %v12547_v46, %v12544_v57 }
 0xa61   : > { %v19664_v47 = vpack.c.bf16 %v12539_v45, %v12536_v0 }
 0xa62   : > { %19933 = vst [vmem:[%s24974_s8 + $0x7e8] sm:$0xff] %v19669_v63  }
 0xa63   : > { %19932 = vst [vmem:[%s24974_s8 + $0x7e0] sm:$0xff] %v19664_v47  }
 0xa67   : > { %v21518_v51 = vpop.f32.mrb[252].mxu0 }
 0xa68   : > { %v12551_v18 = vpop.f32.mrb[253].mxu0 }
 0xa69   : > { %v21519_v56 = vpop.f32.mrb[254].mxu0 }
 0xa6a   : > { %v12554_v4 = vpop.f32.mrb[255].mxu0 }
 0xa6b   : > { %v20990_v40 = vpop.f32.mrb[184].mxu1 }
 0xa6c   : > { %v12560_v26 = vadd.f32 %v21518_v51, %v20990_v40  ;;  %v10422_v34 = vpop.f32.mrb[185].mxu1 }
 0xa6d   : > { %v12552_v17 = vadd.f32 %v12551_v18, %v10422_v34  ;;  %v20991_v13 = vpop.f32.mrb[186].mxu1 }
 0xa6e   : > { %v12563_v2 = vadd.f32 %v21519_v56, %v20991_v13  ;;  %v10425_v9 = vpop.f32.mrb[187].mxu1 }
 0xa6f   : > { %v12555_v35 = vadd.f32 %v12554_v4, %v10425_v9 }
 0xa70   : > { %v19679_v30 = vpack.c.bf16 %v12563_v2, %v12560_v26 }
 0xa71   : > { %v19674_v15 = vpack.c.bf16 %v12555_v35, %v12552_v17 }
 0xa72   : > { %19935 = vst [vmem:[%s24974_s8 + $0x7f8] sm:$0xff] %v19679_v30  }
 0xa73   : > { %19934 = vst [vmem:[%s24974_s8 + $0x7f0] sm:$0xff] %v19674_v15  }
 0xa74   : > { %s17883_s15 = sshll.u32 %s22364_s21, 4  ;;  %s18400_s14 = sshll.u32 %s22368_s22, 10 }
 0xa75   : > { %s15140_s2 = sadd.s32 %s18400_s14, %s17883_s15  ;;  %s15159_s26 = sshll.u32 %s24974_s8, 4  ;;  %s15160_s26 = int_to_ptr.vmem [resolvable:$true] %s15159_s26 }
 0xa76   : > { %s17885_s27 = sshll.u32 %s15140_s2, 6  ;;  %s27748_s3 = sld [smem:[#allocation370_spill]] }
 0xa77   : > { %s22391_s5 = smov 1024   ;;  %p27749_p1 = scmp.ne.s32.totalorder %s27025_s30, 0 }
 0xa78   : > { %s22392_s18 = smov 2048   ;;  %s22393_s12 = smov 16  }
 0xa79   : > { %22042 = sst [smem:[#allocation10]] (%p27749_p1), %s22391_s5  ;;  %s22394_s21 = smov 64  }
 0xa7a   : > { %22043 = sst [smem:[#allocation10 + $0x1]] (%p27749_p1), %s22392_s18  ;;  %s22395_s22 = smov 4  }
 0xa7b   : > { %22044 = sst [smem:[#allocation10 + $0x2]] (%p27749_p1), %s22393_s12  ;;  %s22396_s28 = smov [#allocation9]  }
 0xa7c   : > { %s15142_s6 = scalar_lea.hbm %s27748_s3, %s17885_s27  ;;  %22045 = sst [smem:[#allocation10 + $0x3]] (%p27749_p1), %s22394_s21 }
 0xa7d   : > { %22046 = sst [smem:[#allocation10 + $0x4]] (%p27749_p1), %s22394_s21  ;;  %s22397_s29 = smov 0  }
 0xa7e   : > { %22047 = sst [smem:[#allocation10 + $0x5]] (%p27749_p1), %s22395_s22 }
 0xa7f   : > { %22048 = dma.general (%p27749_p1), %s15160_s26, 32768, %s15142_s6, %s15127_s7, %s22396_s28, [#allocation10], %s22397_s29, 0  }
 0xa80 PF: > { %s27750_s8 = sld [smem:[#allocation14_spill]]  ;;  %s27751_s15 = sld [smem:[#allocation15_spill]] }
 0xa81   : > { %p22070_p4 = scmp.ge.s32.totalorder %s22380_s25, 2 }
 0xa86   : > { %s15187_s14 = sand.u32 1, %s27750_s8   ;;  %p27752_p6 = scmp.ne.s32.totalorder %s27751_s15, 0 }
 0xa87   : > { %s15188_s2 = scalar_lea.sflag [#allocation4], %s15187_s14 }
 0xa88   : > { %p22062_p10 = pnand %p22070_p4, %p27752_p6 }
 0xa8a   : > { %22335 = dma.done.wait (!%p22062_p10), %s15188_s2, 32768  }
 0xa8b   : > { %22337 = vsyncadd (!%p22062_p10), %s15188_s2, 4294934528  ;;  %s21_s25 = sadd.s32 1, %s22380_s25   ;;  %s27753_s30 = sld [smem:[#allocation16_spill]] }
 0xa8c   : > { %p18_p13 = scmp.ge.s32.totalorder %s21_s25, 18   ;;  %s27754_s15 = smov %s22344_s16 }
 0xa8d   : > { %s27755_s16 = smov %s22348_s17  ;;  %s27756_s17 = smov %s22591_s4 }
 0xa8e   : > { %s27757_s18 = smov %s22356_s19  ;;  %s27758_s19 = smov %s22360_s20 }
 0xa8f   : > { %s27759_s20 = smov %s22583_s13  ;;  %s27760_s21 = smov %s22372_s23 }
 0xa90   : > { %s27761_s22 = smov %s22376_s24  ;;  %s27763_s24 = smov %s27769_s9 }
 0xa91   : > { %s27762_s23 = smov %s27753_s30  ;;  %20 = sbr.rel (!%p18_p13) target bundleno = 14 (0xe), region = 97 }
 0xa98   :  { %15193 = vsyncpa [#allocation3], 1 }
 0xa99   :  { %15195 = vsyncpa [#allocation3 + $0x1], 1 }
 0xa9a   :  { %15196 = vsyncpa [#allocation6], 1 }
 0xa9b   :  { %15197 = vsyncpa [#allocation4], 1 }
 0xa9c   :  { %15199 = vsyncpa [#allocation4 + $0x1], 1 }

</bundles_post_ra>
